<compile_context>
chip_gen: v5e
topology: v5e:2x2
jax: 0.10.0
libtpu: 0.0.40
codegen_flags: <defaults>
</compile_context>

<pallas_src>
import jax
import jax.numpy as jnp
from jax.experimental import pallas as pl
from jax.experimental.pallas import tpu as pltpu


L_IN = 700     # input length implied by Linear(22144)
L1 = 700       # after Conv1d(1->64, k3, s1, p1)
L2 = 350       # after Conv1d(64->64, k3, s2, p1)
L3 = 348       # after Conv1d(64->128, k5, s1, p1)
L4 = 173       # after Conv1d(128->128, k5, s2, p1)
L4_PAD = 176   # conv output rows padded to a multiple of 8
K_FLAT = L4_PAD * 128        # 22528 = padded FC1 contraction depth
FC_TK = 5632                 # FC1 K-tile (22528 = 4 * 5632)
PAD = 8                      # 8-aligned row offset of activations in pad buffers


# ---------------------------------------------------------------------------
# Fused conv stack: one kernel per batch element, everything stays in VMEM.
# Intermediate activation buffers are f32 (strided / offset sublane reads are
# the proven-safe path there); im2col buffers and all matmul operands are bf16.
# ---------------------------------------------------------------------------
def _conv_stack_kernel(x_im_ref, w1a_ref, b1a_ref, w1b_ref, b1b_ref,
                       w2a_ref, b2a_ref, w2b_ref, b2b_ref,
                       o_ref, h1_buf, im1, z_buf, im2, h2_buf, im3):
    f32 = jnp.float32
    bf16 = jnp.bfloat16

    # ---- Conv1a: 1->64, k3, s1, p1, ReLU (taps folded via wrapper im2col) ---
    h1 = jnp.dot(x_im_ref[...], w1a_ref[...], preferred_element_type=f32)
    h1 = jnp.maximum(h1 + b1a_ref[...], 0.0)                    # (700, 64) f32
    h1_buf[pl.ds(PAD, L1), :] = h1                              # aligned store
    h1_buf[pl.ds(PAD - 1, 1), :] = jnp.zeros((1, 64), f32)      # left pad row
    # (right pad row of Conv1b is never read for k3/s2/p1 at L=700)

    # ---- Conv1b: 64->64, k3, s2, p1, ReLU — one K=192 contraction ----------
    for k in range(3):                       # padded row 2o+k -> buffer row +7
        im1[pl.ds(0, L2), pl.ds(k * 64, 64)] = (
            h1_buf[pl.ds(k + PAD - 1, L2, stride=2), :].astype(bf16))
    z = jnp.dot(im1[pl.ds(0, L2), :], w1b_ref[...], preferred_element_type=f32)
    z = jnp.maximum(z + b1b_ref[...], 0.0)                      # (350, 64) f32
    z_buf[pl.ds(PAD, L2), :] = z
    z_buf[pl.ds(PAD - 1, 1), :] = jnp.zeros((1, 64), f32)       # left pad row
    z_buf[pl.ds(PAD + L2, 1), :] = jnp.zeros((1, 64), f32)      # right pad row

    # ---- Conv2a: 64->128, k5, s1, p1, ReLU — one K=320 contraction ---------
    for k in range(5):                       # padded row o+k -> buffer row +7
        im2[pl.ds(0, L3), pl.ds(k * 64, 64)] = (
            z_buf[pl.ds(k + PAD - 1, L3), :].astype(bf16))
    h2 = jnp.dot(im2[pl.ds(0, L3), :], w2a_ref[...], preferred_element_type=f32)
    h2 = jnp.maximum(h2 + b2a_ref[...], 0.0)                    # (348, 128) f32
    h2_buf[pl.ds(PAD, L3), :] = h2
    h2_buf[pl.ds(PAD - 1, 1), :] = jnp.zeros((1, 128), f32)     # left pad row
    # zero the tail so the padded 176-row strided reads below stay finite
    h2_buf[pl.ds(PAD + L3, 12), :] = jnp.zeros((12, 128), f32)

    # ---- Conv2b: 128->128, k5, s2, p1, ReLU — one K=640 contraction --------
    # Compute all 176 rows (rows 173..175 come from zeroed inputs); they end up
    # as relu(b2b) and pair with the zero-padded FC1 weight rows, so they never
    # affect the result, and the output store stays a single full aligned tile.
    for k in range(5):                       # padded row 2o+k -> buffer row +7
        im3[:, pl.ds(k * 128, 128)] = (
            h2_buf[pl.ds(k + PAD - 1, L4_PAD, stride=2), :].astype(bf16))
    out = jnp.dot(im3[...], w2b_ref[...], preferred_element_type=f32)
    out = jnp.maximum(out + b2b_ref[...], 0.0)                  # (176, 128)
    o_ref[...] = out.astype(o_ref.dtype)


def conv_stack(x_im, params):
    B = x_im.shape[0]
    return pl.pallas_call(
        _conv_stack_kernel,
        out_shape=jax.ShapeDtypeStruct((B, L4_PAD, 128), jnp.bfloat16),
        grid=(B,),
        in_specs=[
            pl.BlockSpec((None, L1, 8), lambda b: (b, 0, 0)),      # im2col input
            pl.BlockSpec((8, 64), lambda b: (0, 0)),               # w1a (bf16)
            pl.BlockSpec((1, 64), lambda b: (0, 0)),               # b1a
            pl.BlockSpec((192, 64), lambda b: (0, 0)),             # w1b folded
            pl.BlockSpec((1, 64), lambda b: (0, 0)),               # b1b
            pl.BlockSpec((320, 128), lambda b: (0, 0)),            # w2a folded
            pl.BlockSpec((1, 128), lambda b: (0, 0)),              # b2a
            pl.BlockSpec((640, 128), lambda b: (0, 0)),            # w2b folded
            pl.BlockSpec((1, 128), lambda b: (0, 0)),              # b2b
        ],
        out_specs=pl.BlockSpec((None, L4_PAD, 128), lambda b: (b, 0, 0)),
        scratch_shapes=[
            pltpu.VMEM((712, 64), jnp.float32),     # h1 pad buffer (rows 7..707)
            pltpu.VMEM((352, 192), jnp.bfloat16),   # Conv1b im2col
            pltpu.VMEM((360, 64), jnp.float32),     # z pad buffer (rows 7..358)
            pltpu.VMEM((352, 320), jnp.bfloat16),   # Conv2a im2col
            pltpu.VMEM((368, 128), jnp.float32),    # h2 pad buffer (rows 7..367)
            pltpu.VMEM((L4_PAD, 640), jnp.bfloat16),  # Conv2b im2col
        ],
        compiler_params=pltpu.CompilerParams(
            dimension_semantics=("parallel",)),     # shard batch across TCs (v7x)
    )(x_im, params["w1a"], params["b1a"], params["w1b"], params["b1b"],
      params["w2a"], params["b2a"], params["w2b"], params["b2b"])


# ---------------------------------------------------------------------------
# FC head: FC1 K-tiled (4 steps of 5632, pipelined bf16 weight stream),
# small layers fused into the last step.
# ---------------------------------------------------------------------------
def _fc_head_kernel(x_ref, w1_ref, b1_ref, w2_ref, b2_ref, w3_ref, b3_ref,
                    w4_ref, b4_ref, o_ref, acc_ref):
    k = pl.program_id(0)

    @pl.when(k == 0)
    def _():
        acc_ref[...] = jnp.zeros_like(acc_ref)

    acc_ref[...] += jnp.dot(x_ref[...], w1_ref[...],      # bf16 x bf16 -> f32
                            preferred_element_type=jnp.float32)

    @pl.when(k == pl.num_programs(0) - 1)
    def _():
        h = jnp.maximum(acc_ref[...] + b1_ref[...], 0.0)
        h = jnp.dot(h.astype(jnp.bfloat16), w2_ref[...],
                    preferred_element_type=jnp.float32) + b2_ref[...]
        h = jnp.maximum(h, 0.0)
        h = jnp.dot(h.astype(jnp.bfloat16), w3_ref[...],
                    preferred_element_type=jnp.float32) + b3_ref[...]
        h = jnp.maximum(h, 0.0)
        o_ref[...] = jnp.dot(h.astype(jnp.bfloat16), w4_ref[...],
                             preferred_element_type=jnp.float32) + b4_ref[...]


def fc_head(x_flat, fc_params):
    B, K = x_flat.shape
    assert K % FC_TK == 0
    nk = K // FC_TK
    (w1, b1), (w2, b2), (w3, b3), (w4, b4) = fc_params
    return pl.pallas_call(
        _fc_head_kernel,
        out_shape=jax.ShapeDtypeStruct((B, 3), jnp.float32),
        grid=(nk,),
        in_specs=[
            pl.BlockSpec((B, FC_TK), lambda k: (0, k)),     # activation K-tile (bf16)
            pl.BlockSpec((FC_TK, 128), lambda k: (k, 0)),   # w1 K-tile (bf16)
            pl.BlockSpec((1, 128), lambda k: (0, 0)),
            pl.BlockSpec((128, 256), lambda k: (0, 0)),
            pl.BlockSpec((1, 256), lambda k: (0, 0)),
            pl.BlockSpec((256, 512), lambda k: (0, 0)),
            pl.BlockSpec((1, 512), lambda k: (0, 0)),
            pl.BlockSpec((512, 3), lambda k: (0, 0)),
            pl.BlockSpec((1, 3), lambda k: (0, 0)),
        ],
        out_specs=pl.BlockSpec((B, 3), lambda k: (0, 0)),
        scratch_shapes=[pltpu.VMEM((B, 128), jnp.float32)],
        compiler_params=pltpu.CompilerParams(
            dimension_semantics=("arbitrary",)),            # K reduction axis
    )(x_flat, w1, b1, w2, b2, w3, b3, w4, b4)


# ---------------------------------------------------------------------------
# Parameters (deterministic synthetic init; shapes mirror SSAModel.__init__)
# ---------------------------------------------------------------------------
def _winit(key, shape, fan_in):
    return jax.random.normal(key, shape, jnp.float32) / jnp.sqrt(float(fan_in))


def init_params(key):
    ks = jax.random.split(key, 16)
    bf16 = jnp.bfloat16
    p = {}
    # Conv1d(1->64,k3): taps as (K, Cout), zero-padded to the 8-channel im2col.
    w1a = _winit(ks[0], (3, 64), 1 * 3)
    p["w1a"] = jnp.pad(w1a, ((0, 5), (0, 0))).astype(bf16)
    p["b1a"] = _winit(ks[1], (1, 64), 1 * 3)
    # Remaining convs as (K, Cin, Cout) (torch (Cout,Cin,K) transposed), then
    # folded along taps to (K*Cin, Cout) to match the in-kernel im2col layout.
    p["w1b"] = _winit(ks[2], (3, 64, 64), 64 * 3).reshape(192, 64).astype(bf16)
    p["b1b"] = _winit(ks[3], (1, 64), 64 * 3)
    p["w2a"] = _winit(ks[4], (5, 64, 128), 64 * 5).reshape(320, 128).astype(bf16)
    p["b2a"] = _winit(ks[5], (1, 128), 64 * 5)
    p["w2b"] = _winit(ks[6], (5, 128, 128), 128 * 5).reshape(640, 128).astype(bf16)
    p["b2b"] = _winit(ks[7], (1, 128), 128 * 5)

    # FC1 weight generated in PyTorch flatten order (row = c*173 + l), permuted
    # once to consume the channels-last flatten (row = l*128 + c) and zero-padded
    # 22144 -> 22528 to match the conv output's 173 -> 176 rows.
    w1_t = _winit(ks[8], (22144, 128), 22144)
    w1_cl = w1_t.reshape(128, L4, 128).transpose(1, 0, 2).reshape(22144, 128)
    w1_cl = jnp.pad(w1_cl, ((0, K_FLAT - 22144), (0, 0)))
    p["fc"] = (
        (w1_cl.astype(bf16), _winit(ks[9], (1, 128), 22144)),
        (_winit(ks[10], (128, 256), 128).astype(bf16),
         _winit(ks[11], (1, 256), 128)),
        (_winit(ks[12], (256, 512), 256).astype(bf16),
         _winit(ks[13], (1, 512), 256)),
        (_winit(ks[14], (512, 3), 512).astype(bf16),
         _winit(ks[15], (1, 3), 512)),
    )
    return p


# ---------------------------------------------------------------------------
# Forward pass (eval semantics: Dropout == identity)
# ---------------------------------------------------------------------------
def ssa_forward(x_ncl, params):
    """x_ncl: (B, 1, 700) float32 (PyTorch NCL). Returns (B, 3) float32 logits."""
    B = x_ncl.shape[0]
    x = x_ncl[:, 0, :]                                    # (B, 700)
    xp = jnp.pad(x, ((0, 0), (1, 1)))                     # pad=1 -> (B, 702)
    # im2col for Conv1d(1->64,k3): tap k in channel k; channels 3..7 are zero.
    x_im = jnp.stack([xp[:, 0:L1], xp[:, 1:L1 + 1], xp[:, 2:L1 + 2]], axis=-1)
    x_im = jnp.pad(x_im, ((0, 0), (0, 0), (0, 5))).astype(jnp.bfloat16)

    conv_out = conv_stack(x_im, params)                   # (B, 176, 128) bf16
    x_flat = conv_out.reshape(B, K_FLAT)                  # channels-last flatten
    return fc_head(x_flat, params["fc"])                  # (B, 3) f32


if __name__ == "__main__":
    B = 2  # L=700 is implied by Linear(in_features=22144): 128*173 = 22144
    x = jax.random.normal(jax.random.PRNGKey(0), (B, 1, L_IN), jnp.float32)
    params = init_params(jax.random.PRNGKey(1))

    out = jax.jit(ssa_forward)(x, params)
    out = jax.block_until_ready(out)
    assert out.shape == (B, 3) and out.dtype == jnp.float32
    assert bool(jnp.all(jnp.isfinite(out)))
    print("KERNEL_OK")
</pallas_src>

<mosaic_0001>
module attributes {stable_mosaic.version = 11 : i64} {
  func.func @_conv_stack_kernel(%arg0: i32, %arg1: memref<1x700x8xbf16, #tpu.memory_space<vmem>>, %arg2: memref<8x64xbf16, #tpu.memory_space<vmem>>, %arg3: memref<1x64xf32, #tpu.memory_space<vmem>>, %arg4: memref<192x64xbf16, #tpu.memory_space<vmem>>, %arg5: memref<1x64xf32, #tpu.memory_space<vmem>>, %arg6: memref<320x128xbf16, #tpu.memory_space<vmem>>, %arg7: memref<1x128xf32, #tpu.memory_space<vmem>>, %arg8: memref<640x128xbf16, #tpu.memory_space<vmem>>, %arg9: memref<1x128xf32, #tpu.memory_space<vmem>>, %arg10: memref<1x176x128xbf16, #tpu.memory_space<vmem>>, %arg11: memref<712x64xf32, #tpu.memory_space<vmem>>, %arg12: memref<352x192xbf16, #tpu.memory_space<vmem>>, %arg13: memref<360x64xf32, #tpu.memory_space<vmem>>, %arg14: memref<352x320xbf16, #tpu.memory_space<vmem>>, %arg15: memref<368x128xf32, #tpu.memory_space<vmem>>, %arg16: memref<176x640xbf16, #tpu.memory_space<vmem>>) attributes {dimension_semantics = [#tpu.dimension_semantics<parallel>], iteration_bounds = array<i64: 2>, scalar_prefetch = 0 : i64, scratch_operands = 6 : i64, tpu.core_type = #tpu.core_type<tc>, window_params = [{transform_indices = @transform_0, window_bounds = array<i64: 1, 700, 8>}, {pipeline_mode = #tpu.pipeline_mode<synchronous>, transform_indices = @transform_1, window_bounds = array<i64: 8, 64>}, {pipeline_mode = #tpu.pipeline_mode<synchronous>, transform_indices = @transform_2, window_bounds = array<i64: 1, 64>}, {pipeline_mode = #tpu.pipeline_mode<synchronous>, transform_indices = @transform_3, window_bounds = array<i64: 192, 64>}, {pipeline_mode = #tpu.pipeline_mode<synchronous>, transform_indices = @transform_4, window_bounds = array<i64: 1, 64>}, {pipeline_mode = #tpu.pipeline_mode<synchronous>, transform_indices = @transform_5, window_bounds = array<i64: 320, 128>}, {pipeline_mode = #tpu.pipeline_mode<synchronous>, transform_indices = @transform_6, window_bounds = array<i64: 1, 128>}, {pipeline_mode = #tpu.pipeline_mode<synchronous>, transform_indices = @transform_7, window_bounds = array<i64: 640, 128>}, {pipeline_mode = #tpu.pipeline_mode<synchronous>, transform_indices = @transform_8, window_bounds = array<i64: 1, 128>}, {transform_indices = @transform_9, window_bounds = array<i64: 1, 176, 128>}]} {
    %c0 = arith.constant 0 : index
    %c0_0 = arith.constant 0 : index
    %c0_1 = arith.constant 0 : index
    %0 = vector.load %arg1[%c0, %c0_0, %c0_1] : memref<1x700x8xbf16, #tpu.memory_space<vmem>>, vector<1x700x8xbf16>
    %1 = vector.shape_cast %0 : vector<1x700x8xbf16> to vector<700x8xbf16>
    %c0_2 = arith.constant 0 : index
    %c0_3 = arith.constant 0 : index
    %2 = vector.load %arg2[%c0_2, %c0_3] : memref<8x64xbf16, #tpu.memory_space<vmem>>, vector<8x64xbf16>
    %cst = arith.constant dense<0.000000e+00> : vector<700x64xf32>
    %3 = tpu.matmul %1, %2, %cst {dimension_numbers = #tpu.dot_dimension_numbers<[1], [0], [0], [1], [0, 0, 1, 1], [], []>} : vector<700x8xbf16>, vector<8x64xbf16>, vector<700x64xf32> -> vector<700x64xf32>
    %c0_4 = arith.constant 0 : index
    %c0_5 = arith.constant 0 : index
    %4 = vector.load %arg3[%c0_4, %c0_5] : memref<1x64xf32, #tpu.memory_space<vmem>>, vector<1x64xf32>
    %5 = vector.broadcast %4 : vector<1x64xf32> to vector<700x64xf32>
    %6 = arith.addf %3, %5 : vector<700x64xf32>
    %cst_6 = arith.constant 0.000000e+00 : f32
    %7 = vector.broadcast %cst_6 : f32 to vector<700x64xf32>
    %8 = arith.maximumf %6, %7 : vector<700x64xf32>
    %c8 = arith.constant 8 : index
    %c0_7 = arith.constant 0 : index
    %9 = vector.load %arg11[%c8, %c0_7] : memref<712x64xf32, #tpu.memory_space<vmem>>, vector<700x64xf32>
    tpu.vector_store %arg11[%c8, %c0_7], %8 {strides = array<i32>} : memref<712x64xf32, #tpu.memory_space<vmem>>, vector<700x64xf32>,
    %cst_8 = arith.constant 0.000000e+00 : f32
    %10 = vector.broadcast %cst_8 : f32 to vector<1x64xf32>
    %c7 = arith.constant 7 : index
    %c0_9 = arith.constant 0 : index
    %11 = vector.load %arg11[%c7, %c0_9] : memref<712x64xf32, #tpu.memory_space<vmem>>, vector<1x64xf32>
    tpu.vector_store %arg11[%c7, %c0_9], %10 {strides = array<i32>} : memref<712x64xf32, #tpu.memory_space<vmem>>, vector<1x64xf32>,
    %c7_10 = arith.constant 7 : index
    %c0_11 = arith.constant 0 : index
    %12 = tpu.strided_load %arg11[%c7_10, %c0_11] {strides = array<i32: 2, 1>} : memref<712x64xf32, #tpu.memory_space<vmem>>, vector<350x64xf32>
    %13 = arith.truncf %12 : vector<350x64xf32> to vector<350x64xbf16>
    %c0_12 = arith.constant 0 : index
    %c0_13 = arith.constant 0 : index
    %14 = vector.load %arg12[%c0_12, %c0_13] : memref<352x192xbf16, #tpu.memory_space<vmem>>, vector<350x64xbf16>
    tpu.vector_store %arg12[%c0_12, %c0_13], %13 {strides = array<i32>} : memref<352x192xbf16, #tpu.memory_space<vmem>>, vector<350x64xbf16>,
    %c8_14 = arith.constant 8 : index
    %c0_15 = arith.constant 0 : index
    %15 = tpu.strided_load %arg11[%c8_14, %c0_15] {strides = array<i32: 2, 1>} : memref<712x64xf32, #tpu.memory_space<vmem>>, vector<350x64xf32>
    %16 = arith.truncf %15 : vector<350x64xf32> to vector<350x64xbf16>
    %c0_16 = arith.constant 0 : index
    %c64 = arith.constant 64 : index
    %17 = vector.load %arg12[%c0_16, %c64] : memref<352x192xbf16, #tpu.memory_space<vmem>>, vector<350x64xbf16>
    tpu.vector_store %arg12[%c0_16, %c64], %16 {strides = array<i32>} : memref<352x192xbf16, #tpu.memory_space<vmem>>, vector<350x64xbf16>,
    %c9 = arith.constant 9 : index
    %c0_17 = arith.constant 0 : index
    %18 = tpu.strided_load %arg11[%c9, %c0_17] {strides = array<i32: 2, 1>} : memref<712x64xf32, #tpu.memory_space<vmem>>, vector<350x64xf32>
    %19 = arith.truncf %18 : vector<350x64xf32> to vector<350x64xbf16>
    %c0_18 = arith.constant 0 : index
    %c128 = arith.constant 128 : index
    %20 = vector.load %arg12[%c0_18, %c128] : memref<352x192xbf16, #tpu.memory_space<vmem>>, vector<350x64xbf16>
    tpu.vector_store %arg12[%c0_18, %c128], %19 {strides = array<i32>} : memref<352x192xbf16, #tpu.memory_space<vmem>>, vector<350x64xbf16>,
    %c0_19 = arith.constant 0 : index
    %c0_20 = arith.constant 0 : index
    %21 = vector.load %arg12[%c0_19, %c0_20] : memref<352x192xbf16, #tpu.memory_space<vmem>>, vector<350x192xbf16>
    %c0_21 = arith.constant 0 : index
    %c0_22 = arith.constant 0 : index
    %22 = vector.load %arg4[%c0_21, %c0_22] : memref<192x64xbf16, #tpu.memory_space<vmem>>, vector<192x64xbf16>
    %cst_23 = arith.constant dense<0.000000e+00> : vector<350x64xf32>
    %23 = tpu.matmul %21, %22, %cst_23 {dimension_numbers = #tpu.dot_dimension_numbers<[1], [0], [0], [1], [0, 0, 1, 1], [], []>} : vector<350x192xbf16>, vector<192x64xbf16>, vector<350x64xf32> -> vector<350x64xf32>
    %c0_24 = arith.constant 0 : index
    %c0_25 = arith.constant 0 : index
    %24 = vector.load %arg5[%c0_24, %c0_25] : memref<1x64xf32, #tpu.memory_space<vmem>>, vector<1x64xf32>
    %25 = vector.broadcast %24 : vector<1x64xf32> to vector<350x64xf32>
    %26 = arith.addf %23, %25 : vector<350x64xf32>
    %cst_26 = arith.constant 0.000000e+00 : f32
    %27 = vector.broadcast %cst_26 : f32 to vector<350x64xf32>
    %28 = arith.maximumf %26, %27 : vector<350x64xf32>
    %c8_27 = arith.constant 8 : index
    %c0_28 = arith.constant 0 : index
    %29 = vector.load %arg13[%c8_27, %c0_28] : memref<360x64xf32, #tpu.memory_space<vmem>>, vector<350x64xf32>
    tpu.vector_store %arg13[%c8_27, %c0_28], %28 {strides = array<i32>} : memref<360x64xf32, #tpu.memory_space<vmem>>, vector<350x64xf32>,
    %cst_29 = arith.constant 0.000000e+00 : f32
    %30 = vector.broadcast %cst_29 : f32 to vector<1x64xf32>
    %c7_30 = arith.constant 7 : index
    %c0_31 = arith.constant 0 : index
    %31 = vector.load %arg13[%c7_30, %c0_31] : memref<360x64xf32, #tpu.memory_space<vmem>>, vector<1x64xf32>
    tpu.vector_store %arg13[%c7_30, %c0_31], %30 {strides = array<i32>} : memref<360x64xf32, #tpu.memory_space<vmem>>, vector<1x64xf32>,
    %cst_32 = arith.constant 0.000000e+00 : f32
    %32 = vector.broadcast %cst_32 : f32 to vector<1x64xf32>
    %c358 = arith.constant 358 : index
    %c0_33 = arith.constant 0 : index
    %33 = vector.load %arg13[%c358, %c0_33] : memref<360x64xf32, #tpu.memory_space<vmem>>, vector<1x64xf32>
    tpu.vector_store %arg13[%c358, %c0_33], %32 {strides = array<i32>} : memref<360x64xf32, #tpu.memory_space<vmem>>, vector<1x64xf32>,
    %c7_34 = arith.constant 7 : index
    %c0_35 = arith.constant 0 : index
    %34 = vector.load %arg13[%c7_34, %c0_35] : memref<360x64xf32, #tpu.memory_space<vmem>>, vector<348x64xf32>
    %35 = arith.truncf %34 : vector<348x64xf32> to vector<348x64xbf16>
    %c0_36 = arith.constant 0 : index
    %c0_37 = arith.constant 0 : index
    %36 = vector.load %arg14[%c0_36, %c0_37] : memref<352x320xbf16, #tpu.memory_space<vmem>>, vector<348x64xbf16>
    tpu.vector_store %arg14[%c0_36, %c0_37], %35 {strides = array<i32>} : memref<352x320xbf16, #tpu.memory_space<vmem>>, vector<348x64xbf16>,
    %c8_38 = arith.constant 8 : index
    %c0_39 = arith.constant 0 : index
    %37 = vector.load %arg13[%c8_38, %c0_39] : memref<360x64xf32, #tpu.memory_space<vmem>>, vector<348x64xf32>
    %38 = arith.truncf %37 : vector<348x64xf32> to vector<348x64xbf16>
    %c0_40 = arith.constant 0 : index
    %c64_41 = arith.constant 64 : index
    %39 = vector.load %arg14[%c0_40, %c64_41] : memref<352x320xbf16, #tpu.memory_space<vmem>>, vector<348x64xbf16>
    tpu.vector_store %arg14[%c0_40, %c64_41], %38 {strides = array<i32>} : memref<352x320xbf16, #tpu.memory_space<vmem>>, vector<348x64xbf16>,
    %c9_42 = arith.constant 9 : index
    %c0_43 = arith.constant 0 : index
    %40 = vector.load %arg13[%c9_42, %c0_43] : memref<360x64xf32, #tpu.memory_space<vmem>>, vector<348x64xf32>
    %41 = arith.truncf %40 : vector<348x64xf32> to vector<348x64xbf16>
    %c0_44 = arith.constant 0 : index
    %c128_45 = arith.constant 128 : index
    %42 = vector.load %arg14[%c0_44, %c128_45] : memref<352x320xbf16, #tpu.memory_space<vmem>>, vector<348x64xbf16>
    tpu.vector_store %arg14[%c0_44, %c128_45], %41 {strides = array<i32>} : memref<352x320xbf16, #tpu.memory_space<vmem>>, vector<348x64xbf16>,
    %c10 = arith.constant 10 : index
    %c0_46 = arith.constant 0 : index
    %43 = vector.load %arg13[%c10, %c0_46] : memref<360x64xf32, #tpu.memory_space<vmem>>, vector<348x64xf32>
    %44 = arith.truncf %43 : vector<348x64xf32> to vector<348x64xbf16>
    %c0_47 = arith.constant 0 : index
    %c192 = arith.constant 192 : index
    %45 = vector.load %arg14[%c0_47, %c192] : memref<352x320xbf16, #tpu.memory_space<vmem>>, vector<348x64xbf16>
    tpu.vector_store %arg14[%c0_47, %c192], %44 {strides = array<i32>} : memref<352x320xbf16, #tpu.memory_space<vmem>>, vector<348x64xbf16>,
    %c11 = arith.constant 11 : index
    %c0_48 = arith.constant 0 : index
    %46 = vector.load %arg13[%c11, %c0_48] : memref<360x64xf32, #tpu.memory_space<vmem>>, vector<348x64xf32>
    %47 = arith.truncf %46 : vector<348x64xf32> to vector<348x64xbf16>
    %c0_49 = arith.constant 0 : index
    %c256 = arith.constant 256 : index
    %48 = vector.load %arg14[%c0_49, %c256] : memref<352x320xbf16, #tpu.memory_space<vmem>>, vector<348x64xbf16>
    tpu.vector_store %arg14[%c0_49, %c256], %47 {strides = array<i32>} : memref<352x320xbf16, #tpu.memory_space<vmem>>, vector<348x64xbf16>,
    %c0_50 = arith.constant 0 : index
    %c0_51 = arith.constant 0 : index
    %49 = vector.load %arg14[%c0_50, %c0_51] : memref<352x320xbf16, #tpu.memory_space<vmem>>, vector<348x320xbf16>
    %c0_52 = arith.constant 0 : index
    %c0_53 = arith.constant 0 : index
    %50 = vector.load %arg6[%c0_52, %c0_53] : memref<320x128xbf16, #tpu.memory_space<vmem>>, vector<320x128xbf16>
    %cst_54 = arith.constant dense<0.000000e+00> : vector<348x128xf32>
    %51 = tpu.matmul %49, %50, %cst_54 {dimension_numbers = #tpu.dot_dimension_numbers<[1], [0], [0], [1], [0, 0, 1, 1], [], []>} : vector<348x320xbf16>, vector<320x128xbf16>, vector<348x128xf32> -> vector<348x128xf32>
    %c0_55 = arith.constant 0 : index
    %c0_56 = arith.constant 0 : index
    %52 = vector.load %arg7[%c0_55, %c0_56] : memref<1x128xf32, #tpu.memory_space<vmem>>, vector<1x128xf32>
    %53 = vector.broadcast %52 : vector<1x128xf32> to vector<348x128xf32>
    %54 = arith.addf %51, %53 : vector<348x128xf32>
    %cst_57 = arith.constant 0.000000e+00 : f32
    %55 = vector.broadcast %cst_57 : f32 to vector<348x128xf32>
    %56 = arith.maximumf %54, %55 : vector<348x128xf32>
    %c8_58 = arith.constant 8 : index
    %c0_59 = arith.constant 0 : index
    %57 = vector.load %arg15[%c8_58, %c0_59] : memref<368x128xf32, #tpu.memory_space<vmem>>, vector<348x128xf32>
    tpu.vector_store %arg15[%c8_58, %c0_59], %56 {strides = array<i32>} : memref<368x128xf32, #tpu.memory_space<vmem>>, vector<348x128xf32>,
    %cst_60 = arith.constant 0.000000e+00 : f32
    %58 = vector.broadcast %cst_60 : f32 to vector<1x128xf32>
    %c7_61 = arith.constant 7 : index
    %c0_62 = arith.constant 0 : index
    %59 = vector.load %arg15[%c7_61, %c0_62] : memref<368x128xf32, #tpu.memory_space<vmem>>, vector<1x128xf32>
    tpu.vector_store %arg15[%c7_61, %c0_62], %58 {strides = array<i32>} : memref<368x128xf32, #tpu.memory_space<vmem>>, vector<1x128xf32>,
    %cst_63 = arith.constant 0.000000e+00 : f32
    %60 = vector.broadcast %cst_63 : f32 to vector<12x128xf32>
    %c356 = arith.constant 356 : index
    %c0_64 = arith.constant 0 : index
    %61 = vector.load %arg15[%c356, %c0_64] : memref<368x128xf32, #tpu.memory_space<vmem>>, vector<12x128xf32>
    tpu.vector_store %arg15[%c356, %c0_64], %60 {strides = array<i32>} : memref<368x128xf32, #tpu.memory_space<vmem>>, vector<12x128xf32>,
    %c7_65 = arith.constant 7 : index
    %c0_66 = arith.constant 0 : index
    %62 = tpu.strided_load %arg15[%c7_65, %c0_66] {strides = array<i32: 2, 1>} : memref<368x128xf32, #tpu.memory_space<vmem>>, vector<176x128xf32>
    %63 = arith.truncf %62 : vector<176x128xf32> to vector<176x128xbf16>
    %c0_67 = arith.constant 0 : index
    %c0_68 = arith.constant 0 : index
    %64 = vector.load %arg16[%c0_67, %c0_68] : memref<176x640xbf16, #tpu.memory_space<vmem>>, vector<176x128xbf16>
    tpu.vector_store %arg16[%c0_67, %c0_68], %63 {strides = array<i32>} : memref<176x640xbf16, #tpu.memory_space<vmem>>, vector<176x128xbf16>,
    %c8_69 = arith.constant 8 : index
    %c0_70 = arith.constant 0 : index
    %65 = tpu.strided_load %arg15[%c8_69, %c0_70] {strides = array<i32: 2, 1>} : memref<368x128xf32, #tpu.memory_space<vmem>>, vector<176x128xf32>
    %66 = arith.truncf %65 : vector<176x128xf32> to vector<176x128xbf16>
    %c0_71 = arith.constant 0 : index
    %c128_72 = arith.constant 128 : index
    %67 = vector.load %arg16[%c0_71, %c128_72] : memref<176x640xbf16, #tpu.memory_space<vmem>>, vector<176x128xbf16>
    tpu.vector_store %arg16[%c0_71, %c128_72], %66 {strides = array<i32>} : memref<176x640xbf16, #tpu.memory_space<vmem>>, vector<176x128xbf16>,
    %c9_73 = arith.constant 9 : index
    %c0_74 = arith.constant 0 : index
    %68 = tpu.strided_load %arg15[%c9_73, %c0_74] {strides = array<i32: 2, 1>} : memref<368x128xf32, #tpu.memory_space<vmem>>, vector<176x128xf32>
    %69 = arith.truncf %68 : vector<176x128xf32> to vector<176x128xbf16>
    %c0_75 = arith.constant 0 : index
    %c256_76 = arith.constant 256 : index
    %70 = vector.load %arg16[%c0_75, %c256_76] : memref<176x640xbf16, #tpu.memory_space<vmem>>, vector<176x128xbf16>
    tpu.vector_store %arg16[%c0_75, %c256_76], %69 {strides = array<i32>} : memref<176x640xbf16, #tpu.memory_space<vmem>>, vector<176x128xbf16>,
    %c10_77 = arith.constant 10 : index
    %c0_78 = arith.constant 0 : index
    %71 = tpu.strided_load %arg15[%c10_77, %c0_78] {strides = array<i32: 2, 1>} : memref<368x128xf32, #tpu.memory_space<vmem>>, vector<176x128xf32>
    %72 = arith.truncf %71 : vector<176x128xf32> to vector<176x128xbf16>
    %c0_79 = arith.constant 0 : index
    %c384 = arith.constant 384 : index
    %73 = vector.load %arg16[%c0_79, %c384] : memref<176x640xbf16, #tpu.memory_space<vmem>>, vector<176x128xbf16>
    tpu.vector_store %arg16[%c0_79, %c384], %72 {strides = array<i32>} : memref<176x640xbf16, #tpu.memory_space<vmem>>, vector<176x128xbf16>,
    %c11_80 = arith.constant 11 : index
    %c0_81 = arith.constant 0 : index
    %74 = tpu.strided_load %arg15[%c11_80, %c0_81] {strides = array<i32: 2, 1>} : memref<368x128xf32, #tpu.memory_space<vmem>>, vector<176x128xf32>
    %75 = arith.truncf %74 : vector<176x128xf32> to vector<176x128xbf16>
    %c0_82 = arith.constant 0 : index
    %c512 = arith.constant 512 : index
    %76 = vector.load %arg16[%c0_82, %c512] : memref<176x640xbf16, #tpu.memory_space<vmem>>, vector<176x128xbf16>
    tpu.vector_store %arg16[%c0_82, %c512], %75 {strides = array<i32>} : memref<176x640xbf16, #tpu.memory_space<vmem>>, vector<176x128xbf16>,
    %c0_83 = arith.constant 0 : index
    %c0_84 = arith.constant 0 : index
    %77 = vector.load %arg16[%c0_83, %c0_84] : memref<176x640xbf16, #tpu.memory_space<vmem>>, vector<176x640xbf16>
    %c0_85 = arith.constant 0 : index
    %c0_86 = arith.constant 0 : index
    %78 = vector.load %arg8[%c0_85, %c0_86] : memref<640x128xbf16, #tpu.memory_space<vmem>>, vector<640x128xbf16>
    %cst_87 = arith.constant dense<0.000000e+00> : vector<176x128xf32>
    %79 = tpu.matmul %77, %78, %cst_87 {dimension_numbers = #tpu.dot_dimension_numbers<[1], [0], [0], [1], [0, 0, 1, 1], [], []>} : vector<176x640xbf16>, vector<640x128xbf16>, vector<176x128xf32> -> vector<176x128xf32>
    %c0_88 = arith.constant 0 : index
    %c0_89 = arith.constant 0 : index
    %80 = vector.load %arg9[%c0_88, %c0_89] : memref<1x128xf32, #tpu.memory_space<vmem>>, vector<1x128xf32>
    %81 = vector.broadcast %80 : vector<1x128xf32> to vector<176x128xf32>
    %82 = arith.addf %79, %81 : vector<176x128xf32>
    %cst_90 = arith.constant 0.000000e+00 : f32
    %83 = vector.broadcast %cst_90 : f32 to vector<176x128xf32>
    %84 = arith.maximumf %82, %83 : vector<176x128xf32>
    %85 = arith.truncf %84 : vector<176x128xf32> to vector<176x128xbf16>
    %c0_91 = arith.constant 0 : index
    %c0_92 = arith.constant 0 : index
    %c0_93 = arith.constant 0 : index
    %86 = vector.load %arg10[%c0_91, %c0_92, %c0_93] : memref<1x176x128xbf16, #tpu.memory_space<vmem>>, vector<1x176x128xbf16>
    %87 = vector.shape_cast %86 : vector<1x176x128xbf16> to vector<176x128xbf16>
    %88 = vector.shape_cast %85 : vector<176x128xbf16> to vector<1x176x128xbf16>
    tpu.vector_store %arg10[%c0_91, %c0_92, %c0_93], %88 {strides = array<i32>} : memref<1x176x128xbf16, #tpu.memory_space<vmem>>, vector<1x176x128xbf16>,
    return
  }
  func.func @transform_0(%arg0: i32) -> (i32, i32, i32) {
    %c0_i32 = arith.constant 0 : i32
    %c0_i32_0 = arith.constant 0 : i32
    %c0_i32_1 = arith.constant 0 : i32
    return %arg0, %c0_i32, %c0_i32_0 : i32, i32, i32
  }
  func.func @transform_1(%arg0: i32) -> (i32, i32) {
    %c0_i32 = arith.constant 0 : i32
    %c0_i32_0 = arith.constant 0 : i32
    %c0_i32_1 = arith.constant 0 : i32
    return %c0_i32, %c0_i32_0 : i32, i32
  }
  func.func @transform_2(%arg0: i32) -> (i32, i32) {
    %c0_i32 = arith.constant 0 : i32
    %c0_i32_0 = arith.constant 0 : i32
    %c0_i32_1 = arith.constant 0 : i32
    return %c0_i32, %c0_i32_0 : i32, i32
  }
  func.func @transform_3(%arg0: i32) -> (i32, i32) {
    %c0_i32 = arith.constant 0 : i32
    %c0_i32_0 = arith.constant 0 : i32
    %c0_i32_1 = arith.constant 0 : i32
    return %c0_i32, %c0_i32_0 : i32, i32
  }
  func.func @transform_4(%arg0: i32) -> (i32, i32) {
    %c0_i32 = arith.constant 0 : i32
    %c0_i32_0 = arith.constant 0 : i32
    %c0_i32_1 = arith.constant 0 : i32
    return %c0_i32, %c0_i32_0 : i32, i32
  }
  func.func @transform_5(%arg0: i32) -> (i32, i32) {
    %c0_i32 = arith.constant 0 : i32
    %c0_i32_0 = arith.constant 0 : i32
    %c0_i32_1 = arith.constant 0 : i32
    return %c0_i32, %c0_i32_0 : i32, i32
  }
  func.func @transform_6(%arg0: i32) -> (i32, i32) {
    %c0_i32 = arith.constant 0 : i32
    %c0_i32_0 = arith.constant 0 : i32
    %c0_i32_1 = arith.constant 0 : i32
    return %c0_i32, %c0_i32_0 : i32, i32
  }
  func.func @transform_7(%arg0: i32) -> (i32, i32) {
    %c0_i32 = arith.constant 0 : i32
    %c0_i32_0 = arith.constant 0 : i32
    %c0_i32_1 = arith.constant 0 : i32
    return %c0_i32, %c0_i32_0 : i32, i32
  }
  func.func @transform_8(%arg0: i32) -> (i32, i32) {
    %c0_i32 = arith.constant 0 : i32
    %c0_i32_0 = arith.constant 0 : i32
    %c0_i32_1 = arith.constant 0 : i32
    return %c0_i32, %c0_i32_0 : i32, i32
  }
  func.func @transform_9(%arg0: i32) -> (i32, i32, i32) {
    %c0_i32 = arith.constant 0 : i32
    %c0_i32_0 = arith.constant 0 : i32
    %c0_i32_1 = arith.constant 0 : i32
    return %arg0, %c0_i32, %c0_i32_0 : i32, i32, i32
  }
}

module attributes {stable_mosaic.version = 11 : i64} {
  func.func @_fc_head_kernel(%arg0: i32, %arg1: memref<2x5632xbf16, #tpu.memory_space<vmem>>, %arg2: memref<5632x128xbf16, #tpu.memory_space<vmem>>, %arg3: memref<1x128xf32, #tpu.memory_space<vmem>>, %arg4: memref<128x256xbf16, #tpu.memory_space<vmem>>, %arg5: memref<1x256xf32, #tpu.memory_space<vmem>>, %arg6: memref<256x512xbf16, #tpu.memory_space<vmem>>, %arg7: memref<1x512xf32, #tpu.memory_space<vmem>>, %arg8: memref<512x3xbf16, #tpu.memory_space<vmem>>, %arg9: memref<1x3xf32, #tpu.memory_space<vmem>>, %arg10: memref<2x3xf32, #tpu.memory_space<vmem>>, %arg11: memref<2x128xf32, #tpu.memory_space<vmem>>) attributes {dimension_semantics = [#tpu.dimension_semantics<arbitrary>], iteration_bounds = array<i64: 4>, scalar_prefetch = 0 : i64, scratch_operands = 1 : i64, tpu.core_type = #tpu.core_type<tc>, window_params = [{transform_indices = @transform_0, window_bounds = array<i64: 2, 5632>}, {transform_indices = @transform_1, window_bounds = array<i64: 5632, 128>}, {pipeline_mode = #tpu.pipeline_mode<synchronous>, transform_indices = @transform_2, window_bounds = array<i64: 1, 128>}, {pipeline_mode = #tpu.pipeline_mode<synchronous>, transform_indices = @transform_3, window_bounds = array<i64: 128, 256>}, {pipeline_mode = #tpu.pipeline_mode<synchronous>, transform_indices = @transform_4, window_bounds = array<i64: 1, 256>}, {pipeline_mode = #tpu.pipeline_mode<synchronous>, transform_indices = @transform_5, window_bounds = array<i64: 256, 512>}, {pipeline_mode = #tpu.pipeline_mode<synchronous>, transform_indices = @transform_6, window_bounds = array<i64: 1, 512>}, {pipeline_mode = #tpu.pipeline_mode<synchronous>, transform_indices = @transform_7, window_bounds = array<i64: 512, 3>}, {pipeline_mode = #tpu.pipeline_mode<synchronous>, transform_indices = @transform_8, window_bounds = array<i64: 1, 3>}, {pipeline_mode = #tpu.pipeline_mode<synchronous>, transform_indices = @transform_9, window_bounds = array<i64: 2, 3>}]} {
    %c0_i32 = arith.constant 0 : i32
    %0 = arith.cmpi eq, %arg0, %c0_i32 : i32
    %1 = arith.extui %0 : i1 to i32
    %c0_i32_0 = arith.constant 0 : i32
    %2 = arith.cmpi ne, %1, %c0_i32_0 : i32
    scf.if %2 {
      %cst_9 = arith.constant 0.000000e+00 : f32
      %12 = vector.broadcast %cst_9 : f32 to vector<2x128xf32>
      %c0_10 = arith.constant 0 : index
      %c0_11 = arith.constant 0 : index
      %13 = vector.load %arg11[%c0_10, %c0_11] : memref<2x128xf32, #tpu.memory_space<vmem>>, vector<2x128xf32>
      tpu.vector_store %arg11[%c0_10, %c0_11], %12 {strides = array<i32>} : memref<2x128xf32, #tpu.memory_space<vmem>>, vector<2x128xf32>,
    } else {
    }
    %c0 = arith.constant 0 : index
    %c0_1 = arith.constant 0 : index
    %3 = vector.load %arg11[%c0, %c0_1] : memref<2x128xf32, #tpu.memory_space<vmem>>, vector<2x128xf32>
    %c0_2 = arith.constant 0 : index
    %c0_3 = arith.constant 0 : index
    %4 = vector.load %arg1[%c0_2, %c0_3] : memref<2x5632xbf16, #tpu.memory_space<vmem>>, vector<2x5632xbf16>
    %c0_4 = arith.constant 0 : index
    %c0_5 = arith.constant 0 : index
    %5 = vector.load %arg2[%c0_4, %c0_5] : memref<5632x128xbf16, #tpu.memory_space<vmem>>, vector<5632x128xbf16>
    %cst = arith.constant dense<0.000000e+00> : vector<2x128xf32>
    %6 = tpu.matmul %4, %5, %cst {dimension_numbers = #tpu.dot_dimension_numbers<[1], [0], [0], [1], [0, 0, 1, 1], [], []>} : vector<2x5632xbf16>, vector<5632x128xbf16>, vector<2x128xf32> -> vector<2x128xf32>
    %7 = arith.addf %3, %6 : vector<2x128xf32>
    %c0_6 = arith.constant 0 : index
    %c0_7 = arith.constant 0 : index
    %8 = vector.load %arg11[%c0_6, %c0_7] : memref<2x128xf32, #tpu.memory_space<vmem>>, vector<2x128xf32>
    tpu.vector_store %arg11[%c0_6, %c0_7], %7 {strides = array<i32>} : memref<2x128xf32, #tpu.memory_space<vmem>>, vector<2x128xf32>,
    %c3_i32 = arith.constant 3 : i32
    %9 = arith.cmpi eq, %arg0, %c3_i32 : i32
    %10 = arith.extui %9 : i1 to i32
    %c0_i32_8 = arith.constant 0 : i32
    %11 = arith.cmpi ne, %10, %c0_i32_8 : i32
    scf.if %11 {
      %c0_9 = arith.constant 0 : index
      %c0_10 = arith.constant 0 : index
      %12 = vector.load %arg11[%c0_9, %c0_10] : memref<2x128xf32, #tpu.memory_space<vmem>>, vector<2x128xf32>
      %c0_11 = arith.constant 0 : index
      %c0_12 = arith.constant 0 : index
      %13 = vector.load %arg3[%c0_11, %c0_12] : memref<1x128xf32, #tpu.memory_space<vmem>>, vector<1x128xf32>
      %14 = vector.broadcast %13 : vector<1x128xf32> to vector<2x128xf32>
      %15 = arith.addf %12, %14 : vector<2x128xf32>
      %cst_13 = arith.constant 0.000000e+00 : f32
      %16 = vector.broadcast %cst_13 : f32 to vector<2x128xf32>
      %17 = arith.maximumf %15, %16 : vector<2x128xf32>
      %18 = arith.truncf %17 : vector<2x128xf32> to vector<2x128xbf16>
      %c0_14 = arith.constant 0 : index
      %c0_15 = arith.constant 0 : index
      %19 = vector.load %arg4[%c0_14, %c0_15] : memref<128x256xbf16, #tpu.memory_space<vmem>>, vector<128x256xbf16>
      %cst_16 = arith.constant dense<0.000000e+00> : vector<2x256xf32>
      %20 = tpu.matmul %18, %19, %cst_16 {dimension_numbers = #tpu.dot_dimension_numbers<[1], [0], [0], [1], [0, 0, 1, 1], [], []>} : vector<2x128xbf16>, vector<128x256xbf16>, vector<2x256xf32> -> vector<2x256xf32>
      %c0_17 = arith.constant 0 : index
      %c0_18 = arith.constant 0 : index
      %21 = vector.load %arg5[%c0_17, %c0_18] : memref<1x256xf32, #tpu.memory_space<vmem>>, vector<1x256xf32>
      %22 = vector.broadcast %21 : vector<1x256xf32> to vector<2x256xf32>
      %23 = arith.addf %20, %22 : vector<2x256xf32>
      %cst_19 = arith.constant 0.000000e+00 : f32
      %24 = vector.broadcast %cst_19 : f32 to vector<2x256xf32>
      %25 = arith.maximumf %23, %24 : vector<2x256xf32>
      %26 = arith.truncf %25 : vector<2x256xf32> to vector<2x256xbf16>
      %c0_20 = arith.constant 0 : index
      %c0_21 = arith.constant 0 : index
      %27 = vector.load %arg6[%c0_20, %c0_21] : memref<256x512xbf16, #tpu.memory_space<vmem>>, vector<256x512xbf16>
      %cst_22 = arith.constant dense<0.000000e+00> : vector<2x512xf32>
      %28 = tpu.matmul %26, %27, %cst_22 {dimension_numbers = #tpu.dot_dimension_numbers<[1], [0], [0], [1], [0, 0, 1, 1], [], []>} : vector<2x256xbf16>, vector<256x512xbf16>, vector<2x512xf32> -> vector<2x512xf32>
      %c0_23 = arith.constant 0 : index
      %c0_24 = arith.constant 0 : index
      %29 = vector.load %arg7[%c0_23, %c0_24] : memref<1x512xf32, #tpu.memory_space<vmem>>, vector<1x512xf32>
      %30 = vector.broadcast %29 : vector<1x512xf32> to vector<2x512xf32>
      %31 = arith.addf %28, %30 : vector<2x512xf32>
      %cst_25 = arith.constant 0.000000e+00 : f32
      %32 = vector.broadcast %cst_25 : f32 to vector<2x512xf32>
      %33 = arith.maximumf %31, %32 : vector<2x512xf32>
      %34 = arith.truncf %33 : vector<2x512xf32> to vector<2x512xbf16>
      %c0_26 = arith.constant 0 : index
      %c0_27 = arith.constant 0 : index
      %35 = vector.load %arg8[%c0_26, %c0_27] : memref<512x3xbf16, #tpu.memory_space<vmem>>, vector<512x3xbf16>
      %cst_28 = arith.constant dense<0.000000e+00> : vector<2x3xf32>
      %36 = tpu.matmul %34, %35, %cst_28 {dimension_numbers = #tpu.dot_dimension_numbers<[1], [0], [0], [1], [0, 0, 1, 1], [], []>} : vector<2x512xbf16>, vector<512x3xbf16>, vector<2x3xf32> -> vector<2x3xf32>
      %c0_29 = arith.constant 0 : index
      %c0_30 = arith.constant 0 : index
      %37 = vector.load %arg9[%c0_29, %c0_30] : memref<1x3xf32, #tpu.memory_space<vmem>>, vector<1x3xf32>
      %38 = vector.broadcast %37 : vector<1x3xf32> to vector<2x3xf32>
      %39 = arith.addf %36, %38 : vector<2x3xf32>
      %c0_31 = arith.constant 0 : index
      %c0_32 = arith.constant 0 : index
      %40 = vector.load %arg10[%c0_31, %c0_32] : memref<2x3xf32, #tpu.memory_space<vmem>>, vector<2x3xf32>
      tpu.vector_store %arg10[%c0_31, %c0_32], %39 {strides = array<i32>} : memref<2x3xf32, #tpu.memory_space<vmem>>, vector<2x3xf32>,
    } else {
    }
    return
  }
  func.func @transform_0(%arg0: i32) -> (i32, i32) {
    %c0_i32 = arith.constant 0 : i32
    %c0_i32_0 = arith.constant 0 : i32
    return %c0_i32, %arg0 : i32, i32
  }
  func.func @transform_1(%arg0: i32) -> (i32, i32) {
    %c0_i32 = arith.constant 0 : i32
    %c0_i32_0 = arith.constant 0 : i32
    return %arg0, %c0_i32 : i32, i32
  }
  func.func @transform_2(%arg0: i32) -> (i32, i32) {
    %c0_i32 = arith.constant 0 : i32
    %c0_i32_0 = arith.constant 0 : i32
    %c0_i32_1 = arith.constant 0 : i32
    return %c0_i32, %c0_i32_0 : i32, i32
  }
  func.func @transform_3(%arg0: i32) -> (i32, i32) {
    %c0_i32 = arith.constant 0 : i32
    %c0_i32_0 = arith.constant 0 : i32
    %c0_i32_1 = arith.constant 0 : i32
    return %c0_i32, %c0_i32_0 : i32, i32
  }
  func.func @transform_4(%arg0: i32) -> (i32, i32) {
    %c0_i32 = arith.constant 0 : i32
    %c0_i32_0 = arith.constant 0 : i32
    %c0_i32_1 = arith.constant 0 : i32
    return %c0_i32, %c0_i32_0 : i32, i32
  }
  func.func @transform_5(%arg0: i32) -> (i32, i32) {
    %c0_i32 = arith.constant 0 : i32
    %c0_i32_0 = arith.constant 0 : i32
    %c0_i32_1 = arith.constant 0 : i32
    return %c0_i32, %c0_i32_0 : i32, i32
  }
  func.func @transform_6(%arg0: i32) -> (i32, i32) {
    %c0_i32 = arith.constant 0 : i32
    %c0_i32_0 = arith.constant 0 : i32
    %c0_i32_1 = arith.constant 0 : i32
    return %c0_i32, %c0_i32_0 : i32, i32
  }
  func.func @transform_7(%arg0: i32) -> (i32, i32) {
    %c0_i32 = arith.constant 0 : i32
    %c0_i32_0 = arith.constant 0 : i32
    %c0_i32_1 = arith.constant 0 : i32
    return %c0_i32, %c0_i32_0 : i32, i32
  }
  func.func @transform_8(%arg0: i32) -> (i32, i32) {
    %c0_i32 = arith.constant 0 : i32
    %c0_i32_0 = arith.constant 0 : i32
    %c0_i32_1 = arith.constant 0 : i32
    return %c0_i32, %c0_i32_0 : i32, i32
  }
  func.func @transform_9(%arg0: i32) -> (i32, i32) {
    %c0_i32 = arith.constant 0 : i32
    %c0_i32_0 = arith.constant 0 : i32
    %c0_i32_1 = arith.constant 0 : i32
    return %c0_i32, %c0_i32_0 : i32, i32
  }
}

</mosaic_0001>

<bundles_post_ra>
// kernel: ssa_forward.3
= control target key start
LH: loop header
LB: loop body
LE: loop exit
PB: predicated region body
PF: predicated region fallthrough
CT: control target
= control target key end

     0   :  { %s8478_s0 = inlined_call_operand.vmem [shape: bf16[2,22528], index: 0, kind: input, shape index: {}]   ;;  %s8479_s1 = inlined_call_operand.hbm [shape: bf16[22528,128], index: 1, kind: input, shape index: {}]   ;;  %s8480_s2 = inlined_call_operand.hbm [shape: f32[1,128], index: 2, kind: input, shape index: {}]   ;;  %s8481_s3 = inlined_call_operand.hbm [shape: bf16[128,256], index: 3, kind: input, shape index: {}]   ;;  %s8482_s4 = inlined_call_operand.hbm [shape: f32[1,256], index: 4, kind: input, shape index: {}]   ;;  %s8483_s5 = inlined_call_operand.hbm [shape: bf16[256,512], index: 5, kind: input, shape index: {}]   ;;  %s8484_s6 = inlined_call_operand.hbm [shape: f32[1,512], index: 6, kind: input, shape index: {}]   ;;  %s8485_s7 = inlined_call_operand.vmem [shape: bf16[512,3], index: 7, kind: input, shape index: {}]   ;;  %s8486_s8 = inlined_call_operand.hbm [shape: f32[1,3], index: 8, kind: input, shape index: {}]   ;;  %s8487_s9 = inlined_call_operand.hbm [shape: f32[2,3], index: 9, kind: output, shape index: {}]  }
   0x1   :  { %8488 = sst [smem:[#allocation21_spill]] %s8480_s2 }
   0x2   :  { %14 = vsyncpa [#allocation4], 0 }
   0x3   :  { %16 = vsyncpa [#allocation4 + $0x1], 0 }
   0x4   :  { %17 = vsyncpa [#allocation7], 0 }
   0x5   :  { %18 = vsyncpa [#allocation10], 0 }
   0x6   :  { %19 = vsyncpa [#allocation13], 0 }
   0x7   :  { %20 = vsyncpa [#allocation5], 0  ;;  %s7859_s30 = smov 0   ;;  %s7861_s10 = smov 0  }
   0x8   :  { %s7863_s11 = smov 0   ;;  %s7865_s12 = smov 0  }
   0x9 LB: > { %s8489_s2 = sld [smem:[#allocation21_spill]]  ;;  %s7883_s16 = sadd.s32 4294967295, %s7793_s12   ;;  %s7793_s12 = sphi %s7865_s12, %s8497_s12   ;;  %s7789_s11 = sphi %s7863_s11, %s8496_s11   ;;  %s7785_s10 = sphi %s7861_s10, %s8495_s10   ;;  %s7781_s30 = sphi %s7859_s30, %s8494_s30  }
   0xa   : > { %p5044_p0 = scmp.ge.s32.totalorder %s7793_s12, 1  ;;  %p73_p1 = scmp.eq.s32.totalorder %s7883_s16, 0 }
   0xb   : > { %p251_p2 = scmp.lt.s32.totalorder %s7793_s12, 5  ;;  %p5045_p3 = scmp.ne.s32.totalorder %s7883_s16, 0 }
   0xc   : > { %s7795_s18 = smov [#allocation6]   ;;  %s289_s22 = sshll.u32 %s8482_s4, 4  ;;  %s290_s22 = int_to_ptr.hbm [resolvable:$true] %s289_s22 }
   0xd   : > { %p7889_p4 = pnand %p5044_p0, %p251_p2  ;;  %s265_s19 = sshll.u32 %s7795_s18, 4  ;;  %s266_s19 = int_to_ptr.vmem [resolvable:$true] %s265_s19 }
   0xe   : > { %s7796_s24 = smov [#allocation9]   ;;  %s315_s28 = sshll.u32 %s8484_s6, 4  ;;  %s316_s28 = int_to_ptr.hbm [resolvable:$true] %s315_s28 }
   0xf   : > { %s263_s15 = sshll.u32 %s8489_s2, 4  ;;  %p7419_p5 = pneg %p7889_p4  ;;  %s264_s15 = int_to_ptr.hbm [resolvable:$true] %s263_s15 }
  0x10   : > { %s291_s25 = sshll.u32 %s7796_s24, 4  ;;  %s274_s14 = sshll.u32 %s8481_s3, 4  ;;  %s292_s25 = int_to_ptr.vmem [resolvable:$true] %s291_s25  ;;  %s275_s14 = int_to_ptr.hbm [resolvable:$true] %s274_s14 }
  0x11   : > { %p7900_p6 = pnand %p7419_p5, %p73_p1  ;;  %s7797_s18 = smov [#allocation12]  }
  0x12   : > { %s317_s20 = sshll.u32 %s7797_s18, 4  ;;  %s7798_s21 = smov [#allocation8]   ;;  %s318_s20 = int_to_ptr.vmem [resolvable:$true] %s317_s20 }
  0x13   : > { %7422 = dma.hbm_to_vmem [thread:$0]  (!%p7900_p6), %s264_s15, 16, %s266_s19, [#allocation7]  }
  0x14   : > { %7428 = dma.hbm_to_vmem [thread:$0]  (!%p7900_p6), %s290_s22, 32, %s292_s25, [#allocation10]  }
  0x15   : > { %7434 = dma.hbm_to_vmem [thread:$0]  (!%p7900_p6), %s316_s28, 64, %s318_s20, [#allocation13]  }
  0x16   : > { %s276_s24 = sshll.u32 %s7798_s21, 4  ;;  %s7799_s26 = smov 128   ;;  %s277_s24 = int_to_ptr.vmem [resolvable:$true] %s276_s24 }
  0x17   : > { %s7800_s27 = smov 8   ;;  %s300_s22 = sshll.u32 %s8483_s5, 4  ;;  %s301_s22 = int_to_ptr.hbm [resolvable:$true] %s300_s22 }
  0x18   : > { %7425 = dma.hbm_to_vmem [thread:$0]  (!%p7900_p6), %s275_s14, 2048, %s277_s24, [#allocation7], %s7799_s26, %s7799_s26, %s7800_s27  }
  0x19   : > { %s7801_s25 = smov [#allocation11]   ;;  %s330_s18 = sshll.u32 %s8486_s8, 4  ;;  %s331_s18 = int_to_ptr.hbm [resolvable:$true] %s330_s18 }
  0x1a   : > { %s302_s28 = sshll.u32 %s7801_s25, 4  ;;  %s7802_s14 = smov 256   ;;  %s303_s28 = int_to_ptr.vmem [resolvable:$true] %s302_s28 }
  0x1b   : > { %s7803_s20 = smov 16   ;;  %s7804_s21 = smov [#allocation14]  }
  0x1c   : > { %7431 = dma.hbm_to_vmem [thread:$0]  (!%p7900_p6), %s301_s22, 8192, %s303_s28, [#allocation10], %s7802_s14, %s7802_s14, %s7803_s20  }
  0x1d   : > { %s332_s24 = sshll.u32 %s7804_s21, 4  ;;  %s7929_s26 = sadd.s32 1, %s7793_s12   ;;  %s333_s24 = int_to_ptr.vmem [resolvable:$true] %s332_s24 }
  0x1e   : > { %7437 = dma.hbm_to_vmem [thread:$0]  (!%p7900_p6), %s331_s18, 16, %s333_s24, [#allocation13]  }
  0x1f   : > { %s59_s27 = sadd.s32 1, %s7789_s11  ;;  %s56_s15 = ssub.s32 %s7793_s12, %s7929_s26 }
  0x20   : > { %p66_p7 = scmp.ne.s32.totalorder %s7789_s11, %s7785_s10  ;;  %p57_p8 = scmp.eq.s32.totalorder %s56_s15, 0 }
  0x21   : > { %p67_p9 = scmp.eq.s32.totalorder %s7793_s12, 0  ;;  %p72_p10 = scmp.ne.s32.totalorder %s7785_s10, %s7781_s30 }
  0x22   : > { %p7448_p11 = scmp.lt.s32.totalorder %s7793_s12, 4  ;;  %s351_s23 = sand.u32 1, %s7789_s11  }
  0x23   : > { %s7941_s19 = scalar_select %p57_p8, %s7789_s11, %s59_s27  }
  0x24   : > { %p68_p12 = por %p67_p9, %p66_p7  ;;  %p7945_p13 = por %p73_p1, %p72_p10 }
  0x25   : > { %s6922_s25 = smul.u32 2816, %s7793_s12  ;;  %s352_s24 = scalar_lea.sflag [#allocation4], %s351_s23 }
  0x26   : > { %s7387_s28 = smul.u32 2816, %s351_s23  ;;  %p7954_p0 = pnand %p7448_p11, %p68_p12 }
  0x27   : > { %s360_s18 = scalar_lea.hbm %s8479_s1, %s6922_s25  ;;  %s7692_s29 = scalar_lea.hbm %s8479_s1, 11264 }
  0x28   : > { %s361_s30 = sshll.u32 %s360_s18, 4  ;;  %s355_s20 = scalar_lea.vmem [#allocation3], %s7387_s28  ;;  %s362_s30 = int_to_ptr.hbm [resolvable:$true] %s361_s30 }
  0x29   : > { %s363_s21 = sshll.u32 %s355_s20, 4  ;;  %s7685_s27 = sshra.s32 %s362_s30, 4  ;;  %s364_s21 = int_to_ptr.vmem [resolvable:$true] %s363_s21  ;;  %s7686_s27 = int_to_ptr.hbm [resolvable:$true] %s7685_s27 }
  0x2a   : > { %s7687_s15 = scalar_lea.hbm %s7686_s27, 2816  ;;  %p7689_p5 = pneg %p7954_p0 }
  0x2b   : > { %p7688_p2 = scmp.ne.s32.totalorder %s7686_s27, %s7687_s15  ;;  %p7693_p8 = scmp.lt.s32.totalorder %s7686_s27, %s8479_s1 }
  0x2c   : > { %p7694_p9 = scmp.lt.s32.totalorder %s7692_s29, %s7687_s15 }
  0x2d   : > { %p7690_p6 = pnand %p7689_p5, %p7688_p2 }
  0x2e   : > { %p7695_p10 = por %p7694_p9, %p7693_p8 }
  0x2f   : > { %p7691_p7 = pneg %p7690_p6 }
  0x31   : > { %p7696_p11 = pnand %p7695_p10, %p7691_p7 }
  0x33   : > { %7699 = shalt.err (!%p7696_p11)
}
  0x34   : > { %s7805_s23 = smov 64   ;;  %s7806_s28 = smov 4  }
  0x35   : > { %7441 = dma.hbm_to_vmem [thread:$0]  (!%p7954_p0), %s362_s30, 45056, %s364_s21, %s352_s24, %s7805_s23, %s7805_s23, %s7806_s28  }
  0x36   : > { %375 = sbr.rel (%p7889_p4) target bundleno = 1030 (0x406), region = 56  ;;  %s377_s18 = sand.u32 (!%p7889_p4), 1, %s7785_s10  }
  0x37   : > { %s7388_s20 = smul.u32 (!%p7889_p4), 2816, %s377_s18  ;;  %s378_s12 = scalar_lea.sflag (!%p7889_p4), [#allocation4], %s377_s18 }
  0x39   : > { %s7971_s25 = scalar_lea.vmem (!%p7889_p4), [#allocation3], %s7388_s20 }
  0x3b   : > { %7760 = dma.done.wait (%p7945_p13), %s378_s12, 45056  }
  0x3c   : > { %7762 = vsyncadd (%p7945_p13), %s378_s12, 4294922240 }
  0x3d   : > { %7764 = dma.done.wait (%p73_p1), [#allocation7], 2064  }
  0x3e   : > { %7766 = vsyncadd (%p73_p1), [#allocation7], 4294965232 }
  0x3f   : > { %7768 = dma.done.wait (%p73_p1), [#allocation10], 8224  }
  0x40   : > { %7770 = vsyncadd (%p73_p1), [#allocation10], 4294959072 }
  0x41   : > { %7772 = dma.done.wait (%p73_p1), [#allocation13], 80  }
  0x42   : > { %7774 = vsyncadd (%p73_p1), [#allocation13], 4294967216  ;;  %s446_s2 = smul.u32 44, %s7883_s16 }
  0x43   : > { %455 = sbr.rel (%p5045_p3) target bundleno = 74 (0x4a), region = 88 }
  0x44   : > { %p447_p4 = scmp.lt.s32.totalorder %s446_s2, 175 }
  0x46   : > { %s8499_s2 = smov (!%p447_p4, %s446_s2), 175 }
  0x47   : > { %s7993_s14 = scalar_lea.vmem %s8478_s0, %s8499_s2 }
  0x48   : > { %v7807_v0 = vmov 0.0  }
  0x49   : > { %456 = vst [vmem:[#allocation2] sm:$0x3] %v7807_v0 }
  0x4a PF: > { %v6930_v1 = vld [vmem:[%s7971_s25 + $0x38] sm:$0xff]  ;;  %v6929_v5 = vld [vmem:[%s7971_s25 + $0x30] sm:$0xff]  ;;  %v6928_v9 = vld [vmem:[%s7971_s25 + $0x28] sm:$0xff]  ;;  %p6469_p1 = scmp.ne.s32.totalorder %s7883_s16, 3 }
  0x4b   : > { %v6938_v2 = vld [vmem:[%s7971_s25 + $0x78] sm:$0xff]  ;;  %3380 = vmatpush.bf16.msra.mxu0 %v6930_v1  ;;  %v6937_v6 = vld [vmem:[%s7971_s25 + $0x70] sm:$0xff]  ;;  %v6936_v10 = vld [vmem:[%s7971_s25 + $0x68] sm:$0xff] }
  0x4c   : > { %v6946_v3 = vld [vmem:[%s7971_s25 + $0xb8] sm:$0xff]  ;;  %3393 = vmatpush.bf16.msra.mxu1 %v6938_v2  ;;  %v6945_v7 = vld [vmem:[%s7971_s25 + $0xb0] sm:$0xff]  ;;  %v6944_v11 = vld [vmem:[%s7971_s25 + $0xa8] sm:$0xff] }
  0x4d   : > { %v6954_v4 = vld [vmem:[%s7971_s25 + $0xf8] sm:$0xff]  ;;  %3406 = vmatpush.bf16.msra.mxu2 %v6946_v3  ;;  %v6953_v8 = vld [vmem:[%s7971_s25 + $0xf0] sm:$0xff]  ;;  %v6952_v12 = vld [vmem:[%s7971_s25 + $0xe8] sm:$0xff] }
  0x4e   : > { %3419 = vmatpush.bf16.msra.mxu3 %v6954_v4  ;;  %v6927_v13 = vld [vmem:[%s7971_s25 + $0x20] sm:$0xff]  ;;  %v6926_v17 = vld [vmem:[%s7971_s25 + $0x18] sm:$0xff]  ;;  %v6925_v22 = vld [vmem:[%s7971_s25 + $0x10] sm:$0xff] }
  0x4f   : > { %3381 = vmatpush.bf16.msra.mxu0 %v6929_v5  ;;  %v6935_v14 = vld [vmem:[%s7971_s25 + $0x60] sm:$0xff]  ;;  %v6934_v18 = vld [vmem:[%s7971_s25 + $0x58] sm:$0xff]  ;;  %v6933_v23 = vld [vmem:[%s7971_s25 + $0x50] sm:$0xff] }
  0x50   : > { %3394 = vmatpush.bf16.msra.mxu1 %v6937_v6  ;;  %v6943_v15 = vld [vmem:[%s7971_s25 + $0xa0] sm:$0xff]  ;;  %v6942_v19 = vld [vmem:[%s7971_s25 + $0x98] sm:$0xff]  ;;  %v6941_v24 = vld [vmem:[%s7971_s25 + $0x90] sm:$0xff] }
  0x51   : > { %3407 = vmatpush.bf16.msra.mxu2 %v6945_v7  ;;  %v6951_v16 = vld [vmem:[%s7971_s25 + $0xe0] sm:$0xff]  ;;  %v6950_v20 = vld [vmem:[%s7971_s25 + $0xd8] sm:$0xff]  ;;  %v6949_v25 = vld [vmem:[%s7971_s25 + $0xd0] sm:$0xff] }
  0x52   : > { %3420 = vmatpush.bf16.msra.mxu3 %v6953_v8  ;;  %v458_v21 = vld [vmem:[%s7993_s14] sm:$0xff]  ;;  %v6924_v26 = vld [vmem:[%s7971_s25 + $0x8] sm:$0xff]  ;;  %v6923_v30 = vld [vmem:[%s7971_s25] sm:$0xff] }
  0x53   : > { %3382 = vmatpush.bf16.msra.mxu0 %v6928_v9  ;;  %1169 = vst [vmem:[#allocation1] ss:$9 sm:$0xff] %v458_v21  ;;  %v6932_v27 = vld [vmem:[%s7971_s25 + $0x48] sm:$0xff]  ;;  %v6931_v31 = vld [vmem:[%s7971_s25 + $0x40] sm:$0xff]  ;;  %v6962_v34 = vld [vmem:[%s7971_s25 + $0x138] sm:$0xff] }
  0x54   : > { %3395 = vmatpush.bf16.msra.mxu1 %v6936_v10  ;;  %v6940_v28 = vld [vmem:[%s7971_s25 + $0x88] sm:$0xff]  ;;  %v6939_v32 = vld [vmem:[%s7971_s25 + $0x80] sm:$0xff]  ;;  %v6970_v35 = vld [vmem:[%s7971_s25 + $0x178] sm:$0xff] }
  0x55   : > { %3408 = vmatpush.bf16.msra.mxu2 %v6944_v11  ;;  %v6948_v29 = vld [vmem:[%s7971_s25 + $0xc8] sm:$0xff]  ;;  %v6947_v33 = vld [vmem:[%s7971_s25 + $0xc0] sm:$0xff]  ;;  %v6978_v36 = vld [vmem:[%s7971_s25 + $0x1b8] sm:$0xff] }
  0x56   : > { %3421 = vmatpush.bf16.msra.mxu3 %v6952_v12  ;;  %v6986_v37 = vld [vmem:[%s7971_s25 + $0x1f8] sm:$0xff]  ;;  %v6961_v38 = vld [vmem:[%s7971_s25 + $0x130] sm:$0xff]  ;;  %v6960_v46 = vld [vmem:[%s7971_s25 + $0x128] sm:$0xff] }
  0x57   : > { %3383 = vmatpush.bf16.msra.mxu0 %v6927_v13  ;;  %v6969_v41 = vld [vmem:[%s7971_s25 + $0x170] sm:$0xff]  ;;  %v6968_v47 = vld [vmem:[%s7971_s25 + $0x168] sm:$0xff]  ;;  %v459_v53 = vld [vmem:[%s7993_s14 + $0x8] sm:$0xff] }
  0x58   : > { %3396 = vmatpush.bf16.msra.mxu1 %v6935_v14  ;;  %v6977_v44 = vld [vmem:[%s7971_s25 + $0x1b0] sm:$0xff]  ;;  %v6976_v48 = vld [vmem:[%s7971_s25 + $0x1a8] sm:$0xff]  ;;  %v6959_v55 = vld [vmem:[%s7971_s25 + $0x120] sm:$0xff] }
  0x59   : > { %3409 = vmatpush.bf16.msra.mxu2 %v6943_v15  ;;  %v6985_v45 = vld [vmem:[%s7971_s25 + $0x1f0] sm:$0xff]  ;;  %v6984_v49 = vld [vmem:[%s7971_s25 + $0x1e8] sm:$0xff]  ;;  %v6967_v56 = vld [vmem:[%s7971_s25 + $0x160] sm:$0xff] }
  0x5a   : > { %3422 = vmatpush.bf16.msra.mxu3 %v6951_v16  ;;  %v1172_v39 = vld [vmem:[#allocation1 + $0x12] sm:$0xff]  ;;  %v1170_v40 = vld [vmem:[#allocation1] sm:$0xff]  ;;  %v1171_v43 = vld [vmem:[#allocation1 + $0x9] sm:$0xff] }
  0x5b   : > { %3384 = vmatpush.bf16.msra.mxu0 %v6926_v17  ;;  %v1173_v42 = vld [vmem:[#allocation1 + $0x1b] sm:$0xff]  ;;  %v1174_v51 = vld [vmem:[#allocation1 + $0x24] sm:$0xff]  ;;  %v1175_v54 = vld [vmem:[#allocation1 + $0x2d] sm:$0xff] }
  0x5c   : > { %3397 = vmatpush.bf16.msra.mxu1 %v6934_v18  ;;  %v1176_v50 = vld [vmem:[#allocation1 + $0x36] sm:$0xff]  ;;  %v1177_v52 = vld [vmem:[#allocation1 + $0x3f] sm:$0xff]  ;;  %v6975_v57 = vld [vmem:[%s7971_s25 + $0x1a0] sm:$0xff] }
  0x5d   : > { %3410 = vmatpush.bf16.msra.mxu2 %v6942_v19  ;;  %1179 = vst [vmem:[#allocation1] ss:$9 sm:$0xff] %v459_v53  ;;  %v6983_v58 = vld [vmem:[%s7971_s25 + $0x1e0] sm:$0xff]  ;;  %v6958_v59 = vld [vmem:[%s7971_s25 + $0x118] sm:$0xff]  ;;  %v6957_v63 = vld [vmem:[%s7971_s25 + $0x110] sm:$0xff] }
  0x5e   : > { %3423 = vmatpush.bf16.msra.mxu3 %v6950_v20  ;;  %v6966_v60 = vld [vmem:[%s7971_s25 + $0x158] sm:$0xff]  ;;  %v6965_v0 = vld [vmem:[%s7971_s25 + $0x150] sm:$0xff]  ;;  %v6956_v3 = vld [vmem:[%s7971_s25 + $0x108] sm:$0xff] }
  0x5f   : > { %3385 = vmatpush.bf16.msra.mxu0 %v6925_v22  ;;  %v6974_v61 = vld [vmem:[%s7971_s25 + $0x198] sm:$0xff]  ;;  %v6973_v1 = vld [vmem:[%s7971_s25 + $0x190] sm:$0xff]  ;;  %v6964_v4 = vld [vmem:[%s7971_s25 + $0x148] sm:$0xff] }
  0x60   : > { %3398 = vmatpush.bf16.msra.mxu1 %v6933_v23  ;;  %v6982_v62 = vld [vmem:[%s7971_s25 + $0x1d8] sm:$0xff]  ;;  %v6981_v2 = vld [vmem:[%s7971_s25 + $0x1d0] sm:$0xff]  ;;  %v6972_v5 = vld [vmem:[%s7971_s25 + $0x188] sm:$0xff] }
  0x61   : > { %3411 = vmatpush.bf16.msra.mxu2 %v6941_v24  ;;  %v6980_v6 = vld [vmem:[%s7971_s25 + $0x1c8] sm:$0xff]  ;;  %v6955_v7 = vld [vmem:[%s7971_s25 + $0x100] sm:$0xff]  ;;  %v6994_v11 = vld [vmem:[%s7971_s25 + $0x238] sm:$0xff] }
  0x62   : > { %3424 = vmatpush.bf16.msra.mxu3 %v6949_v25  ;;  %v6963_v8 = vld [vmem:[%s7971_s25 + $0x140] sm:$0xff]  ;;  %v7002_v12 = vld [vmem:[%s7971_s25 + $0x278] sm:$0xff]  ;;  %v6993_v15 = vld [vmem:[%s7971_s25 + $0x230] sm:$0xff] }
  0x63   : > { %3386 = vmatpush.bf16.msra.mxu0 %v6924_v26  ;;  %v6971_v9 = vld [vmem:[%s7971_s25 + $0x180] sm:$0xff]  ;;  %v7010_v13 = vld [vmem:[%s7971_s25 + $0x2b8] sm:$0xff]  ;;  %v7001_v16 = vld [vmem:[%s7971_s25 + $0x270] sm:$0xff] }
  0x64   : > { %3399 = vmatpush.bf16.msra.mxu1 %v6932_v27  ;;  %v6979_v10 = vld [vmem:[%s7971_s25 + $0x1c0] sm:$0xff]  ;;  %v7018_v14 = vld [vmem:[%s7971_s25 + $0x2f8] sm:$0xff]  ;;  %v7009_v17 = vld [vmem:[%s7971_s25 + $0x2b0] sm:$0xff] }
  0x65   : > { %3412 = vmatpush.bf16.msra.mxu2 %v6940_v28  ;;  %v7017_v18 = vld [vmem:[%s7971_s25 + $0x2f0] sm:$0xff]  ;;  %v6992_v19 = vld [vmem:[%s7971_s25 + $0x228] sm:$0xff]  ;;  %v6991_v23 = vld [vmem:[%s7971_s25 + $0x220] sm:$0xff] }
  0x66   : > { %3425 = vmatpush.bf16.msra.mxu3 %v6948_v29  ;;  %v7000_v20 = vld [vmem:[%s7971_s25 + $0x268] sm:$0xff]  ;;  %v6999_v24 = vld [vmem:[%s7971_s25 + $0x260] sm:$0xff]  ;;  %v6990_v27 = vld [vmem:[%s7971_s25 + $0x218] sm:$0xff] }
  0x67   : > { %3387 = vmatpush.bf16.msra.mxu0 %v6923_v30  ;;  %v7008_v21 = vld [vmem:[%s7971_s25 + $0x2a8] sm:$0xff]  ;;  %v7007_v25 = vld [vmem:[%s7971_s25 + $0x2a0] sm:$0xff]  ;;  %v6998_v28 = vld [vmem:[%s7971_s25 + $0x258] sm:$0xff] }
  0x68   : > { %3400 = vmatpush.bf16.msra.mxu1 %v6931_v31  ;;  %v7016_v22 = vld [vmem:[%s7971_s25 + $0x2e8] sm:$0xff]  ;;  %v7015_v26 = vld [vmem:[%s7971_s25 + $0x2e0] sm:$0xff]  ;;  %v7006_v29 = vld [vmem:[%s7971_s25 + $0x298] sm:$0xff] }
  0x69   : > { %3413 = vmatpush.bf16.msra.mxu2 %v6939_v32  ;;  %v7014_v30 = vld [vmem:[%s7971_s25 + $0x2d8] sm:$0xff]  ;;  %v6989_v31 = vld [vmem:[%s7971_s25 + $0x210] sm:$0xff] }
  0x6a   : > { %3426 = vmatpush.bf16.msra.mxu3 %v6947_v33  ;;  %3388 = vmatmul.bf16.vlgmr.msra.gmra.mxu0 %v1170_v40  ;;  %v6997_v32 = vld [vmem:[%s7971_s25 + $0x250] sm:$0xff]  ;;  %v6995_v40 = vld [vmem:[%s7971_s25 + $0x240] sm:$0xff] }
  0x6b   : > { %3432 = vmatpush.bf16.msrb.mxu0 %v6962_v34  ;;  %3401 = vmatmul.bf16.vlgmr.msra.gmra.mxu1 %v1171_v43  ;;  %v7005_v33 = vld [vmem:[%s7971_s25 + $0x290] sm:$0xff]  ;;  %v7026_v43 = vld [vmem:[%s7971_s25 + $0x338] sm:$0xff] }
  0x6c   : > { %3445 = vmatpush.bf16.msrb.mxu1 %v6970_v35  ;;  %3414 = vmatmul.bf16.vlgmr.msra.gmra.mxu2 %v1172_v39  ;;  %v7013_v34 = vld [vmem:[%s7971_s25 + $0x2d0] sm:$0xff]  ;;  %v6988_v35 = vld [vmem:[%s7971_s25 + $0x208] sm:$0xff]  ;;  %v6987_v39 = vld [vmem:[%s7971_s25 + $0x200] sm:$0xff] }
  0x6d   : > { %3458 = vmatpush.bf16.msrb.mxu2 %v6978_v36  ;;  %3427 = vmatmul.bf16.vlgmr.msra.gmra.mxu3 %v1173_v42  ;;  %v6996_v36 = vld [vmem:[%s7971_s25 + $0x248] sm:$0xff]  ;;  %v7011_v42 = vld [vmem:[%s7971_s25 + $0x2c0] sm:$0xff]  ;;  %v7041_v53 = vld [vmem:[%s7971_s25 + $0x3b0] sm:$0xff] }
  0x6e   : > { %3471 = vmatpush.bf16.msrb.mxu3 %v6986_v37  ;;  %v7004_v37 = vld [vmem:[%s7971_s25 + $0x288] sm:$0xff] }
  0x6f   : > { %3433 = vmatpush.bf16.msrb.mxu0 %v6961_v38  ;;  %v7012_v38 = vld [vmem:[%s7971_s25 + $0x2c8] sm:$0xff] }
  0x70   : > { %3446 = vmatpush.bf16.msrb.mxu1 %v6969_v41  ;;  %v7003_v41 = vld [vmem:[%s7971_s25 + $0x280] sm:$0xff] }
  0x71   : > { %3459 = vmatpush.bf16.msrb.mxu2 %v6977_v44  ;;  %v7034_v44 = vld [vmem:[%s7971_s25 + $0x378] sm:$0xff] }
  0x72   : > { %3472 = vmatpush.bf16.msrb.mxu3 %v6985_v45  ;;  %v7042_v45 = vld [vmem:[%s7971_s25 + $0x3b8] sm:$0xff] }
  0x73   : > { %3434 = vmatpush.bf16.msrb.mxu0 %v6960_v46  ;;  %v7050_v46 = vld [vmem:[%s7971_s25 + $0x3f8] sm:$0xff] }
  0x74   : > { %3447 = vmatpush.bf16.msrb.mxu1 %v6968_v47  ;;  %v1180_v47 = vld [vmem:[#allocation1] sm:$0xff] }
  0x75   : > { %3460 = vmatpush.bf16.msrb.mxu2 %v6976_v48  ;;  %v1182_v48 = vld [vmem:[#allocation1 + $0x12] sm:$0xff] }
  0x76   : > { %3473 = vmatpush.bf16.msrb.mxu3 %v6984_v49  ;;  %v1181_v49 = vld [vmem:[#allocation1 + $0x9] sm:$0xff] }
  0x77   : > { %3435 = vmatpush.bf16.msrb.mxu0 %v6959_v55  ;;  %v7024_v55 = vld [vmem:[%s7971_s25 + $0x328] sm:$0xff] }
  0x78   : > { %3448 = vmatpush.bf16.msrb.mxu1 %v6967_v56  ;;  %v7032_v56 = vld [vmem:[%s7971_s25 + $0x368] sm:$0xff] }
  0x79   : > { %3461 = vmatpush.bf16.msrb.mxu2 %v6975_v57  ;;  %v7040_v57 = vld [vmem:[%s7971_s25 + $0x3a8] sm:$0xff] }
  0x7a   : > { %3474 = vmatpush.bf16.msrb.mxu3 %v6983_v58  ;;  %v7048_v58 = vld [vmem:[%s7971_s25 + $0x3e8] sm:$0xff] }
  0x7b   : > { %3436 = vmatpush.bf16.msrb.mxu0 %v6958_v59  ;;  %v7023_v59 = vld [vmem:[%s7971_s25 + $0x320] sm:$0xff] }
  0x7c   : > { %3449 = vmatpush.bf16.msrb.mxu1 %v6966_v60  ;;  %v7031_v60 = vld [vmem:[%s7971_s25 + $0x360] sm:$0xff] }
  0x7d   : > { %3462 = vmatpush.bf16.msrb.mxu2 %v6974_v61  ;;  %v7039_v61 = vld [vmem:[%s7971_s25 + $0x3a0] sm:$0xff] }
  0x7e   : > { %3475 = vmatpush.bf16.msrb.mxu3 %v6982_v62  ;;  %v7047_v62 = vld [vmem:[%s7971_s25 + $0x3e0] sm:$0xff] }
  0x7f   : > { %3437 = vmatpush.bf16.msrb.mxu0 %v6957_v63  ;;  %v7022_v63 = vld [vmem:[%s7971_s25 + $0x318] sm:$0xff] }
  0x80   : > { %3450 = vmatpush.bf16.msrb.mxu1 %v6965_v0  ;;  %v7030_v0 = vld [vmem:[%s7971_s25 + $0x358] sm:$0xff] }
  0x81   : > { %3463 = vmatpush.bf16.msrb.mxu2 %v6973_v1  ;;  %v7038_v1 = vld [vmem:[%s7971_s25 + $0x398] sm:$0xff] }
  0x82   : > { %3476 = vmatpush.bf16.msrb.mxu3 %v6981_v2  ;;  %v7046_v2 = vld [vmem:[%s7971_s25 + $0x3d8] sm:$0xff] }
  0x83   : > { %3438 = vmatpush.bf16.msrb.mxu0 %v6956_v3  ;;  %v7021_v3 = vld [vmem:[%s7971_s25 + $0x310] sm:$0xff] }
  0x84   : > { %3451 = vmatpush.bf16.msrb.mxu1 %v6964_v4  ;;  %v7029_v4 = vld [vmem:[%s7971_s25 + $0x350] sm:$0xff] }
  0x85   : > { %3464 = vmatpush.bf16.msrb.mxu2 %v6972_v5  ;;  %v7037_v5 = vld [vmem:[%s7971_s25 + $0x390] sm:$0xff] }
  0x86   : > { %3477 = vmatpush.bf16.msrb.mxu3 %v6980_v6  ;;  %v7045_v6 = vld [vmem:[%s7971_s25 + $0x3d0] sm:$0xff] }
  0x87   : > { %3439 = vmatpush.bf16.msrb.mxu0 %v6955_v7  ;;  %v7020_v7 = vld [vmem:[%s7971_s25 + $0x308] sm:$0xff] }
  0x88   : > { %3452 = vmatpush.bf16.msrb.mxu1 %v6963_v8  ;;  %v7028_v8 = vld [vmem:[%s7971_s25 + $0x348] sm:$0xff] }
  0x89   : > { %3465 = vmatpush.bf16.msrb.mxu2 %v6971_v9  ;;  %v7036_v9 = vld [vmem:[%s7971_s25 + $0x388] sm:$0xff] }
  0x8a   : > { %3478 = vmatpush.bf16.msrb.mxu3 %v6979_v10  ;;  %3440 = vmatmul.bf16.vlgmr.msrb.gmra.mxu0 %v1174_v51  ;;  %v7025_v51 = vld [vmem:[%s7971_s25 + $0x330] sm:$0xff]  ;;  %v7044_v10 = vld [vmem:[%s7971_s25 + $0x3c8] sm:$0xff] }
  0x8b   : > { %3484 = vmatpush.bf16.msra.mxu0 %v6994_v11  ;;  %3453 = vmatmul.bf16.vlgmr.msrb.gmra.mxu1 %v1175_v54  ;;  %v7049_v54 = vld [vmem:[%s7971_s25 + $0x3f0] sm:$0xff]  ;;  %v1184_v11 = vld [vmem:[#allocation1 + $0x24] sm:$0xff] }
  0x8c   : > { %3497 = vmatpush.bf16.msra.mxu1 %v7002_v12  ;;  %3466 = vmatmul.bf16.vlgmr.msrb.gmra.mxu2 %v1176_v50  ;;  %v1183_v50 = vld [vmem:[#allocation1 + $0x1b] sm:$0xff] }
  0x8d   : > { %3510 = vmatpush.bf16.msra.mxu2 %v7010_v13  ;;  %3479 = vmatmul.bf16.vlgmr.msrb.gmra.mxu3 %v1177_v52  ;;  %v7033_v52 = vld [vmem:[%s7971_s25 + $0x370] sm:$0xff]  ;;  %v1185_v13 = vld [vmem:[#allocation1 + $0x2d] sm:$0xff] }
  0x8e   : > { %3523 = vmatpush.bf16.msra.mxu3 %v7018_v14  ;;  %v1186_v12 = vld [vmem:[#allocation1 + $0x36] sm:$0xff]  ;;  %v1187_v14 = vld [vmem:[#allocation1 + $0x3f] sm:$0xff] }
  0x8f   : > { %3485 = vmatpush.bf16.msra.mxu0 %v6993_v15  ;;  %v460_v15 = vld [vmem:[%s7993_s14 + $0x10] sm:$0xff] }
  0x90   : > { %3498 = vmatpush.bf16.msra.mxu1 %v7001_v16  ;;  %1189 = vst [vmem:[#allocation1] ss:$9 sm:$0xff] %v460_v15  ;;  %v7019_v16 = vld [vmem:[%s7971_s25 + $0x300] sm:$0xff] }
  0x91   : > { %3511 = vmatpush.bf16.msra.mxu2 %v7009_v17  ;;  %v7027_v17 = vld [vmem:[%s7971_s25 + $0x340] sm:$0xff] }
  0x92   : > { %3524 = vmatpush.bf16.msra.mxu3 %v7017_v18  ;;  %v7035_v18 = vld [vmem:[%s7971_s25 + $0x380] sm:$0xff] }
  0x93   : > { %3486 = vmatpush.bf16.msra.mxu0 %v6992_v19  ;;  %v7043_v19 = vld [vmem:[%s7971_s25 + $0x3c0] sm:$0xff] }
  0x94   : > { %3499 = vmatpush.bf16.msra.mxu1 %v7000_v20  ;;  %v7058_v20 = vld [vmem:[%s7971_s25 + $0x438] sm:$0xff] }
  0x95   : > { %3512 = vmatpush.bf16.msra.mxu2 %v7008_v21  ;;  %v7066_v21 = vld [vmem:[%s7971_s25 + $0x478] sm:$0xff] }
  0x96   : > { %3525 = vmatpush.bf16.msra.mxu3 %v7016_v22  ;;  %v7074_v22 = vld [vmem:[%s7971_s25 + $0x4b8] sm:$0xff] }
  0x97   : > { %3487 = vmatpush.bf16.msra.mxu0 %v6991_v23  ;;  %v7082_v23 = vld [vmem:[%s7971_s25 + $0x4f8] sm:$0xff] }
  0x98   : > { %3500 = vmatpush.bf16.msra.mxu1 %v6999_v24  ;;  %v7057_v24 = vld [vmem:[%s7971_s25 + $0x430] sm:$0xff] }
  0x99   : > { %3513 = vmatpush.bf16.msra.mxu2 %v7007_v25  ;;  %v7065_v25 = vld [vmem:[%s7971_s25 + $0x470] sm:$0xff] }
  0x9a   : > { %3526 = vmatpush.bf16.msra.mxu3 %v7015_v26  ;;  %v7073_v26 = vld [vmem:[%s7971_s25 + $0x4b0] sm:$0xff] }
  0x9b   : > { %3488 = vmatpush.bf16.msra.mxu0 %v6990_v27  ;;  %v7081_v27 = vld [vmem:[%s7971_s25 + $0x4f0] sm:$0xff] }
  0x9c   : > { %3501 = vmatpush.bf16.msra.mxu1 %v6998_v28  ;;  %v7056_v28 = vld [vmem:[%s7971_s25 + $0x428] sm:$0xff] }
  0x9d   : > { %3514 = vmatpush.bf16.msra.mxu2 %v7006_v29  ;;  %v7064_v29 = vld [vmem:[%s7971_s25 + $0x468] sm:$0xff] }
  0x9e   : > { %3527 = vmatpush.bf16.msra.mxu3 %v7014_v30  ;;  %v7072_v30 = vld [vmem:[%s7971_s25 + $0x4a8] sm:$0xff] }
  0x9f   : > { %3489 = vmatpush.bf16.msra.mxu0 %v6989_v31  ;;  %v7080_v31 = vld [vmem:[%s7971_s25 + $0x4e8] sm:$0xff] }
  0xa0   : > { %3502 = vmatpush.bf16.msra.mxu1 %v6997_v32  ;;  %v7055_v32 = vld [vmem:[%s7971_s25 + $0x420] sm:$0xff] }
  0xa1   : > { %3515 = vmatpush.bf16.msra.mxu2 %v7005_v33  ;;  %v7063_v33 = vld [vmem:[%s7971_s25 + $0x460] sm:$0xff] }
  0xa2   : > { %3528 = vmatpush.bf16.msra.mxu3 %v7013_v34  ;;  %v7071_v34 = vld [vmem:[%s7971_s25 + $0x4a0] sm:$0xff] }
  0xa3   : > { %3490 = vmatpush.bf16.msra.mxu0 %v6988_v35  ;;  %v7079_v35 = vld [vmem:[%s7971_s25 + $0x4e0] sm:$0xff] }
  0xa4   : > { %3503 = vmatpush.bf16.msra.mxu1 %v6996_v36  ;;  %v7054_v36 = vld [vmem:[%s7971_s25 + $0x418] sm:$0xff] }
  0xa5   : > { %3516 = vmatpush.bf16.msra.mxu2 %v7004_v37  ;;  %v7062_v37 = vld [vmem:[%s7971_s25 + $0x458] sm:$0xff] }
  0xa6   : > { %3529 = vmatpush.bf16.msra.mxu3 %v7012_v38  ;;  %v7070_v38 = vld [vmem:[%s7971_s25 + $0x498] sm:$0xff] }
  0xa7   : > { %3491 = vmatpush.bf16.msra.mxu0 %v6987_v39  ;;  %v7078_v39 = vld [vmem:[%s7971_s25 + $0x4d8] sm:$0xff] }
  0xa8   : > { %3504 = vmatpush.bf16.msra.mxu1 %v6995_v40  ;;  %v7053_v40 = vld [vmem:[%s7971_s25 + $0x410] sm:$0xff] }
  0xa9   : > { %3517 = vmatpush.bf16.msra.mxu2 %v7003_v41  ;;  %v7061_v41 = vld [vmem:[%s7971_s25 + $0x450] sm:$0xff] }
  0xaa   : > { %3530 = vmatpush.bf16.msra.mxu3 %v7011_v42  ;;  %3492 = vmatmul.bf16.vlgmr.msra.gmra.mxu0 %v1180_v47  ;;  %v7069_v42 = vld [vmem:[%s7971_s25 + $0x490] sm:$0xff]  ;;  %v7076_v47 = vld [vmem:[%s7971_s25 + $0x4c8] sm:$0xff] }
  0xab   : > { %3536 = vmatpush.bf16.msrb.mxu0 %v7026_v43  ;;  %3505 = vmatmul.bf16.vlgmr.msra.gmra.mxu1 %v1181_v49  ;;  %v7077_v43 = vld [vmem:[%s7971_s25 + $0x4d0] sm:$0xff]  ;;  %v7059_v49 = vld [vmem:[%s7971_s25 + $0x440] sm:$0xff] }
  0xac   : > { %3549 = vmatpush.bf16.msrb.mxu1 %v7034_v44  ;;  %3518 = vmatmul.bf16.vlgmr.msra.gmra.mxu2 %v1182_v48  ;;  %v7052_v44 = vld [vmem:[%s7971_s25 + $0x408] sm:$0xff]  ;;  %v7051_v48 = vld [vmem:[%s7971_s25 + $0x400] sm:$0xff] }
  0xad   : > { %3562 = vmatpush.bf16.msrb.mxu2 %v7042_v45  ;;  %3531 = vmatmul.bf16.vlgmr.msra.gmra.mxu3 %v1183_v50  ;;  %v7060_v45 = vld [vmem:[%s7971_s25 + $0x448] sm:$0xff]  ;;  %v7067_v50 = vld [vmem:[%s7971_s25 + $0x480] sm:$0xff] }
  0xae   : > { %3575 = vmatpush.bf16.msrb.mxu3 %v7050_v46  ;;  %v7068_v46 = vld [vmem:[%s7971_s25 + $0x488] sm:$0xff] }
  0xaf   : > { %3537 = vmatpush.bf16.msrb.mxu0 %v7025_v51  ;;  %v7075_v51 = vld [vmem:[%s7971_s25 + $0x4c0] sm:$0xff] }
  0xb0   : > { %3550 = vmatpush.bf16.msrb.mxu1 %v7033_v52  ;;  %v7090_v52 = vld [vmem:[%s7971_s25 + $0x538] sm:$0xff] }
  0xb1   : > { %3563 = vmatpush.bf16.msrb.mxu2 %v7041_v53  ;;  %v7098_v53 = vld [vmem:[%s7971_s25 + $0x578] sm:$0xff] }
  0xb2   : > { %3576 = vmatpush.bf16.msrb.mxu3 %v7049_v54  ;;  %v7106_v54 = vld [vmem:[%s7971_s25 + $0x5b8] sm:$0xff] }
  0xb3   : > { %3538 = vmatpush.bf16.msrb.mxu0 %v7024_v55  ;;  %v7114_v55 = vld [vmem:[%s7971_s25 + $0x5f8] sm:$0xff] }
  0xb4   : > { %3551 = vmatpush.bf16.msrb.mxu1 %v7032_v56  ;;  %v1190_v56 = vld [vmem:[#allocation1] sm:$0xff] }
  0xb5   : > { %3564 = vmatpush.bf16.msrb.mxu2 %v7040_v57  ;;  %v1192_v57 = vld [vmem:[#allocation1 + $0x12] sm:$0xff] }
  0xb6   : > { %3577 = vmatpush.bf16.msrb.mxu3 %v7048_v58  ;;  %v1191_v58 = vld [vmem:[#allocation1 + $0x9] sm:$0xff] }
  0xb7   : > { %3539 = vmatpush.bf16.msrb.mxu0 %v7023_v59  ;;  %v1193_v59 = vld [vmem:[#allocation1 + $0x1b] sm:$0xff] }
  0xb8   : > { %3552 = vmatpush.bf16.msrb.mxu1 %v7031_v60  ;;  %v7089_v60 = vld [vmem:[%s7971_s25 + $0x530] sm:$0xff] }
  0xb9   : > { %3565 = vmatpush.bf16.msrb.mxu2 %v7039_v61  ;;  %v7097_v61 = vld [vmem:[%s7971_s25 + $0x570] sm:$0xff] }
  0xba   : > { %3578 = vmatpush.bf16.msrb.mxu3 %v7047_v62  ;;  %v7105_v62 = vld [vmem:[%s7971_s25 + $0x5b0] sm:$0xff] }
  0xbb   : > { %3540 = vmatpush.bf16.msrb.mxu0 %v7022_v63  ;;  %v7113_v63 = vld [vmem:[%s7971_s25 + $0x5f0] sm:$0xff] }
  0xbc   : > { %3553 = vmatpush.bf16.msrb.mxu1 %v7030_v0  ;;  %v7088_v0 = vld [vmem:[%s7971_s25 + $0x528] sm:$0xff] }
  0xbd   : > { %3566 = vmatpush.bf16.msrb.mxu2 %v7038_v1  ;;  %v7096_v1 = vld [vmem:[%s7971_s25 + $0x568] sm:$0xff] }
  0xbe   : > { %3579 = vmatpush.bf16.msrb.mxu3 %v7046_v2  ;;  %v7104_v2 = vld [vmem:[%s7971_s25 + $0x5a8] sm:$0xff] }
  0xbf   : > { %3541 = vmatpush.bf16.msrb.mxu0 %v7021_v3  ;;  %v7112_v3 = vld [vmem:[%s7971_s25 + $0x5e8] sm:$0xff] }
  0xc0   : > { %3554 = vmatpush.bf16.msrb.mxu1 %v7029_v4 }
  0xc1   : > { %3567 = vmatpush.bf16.msrb.mxu2 %v7037_v5  ;;  %v7087_v5 = vld [vmem:[%s7971_s25 + $0x520] sm:$0xff] }
  0xc2   : > { %3580 = vmatpush.bf16.msrb.mxu3 %v7045_v6  ;;  %v7095_v6 = vld [vmem:[%s7971_s25 + $0x560] sm:$0xff] }
  0xc3   : > { %3542 = vmatpush.bf16.msrb.mxu0 %v7020_v7 }
  0xc4   : > { %3555 = vmatpush.bf16.msrb.mxu1 %v7028_v8  ;;  %v7103_v8 = vld [vmem:[%s7971_s25 + $0x5a0] sm:$0xff] }
  0xc5   : > { %3568 = vmatpush.bf16.msrb.mxu2 %v7036_v9  ;;  %v7111_v9 = vld [vmem:[%s7971_s25 + $0x5e0] sm:$0xff] }
  0xc6   : > { %3581 = vmatpush.bf16.msrb.mxu3 %v7044_v10 }
  0xc7   : > { %3543 = vmatpush.bf16.msrb.mxu0 %v7019_v16 }
  0xc8   : > { %3556 = vmatpush.bf16.msrb.mxu1 %v7027_v17 }
  0xc9   : > { %3569 = vmatpush.bf16.msrb.mxu2 %v7035_v18 }
  0xca   : > { %3582 = vmatpush.bf16.msrb.mxu3 %v7043_v19  ;;  %3544 = vmatmul.bf16.vlgmr.msrb.gmra.mxu0 %v1184_v11  ;;  %v7086_v11 = vld [vmem:[%s7971_s25 + $0x518] sm:$0xff]  ;;  %v7085_v19 = vld [vmem:[%s7971_s25 + $0x510] sm:$0xff] }
  0xcb   : > { %3588 = vmatpush.bf16.msra.mxu0 %v7058_v20  ;;  %3557 = vmatmul.bf16.vlgmr.msrb.gmra.mxu1 %v1185_v13  ;;  %v7102_v13 = vld [vmem:[%s7971_s25 + $0x598] sm:$0xff]  ;;  %v7093_v20 = vld [vmem:[%s7971_s25 + $0x550] sm:$0xff] }
  0xcc   : > { %3601 = vmatpush.bf16.msra.mxu1 %v7066_v21  ;;  %3570 = vmatmul.bf16.vlgmr.msrb.gmra.mxu2 %v1186_v12  ;;  %v7094_v12 = vld [vmem:[%s7971_s25 + $0x558] sm:$0xff] }
  0xcd   : > { %3614 = vmatpush.bf16.msra.mxu2 %v7074_v22  ;;  %3583 = vmatmul.bf16.vlgmr.msrb.gmra.mxu3 %v1187_v14  ;;  %v7110_v14 = vld [vmem:[%s7971_s25 + $0x5d8] sm:$0xff] }
  0xce   : > { %3627 = vmatpush.bf16.msra.mxu3 %v7082_v23  ;;  %v7101_v23 = vld [vmem:[%s7971_s25 + $0x590] sm:$0xff] }
  0xcf   : > { %3589 = vmatpush.bf16.msra.mxu0 %v7057_v24  ;;  %v7109_v24 = vld [vmem:[%s7971_s25 + $0x5d0] sm:$0xff] }
  0xd0   : > { %3602 = vmatpush.bf16.msra.mxu1 %v7065_v25  ;;  %v7084_v25 = vld [vmem:[%s7971_s25 + $0x508] sm:$0xff] }
  0xd1   : > { %3615 = vmatpush.bf16.msra.mxu2 %v7073_v26  ;;  %v7092_v26 = vld [vmem:[%s7971_s25 + $0x548] sm:$0xff] }
  0xd2   : > { %3628 = vmatpush.bf16.msra.mxu3 %v7081_v27  ;;  %v7100_v27 = vld [vmem:[%s7971_s25 + $0x588] sm:$0xff] }
  0xd3   : > { %3590 = vmatpush.bf16.msra.mxu0 %v7056_v28  ;;  %v7108_v28 = vld [vmem:[%s7971_s25 + $0x5c8] sm:$0xff] }
  0xd4   : > { %3603 = vmatpush.bf16.msra.mxu1 %v7064_v29  ;;  %v1194_v29 = vld [vmem:[#allocation1 + $0x24] sm:$0xff] }
  0xd5   : > { %3616 = vmatpush.bf16.msra.mxu2 %v7072_v30  ;;  %v1196_v30 = vld [vmem:[#allocation1 + $0x36] sm:$0xff] }
  0xd6   : > { %3629 = vmatpush.bf16.msra.mxu3 %v7080_v31 }
  0xd7   : > { %3591 = vmatpush.bf16.msra.mxu0 %v7055_v32  ;;  %v1195_v32 = vld [vmem:[#allocation1 + $0x2d] sm:$0xff] }
  0xd8   : > { %3604 = vmatpush.bf16.msra.mxu1 %v7063_v33  ;;  %v1197_v33 = vld [vmem:[#allocation1 + $0x3f] sm:$0xff] }
  0xd9   : > { %3617 = vmatpush.bf16.msra.mxu2 %v7071_v34 }
  0xda   : > { %3630 = vmatpush.bf16.msra.mxu3 %v7079_v35  ;;  %v461_v35 = vld [vmem:[%s7993_s14 + $0x18] sm:$0xff] }
  0xdb   : > { %3592 = vmatpush.bf16.msra.mxu0 %v7054_v36  ;;  %1199 = vst [vmem:[#allocation1] ss:$9 sm:$0xff] %v461_v35  ;;  %v7083_v36 = vld [vmem:[%s7971_s25 + $0x500] sm:$0xff]  ;;  %v7176_v35 = vld [vmem:[%s7971_s25 + $0x7e8] sm:$0xff] }
  0xdc   : > { %3605 = vmatpush.bf16.msra.mxu1 %v7062_v37  ;;  %v7091_v37 = vld [vmem:[%s7971_s25 + $0x540] sm:$0xff] }
  0xdd   : > { %3618 = vmatpush.bf16.msra.mxu2 %v7070_v38  ;;  %v7099_v38 = vld [vmem:[%s7971_s25 + $0x580] sm:$0xff] }
  0xde   : > { %3631 = vmatpush.bf16.msra.mxu3 %v7078_v39  ;;  %v7107_v39 = vld [vmem:[%s7971_s25 + $0x5c0] sm:$0xff] }
  0xdf   : > { %3593 = vmatpush.bf16.msra.mxu0 %v7053_v40  ;;  %v7122_v40 = vld [vmem:[%s7971_s25 + $0x638] sm:$0xff] }
  0xe0   : > { %3606 = vmatpush.bf16.msra.mxu1 %v7061_v41  ;;  %v7130_v41 = vld [vmem:[%s7971_s25 + $0x678] sm:$0xff] }
  0xe1   : > { %3619 = vmatpush.bf16.msra.mxu2 %v7069_v42  ;;  %v7138_v42 = vld [vmem:[%s7971_s25 + $0x6b8] sm:$0xff] }
  0xe2   : > { %3632 = vmatpush.bf16.msra.mxu3 %v7077_v43  ;;  %v7146_v43 = vld [vmem:[%s7971_s25 + $0x6f8] sm:$0xff] }
  0xe3   : > { %3594 = vmatpush.bf16.msra.mxu0 %v7052_v44  ;;  %v7121_v44 = vld [vmem:[%s7971_s25 + $0x630] sm:$0xff] }
  0xe4   : > { %3607 = vmatpush.bf16.msra.mxu1 %v7060_v45  ;;  %v7129_v45 = vld [vmem:[%s7971_s25 + $0x670] sm:$0xff] }
  0xe5   : > { %3620 = vmatpush.bf16.msra.mxu2 %v7068_v46  ;;  %v7137_v46 = vld [vmem:[%s7971_s25 + $0x6b0] sm:$0xff] }
  0xe6   : > { %3633 = vmatpush.bf16.msra.mxu3 %v7076_v47  ;;  %v7145_v47 = vld [vmem:[%s7971_s25 + $0x6f0] sm:$0xff] }
  0xe7   : > { %3595 = vmatpush.bf16.msra.mxu0 %v7051_v48  ;;  %v3389_v4 = vpop.f32.mrf.mxu0  ;;  %v7120_v48 = vld [vmem:[%s7971_s25 + $0x628] sm:$0xff] }
  0xe8   : > { %3608 = vmatpush.bf16.msra.mxu1 %v7059_v49  ;;  %v3402_v7 = vpop.f32.mrf.mxu1  ;;  %v7128_v49 = vld [vmem:[%s7971_s25 + $0x668] sm:$0xff] }
  0xe9   : > { %3621 = vmatpush.bf16.msra.mxu2 %v7067_v50  ;;  %v3403_v10 = vadd.f32 %v3402_v7, %v3389_v4  ;;  %v7136_v50 = vld [vmem:[%s7971_s25 + $0x6a8] sm:$0xff]  ;;  %v7117_v4 = vld [vmem:[%s7971_s25 + $0x610] sm:$0xff] }
  0xea   : > { %3634 = vmatpush.bf16.msra.mxu3 %v7075_v51  ;;  %3596 = vmatmul.bf16.vlgmr.msra.gmra.mxu0 %v1190_v56  ;;  %v7144_v51 = vld [vmem:[%s7971_s25 + $0x6e8] sm:$0xff] }
  0xeb   : > { %3640 = vmatpush.bf16.msrb.mxu0 %v7090_v52  ;;  %3609 = vmatmul.bf16.vlgmr.msra.gmra.mxu1 %v1191_v58  ;;  %v7143_v58 = vld [vmem:[%s7971_s25 + $0x6e0] sm:$0xff] }
  0xec   : > { %3653 = vmatpush.bf16.msrb.mxu1 %v7098_v53  ;;  %3622 = vmatmul.bf16.vlgmr.msra.gmra.mxu2 %v1192_v57  ;;  %v7119_v53 = vld [vmem:[%s7971_s25 + $0x620] sm:$0xff] }
  0xed   : > { %3666 = vmatpush.bf16.msrb.mxu2 %v7106_v54  ;;  %3635 = vmatmul.bf16.vlgmr.msra.gmra.mxu3 %v1193_v59  ;;  %v7127_v54 = vld [vmem:[%s7971_s25 + $0x660] sm:$0xff] }
  0xee   : > { %3679 = vmatpush.bf16.msrb.mxu3 %v7114_v55  ;;  %v7135_v57 = vld [vmem:[%s7971_s25 + $0x6a0] sm:$0xff] }
  0xef   : > { %3641 = vmatpush.bf16.msrb.mxu0 %v7089_v60  ;;  %v3415_v15 = vpop.f32.mrf.mxu2  ;;  %v3391_v18 = vpop.f32.mrf.mxu0  ;;  %v7118_v60 = vld [vmem:[%s7971_s25 + $0x618] sm:$0xff] }
  0xf0   : > { %3654 = vmatpush.bf16.msrb.mxu1 %v7097_v61  ;;  %v3416_v16 = vadd.f32 %v3415_v15, %v3403_v10  ;;  %v3428_v17 = vpop.f32.mrf.mxu3  ;;  %v3404_v22 = vpop.f32.mrf.mxu1  ;;  %v7126_v61 = vld [vmem:[%s7971_s25 + $0x658] sm:$0xff]  ;;  %v7116_v10 = vld [vmem:[%s7971_s25 + $0x608] sm:$0xff]  ;;  %v7131_v18 = vld [vmem:[%s7971_s25 + $0x680] sm:$0xff] }
  0xf1   : > { %3667 = vmatpush.bf16.msrb.mxu2 %v7105_v62  ;;  %v7134_v62 = vld [vmem:[%s7971_s25 + $0x698] sm:$0xff] }
  0xf2   : > { %3680 = vmatpush.bf16.msrb.mxu3 %v7113_v63  ;;  %v8182_v21 = vadd.f32 %v3428_v17, %v3416_v16  ;;  %v7142_v63 = vld [vmem:[%s7971_s25 + $0x6d8] sm:$0xff]  ;;  %v7115_v16 = vld [vmem:[%s7971_s25 + $0x600] sm:$0xff] }
  0xf3   : > { %3642 = vmatpush.bf16.msrb.mxu0 %v7088_v0  ;;  %v7123_v17 = vld [vmem:[%s7971_s25 + $0x640] sm:$0xff]  ;;  %v7170_v22 = vld [vmem:[%s7971_s25 + $0x7b8] sm:$0xff] }
  0xf4   : > { %3655 = vmatpush.bf16.msrb.mxu1 %v7096_v1 }
  0xf5   : > { %3668 = vmatpush.bf16.msrb.mxu2 %v7104_v2 }
  0xf6   : > { %3681 = vmatpush.bf16.msrb.mxu3 %v7112_v3 }
  0xf7   : > { %3643 = vmatpush.bf16.msrb.mxu0 %v7087_v5  ;;  %v3417_v31 = vpop.f32.mrf.mxu2  ;;  %v7125_v5 = vld [vmem:[%s7971_s25 + $0x650] sm:$0xff] }
  0xf8   : > { %3656 = vmatpush.bf16.msrb.mxu1 %v7095_v6  ;;  %v3430_v34 = vpop.f32.mrf.mxu3  ;;  %v7177_v31 = vld [vmem:[%s7971_s25 + $0x7f0] sm:$0xff] }
  0xf9   : > { %3669 = vmatpush.bf16.msrb.mxu2 %v7103_v8  ;;  %v7133_v8 = vld [vmem:[%s7971_s25 + $0x690] sm:$0xff]  ;;  %v7168_v34 = vld [vmem:[%s7971_s25 + $0x7a8] sm:$0xff] }
  0xfa   : > { %3682 = vmatpush.bf16.msrb.mxu3 %v7111_v9  ;;  %v7141_v9 = vld [vmem:[%s7971_s25 + $0x6d0] sm:$0xff] }
  0xfb   : > { %3644 = vmatpush.bf16.msrb.mxu0 %v7086_v11  ;;  %v7124_v11 = vld [vmem:[%s7971_s25 + $0x648] sm:$0xff] }
  0xfc   : > { %3657 = vmatpush.bf16.msrb.mxu1 %v7094_v12  ;;  %v7132_v12 = vld [vmem:[%s7971_s25 + $0x688] sm:$0xff] }
  0xfd   : > { %3670 = vmatpush.bf16.msrb.mxu2 %v7102_v13  ;;  %v7140_v13 = vld [vmem:[%s7971_s25 + $0x6c8] sm:$0xff] }
  0xfe   : > { %3683 = vmatpush.bf16.msrb.mxu3 %v7110_v14 }
  0xff   : > { %3645 = vmatpush.bf16.msrb.mxu0 %v7085_v19  ;;  %v7139_v19 = vld [vmem:[%s7971_s25 + $0x6c0] sm:$0xff] }
 0x100   : > { %3658 = vmatpush.bf16.msrb.mxu1 %v7093_v20  ;;  %v7154_v20 = vld [vmem:[%s7971_s25 + $0x738] sm:$0xff] }
 0x101   : > { %3671 = vmatpush.bf16.msrb.mxu2 %v7101_v23  ;;  %v7178_v23 = vld [vmem:[%s7971_s25 + $0x7f8] sm:$0xff] }
 0x102   : > { %3684 = vmatpush.bf16.msrb.mxu3 %v7109_v24  ;;  %v1200_v24 = vld [vmem:[#allocation1] sm:$0xff] }
 0x103   : > { %3646 = vmatpush.bf16.msrb.mxu0 %v7084_v25  ;;  %v1202_v25 = vld [vmem:[#allocation1 + $0x12] sm:$0xff] }
 0x104   : > { %3659 = vmatpush.bf16.msrb.mxu1 %v7092_v26  ;;  %v1201_v26 = vld [vmem:[#allocation1 + $0x9] sm:$0xff] }
 0x105   : > { %3672 = vmatpush.bf16.msrb.mxu2 %v7100_v27  ;;  %v1203_v27 = vld [vmem:[#allocation1 + $0x1b] sm:$0xff] }
 0x106   : > { %3685 = vmatpush.bf16.msrb.mxu3 %v7108_v28  ;;  %v7153_v28 = vld [vmem:[%s7971_s25 + $0x730] sm:$0xff] }
 0x107   : > { %3647 = vmatpush.bf16.msrb.mxu0 %v7083_v36  ;;  %v3441_v52 = vpop.f32.mrf.mxu0 }
 0x108   : > { %3660 = vmatpush.bf16.msrb.mxu1 %v7091_v37  ;;  %v3442_v55 = vadd.f32 %v3441_v52, %v8182_v21  ;;  %v3454_v56 = vpop.f32.mrf.mxu1  ;;  %v7162_v21 = vld [vmem:[%s7971_s25 + $0x778] sm:$0xff] }
 0x109   : > { %3673 = vmatpush.bf16.msrb.mxu2 %v7099_v38  ;;  %v7151_v38 = vld [vmem:[%s7971_s25 + $0x720] sm:$0xff] }
 0x10a   : > { %3686 = vmatpush.bf16.msrb.mxu3 %v7107_v39  ;;  %3648 = vmatmul.bf16.vlgmr.msrb.gmra.mxu0 %v1194_v29  ;;  %v3455_v59 = vadd.f32 %v3454_v56, %v3442_v55  ;;  %v7161_v29 = vld [vmem:[%s7971_s25 + $0x770] sm:$0xff]  ;;  %v7159_v39 = vld [vmem:[%s7971_s25 + $0x760] sm:$0xff] }
 0x10b   : > { %3692 = vmatpush.bf16.msra.mxu0 %v7122_v40  ;;  %3661 = vmatmul.bf16.vlgmr.msrb.gmra.mxu1 %v1195_v32  ;;  %v7152_v32 = vld [vmem:[%s7971_s25 + $0x728] sm:$0xff]  ;;  %v7165_v56 = vld [vmem:[%s7971_s25 + $0x790] sm:$0xff] }
 0x10c   : > { %3705 = vmatpush.bf16.msra.mxu1 %v7130_v41  ;;  %3674 = vmatmul.bf16.vlgmr.msrb.gmra.mxu2 %v1196_v30  ;;  %v7169_v30 = vld [vmem:[%s7971_s25 + $0x7b0] sm:$0xff]  ;;  %v7167_v41 = vld [vmem:[%s7971_s25 + $0x7a0] sm:$0xff] }
 0x10d   : > { %3718 = vmatpush.bf16.msra.mxu2 %v7138_v42  ;;  %3687 = vmatmul.bf16.vlgmr.msrb.gmra.mxu3 %v1197_v33  ;;  %v7160_v33 = vld [vmem:[%s7971_s25 + $0x768] sm:$0xff]  ;;  %v7175_v42 = vld [vmem:[%s7971_s25 + $0x7e0] sm:$0xff] }
 0x10e   : > { %3731 = vmatpush.bf16.msra.mxu3 %v7146_v43 }
 0x10f   : > { %3693 = vmatpush.bf16.msra.mxu0 %v7121_v44  ;;  %v3467_v0 = vpop.f32.mrf.mxu2  ;;  %v3443_v3 = vpop.f32.mrf.mxu0  ;;  %v7150_v44 = vld [vmem:[%s7971_s25 + $0x718] sm:$0xff] }
 0x110   : > { %3706 = vmatpush.bf16.msra.mxu1 %v7129_v45  ;;  %v3468_v1 = vadd.f32 %v3467_v0, %v3455_v59  ;;  %v3480_v2 = vpop.f32.mrf.mxu3  ;;  %v3456_v7 = vpop.f32.mrf.mxu1  ;;  %v7158_v45 = vld [vmem:[%s7971_s25 + $0x758] sm:$0xff]  ;;  %v7156_v59 = vld [vmem:[%s7971_s25 + $0x748] sm:$0xff] }
 0x111   : > { %3719 = vmatpush.bf16.msra.mxu2 %v7137_v46  ;;  %v7166_v46 = vld [vmem:[%s7971_s25 + $0x798] sm:$0xff]  ;;  %v7163_v7 = vld [vmem:[%s7971_s25 + $0x780] sm:$0xff] }
 0x112   : > { %3732 = vmatpush.bf16.msra.mxu3 %v7145_v47  ;;  %v3481_v6 = vadd.f32 %v3480_v2, %v3468_v1  ;;  %v7174_v47 = vld [vmem:[%s7971_s25 + $0x7d8] sm:$0xff]  ;;  %v1205_v1 = vld [vmem:[#allocation1 + $0x2d] sm:$0xff] }
 0x113   : > { %3694 = vmatpush.bf16.msra.mxu0 %v7120_v48  ;;  %v1207_v2 = vld [vmem:[#allocation1 + $0x3f] sm:$0xff] }
 0x114   : > { %3707 = vmatpush.bf16.msra.mxu1 %v7128_v49 }
 0x115   : > { %3720 = vmatpush.bf16.msra.mxu2 %v7136_v50 }
 0x116   : > { %3733 = vmatpush.bf16.msra.mxu3 %v7144_v51 }
 0x117   : > { %3695 = vmatpush.bf16.msra.mxu0 %v7119_v53  ;;  %v3469_v14 = vpop.f32.mrf.mxu2  ;;  %v7149_v53 = vld [vmem:[%s7971_s25 + $0x710] sm:$0xff] }
 0x118   : > { %3708 = vmatpush.bf16.msra.mxu1 %v7127_v54  ;;  %v3482_v15 = vpop.f32.mrf.mxu3  ;;  %v7157_v54 = vld [vmem:[%s7971_s25 + $0x750] sm:$0xff] }
 0x119   : > { %3721 = vmatpush.bf16.msra.mxu2 %v7135_v57  ;;  %v7173_v57 = vld [vmem:[%s7971_s25 + $0x7d0] sm:$0xff] }
 0x11a   : > { %3734 = vmatpush.bf16.msra.mxu3 %v7143_v58  ;;  %v7148_v58 = vld [vmem:[%s7971_s25 + $0x708] sm:$0xff]  ;;  %v7193_v14 = vld [vmem:[%s7971_s25 + $0x870] sm:$0xff] }
 0x11b   : > { %3696 = vmatpush.bf16.msra.mxu0 %v7118_v60  ;;  %v7164_v60 = vld [vmem:[%s7971_s25 + $0x788] sm:$0xff]  ;;  %v7201_v15 = vld [vmem:[%s7971_s25 + $0x8b0] sm:$0xff] }
 0x11c   : > { %3709 = vmatpush.bf16.msra.mxu1 %v7126_v61  ;;  %v7172_v61 = vld [vmem:[%s7971_s25 + $0x7c8] sm:$0xff] }
 0x11d   : > { %3722 = vmatpush.bf16.msra.mxu2 %v7134_v62  ;;  %v1204_v62 = vld [vmem:[#allocation1 + $0x24] sm:$0xff] }
 0x11e   : > { %3735 = vmatpush.bf16.msra.mxu3 %v7142_v63  ;;  %v1206_v63 = vld [vmem:[#allocation1 + $0x36] sm:$0xff] }
 0x11f   : > { %3697 = vmatpush.bf16.msra.mxu0 %v7117_v4  ;;  %v462_v4 = vld [vmem:[%s7993_s14 + $0x20] sm:$0xff] }
 0x120   : > { %3710 = vmatpush.bf16.msra.mxu1 %v7125_v5  ;;  %1209 = vst [vmem:[#allocation1] ss:$9 sm:$0xff] %v462_v4  ;;  %v7147_v5 = vld [vmem:[%s7971_s25 + $0x700] sm:$0xff]  ;;  %v7240_v4 = vld [vmem:[%s7971_s25 + $0x9e8] sm:$0xff] }
 0x121   : > { %3723 = vmatpush.bf16.msra.mxu2 %v7133_v8  ;;  %v7171_v8 = vld [vmem:[%s7971_s25 + $0x7c0] sm:$0xff] }
 0x122   : > { %3736 = vmatpush.bf16.msra.mxu3 %v7141_v9  ;;  %v7186_v9 = vld [vmem:[%s7971_s25 + $0x838] sm:$0xff] }
 0x123   : > { %3698 = vmatpush.bf16.msra.mxu0 %v7116_v10  ;;  %v7194_v10 = vld [vmem:[%s7971_s25 + $0x878] sm:$0xff] }
 0x124   : > { %3711 = vmatpush.bf16.msra.mxu1 %v7124_v11  ;;  %v7202_v11 = vld [vmem:[%s7971_s25 + $0x8b8] sm:$0xff] }
 0x125   : > { %3724 = vmatpush.bf16.msra.mxu2 %v7132_v12  ;;  %v7210_v12 = vld [vmem:[%s7971_s25 + $0x8f8] sm:$0xff] }
 0x126   : > { %3737 = vmatpush.bf16.msra.mxu3 %v7140_v13  ;;  %v7185_v13 = vld [vmem:[%s7971_s25 + $0x830] sm:$0xff] }
 0x127   : > { %3699 = vmatpush.bf16.msra.mxu0 %v7115_v16  ;;  %v3493_v36 = vpop.f32.mrf.mxu0  ;;  %v7209_v16 = vld [vmem:[%s7971_s25 + $0x8f0] sm:$0xff] }
 0x128   : > { %3712 = vmatpush.bf16.msra.mxu1 %v7123_v17  ;;  %v3494_v37 = vadd.f32 %v3493_v36, %v3481_v6  ;;  %v3506_v40 = vpop.f32.mrf.mxu1  ;;  %v7155_v6 = vld [vmem:[%s7971_s25 + $0x740] sm:$0xff]  ;;  %v7184_v17 = vld [vmem:[%s7971_s25 + $0x828] sm:$0xff] }
 0x129   : > { %3725 = vmatpush.bf16.msra.mxu2 %v7131_v18  ;;  %v7192_v18 = vld [vmem:[%s7971_s25 + $0x868] sm:$0xff] }
 0x12a   : > { %3738 = vmatpush.bf16.msra.mxu3 %v7139_v19  ;;  %3700 = vmatmul.bf16.vlgmr.msra.gmra.mxu0 %v1200_v24  ;;  %v3507_v43 = vadd.f32 %v3506_v40, %v3494_v37  ;;  %v7200_v19 = vld [vmem:[%s7971_s25 + $0x8a8] sm:$0xff]  ;;  %v7191_v24 = vld [vmem:[%s7971_s25 + $0x860] sm:$0xff] }
 0x12b   : > { %3744 = vmatpush.bf16.msrb.mxu0 %v7154_v20  ;;  %3713 = vmatmul.bf16.vlgmr.msra.gmra.mxu1 %v1201_v26  ;;  %v7208_v20 = vld [vmem:[%s7971_s25 + $0x8e8] sm:$0xff]  ;;  %v7199_v26 = vld [vmem:[%s7971_s25 + $0x8a0] sm:$0xff] }
 0x12c   : > { %3757 = vmatpush.bf16.msrb.mxu1 %v7162_v21  ;;  %3726 = vmatmul.bf16.vlgmr.msra.gmra.mxu2 %v1202_v25 }
 0x12d   : > { %3770 = vmatpush.bf16.msrb.mxu2 %v7170_v22  ;;  %3739 = vmatmul.bf16.vlgmr.msra.gmra.mxu3 %v1203_v27  ;;  %v7207_v27 = vld [vmem:[%s7971_s25 + $0x8e0] sm:$0xff] }
 0x12e   : > { %3783 = vmatpush.bf16.msrb.mxu3 %v7178_v23  ;;  %v7183_v23 = vld [vmem:[%s7971_s25 + $0x820] sm:$0xff] }
 0x12f   : > { %3745 = vmatpush.bf16.msrb.mxu0 %v7153_v28  ;;  %v3519_v48 = vpop.f32.mrf.mxu2  ;;  %v3495_v51 = vpop.f32.mrf.mxu0 }
 0x130   : > { %3758 = vmatpush.bf16.msrb.mxu1 %v7161_v29  ;;  %v3520_v49 = vadd.f32 %v3519_v48, %v3507_v43  ;;  %v3532_v50 = vpop.f32.mrf.mxu3  ;;  %v3508_v55 = vpop.f32.mrf.mxu1  ;;  %v7182_v29 = vld [vmem:[%s7971_s25 + $0x818] sm:$0xff]  ;;  %v7180_v43 = vld [vmem:[%s7971_s25 + $0x808] sm:$0xff]  ;;  %v7195_v51 = vld [vmem:[%s7971_s25 + $0x880] sm:$0xff] }
 0x131   : > { %3771 = vmatpush.bf16.msrb.mxu2 %v7169_v30  ;;  %v7190_v30 = vld [vmem:[%s7971_s25 + $0x858] sm:$0xff] }
 0x132   : > { %3784 = vmatpush.bf16.msrb.mxu3 %v7177_v31  ;;  %v8248_v52 = vadd.f32 %v3532_v50, %v3520_v49  ;;  %v7198_v31 = vld [vmem:[%s7971_s25 + $0x898] sm:$0xff]  ;;  %v7179_v49 = vld [vmem:[%s7971_s25 + $0x800] sm:$0xff] }
 0x133   : > { %3746 = vmatpush.bf16.msrb.mxu0 %v7152_v32  ;;  %v7206_v32 = vld [vmem:[%s7971_s25 + $0x8d8] sm:$0xff]  ;;  %v7187_v50 = vld [vmem:[%s7971_s25 + $0x840] sm:$0xff] }
 0x134   : > { %3759 = vmatpush.bf16.msrb.mxu1 %v7160_v33  ;;  %v7234_v55 = vld [vmem:[%s7971_s25 + $0x9b8] sm:$0xff] }
 0x135   : > { %3772 = vmatpush.bf16.msrb.mxu2 %v7168_v34 }
 0x136   : > { %3785 = vmatpush.bf16.msrb.mxu3 %v7176_v35 }
 0x137   : > { %3747 = vmatpush.bf16.msrb.mxu0 %v7151_v38  ;;  %v3521_v0 = vpop.f32.mrf.mxu2  ;;  %v7181_v38 = vld [vmem:[%s7971_s25 + $0x810] sm:$0xff] }
 0x138   : > { %3760 = vmatpush.bf16.msrb.mxu1 %v7159_v39  ;;  %v3534_v3 = vpop.f32.mrf.mxu3  ;;  %v7189_v39 = vld [vmem:[%s7971_s25 + $0x850] sm:$0xff] }
 0x139   : > { %3773 = vmatpush.bf16.msrb.mxu2 %v7167_v41  ;;  %v7197_v41 = vld [vmem:[%s7971_s25 + $0x890] sm:$0xff]  ;;  %v7232_v3 = vld [vmem:[%s7971_s25 + $0x9a8] sm:$0xff] }
 0x13a   : > { %3786 = vmatpush.bf16.msrb.mxu3 %v7175_v42  ;;  %v7205_v42 = vld [vmem:[%s7971_s25 + $0x8d0] sm:$0xff] }
 0x13b   : > { %3748 = vmatpush.bf16.msrb.mxu0 %v7150_v44  ;;  %v7188_v44 = vld [vmem:[%s7971_s25 + $0x848] sm:$0xff]  ;;  %v7241_v0 = vld [vmem:[%s7971_s25 + $0x9f0] sm:$0xff] }
 0x13c   : > { %3761 = vmatpush.bf16.msrb.mxu1 %v7158_v45  ;;  %v7196_v45 = vld [vmem:[%s7971_s25 + $0x888] sm:$0xff] }
 0x13d   : > { %3774 = vmatpush.bf16.msrb.mxu2 %v7166_v46  ;;  %v7204_v46 = vld [vmem:[%s7971_s25 + $0x8c8] sm:$0xff] }
 0x13e   : > { %3787 = vmatpush.bf16.msrb.mxu3 %v7174_v47 }
 0x13f   : > { %3749 = vmatpush.bf16.msrb.mxu0 %v7149_v53  ;;  %v7218_v53 = vld [vmem:[%s7971_s25 + $0x938] sm:$0xff] }
 0x140   : > { %3762 = vmatpush.bf16.msrb.mxu1 %v7157_v54  ;;  %v7226_v54 = vld [vmem:[%s7971_s25 + $0x978] sm:$0xff] }
 0x141   : > { %3775 = vmatpush.bf16.msrb.mxu2 %v7165_v56  ;;  %v7242_v56 = vld [vmem:[%s7971_s25 + $0x9f8] sm:$0xff] }
 0x142   : > { %3788 = vmatpush.bf16.msrb.mxu3 %v7173_v57  ;;  %v1210_v57 = vld [vmem:[#allocation1] sm:$0xff] }
 0x143   : > { %3750 = vmatpush.bf16.msrb.mxu0 %v7148_v58  ;;  %v1212_v58 = vld [vmem:[#allocation1 + $0x12] sm:$0xff] }
 0x144   : > { %3763 = vmatpush.bf16.msrb.mxu1 %v7156_v59  ;;  %v1211_v59 = vld [vmem:[#allocation1 + $0x9] sm:$0xff] }
 0x145   : > { %3776 = vmatpush.bf16.msrb.mxu2 %v7164_v60  ;;  %v1213_v60 = vld [vmem:[#allocation1 + $0x1b] sm:$0xff] }
 0x146   : > { %3789 = vmatpush.bf16.msrb.mxu3 %v7172_v61  ;;  %v7217_v61 = vld [vmem:[%s7971_s25 + $0x930] sm:$0xff] }
 0x147   : > { %3751 = vmatpush.bf16.msrb.mxu0 %v7147_v5  ;;  %v3545_v21 = vpop.f32.mrf.mxu0 }
 0x148   : > { %3764 = vmatpush.bf16.msrb.mxu1 %v7155_v6  ;;  %v3546_v22 = vadd.f32 %v3545_v21, %v8248_v52  ;;  %v3558_v25 = vpop.f32.mrf.mxu1  ;;  %v7203_v52 = vld [vmem:[%s7971_s25 + $0x8c0] sm:$0xff] }
 0x149   : > { %3777 = vmatpush.bf16.msrb.mxu2 %v7163_v7  ;;  %v7215_v7 = vld [vmem:[%s7971_s25 + $0x920] sm:$0xff] }
 0x14a   : > { %3790 = vmatpush.bf16.msrb.mxu3 %v7171_v8  ;;  %3752 = vmatmul.bf16.vlgmr.msrb.gmra.mxu0 %v1204_v62  ;;  %v3559_v28 = vadd.f32 %v3558_v25, %v3546_v22  ;;  %v7225_v62 = vld [vmem:[%s7971_s25 + $0x970] sm:$0xff]  ;;  %v7223_v8 = vld [vmem:[%s7971_s25 + $0x960] sm:$0xff] }
 0x14b   : > { %3796 = vmatpush.bf16.msra.mxu0 %v7186_v9  ;;  %3765 = vmatmul.bf16.vlgmr.msrb.gmra.mxu1 %v1205_v1  ;;  %v7216_v1 = vld [vmem:[%s7971_s25 + $0x928] sm:$0xff]  ;;  %v7213_v22 = vld [vmem:[%s7971_s25 + $0x910] sm:$0xff] }
 0x14c   : > { %3809 = vmatpush.bf16.msra.mxu1 %v7194_v10  ;;  %3778 = vmatmul.bf16.vlgmr.msrb.gmra.mxu2 %v1206_v63  ;;  %v7233_v63 = vld [vmem:[%s7971_s25 + $0x9b0] sm:$0xff]  ;;  %v7231_v10 = vld [vmem:[%s7971_s25 + $0x9a0] sm:$0xff] }
 0x14d   : > { %3822 = vmatpush.bf16.msra.mxu2 %v7202_v11  ;;  %3791 = vmatmul.bf16.vlgmr.msrb.gmra.mxu3 %v1207_v2  ;;  %v7224_v2 = vld [vmem:[%s7971_s25 + $0x968] sm:$0xff]  ;;  %v7239_v11 = vld [vmem:[%s7971_s25 + $0x9e0] sm:$0xff]  ;;  %v7229_v25 = vld [vmem:[%s7971_s25 + $0x990] sm:$0xff] }
 0x14e   : > { %3835 = vmatpush.bf16.msra.mxu3 %v7210_v12 }
 0x14f   : > { %3797 = vmatpush.bf16.msra.mxu0 %v7185_v13  ;;  %v3571_v33 = vpop.f32.mrf.mxu2  ;;  %v3547_v36 = vpop.f32.mrf.mxu0  ;;  %v7214_v13 = vld [vmem:[%s7971_s25 + $0x918] sm:$0xff] }
 0x150   : > { %3810 = vmatpush.bf16.msra.mxu1 %v7193_v14  ;;  %v3572_v34 = vadd.f32 %v3571_v33, %v3559_v28  ;;  %v3584_v35 = vpop.f32.mrf.mxu3  ;;  %v3560_v40 = vpop.f32.mrf.mxu1  ;;  %v7222_v14 = vld [vmem:[%s7971_s25 + $0x958] sm:$0xff]  ;;  %v7220_v28 = vld [vmem:[%s7971_s25 + $0x948] sm:$0xff] }
 0x151   : > { %3823 = vmatpush.bf16.msra.mxu2 %v7201_v15  ;;  %v7230_v15 = vld [vmem:[%s7971_s25 + $0x998] sm:$0xff]  ;;  %v7227_v40 = vld [vmem:[%s7971_s25 + $0x980] sm:$0xff] }
 0x152   : > { %3836 = vmatpush.bf16.msra.mxu3 %v7209_v16  ;;  %v3585_v37 = vadd.f32 %v3584_v35, %v3572_v34  ;;  %v7238_v16 = vld [vmem:[%s7971_s25 + $0x9d8] sm:$0xff]  ;;  %v1215_v34 = vld [vmem:[#allocation1 + $0x2d] sm:$0xff] }
 0x153   : > { %3798 = vmatpush.bf16.msra.mxu0 %v7184_v17  ;;  %v1217_v35 = vld [vmem:[#allocation1 + $0x3f] sm:$0xff] }
 0x154   : > { %3811 = vmatpush.bf16.msra.mxu1 %v7192_v18 }
 0x155   : > { %3824 = vmatpush.bf16.msra.mxu2 %v7200_v19 }
 0x156   : > { %3837 = vmatpush.bf16.msra.mxu3 %v7208_v20 }
 0x157   : > { %3799 = vmatpush.bf16.msra.mxu0 %v7183_v23  ;;  %v3573_v47 = vpop.f32.mrf.mxu2  ;;  %v7221_v23 = vld [vmem:[%s7971_s25 + $0x950] sm:$0xff] }
 0x158   : > { %3812 = vmatpush.bf16.msra.mxu1 %v7191_v24  ;;  %v3586_v48 = vpop.f32.mrf.mxu3  ;;  %v7257_v47 = vld [vmem:[%s7971_s25 + $0xa70] sm:$0xff] }
 0x159   : > { %3825 = vmatpush.bf16.msra.mxu2 %v7199_v26  ;;  %v7237_v26 = vld [vmem:[%s7971_s25 + $0x9d0] sm:$0xff] }
 0x15a   : > { %3838 = vmatpush.bf16.msra.mxu3 %v7207_v27  ;;  %v7212_v27 = vld [vmem:[%s7971_s25 + $0x908] sm:$0xff]  ;;  %v7265_v48 = vld [vmem:[%s7971_s25 + $0xab0] sm:$0xff] }
 0x15b   : > { %3800 = vmatpush.bf16.msra.mxu0 %v7182_v29  ;;  %v7228_v29 = vld [vmem:[%s7971_s25 + $0x988] sm:$0xff] }
 0x15c   : > { %3813 = vmatpush.bf16.msra.mxu1 %v7190_v30  ;;  %v7236_v30 = vld [vmem:[%s7971_s25 + $0x9c8] sm:$0xff] }
 0x15d   : > { %3826 = vmatpush.bf16.msra.mxu2 %v7198_v31  ;;  %v1214_v31 = vld [vmem:[#allocation1 + $0x24] sm:$0xff] }
 0x15e   : > { %3839 = vmatpush.bf16.msra.mxu3 %v7206_v32  ;;  %v1216_v32 = vld [vmem:[#allocation1 + $0x36] sm:$0xff] }
 0x15f   : > { %3801 = vmatpush.bf16.msra.mxu0 %v7181_v38  ;;  %v7211_v38 = vld [vmem:[%s7971_s25 + $0x900] sm:$0xff] }
 0x160   : > { %3814 = vmatpush.bf16.msra.mxu1 %v7189_v39  ;;  %v7219_v39 = vld [vmem:[%s7971_s25 + $0x940] sm:$0xff] }
 0x161   : > { %3827 = vmatpush.bf16.msra.mxu2 %v7197_v41  ;;  %v7235_v41 = vld [vmem:[%s7971_s25 + $0x9c0] sm:$0xff] }
 0x162   : > { %3840 = vmatpush.bf16.msra.mxu3 %v7205_v42  ;;  %v7250_v42 = vld [vmem:[%s7971_s25 + $0xa38] sm:$0xff] }
 0x163   : > { %3802 = vmatpush.bf16.msra.mxu0 %v7180_v43  ;;  %v7258_v43 = vld [vmem:[%s7971_s25 + $0xa78] sm:$0xff] }
 0x164   : > { %3815 = vmatpush.bf16.msra.mxu1 %v7188_v44  ;;  %v7266_v44 = vld [vmem:[%s7971_s25 + $0xab8] sm:$0xff] }
 0x165   : > { %3828 = vmatpush.bf16.msra.mxu2 %v7196_v45  ;;  %v7274_v45 = vld [vmem:[%s7971_s25 + $0xaf8] sm:$0xff] }
 0x166   : > { %3841 = vmatpush.bf16.msra.mxu3 %v7204_v46  ;;  %v7249_v46 = vld [vmem:[%s7971_s25 + $0xa30] sm:$0xff] }
 0x167   : > { %3803 = vmatpush.bf16.msra.mxu0 %v7179_v49  ;;  %v3597_v5 = vpop.f32.mrf.mxu0  ;;  %v7273_v49 = vld [vmem:[%s7971_s25 + $0xaf0] sm:$0xff] }
 0x168   : > { %3816 = vmatpush.bf16.msra.mxu1 %v7187_v50  ;;  %v3598_v6 = vadd.f32 %v3597_v5, %v3585_v37  ;;  %v3610_v9 = vpop.f32.mrf.mxu1  ;;  %v463_v37 = vld [vmem:[%s7993_s14 + $0x28] sm:$0xf]  ;;  %v7248_v50 = vld [vmem:[%s7971_s25 + $0xa28] sm:$0xff] }
 0x169   : > { %3829 = vmatpush.bf16.msra.mxu2 %v7195_v51  ;;  %1219 = vst [vmem:[#allocation1] ss:$9 sm:$0xff] %v463_v37  ;;  %v7256_v51 = vld [vmem:[%s7971_s25 + $0xa68] sm:$0xff] }
 0x16a   : > { %3842 = vmatpush.bf16.msra.mxu3 %v7203_v52  ;;  %3804 = vmatmul.bf16.vlgmr.msra.gmra.mxu0 %v1210_v57  ;;  %v3611_v12 = vadd.f32 %v3610_v9, %v3598_v6  ;;  %v7264_v52 = vld [vmem:[%s7971_s25 + $0xaa8] sm:$0xff]  ;;  %v7255_v57 = vld [vmem:[%s7971_s25 + $0xa60] sm:$0xff] }
 0x16b   : > { %3848 = vmatpush.bf16.msrb.mxu0 %v7218_v53  ;;  %3817 = vmatmul.bf16.vlgmr.msra.gmra.mxu1 %v1211_v59  ;;  %v7272_v53 = vld [vmem:[%s7971_s25 + $0xae8] sm:$0xff]  ;;  %v7263_v59 = vld [vmem:[%s7971_s25 + $0xaa0] sm:$0xff] }
 0x16c   : > { %3861 = vmatpush.bf16.msrb.mxu1 %v7226_v54  ;;  %3830 = vmatmul.bf16.vlgmr.msra.gmra.mxu2 %v1212_v58 }
 0x16d   : > { %3874 = vmatpush.bf16.msrb.mxu2 %v7234_v55  ;;  %3843 = vmatmul.bf16.vlgmr.msra.gmra.mxu3 %v1213_v60  ;;  %v7271_v60 = vld [vmem:[%s7971_s25 + $0xae0] sm:$0xff] }
 0x16e   : > { %3887 = vmatpush.bf16.msrb.mxu3 %v7242_v56  ;;  %v7247_v56 = vld [vmem:[%s7971_s25 + $0xa20] sm:$0xff] }
 0x16f   : > { %3849 = vmatpush.bf16.msrb.mxu0 %v7217_v61  ;;  %v3623_v17 = vpop.f32.mrf.mxu2  ;;  %v3599_v20 = vpop.f32.mrf.mxu0 }
 0x170   : > { %3862 = vmatpush.bf16.msrb.mxu1 %v7225_v62  ;;  %v3624_v18 = vadd.f32 %v3623_v17, %v3611_v12  ;;  %v3636_v19 = vpop.f32.mrf.mxu3  ;;  %v3612_v24 = vpop.f32.mrf.mxu1  ;;  %v7246_v62 = vld [vmem:[%s7971_s25 + $0xa18] sm:$0xff]  ;;  %v7244_v12 = vld [vmem:[%s7971_s25 + $0xa08] sm:$0xff]  ;;  %v7259_v20 = vld [vmem:[%s7971_s25 + $0xa80] sm:$0xff] }
 0x171   : > { %3875 = vmatpush.bf16.msrb.mxu2 %v7233_v63  ;;  %v7254_v63 = vld [vmem:[%s7971_s25 + $0xa58] sm:$0xff]  ;;  %v1222_v24 = vld [vmem:[#allocation1 + $0x12] sm:$0xff] }
 0x172   : > { %3888 = vmatpush.bf16.msrb.mxu3 %v7241_v0  ;;  %v8316_v21 = vadd.f32 %v3636_v19, %v3624_v18  ;;  %v7262_v0 = vld [vmem:[%s7971_s25 + $0xa98] sm:$0xff]  ;;  %v7243_v18 = vld [vmem:[%s7971_s25 + $0xa00] sm:$0xff] }
 0x173   : > { %3850 = vmatpush.bf16.msrb.mxu0 %v7216_v1  ;;  %v7270_v1 = vld [vmem:[%s7971_s25 + $0xad8] sm:$0xff]  ;;  %v7251_v19 = vld [vmem:[%s7971_s25 + $0xa40] sm:$0xff] }
 0x174   : > { %3863 = vmatpush.bf16.msrb.mxu1 %v7224_v2 }
 0x175   : > { %3876 = vmatpush.bf16.msrb.mxu2 %v7232_v3 }
 0x176   : > { %3889 = vmatpush.bf16.msrb.mxu3 %v7240_v4 }
 0x177   : > { %3851 = vmatpush.bf16.msrb.mxu0 %v7215_v7  ;;  %v3625_v33 = vpop.f32.mrf.mxu2  ;;  %v7245_v7 = vld [vmem:[%s7971_s25 + $0xa10] sm:$0xff] }
 0x178   : > { %3864 = vmatpush.bf16.msrb.mxu1 %v7223_v8  ;;  %v3638_v36 = vpop.f32.mrf.mxu3  ;;  %v7253_v8 = vld [vmem:[%s7971_s25 + $0xa50] sm:$0xff] }
 0x179   : > { %3877 = vmatpush.bf16.msrb.mxu2 %v7231_v10  ;;  %v7261_v10 = vld [vmem:[%s7971_s25 + $0xa90] sm:$0xff] }
 0x17a   : > { %3890 = vmatpush.bf16.msrb.mxu3 %v7239_v11  ;;  %v7269_v11 = vld [vmem:[%s7971_s25 + $0xad0] sm:$0xff] }
 0x17b   : > { %3852 = vmatpush.bf16.msrb.mxu0 %v7214_v13  ;;  %v7252_v13 = vld [vmem:[%s7971_s25 + $0xa48] sm:$0xff] }
 0x17c   : > { %3865 = vmatpush.bf16.msrb.mxu1 %v7222_v14  ;;  %v7260_v14 = vld [vmem:[%s7971_s25 + $0xa88] sm:$0xff] }
 0x17d   : > { %3878 = vmatpush.bf16.msrb.mxu2 %v7230_v15  ;;  %v7268_v15 = vld [vmem:[%s7971_s25 + $0xac8] sm:$0xff] }
 0x17e   : > { %3891 = vmatpush.bf16.msrb.mxu3 %v7238_v16 }
 0x17f   : > { %3853 = vmatpush.bf16.msrb.mxu0 %v7213_v22  ;;  %v1220_v22 = vld [vmem:[#allocation1] sm:$0xff] }
 0x180   : > { %3866 = vmatpush.bf16.msrb.mxu1 %v7221_v23  ;;  %v1221_v23 = vld [vmem:[#allocation1 + $0x9] sm:$0xff] }
 0x181   : > { %3879 = vmatpush.bf16.msrb.mxu2 %v7229_v25  ;;  %v1223_v25 = vld [vmem:[#allocation1 + $0x1b] sm:$0xff] }
 0x182   : > { %3892 = vmatpush.bf16.msrb.mxu3 %v7237_v26 }
 0x183   : > { %3854 = vmatpush.bf16.msrb.mxu0 %v7212_v27 }
 0x184   : > { %3867 = vmatpush.bf16.msrb.mxu1 %v7220_v28 }
 0x185   : > { %3880 = vmatpush.bf16.msrb.mxu2 %v7228_v29 }
 0x186   : > { %3893 = vmatpush.bf16.msrb.mxu3 %v7236_v30 }
 0x187   : > { %3855 = vmatpush.bf16.msrb.mxu0 %v7211_v38  ;;  %v3649_v54 = vpop.f32.mrf.mxu0 }
 0x188   : > { %3868 = vmatpush.bf16.msrb.mxu1 %v7219_v39  ;;  %v3650_v55 = vadd.f32 %v3649_v54, %v8316_v21  ;;  %v3662_v58 = vpop.f32.mrf.mxu1  ;;  %v7267_v21 = vld [vmem:[%s7971_s25 + $0xac0] sm:$0xff] }
 0x189   : > { %3881 = vmatpush.bf16.msrb.mxu2 %v7227_v40 }
 0x18a   : > { %3894 = vmatpush.bf16.msrb.mxu3 %v7235_v41  ;;  %3856 = vmatmul.bf16.vlgmr.msrb.gmra.mxu0 %v1214_v31  ;;  %v3663_v61 = vadd.f32 %v3662_v58, %v3650_v55 }
 0x18b   : > { %3900 = vmatpush.bf16.msra.mxu0 %v7250_v42  ;;  %3869 = vmatmul.bf16.vlgmr.msrb.gmra.mxu1 %v1215_v34 }
 0x18c   : > { %3913 = vmatpush.bf16.msra.mxu1 %v7258_v43  ;;  %3882 = vmatmul.bf16.vlgmr.msrb.gmra.mxu2 %v1216_v32 }
 0x18d   : > { %3926 = vmatpush.bf16.msra.mxu2 %v7266_v44  ;;  %3895 = vmatmul.bf16.vlgmr.msrb.gmra.mxu3 %v1217_v35 }
 0x18e   : > { %3939 = vmatpush.bf16.msra.mxu3 %v7274_v45 }
 0x18f   : > { %3901 = vmatpush.bf16.msra.mxu0 %v7249_v46  ;;  %v3675_v2 = vpop.f32.mrf.mxu2  ;;  %v3651_v5 = vpop.f32.mrf.mxu0 }
 0x190   : > { %3914 = vmatpush.bf16.msra.mxu1 %v7257_v47  ;;  %v3676_v3 = vadd.f32 %v3675_v2, %v3663_v61  ;;  %v3688_v4 = vpop.f32.mrf.mxu3  ;;  %v3664_v9 = vpop.f32.mrf.mxu1 }
 0x191   : > { %3927 = vmatpush.bf16.msra.mxu2 %v7265_v48 }
 0x192   : > { %3940 = vmatpush.bf16.msra.mxu3 %v7273_v49  ;;  %v3689_v6 = vadd.f32 %v3688_v4, %v3676_v3 }
 0x193   : > { %3902 = vmatpush.bf16.msra.mxu0 %v7248_v50 }
 0x194   : > { %3915 = vmatpush.bf16.msra.mxu1 %v7256_v51 }
 0x195   : > { %3928 = vmatpush.bf16.msra.mxu2 %v7264_v52 }
 0x196   : > { %3941 = vmatpush.bf16.msra.mxu3 %v7272_v53 }
 0x197   : > { %3903 = vmatpush.bf16.msra.mxu0 %v7247_v56  ;;  %v3677_v16 = vpop.f32.mrf.mxu2 }
 0x198   : > { %3916 = vmatpush.bf16.msra.mxu1 %v7255_v57  ;;  %v3690_v17 = vpop.f32.mrf.mxu3 }
 0x199   : > { %3929 = vmatpush.bf16.msra.mxu2 %v7263_v59 }
 0x19a   : > { %3942 = vmatpush.bf16.msra.mxu3 %v7271_v60 }
 0x19b   : > { %3904 = vmatpush.bf16.msra.mxu0 %v7246_v62 }
 0x19c   : > { %3917 = vmatpush.bf16.msra.mxu1 %v7254_v63 }
 0x19d   : > { %3930 = vmatpush.bf16.msra.mxu2 %v7262_v0 }
 0x19e   : > { %3943 = vmatpush.bf16.msra.mxu3 %v7270_v1 }
 0x19f   : > { %3905 = vmatpush.bf16.msra.mxu0 %v7245_v7 }
 0x1a0   : > { %3918 = vmatpush.bf16.msra.mxu1 %v7253_v8 }
 0x1a1   : > { %3931 = vmatpush.bf16.msra.mxu2 %v7261_v10 }
 0x1a2   : > { %3944 = vmatpush.bf16.msra.mxu3 %v7269_v11 }
 0x1a3   : > { %3906 = vmatpush.bf16.msra.mxu0 %v7244_v12 }
 0x1a4   : > { %3919 = vmatpush.bf16.msra.mxu1 %v7252_v13 }
 0x1a5   : > { %3932 = vmatpush.bf16.msra.mxu2 %v7260_v14 }
 0x1a6   : > { %3945 = vmatpush.bf16.msra.mxu3 %v7268_v15 }
 0x1a7   : > { %3907 = vmatpush.bf16.msra.mxu0 %v7243_v18  ;;  %v3701_v26 = vpop.f32.mrf.mxu0 }
 0x1a8   : > { %3920 = vmatpush.bf16.msra.mxu1 %v7251_v19  ;;  %v3702_v27 = vadd.f32 %v3701_v26, %v3689_v6  ;;  %v3714_v28 = vpop.f32.mrf.mxu1  ;;  %v457_v19 = vld [vmem:[#allocation2] sm:$0x3] }
 0x1a9   : > { %3933 = vmatpush.bf16.msra.mxu2 %v7259_v20 }
 0x1aa   : > { %3946 = vmatpush.bf16.msra.mxu3 %v7267_v21  ;;  %3908 = vmatmul.bf16.vlgmr.msra.gmra.mxu0 %v1220_v22  ;;  %v3715_v29 = vadd.f32 %v3714_v28, %v3702_v27 }
 0x1ab   : > { %3921 = vmatmul.bf16.vlgmr.msra.gmra.mxu1 %v1221_v23 }
 0x1ac   : > { %3934 = vmatmul.bf16.vlgmr.msra.gmra.mxu2 %v1222_v24 }
 0x1ad   : > { %3947 = vmatmul.bf16.vlgmr.msra.gmra.mxu3 %v1223_v25 }
 0x1af   : > { %v3727_v30 = vpop.f32.mrf.mxu2  ;;  %v3703_v33 = vpop.f32.mrf.mxu0 }
 0x1b0   : > { %v3728_v31 = vadd.f32 %v3727_v30, %v3715_v29  ;;  %v3740_v32 = vpop.f32.mrf.mxu3  ;;  %v3716_v35 = vpop.f32.mrf.mxu1 }
 0x1b2   : > { %v3741_v34 = vadd.f32 %v3740_v32, %v3728_v31 }
 0x1b7   : > { %v3729_v36 = vpop.f32.mrf.mxu2 }
 0x1b8   : > { %v3742_v37 = vpop.f32.mrf.mxu3 }
 0x1c7   : > { %v3753_v38 = vpop.f32.mrf.mxu0 }
 0x1c8   : > { %v3754_v39 = vadd.f32 %v3753_v38, %v3741_v34  ;;  %v3766_v40 = vpop.f32.mrf.mxu1 }
 0x1ca   : > { %v3767_v41 = vadd.f32 %v3766_v40, %v3754_v39 }
 0x1cf   : > { %v3779_v42 = vpop.f32.mrf.mxu2  ;;  %v3755_v45 = vpop.f32.mrf.mxu0 }
 0x1d0   : > { %v3780_v43 = vadd.f32 %v3779_v42, %v3767_v41  ;;  %v3792_v44 = vpop.f32.mrf.mxu3  ;;  %v3768_v47 = vpop.f32.mrf.mxu1 }
 0x1d2   : > { %v3793_v46 = vadd.f32 %v3792_v44, %v3780_v43 }
 0x1d7   : > { %v3781_v48 = vpop.f32.mrf.mxu2 }
 0x1d8   : > { %v3794_v49 = vpop.f32.mrf.mxu3 }
 0x1e7   : > { %v3805_v50 = vpop.f32.mrf.mxu0 }
 0x1e8   : > { %v3818_v51 = vpop.f32.mrf.mxu1  ;;  %v3806_v61 = vadd.f32 %v3805_v50, %v3793_v46 }
 0x1ea   : > { %v3819_v1 = vadd.f32 %v3818_v51, %v3806_v61 }
 0x1ef   : > { %v3831_v52 = vpop.f32.mrf.mxu2  ;;  %v3807_v54 = vpop.f32.mrf.mxu0 }
 0x1f0   : > { %v3844_v53 = vpop.f32.mrf.mxu3  ;;  %v3820_v55 = vpop.f32.mrf.mxu1  ;;  %v3832_v2 = vadd.f32 %v3831_v52, %v3819_v1 }
 0x1f2   : > { %v3845_v5 = vadd.f32 %v3844_v53, %v3832_v2 }
 0x1f7   : > { %v3833_v56 = vpop.f32.mrf.mxu2 }
 0x1f8   : > { %v3846_v57 = vpop.f32.mrf.mxu3 }
 0x207   : > { %v3857_v58 = vpop.f32.mrf.mxu0 }
 0x208   : > { %v3870_v59 = vpop.f32.mrf.mxu1  ;;  %v3858_v6 = vadd.f32 %v3857_v58, %v3845_v5 }
 0x20a   : > { %v3871_v7 = vadd.f32 %v3870_v59, %v3858_v6 }
 0x20f   : > { %v3883_v60 = vpop.f32.mrf.mxu2  ;;  %v3859_v63 = vpop.f32.mrf.mxu0 }
 0x210   : > { %v3896_v62 = vpop.f32.mrf.mxu3  ;;  %v3872_v0 = vpop.f32.mrf.mxu1  ;;  %v3884_v8 = vadd.f32 %v3883_v60, %v3871_v7 }
 0x212   : > { %v3897_v9 = vadd.f32 %v3896_v62, %v3884_v8 }
 0x217   : > { %v3885_v3 = vpop.f32.mrf.mxu2 }
 0x218   : > { %v3898_v4 = vpop.f32.mrf.mxu3 }
 0x227   : > { %v3909_v10 = vpop.f32.mrf.mxu0 }
 0x228   : > { %v3922_v11 = vpop.f32.mrf.mxu1  ;;  %v3910_v12 = vadd.f32 %v3909_v10, %v3897_v9 }
 0x22a   : > { %v3923_v13 = vadd.f32 %v3922_v11, %v3910_v12 }
 0x22f   : > { %v3935_v14 = vpop.f32.mrf.mxu2  ;;  %v3911_v17 = vpop.f32.mrf.mxu0 }
 0x230   : > { %v3948_v15 = vpop.f32.mrf.mxu3  ;;  %v3936_v16 = vadd.f32 %v3935_v14, %v3923_v13  ;;  %v3924_v18 = vpop.f32.mrf.mxu1 }
 0x232   : > { %v3949_v20 = vadd.f32 %v3948_v15, %v3936_v16 }
 0x234   : > { %v3952_v21 = vadd.f32 %v3949_v20, %v457_v19  ;;  %3957 = sbr.rel (%p6469_p1) target bundleno = 1025 (0x401), region = 92 }
 0x236   : > { %3953 = vst [vmem:[#allocation2] sm:$0x3] %v3952_v21 }
 0x237   : > { %v3937_v22 = vpop.f32.mrf.mxu2 }
 0x238   : > { %v3950_v23 = vpop.f32.mrf.mxu3 }
 0x239   : > { %v6528_v24 = vld [vmem:[#allocation8 + $0x70] sm:$0xf]  ;;  %v7290_v25 = vld [vmem:[#allocation8 + $0x74] sm:$0xf0]  ;;  %v7289_v26 = vld [vmem:[#allocation8 + $0x74] sm:$0xf] }
 0x23a   : > { %v6529_v27 = vor.u32 %v7290_v25, %v6528_v24  ;;  %v6530_v28 = vld [vmem:[#allocation8 + $0x78] sm:$0xf0]  ;;  %v6520_v29 = vld [vmem:[#allocation8 + $0x60] sm:$0xf]  ;;  %v7288_v30 = vld [vmem:[#allocation8 + $0x64] sm:$0xf0] }
 0x23b   : > { %v6533_v31 = vor.u32 %v7289_v26, %v6530_v28  ;;  %v7287_v32 = vld [vmem:[#allocation8 + $0x64] sm:$0xf]  ;;  %v6522_v33 = vld [vmem:[#allocation8 + $0x68] sm:$0xf0]  ;;  %v6521_v34 = vor.u32 %v7288_v30, %v6520_v29  ;;  %v6512_v36 = vld [vmem:[#allocation8 + $0x50] sm:$0xf] }
 0x23c   : > { %4068 = vmatpush.bf16.msra.mxu0 %v6529_v27  ;;  %v6525_v35 = vor.u32 %v7287_v32, %v6522_v33  ;;  %v7286_v37 = vld [vmem:[#allocation8 + $0x54] sm:$0xf0]  ;;  %v7285_v38 = vld [vmem:[#allocation8 + $0x54] sm:$0xf]  ;;  %v6514_v39 = vld [vmem:[#allocation8 + $0x58] sm:$0xf0] }
 0x23d   : > { %4081 = vmatpush.bf16.msra.mxu1 %v6533_v31  ;;  %v6513_v40 = vor.u32 %v7286_v37, %v6512_v36  ;;  %v6517_v41 = vor.u32 %v7285_v38, %v6514_v39  ;;  %v6504_v42 = vld [vmem:[#allocation8 + $0x40] sm:$0xf]  ;;  %v7284_v43 = vld [vmem:[#allocation8 + $0x44] sm:$0xf0]  ;;  %v7283_v44 = vld [vmem:[#allocation8 + $0x44] sm:$0xf] }
 0x23e   : > { %v6506_v45 = vld [vmem:[#allocation8 + $0x48] sm:$0xf0]  ;;  %v6496_v46 = vld [vmem:[#allocation8 + $0x30] sm:$0xf]  ;;  %v6505_v47 = vor.u32 %v7284_v43, %v6504_v42  ;;  %v7282_v48 = vld [vmem:[#allocation8 + $0x34] sm:$0xf0] }
 0x23f   : > { %v6648_v49 = vld [vmem:[#allocation11 + $0xe0] sm:$0xf]  ;;  %v6509_v50 = vor.u32 %v7283_v44, %v6506_v45  ;;  %v7321_v51 = vld [vmem:[#allocation11 + $0xec] sm:$0xf0]  ;;  %v6498_v55 = vld [vmem:[#allocation8 + $0x38] sm:$0xf0]  ;;  %v6497_v60 = vor.u32 %v7282_v48, %v6496_v46 }
 0x240   : > { %4069 = vmatpush.bf16.msra.mxu0 %v6521_v34  ;;  %v6776_v52 = vld [vmem:[#allocation11 + $0x1e0] sm:$0xf]  ;;  %v7353_v53 = vld [vmem:[#allocation11 + $0x1ec] sm:$0xf0]  ;;  %v6649_v56 = vor.u32 %v7321_v51, %v6648_v49  ;;  %v7280_v2 = vld [vmem:[#allocation8 + $0x24] sm:$0xf0] }
 0x241   : > { %4082 = vmatpush.bf16.msra.mxu1 %v6525_v35  ;;  %v7281_v54 = vld [vmem:[#allocation8 + $0x34] sm:$0xf]  ;;  %v6777_v57 = vor.u32 %v7353_v53, %v6776_v52  ;;  %v6632_v58 = vld [vmem:[#allocation11 + $0xc0] sm:$0xf]  ;;  %v6490_v5 = vld [vmem:[#allocation8 + $0x28] sm:$0xf0] }
 0x242   : > { %v7317_v59 = vld [vmem:[#allocation11 + $0xcc] sm:$0xf0]  ;;  %4492 = vmatpush.bf16.msra.mxu2 %v6649_v56  ;;  %v6760_v62 = vld [vmem:[#allocation11 + $0x1c0] sm:$0xf]  ;;  %v6501_v0 = vor.u32 %v7281_v54, %v6498_v55  ;;  %v7503_v8 = vld [vmem:[#allocation6] ss:$0 sm:$0xff] }
 0x243   : > { %v6633_v61 = vor.u32 %v7317_v59, %v6632_v58  ;;  %v7349_v63 = vld [vmem:[#allocation11 + $0x1cc] sm:$0xf0]  ;;  %v6488_v1 = vld [vmem:[#allocation8 + $0x20] sm:$0xf]  ;;  %v7279_v3 = vld [vmem:[#allocation8 + $0x24] sm:$0xf]  ;;  %4505 = vmatpush.bf16.msra.mxu3 %v6777_v57 }
 0x244   : > { %4070 = vmatpush.bf16.msra.mxu0 %v6513_v40  ;;  %v6761_v4 = vor.u32 %v7349_v63, %v6760_v62  ;;  %v6616_v6 = vld [vmem:[#allocation11 + $0xa0] sm:$0xf]  ;;  %v7313_v7 = vld [vmem:[#allocation11 + $0xac] sm:$0xf0]  ;;  %v6489_v11 = vor.u32 %v7280_v2, %v6488_v1  ;;  %v7278_v13 = vld [vmem:[#allocation8 + $0x14] sm:$0xf0]  ;;  %v6493_v16 = vor.u32 %v7279_v3, %v6490_v5 }
 0x245   : > { %4083 = vmatpush.bf16.msra.mxu1 %v6517_v41  ;;  %v6744_v9 = vld [vmem:[#allocation11 + $0x1a0] sm:$0xf]  ;;  %v7345_v10 = vld [vmem:[#allocation11 + $0x1ac] sm:$0xf0]  ;;  %v3958_v14 = vld [vmem:[#allocation2] sm:$0x3]  ;;  %v6617_v15 = vor.u32 %v7313_v7, %v6616_v6 }
 0x246   : > { %v6480_v12 = vld [vmem:[#allocation8 + $0x10] sm:$0xf]  ;;  %4493 = vmatpush.bf16.msra.mxu2 %v6633_v61  ;;  %v7277_v17 = vld [vmem:[#allocation8 + $0x14] sm:$0xf]  ;;  %v6745_v18 = vor.u32 %v7345_v10, %v6744_v9  ;;  %v6600_v19 = vld [vmem:[#allocation11 + $0x80] sm:$0xf]  ;;  %v3963_v25 = vadd.f32 %v7503_v8, %v3958_v14 }
 0x247   : > { %4506 = vmatpush.bf16.msra.mxu3 %v6761_v4  ;;  %v7309_v20 = vld [vmem:[#allocation11 + $0x8c] sm:$0xf0]  ;;  %v6482_v21 = vld [vmem:[#allocation8 + $0x18] sm:$0xf0]  ;;  %v6728_v22 = vld [vmem:[#allocation11 + $0x180] sm:$0xf]  ;;  %v6481_v26 = vor.u32 %v7278_v13, %v6480_v12 }
 0x248   : > { %4071 = vmatpush.bf16.msra.mxu0 %v6505_v47  ;;  %v7341_v23 = vld [vmem:[#allocation11 + $0x18c] sm:$0xf0]  ;;  %v6472_v24 = vld [vmem:[#allocation8] sm:$0xf]  ;;  %v7276_v27 = vld [vmem:[#allocation8 + $0x4] sm:$0xf0]  ;;  %v6601_v30 = vor.u32 %v7309_v20, %v6600_v19  ;;  %v6485_v31 = vor.u32 %v7277_v17, %v6482_v21 }
 0x249   : > { %4084 = vmatpush.bf16.msra.mxu1 %v6509_v50  ;;  %v7275_v28 = vld [vmem:[#allocation8 + $0x4] sm:$0xf]  ;;  %v6474_v29 = vld [vmem:[#allocation8 + $0x8] sm:$0xf0]  ;;  %v6729_v33 = vor.u32 %v7341_v23, %v6728_v22  ;;  %v7305_v35 = vld [vmem:[#allocation11 + $0x6c] sm:$0xf0]  ;;  %v6473_v42 = vor.u32 %v7276_v27, %v6472_v24 }
 0x24a   : > { %4494 = vmatpush.bf16.msra.mxu2 %v6617_v15  ;;  %v7319_v32 = vld [vmem:[#allocation11 + $0xe4] sm:$0xf]  ;;  %v6584_v34 = vld [vmem:[#allocation11 + $0x60] sm:$0xf]  ;;  %v6650_v36 = vld [vmem:[#allocation11 + $0xf0] sm:$0xf0]  ;;  %v6477_v44 = vor.u32 %v7275_v28, %v6474_v29 }
 0x24b   : > { %4507 = vmatpush.bf16.msra.mxu3 %v6745_v18  ;;  %v7351_v37 = vld [vmem:[#allocation11 + $0x1e4] sm:$0xf]  ;;  %v6778_v38 = vld [vmem:[#allocation11 + $0x1f0] sm:$0xf0]  ;;  %v3964_v39 = vmax.f32 %v3963_v25, 0.0  ;;  %v6585_v43 = vor.u32 %v7305_v35, %v6584_v34  ;;  %v6653_v45 = vor.u32 %v7319_v32, %v6650_v36  ;;  %vm4916_vm0 = vcmask 17408  }
 0x24c   : > { %4072 = vmatpush.bf16.msra.mxu0 %v6497_v60  ;;  %v6712_v40 = vld [vmem:[#allocation11 + $0x160] sm:$0xf]  ;;  %v7337_v41 = vld [vmem:[#allocation11 + $0x16c] sm:$0xf0]  ;;  %v6781_v48 = vor.u32 %v7351_v37, %v6778_v38  ;;  %v7315_v49 = vld [vmem:[#allocation11 + $0xc4] sm:$0xf] }
 0x24d   : > { %4085 = vmatpush.bf16.msra.mxu1 %v6501_v0  ;;  %v6568_v46 = vld [vmem:[#allocation11 + $0x40] sm:$0xf]  ;;  %v7301_v47 = vld [vmem:[#allocation11 + $0x4c] sm:$0xf0]  ;;  %v6634_v50 = vld [vmem:[#allocation11 + $0xd0] sm:$0xf0]  ;;  %v6713_v52 = vor.u32 %v7337_v41, %v6712_v40  ;;  %v3965_v53 = vpack.c.bf16 %v3964_v39, %v3964_v39 }
 0x24e   : > { %4495 = vmatpush.bf16.msra.mxu2 %v6601_v30  ;;  %v7347_v51 = vld [vmem:[#allocation11 + $0x1c4] sm:$0xf]  ;;  %v6762_v54 = vld [vmem:[#allocation11 + $0x1d0] sm:$0xf0]  ;;  %v6696_v55 = vld [vmem:[#allocation11 + $0x140] sm:$0xf]  ;;  %v6569_v57 = vor.u32 %v7301_v47, %v6568_v46  ;;  %v6637_v58 = vor.u32 %v7315_v49, %v6634_v50 }
 0x24f   : > { %4508 = vmatpush.bf16.msra.mxu3 %v6729_v33  ;;  %v7333_v56 = vld [vmem:[#allocation11 + $0x14c] sm:$0xf0]  ;;  %v6552_v59 = vld [vmem:[#allocation11 + $0x20] sm:$0xf]  ;;  %v6765_v61 = vor.u32 %v7347_v51, %v6762_v54  ;;  %v7311_v62 = vld [vmem:[#allocation11 + $0xa4] sm:$0xf] }
 0x250   : > { %4073 = vmatpush.bf16.msra.mxu0 %v6489_v11  ;;  %v7297_v60 = vld [vmem:[#allocation11 + $0x2c] sm:$0xf0]  ;;  %v6618_v63 = vld [vmem:[#allocation11 + $0xb0] sm:$0xf0]  ;;  %v7343_v0 = vld [vmem:[#allocation11 + $0x1a4] sm:$0xf]  ;;  %v6697_v1 = vor.u32 %v7333_v56, %v6696_v55 }
 0x251   : > { %4086 = vmatpush.bf16.msra.mxu1 %v6493_v16  ;;  %v6746_v2 = vld [vmem:[#allocation11 + $0x1b0] sm:$0xf0]  ;;  %v6680_v3 = vld [vmem:[#allocation11 + $0x120] sm:$0xf]  ;;  %v7329_v4 = vld [vmem:[#allocation11 + $0x12c] sm:$0xf0]  ;;  %v6553_v6 = vor.u32 %v7297_v60, %v6552_v59  ;;  %v6621_v7 = vor.u32 %v7311_v62, %v6618_v63 }
 0x252   : > { %4496 = vmatpush.bf16.msra.mxu2 %v6585_v43  ;;  %v7307_v5 = vld [vmem:[#allocation11 + $0x84] sm:$0xf]  ;;  %v6602_v8 = vld [vmem:[#allocation11 + $0x90] sm:$0xf0]  ;;  %v6536_v9 = vld [vmem:[#allocation11] sm:$0xf]  ;;  %v6749_v11 = vor.u32 %v7343_v0, %v6746_v2  ;;  %v6681_v13 = vor.u32 %v7329_v4, %v6680_v3 }
 0x253   : > { %4509 = vmatpush.bf16.msra.mxu3 %v6713_v52  ;;  %v7293_v10 = vld [vmem:[#allocation11 + $0xc] sm:$0xf0]  ;;  %v7339_v12 = vld [vmem:[#allocation11 + $0x184] sm:$0xf]  ;;  %v6656_v14 = vld [vmem:[#allocation11 + $0xe8] sm:$0xf]  ;;  %v6605_v22 = vor.u32 %v7307_v5, %v6602_v8 }
 0x254   : > { %4074 = vmatpush.bf16.msra.mxu0 %v6481_v26  ;;  %v7322_v15 = vld [vmem:[#allocation11 + $0xf4] sm:$0xf0]  ;;  %v6730_v16 = vld [vmem:[#allocation11 + $0x190] sm:$0xf0]  ;;  %v6664_v17 = vld [vmem:[#allocation11 + $0x100] sm:$0xf]  ;;  %v6537_v19 = vor.u32 %v7293_v10, %v6536_v9 }
 0x255   : > { %4087 = vmatpush.bf16.msra.mxu1 %v6485_v31  ;;  %v7325_v18 = vld [vmem:[#allocation11 + $0x10c] sm:$0xf0]  ;;  %v6784_v20 = vld [vmem:[#allocation11 + $0x1e8] sm:$0xf]  ;;  %v7354_v21 = vld [vmem:[#allocation11 + $0x1f4] sm:$0xf0]  ;;  %v6657_v24 = vor.u32 %v7322_v15, %v6656_v14  ;;  %v6733_v25 = vor.u32 %v7339_v12, %v6730_v16 }
 0x256   : > { %4497 = vmatpush.bf16.msra.mxu2 %v6569_v57  ;;  %v7303_v23 = vld [vmem:[#allocation11 + $0x64] sm:$0xf]  ;;  %v6586_v26 = vld [vmem:[#allocation11 + $0x70] sm:$0xf0]  ;;  %v6665_v27 = vor.u32 %v7325_v18, %v6664_v17  ;;  %v6640_v28 = vld [vmem:[#allocation11 + $0xc8] sm:$0xf]  ;;  %v6785_v32 = vor.u32 %v7354_v21, %v6784_v20 }
 0x257   : > { %4510 = vmatpush.bf16.msra.mxu3 %v6697_v1  ;;  %v7318_v29 = vld [vmem:[#allocation11 + $0xd4] sm:$0xf0]  ;;  %v7335_v30 = vld [vmem:[#allocation11 + $0x164] sm:$0xf]  ;;  %v6714_v31 = vld [vmem:[#allocation11 + $0x170] sm:$0xf0]  ;;  %v6589_v35 = vor.u32 %v7303_v23, %v6586_v26 }
 0x258   : > { %4075 = vmatpush.bf16.msra.mxu0 %v6473_v42  ;;  %v6768_v33 = vld [vmem:[#allocation11 + $0x1c8] sm:$0xf]  ;;  %v7350_v34 = vld [vmem:[#allocation11 + $0x1d4] sm:$0xf0]  ;;  %v6641_v36 = vor.u32 %v7318_v29, %v6640_v28  ;;  %v6717_v37 = vor.u32 %v7335_v30, %v6714_v31  ;;  %v7299_v38 = vld [vmem:[#allocation11 + $0x44] sm:$0xf] }
 0x259   : > { %4088 = vmatpush.bf16.msra.mxu1 %v6477_v44  ;;  %v6570_v39 = vld [vmem:[#allocation11 + $0x50] sm:$0xf0]  ;;  %v7331_v40 = vld [vmem:[#allocation11 + $0x144] sm:$0xf]  ;;  %v6769_v42 = vor.u32 %v7350_v34, %v6768_v33  ;;  %v7320_v55 = vld [vmem:[#allocation11 + $0xec] sm:$0xf] }
 0x25a   : > { %4498 = vmatpush.bf16.msra.mxu2 %v6553_v6  ;;  %v6698_v41 = vld [vmem:[#allocation11 + $0x150] sm:$0xf0]  ;;  %v6573_v43 = vor.u32 %v7299_v38, %v6570_v39  ;;  %v7327_v47 = vld [vmem:[#allocation11 + $0x124] sm:$0xf]  ;;  %v6658_v56 = vld [vmem:[#allocation11 + $0xf8] sm:$0xf0] }
 0x25b   : > { %4076 = vmatmul.bf16.vlgmr.msra.gmra.mxu0 %v3965_v53  ;;  %4511 = vmatpush.bf16.msra.mxu3 %v6681_v13  ;;  %v6701_v44 = vor.u32 %v7331_v40, %v6698_v41  ;;  %v6554_v46 = vld [vmem:[#allocation11 + $0x30] sm:$0xf0]  ;;  %v7291_v51 = vld [vmem:[#allocation11 + $0x4] sm:$0xf]  ;;  %v7352_v57 = vld [vmem:[#allocation11 + $0x1ec] sm:$0xf] }
 0x25c   : > { %4518 = vmatpush.bf16.msrb.mxu0 %v6653_v45  ;;  %4089 = vmatmul.bf16.vlgmr.msra.gmra.mxu1 %v3965_v53  ;;  %v7295_v45 = vld [vmem:[#allocation11 + $0x24] sm:$0xf]  ;;  %v6538_v52 = vld [vmem:[#allocation11 + $0x10] sm:$0xf0]  ;;  %v7316_v63 = vld [vmem:[#allocation11 + $0xcc] sm:$0xf] }
 0x25d   : > { %4531 = vmatpush.bf16.msrb.mxu1 %v6781_v48  ;;  %v6682_v48 = vld [vmem:[#allocation11 + $0x130] sm:$0xf0]  ;;  %v6557_v49 = vor.u32 %v7295_v45, %v6554_v46  ;;  %v7323_v53 = vld [vmem:[#allocation11 + $0x104] sm:$0xf]  ;;  %v6541_v59 = vor.u32 %v7291_v51, %v6538_v52  ;;  %v6642_v0 = vld [vmem:[#allocation11 + $0xd8] sm:$0xf0] }
 0x25e   : > { %4499 = vmatpush.bf16.msra.mxu2 %v6537_v19  ;;  %v6685_v50 = vor.u32 %v7327_v47, %v6682_v48  ;;  %v6666_v54 = vld [vmem:[#allocation11 + $0x110] sm:$0xf0]  ;;  %v7348_v1 = vld [vmem:[#allocation11 + $0x1cc] sm:$0xf]  ;;  %v6770_v2 = vld [vmem:[#allocation11 + $0x1d8] sm:$0xf0]  ;;  %v6645_v3 = vor.u32 %v7316_v63, %v6642_v0 }
 0x25f   : > { %4512 = vmatpush.bf16.msra.mxu3 %v6665_v27  ;;  %v6669_v60 = vor.u32 %v7323_v53, %v6666_v54  ;;  %v6773_v4 = vor.u32 %v7348_v1, %v6770_v2  ;;  %v6624_v5 = vld [vmem:[#allocation11 + $0xa8] sm:$0xf]  ;;  %v7314_v6 = vld [vmem:[#allocation11 + $0xb4] sm:$0xf0]  ;;  %v7312_v10 = vld [vmem:[#allocation11 + $0xac] sm:$0xf] }
 0x260   : > { %4519 = vmatpush.bf16.msrb.mxu0 %v6637_v58  ;;  %v6786_v58 = vld [vmem:[#allocation11 + $0x1f8] sm:$0xf0]  ;;  %v6625_v8 = vor.u32 %v7314_v6, %v6624_v5  ;;  %v7346_v9 = vld [vmem:[#allocation11 + $0x1b4] sm:$0xf0]  ;;  %v7344_v14 = vld [vmem:[#allocation11 + $0x1ac] sm:$0xf] }
 0x261   : > { %4532 = vmatpush.bf16.msrb.mxu1 %v6765_v61  ;;  %v6661_v61 = vor.u32 %v7320_v55, %v6658_v56  ;;  %v6789_v62 = vor.u32 %v7352_v57, %v6786_v58  ;;  %v6754_v15 = vld [vmem:[#allocation11 + $0x1b8] sm:$0xf0]  ;;  %v6608_v17 = vld [vmem:[#allocation11 + $0x88] sm:$0xf]  ;;  %v7310_v18 = vld [vmem:[#allocation11 + $0x94] sm:$0xf0] }
 0x262   : > { %4544 = vmatpush.bf16.msrb.mxu2 %v6657_v24  ;;  %v6757_v16 = vor.u32 %v7344_v14, %v6754_v15  ;;  %v6736_v19 = vld [vmem:[#allocation11 + $0x188] sm:$0xf]  ;;  %v6609_v20 = vor.u32 %v7310_v18, %v6608_v17  ;;  %v7342_v21 = vld [vmem:[#allocation11 + $0x194] sm:$0xf0]  ;;  %v6610_v23 = vld [vmem:[#allocation11 + $0x98] sm:$0xf0] }
 0x263   : > { %4557 = vmatpush.bf16.msrb.mxu3 %v6785_v32  ;;  %v6737_v24 = vor.u32 %v7342_v21, %v6736_v19  ;;  %v7340_v26 = vld [vmem:[#allocation11 + $0x18c] sm:$0xf]  ;;  %v6738_v27 = vld [vmem:[#allocation11 + $0x198] sm:$0xf0]  ;;  %v6592_v29 = vld [vmem:[#allocation11 + $0x68] sm:$0xf] }
 0x264   : > { %4520 = vmatpush.bf16.msrb.mxu0 %v6621_v7  ;;  %v6752_v7 = vld [vmem:[#allocation11 + $0x1a8] sm:$0xf]  ;;  %v6741_v28 = vor.u32 %v7340_v26, %v6738_v27  ;;  %v7306_v30 = vld [vmem:[#allocation11 + $0x74] sm:$0xf0]  ;;  %v7304_v34 = vld [vmem:[#allocation11 + $0x6c] sm:$0xf] }
 0x265   : > { %4533 = vmatpush.bf16.msrb.mxu1 %v6749_v11  ;;  %v6626_v11 = vld [vmem:[#allocation11 + $0xb8] sm:$0xf0]  ;;  %v6753_v12 = vor.u32 %v7346_v9, %v6752_v7  ;;  %v6720_v31 = vld [vmem:[#allocation11 + $0x168] sm:$0xf]  ;;  %v6593_v32 = vor.u32 %v7306_v30, %v6592_v29  ;;  %v7338_v33 = vld [vmem:[#allocation11 + $0x174] sm:$0xf0] }
 0x266   : > { %4545 = vmatpush.bf16.msrb.mxu2 %v6641_v36  ;;  %v6629_v13 = vor.u32 %v7312_v10, %v6626_v11  ;;  %v6721_v36 = vor.u32 %v7338_v33, %v6720_v31  ;;  %v7336_v38 = vld [vmem:[#allocation11 + $0x16c] sm:$0xf]  ;;  %v6722_v39 = vld [vmem:[#allocation11 + $0x178] sm:$0xf0]  ;;  %v6576_v41 = vld [vmem:[#allocation11 + $0x48] sm:$0xf] }
 0x267   : > { %4558 = vmatpush.bf16.msrb.mxu3 %v6769_v42  ;;  %v6725_v40 = vor.u32 %v7336_v38, %v6722_v39  ;;  %v7302_v42 = vld [vmem:[#allocation11 + $0x54] sm:$0xf0]  ;;  %v7300_v46 = vld [vmem:[#allocation11 + $0x4c] sm:$0xf]  ;;  %v6578_v47 = vld [vmem:[#allocation11 + $0x58] sm:$0xf0] }
 0x268   : > { %4521 = vmatpush.bf16.msrb.mxu0 %v6605_v22  ;;  %v7308_v22 = vld [vmem:[#allocation11 + $0x8c] sm:$0xf]  ;;  %v7334_v45 = vld [vmem:[#allocation11 + $0x154] sm:$0xf0]  ;;  %v6706_v51 = vld [vmem:[#allocation11 + $0x158] sm:$0xf0] }
 0x269   : > { %4534 = vmatpush.bf16.msrb.mxu1 %v6733_v25  ;;  %v6613_v25 = vor.u32 %v7308_v22, %v6610_v23  ;;  %v6560_v52 = vld [vmem:[#allocation11 + $0x28] sm:$0xf]  ;;  %v7298_v54 = vld [vmem:[#allocation11 + $0x34] sm:$0xf0]  ;;  %v7296_v58 = vld [vmem:[#allocation11 + $0x2c] sm:$0xf] }
 0x26a   : > { %4546 = vmatpush.bf16.msrb.mxu2 %v6625_v8  ;;  %v6688_v55 = vld [vmem:[#allocation11 + $0x128] sm:$0xf]  ;;  %v7330_v56 = vld [vmem:[#allocation11 + $0x134] sm:$0xf0]  ;;  %v6561_v57 = vor.u32 %v7298_v54, %v6560_v52  ;;  %v6690_v63 = vld [vmem:[#allocation11 + $0x138] sm:$0xf0] }
 0x26b   : > { %4559 = vmatpush.bf16.msrb.mxu3 %v6753_v12  ;;  %v6544_v0 = vld [vmem:[#allocation11 + $0x8] sm:$0xf]  ;;  %v7294_v1 = vld [vmem:[#allocation11 + $0x14] sm:$0xf0]  ;;  %v7292_v5 = vld [vmem:[#allocation11 + $0xc] sm:$0xf] }
 0x26c   : > { %4522 = vmatpush.bf16.msrb.mxu0 %v6589_v35  ;;  %v6594_v35 = vld [vmem:[#allocation11 + $0x78] sm:$0xf0]  ;;  %v7324_v7 = vld [vmem:[#allocation11 + $0x10c] sm:$0xf]  ;;  %v6545_v9 = vor.u32 %v7294_v1, %v6544_v0  ;;  %v7369_v29 = vld [vmem:[%s8485_s7 + $0x70] sm:$0xff] }
 0x26d   : > { %4535 = vmatpush.bf16.msrb.mxu1 %v6717_v37  ;;  %v6597_v37 = vor.u32 %v7304_v34, %v6594_v35  ;;  %v6546_v6 = vld [vmem:[#allocation11 + $0x18] sm:$0xf0]  ;;  %v7370_v23 = vld [vmem:[%s8485_s7 + $0x78] sm:$0xff]  ;;  %v7361_v30 = vld [vmem:[%s8485_s7 + $0x30] sm:$0xff] }
 0x26e   : > { %4547 = vmatpush.bf16.msrb.mxu2 %v6609_v20  ;;  %v6674_v8 = vld [vmem:[#allocation11 + $0x118] sm:$0xf0]  ;;  %v6549_v11 = vor.u32 %v7292_v5, %v6546_v6  ;;  %v7386_v26 = vld [vmem:[%s8485_s7 + $0xf8] sm:$0xff]  ;;  %v7385_v31 = vld [vmem:[%s8485_s7 + $0xf0] sm:$0xff] }
 0x26f   : > { %4560 = vmatpush.bf16.msrb.mxu3 %v6737_v24  ;;  %v6677_v12 = vor.u32 %v7324_v7, %v6674_v8  ;;  %v7362_v24 = vld [vmem:[%s8485_s7 + $0x38] sm:$0xff]  ;;  %v7360_v33 = vld [vmem:[%s8485_s7 + $0x28] sm:$0xff]  ;;  %v7367_v34 = vld [vmem:[%s8485_s7 + $0x60] sm:$0xff] }
 0x270   : > { %4523 = vmatpush.bf16.msrb.mxu0 %v6573_v43  ;;  %v6704_v43 = vld [vmem:[#allocation11 + $0x148] sm:$0xf]  ;;  %v7359_v35 = vld [vmem:[%s8485_s7 + $0x20] sm:$0xff] }
 0x271   : > { %4536 = vmatpush.bf16.msrb.mxu1 %v6701_v44  ;;  %v6577_v44 = vor.u32 %v7302_v42, %v6576_v41  ;;  %v6705_v48 = vor.u32 %v7334_v45, %v6704_v43  ;;  %v7358_v38 = vld [vmem:[%s8485_s7 + $0x18] sm:$0xff]  ;;  %v7384_v41 = vld [vmem:[%s8485_s7 + $0xe8] sm:$0xff]  ;;  %v7357_v42 = vld [vmem:[%s8485_s7 + $0x10] sm:$0xff] }
 0x272   : > { %4548 = vmatpush.bf16.msrb.mxu2 %v6593_v32  ;;  %v7368_v32 = vld [vmem:[%s8485_s7 + $0x68] sm:$0xff]  ;;  %v7378_v39 = vld [vmem:[%s8485_s7 + $0xb8] sm:$0xff]  ;;  %v7377_v43 = vld [vmem:[%s8485_s7 + $0xb0] sm:$0xff] }
 0x273   : > { %4561 = vmatpush.bf16.msrb.mxu3 %v6721_v36  ;;  %v7366_v36 = vld [vmem:[%s8485_s7 + $0x58] sm:$0xff]  ;;  %v7383_v45 = vld [vmem:[%s8485_s7 + $0xe0] sm:$0xff]  ;;  %v7373_v54 = vld [vmem:[%s8485_s7 + $0x90] sm:$0xff] }
 0x274   : > { %4524 = vmatpush.bf16.msrb.mxu0 %v6557_v49  ;;  %v6581_v49 = vor.u32 %v7300_v46, %v6578_v47  ;;  %v7356_v46 = vld [vmem:[%s8485_s7 + $0x8] sm:$0xff]  ;;  %v7374_v52 = vld [vmem:[%s8485_s7 + $0x98] sm:$0xff] }
 0x275   : > { %4537 = vmatpush.bf16.msrb.mxu1 %v6685_v50  ;;  %v7332_v50 = vld [vmem:[#allocation11 + $0x14c] sm:$0xf]  ;;  %v7376_v47 = vld [vmem:[%s8485_s7 + $0xa8] sm:$0xff] }
 0x276   : > { %v6709_v53 = vor.u32 %v7332_v50, %v6706_v51  ;;  %4549 = vmatpush.bf16.msrb.mxu2 %v6577_v44  ;;  %v7363_v44 = vld [vmem:[%s8485_s7 + $0x40] sm:$0xff]  ;;  %v7381_v51 = vld [vmem:[%s8485_s7 + $0xd0] sm:$0xff] }
 0x277   : > { %4562 = vmatpush.bf16.msrb.mxu3 %v6705_v48  ;;  %v7382_v48 = vld [vmem:[%s8485_s7 + $0xd8] sm:$0xff]  ;;  %v7375_v50 = vld [vmem:[%s8485_s7 + $0xa0] sm:$0xff] }
 0x278   : > { %4525 = vmatpush.bf16.msrb.mxu0 %v6541_v59  ;;  %v6562_v59 = vld [vmem:[#allocation11 + $0x38] sm:$0xf0] }
 0x279   : > { %4538 = vmatpush.bf16.msrb.mxu1 %v6669_v60  ;;  %v7328_v60 = vld [vmem:[#allocation11 + $0x12c] sm:$0xf] }
 0x27a   : > { %v6693_v2 = vor.u32 %v7328_v60, %v6690_v63  ;;  %4550 = vmatpush.bf16.msrb.mxu2 %v6561_v57  ;;  %v4162_v57 = vld [vmem:[#allocation12] sm:$0xf] }
 0x27b   : > { %v4164_v0 = vperm.slane %v4162_v57, 0 }
 0x27c   : > { %4570 = vmatpush.bf16.msra.mxu0 %v6661_v61  ;;  %v6689_v61 = vor.u32 %v7330_v56, %v6688_v55  ;;  %v7379_v55 = vld [vmem:[%s8485_s7 + $0xc0] sm:$0xff]  ;;  %v7372_v56 = vld [vmem:[%s8485_s7 + $0x88] sm:$0xff] }
 0x27d   : > { %4583 = vmatpush.bf16.msra.mxu1 %v6789_v62  ;;  %v6565_v62 = vor.u32 %v7296_v58, %v6562_v59  ;;  %v7371_v58 = vld [vmem:[%s8485_s7 + $0x80] sm:$0xff]  ;;  %v4165_v59 = vperm.slane %v4162_v57, 1 }
 0x27e   : > { %4563 = vmatpush.bf16.msrb.mxu3 %v6689_v61  ;;  %4551 = vmatpush.bf16.msrb.mxu2 %v6545_v9 }
 0x280   : > { %4571 = vmatpush.bf16.msra.mxu0 %v6645_v3  ;;  %v6672_v3 = vld [vmem:[#allocation11 + $0x108] sm:$0xf] }
 0x281   : > { %4584 = vmatpush.bf16.msra.mxu1 %v6773_v4  ;;  %v7326_v4 = vld [vmem:[#allocation11 + $0x114] sm:$0xf0] }
 0x282   : > { %v6673_v10 = vor.u32 %v7326_v4, %v6672_v3 }
 0x284   : > { %4572 = vmatpush.bf16.msra.mxu0 %v6629_v13  ;;  %4564 = vmatpush.bf16.msrb.mxu3 %v6673_v10  ;;  %v3982_v13 = vld [vmem:[#allocation9] sm:$0x3] }
 0x285   : > { %4585 = vmatpush.bf16.msra.mxu1 %v6757_v16  ;;  %v3984_v14 = vperm.slane %v3982_v13, 0  ;;  %v3985_v15 = vperm.slane %v3982_v13, 1 }
 0x288   : > { %4573 = vmatpush.bf16.msra.mxu0 %v6613_v25 }
 0x289   : > { %4586 = vmatpush.bf16.msra.mxu1 %v6741_v28 }
 0x28c   : > { %4574 = vmatpush.bf16.msra.mxu0 %v6597_v37  ;;  %v7365_v37 = vld [vmem:[%s8485_s7 + $0x50] sm:$0xff] }
 0x28d   : > { %4587 = vmatpush.bf16.msra.mxu1 %v6725_v40  ;;  %v7364_v40 = vld [vmem:[%s8485_s7 + $0x48] sm:$0xff] }
 0x290   : > { %4575 = vmatpush.bf16.msra.mxu0 %v6581_v49  ;;  %v7355_v49 = vld [vmem:[%s8485_s7] sm:$0xff] }
 0x291   : > { %4588 = vmatpush.bf16.msra.mxu1 %v6709_v53  ;;  %v7380_v53 = vld [vmem:[%s8485_s7 + $0xc8] sm:$0xff] }
 0x294   : > { %4576 = vmatpush.bf16.msra.mxu0 %v6565_v62 }
 0x295   : > { %4589 = vmatpush.bf16.msra.mxu1 %v6693_v2 }
 0x298   : > { %4577 = vmatpush.bf16.msra.mxu0 %v6549_v11  ;;  %v4167_v11 = vperm.slane %v4162_v57, 3 }
 0x299   : > { %4590 = vmatpush.bf16.msra.mxu1 %v6677_v12 }
 0x2d8   : > { %v4077_v16 = vpop.f32.mrf.mxu0 }
 0x2d9   : > { %v4078_v17 = vadd.f32 %v4077_v16, %v3984_v14  ;;  %v4090_v18 = vpop.f32.mrf.mxu1 }
 0x2da   : > { %v4091_v19 = vadd.f32 %v4090_v18, %v3985_v15  ;;  %v4166_v18 = vperm.slane %v4162_v57, 2 }
 0x2db   : > { %v4094_v20 = vmax.f32 %v4078_v17, 0.0 }
 0x2dc   : > { %v4095_v21 = vmax.f32 %v4091_v19, 0.0 }
 0x2dd   : > { %v4096_v22 = vpack.c.bf16 %v4094_v20, %v4094_v20 }
 0x2de   : > { %v4097_v25 = vpack.c.bf16 %v4095_v21, %v4095_v21 }
 0x2df   : > { %4500 = vmatmul.bf16.vlgmr.msra.gmra.mxu2 %v4096_v22  ;;  %4526 = vmatmul.bf16.vlgmr.msrb.gmra.mxu0 %v4096_v22 }
 0x2e0   : > { %4513 = vmatmul.bf16.vlgmr.msra.gmra.mxu3 %v4097_v25  ;;  %4539 = vmatmul.bf16.vlgmr.msrb.gmra.mxu1 %v4097_v25  ;;  %v4079_v27 = vpop.f32.mrf.mxu0 }
 0x2e1   : > { %v4092_v28 = vpop.f32.mrf.mxu1  ;;  %4877 = vmatpush.bf16.msra.mxu3 %v7370_v23  ;;  %4864 = vmatpush.bf16.msra.mxu2 %v7362_v24 }
 0x2e2   : > { %4903 = vmatpush.bf16.msrb.mxu1 %v7386_v26  ;;  %4890 = vmatpush.bf16.msrb.mxu0 %v7378_v39 }
 0x2e5   : > { %4878 = vmatpush.bf16.msra.mxu3 %v7369_v29  ;;  %4865 = vmatpush.bf16.msra.mxu2 %v7361_v30 }
 0x2e6   : > { %4904 = vmatpush.bf16.msrb.mxu1 %v7385_v31  ;;  %4891 = vmatpush.bf16.msrb.mxu0 %v7377_v43 }
 0x2e9   : > { %4879 = vmatpush.bf16.msra.mxu3 %v7368_v32  ;;  %4866 = vmatpush.bf16.msra.mxu2 %v7360_v33  ;;  %v7504_v33 = vld [vmem:[#allocation14] ss:$0 sm:$0xff] }
 0x2ea   : > { %4905 = vmatpush.bf16.msrb.mxu1 %v7384_v41  ;;  %4892 = vmatpush.bf16.msrb.mxu0 %v7376_v47 }
 0x2ed   : > { %4880 = vmatpush.bf16.msra.mxu3 %v7367_v34  ;;  %4867 = vmatpush.bf16.msra.mxu2 %v7359_v35 }
 0x2ee   : > { %4906 = vmatpush.bf16.msrb.mxu1 %v7383_v45  ;;  %4893 = vmatpush.bf16.msrb.mxu0 %v7375_v50 }
 0x2ef   : > { %4552 = vmatmul.bf16.vlgmr.msrb.gmra.mxu2 %v4096_v22  ;;  %4578 = vmatmul.bf16.vlgmr.msra.gmra.mxu0 %v4096_v22 }
 0x2f0   : > { %4565 = vmatmul.bf16.vlgmr.msrb.gmra.mxu3 %v4097_v25  ;;  %4591 = vmatmul.bf16.vlgmr.msra.gmra.mxu1 %v4097_v25 }
 0x2f1   : > { %4881 = vmatpush.bf16.msra.mxu3 %v7366_v36  ;;  %4868 = vmatpush.bf16.msra.mxu2 %v7358_v38 }
 0x2f2   : > { %4907 = vmatpush.bf16.msrb.mxu1 %v7382_v48  ;;  %4894 = vmatpush.bf16.msrb.mxu0 %v7374_v52 }
 0x2f5   : > { %4882 = vmatpush.bf16.msra.mxu3 %v7365_v37  ;;  %4869 = vmatpush.bf16.msra.mxu2 %v7357_v42 }
 0x2f6   : > { %4908 = vmatpush.bf16.msrb.mxu1 %v7381_v51  ;;  %4895 = vmatpush.bf16.msrb.mxu0 %v7373_v54 }
 0x2f9   : > { %4883 = vmatpush.bf16.msra.mxu3 %v7364_v40  ;;  %4870 = vmatpush.bf16.msra.mxu2 %v7356_v46 }
 0x2fa   : > { %4909 = vmatpush.bf16.msrb.mxu1 %v7380_v53  ;;  %4896 = vmatpush.bf16.msrb.mxu0 %v7372_v56 }
 0x2fd   : > { %4884 = vmatpush.bf16.msra.mxu3 %v7363_v44  ;;  %4871 = vmatpush.bf16.msra.mxu2 %v7355_v49 }
 0x2fe   : > { %4910 = vmatpush.bf16.msrb.mxu1 %v7379_v55  ;;  %4897 = vmatpush.bf16.msrb.mxu0 %v7371_v58 }
 0x35c   : > { %v4527_v60 = vpop.f32.mrf.mxu0 }
 0x35d   : > { %v4528_v61 = vadd.f32 %v4527_v60, %v4165_v59  ;;  %v4540_v62 = vpop.f32.mrf.mxu1 }
 0x35f   : > { %v4541_v63 = vadd.f32 %v4540_v62, %v4528_v61 }
 0x361   : > { %v4597_v1 = vmax.f32 %v4541_v63, 0.0 }
 0x362   : > { %v4501_v2 = vpop.f32.mrf.mxu2 }
 0x363   : > { %v4601_v3 = vpack.c.bf16 %v4597_v1, %v4597_v1  ;;  %v4502_v4 = vadd.f32 %v4501_v2, %v4164_v0  ;;  %v4514_v5 = vpop.f32.mrf.mxu3 }
 0x364   : > { %v4529_v6 = vpop.f32.mrf.mxu0 }
 0x365   : > { %v4515_v7 = vadd.f32 %v4514_v5, %v4502_v4  ;;  %v4542_v8 = vpop.f32.mrf.mxu1  ;;  %4885 = vmatmul.bf16.vlgmr.msra.gmra.mxu3 %v4601_v3 }
 0x367   : > { %v4596_v9 = vmax.f32 %v4515_v7, 0.0 }
 0x369   : > { %v4600_v10 = vpack.c.bf16 %v4596_v9, %v4596_v9 }
 0x36a   : > { %v4503_v12 = vpop.f32.mrf.mxu2 }
 0x36b   : > { %v4516_v13 = vpop.f32.mrf.mxu3  ;;  %4872 = vmatmul.bf16.vlgmr.msra.gmra.mxu2 %v4600_v10 }
 0x36c   : > { %v4579_v14 = vpop.f32.mrf.mxu0 }
 0x36d   : > { %v4580_v15 = vadd.f32 %v4579_v14, %v4167_v11  ;;  %v4592_v16 = vpop.f32.mrf.mxu1 }
 0x36f   : > { %v4593_v17 = vadd.f32 %v4592_v16, %v4580_v15 }
 0x371   : > { %v4599_v19 = vmax.f32 %v4593_v17, 0.0 }
 0x372   : > { %v4553_v20 = vpop.f32.mrf.mxu2 }
 0x373   : > { %v4603_v21 = vpack.c.bf16 %v4599_v19, %v4599_v19  ;;  %v4554_v22 = vadd.f32 %v4553_v20, %v4166_v18  ;;  %v4566_v23 = vpop.f32.mrf.mxu3 }
 0x374   : > { %v4581_v24 = vpop.f32.mrf.mxu0 }
 0x375   : > { %v4567_v25 = vadd.f32 %v4566_v23, %v4554_v22  ;;  %v4594_v26 = vpop.f32.mrf.mxu1  ;;  %4911 = vmatmul.bf16.vlgmr.msrb.gmra.mxu1 %v4603_v21 }
 0x377   : > { %v4598_v27 = vmax.f32 %v4567_v25, 0.0 }
 0x379   : > { %v4602_v28 = vpack.c.bf16 %v4598_v27, %v4598_v27 }
 0x37a   : > { %v4555_v29 = vpop.f32.mrf.mxu2 }
 0x37b   : > { %v4568_v30 = vpop.f32.mrf.mxu3  ;;  %4898 = vmatmul.bf16.vlgmr.msrb.gmra.mxu0 %v4602_v28 }
 0x3e8   : > { %v4886_v31 = vpop.f32.mrf.mxu3 }
 0x3ee   : > { %v4873_v32 = vpop.f32.mrf.mxu2 }
 0x3ef   : > { %v4874_v36 = vadd.f32 %v7504_v33, %v4873_v32 }
 0x3f0   : > { %v4888_v34 = vpop.f32.mrf.mxu3 }
 0x3f1   : > { %v4887_v38 = vadd.f32 %v4886_v31, %v4874_v36 }
 0x3f2   : > { %v4912_v35 = vpop.f32.mrf.mxu1 }
 0x3f6   : > { %v4875_v37 = vpop.f32.mrf.mxu2 }
 0x3f8   : > { %v4899_v39 = vpop.f32.mrf.mxu0 }
 0x3f9   : > { %v4900_v40 = vadd.f32 %v4899_v39, %v4887_v38 }
 0x3fa   : > { %v4914_v41 = vpop.f32.mrf.mxu1 }
 0x3fb   : > { %v4913_v42 = vadd.f32 %v4912_v35, %v4900_v40 }
 0x3fd   : > { %4917 = vst.msk [vmem:[#allocation15] sm:$0x3] %vm4916_vm0, %v4913_v42 }
 0x400   : > { %v4901_v43 = vpop.f32.mrf.mxu0 }
 0x401 PF: > { %p7455_p3 = scmp.eq.s32.totalorder %s7883_s16, 3  ;;  %s7808_s2 = smov [#allocation15]  }
 0x402   : > { %s4924_s17 = sshll.u32 %s7808_s2, 4  ;;  %s4926_s30 = sshll.u32 %s8487_s9, 4  ;;  %s4925_s17 = int_to_ptr.vmem [resolvable:$true] %s4924_s17  ;;  %s4927_s30 = int_to_ptr.hbm [resolvable:$true] %s4926_s30 }
 0x403   : > { %7416 = dma.vmem_to_hbm [thread:$0]  (%p7455_p3), %s4925_s17, 32, %s4927_s30, [#allocation5]  }
 0x404   : > { %7776 = dma.done.wait (%p7455_p3), [#allocation5], 32  }
 0x405   : > { %7778 = vsyncadd (%p7455_p3), [#allocation5], 4294967264 }
 0x406 PF: > { %p23_p12 = scmp.ge.s32.totalorder %s7929_s26, 6   ;;  %s8494_s30 = smov %s7785_s10 }
 0x407   : > { %s8495_s10 = smov %s7789_s11  ;;  %s8496_s11 = smov %s7941_s19 }
 0x408   : > { %s8497_s12 = smov %s7929_s26  ;;  %25 = sbr.rel (!%p23_p12) target bundleno = 9 (0x9), region = 128 }
 0x40d   :  { %4940 = vsyncpa [#allocation4], 1 }
 0x40e   :  { %4942 = vsyncpa [#allocation4 + $0x1], 1 }
 0x40f   :  { %4943 = vsyncpa [#allocation7], 1 }
 0x410   :  { %4944 = vsyncpa [#allocation10], 1 }
 0x411   :  { %4945 = vsyncpa [#allocation13], 1 }
 0x412   :  { %4946 = vsyncpa [#allocation5], 1 }
 0x413   :  { %4948 = vsyncpa [#allocation5 + $0x1], 1 }

// kernel: ssa_forward.2
= control target key start
LH: loop header
LB: loop body
LE: loop exit
PB: predicated region body
PF: predicated region fallthrough
CT: control target
= control target key end

     0   :  { %14 = vsyncpa [#allocation9], 0  ;;  %s9762_s0 = inlined_call_operand.vmem [shape: bf16[2,700,8], index: 0, kind: input, shape index: {}]   ;;  %s9763_s1 = inlined_call_operand.hbm [shape: bf16[8,64], index: 1, kind: input, shape index: {}]   ;;  %s9764_s2 = inlined_call_operand.hbm [shape: f32[1,64], index: 2, kind: input, shape index: {}]   ;;  %s9765_s3 = inlined_call_operand.vmem [shape: bf16[192,64], index: 3, kind: input, shape index: {}]   ;;  %s9766_s4 = inlined_call_operand.hbm [shape: f32[1,64], index: 4, kind: input, shape index: {}]   ;;  %s9767_s5 = inlined_call_operand.hbm [shape: bf16[320,128], index: 5, kind: input, shape index: {}]   ;;  %s9768_s6 = inlined_call_operand.hbm [shape: f32[1,128], index: 6, kind: input, shape index: {}]   ;;  %s9769_s7 = inlined_call_operand.hbm [shape: bf16[640,128], index: 7, kind: input, shape index: {}]   ;;  %s9770_s8 = inlined_call_operand.hbm [shape: f32[1,128], index: 8, kind: input, shape index: {}]   ;;  %s9771_s9 = inlined_call_operand.vmem [shape: bf16[2,176,128], index: 9, kind: output, shape index: {}]  }
   0x1   :  { %15 = vsyncpa [#allocation11], 0 }
   0x2   :  { %16 = vsyncpa [#allocation14], 0 }
   0x3   :  { %17 = vsyncpa [#allocation17], 0  ;;  %s8467_s30 = smov 0  }
   0x4 LB: > { %s272_s12 = sshll.u32 %s9764_s2, 4  ;;  %s8476_s13 = sadd.s32 4294967295, %s8404_s30   ;;  %s8404_s30 = sphi %s8467_s30, %s23_s30   ;;  %s273_s12 = int_to_ptr.hbm [resolvable:$true] %s272_s12 }
   0x5   : > { %p6481_p0 = scmp.ge.s32.totalorder %s8404_s30, 1  ;;  %p248_p1 = scmp.lt.s32.totalorder %s8404_s30, 3 }
   0x6   : > { %p8125_p2 = scmp.eq.s32.totalorder %s8476_s13, 0  ;;  %s8406_s15 = smov [#allocation10]  }
   0x7   : > { %p8481_p3 = pnand %p6481_p0, %p248_p1  ;;  %s274_s16 = sshll.u32 %s8406_s15, 4  ;;  %s275_s16 = int_to_ptr.vmem [resolvable:$true] %s274_s16 }
   0x8   : > { %s298_s19 = sshll.u32 %s9767_s5, 4  ;;  %s8407_s21 = smov [#allocation13]   ;;  %s299_s19 = int_to_ptr.hbm [resolvable:$true] %s298_s19 }
   0x9   : > { %p8103_p4 = pneg %p8481_p3  ;;  %s300_s22 = sshll.u32 %s8407_s21, 4  ;;  %s301_s22 = int_to_ptr.vmem [resolvable:$true] %s300_s22 }
   0xa   : > { %s324_s25 = sshll.u32 %s9769_s7, 4  ;;  %s8408_s26 = smov 64   ;;  %s325_s25 = int_to_ptr.hbm [resolvable:$true] %s324_s25 }
   0xb   : > { %p8492_p5 = pnand %p8125_p2, %p8103_p4  ;;  %s8409_s27 = smov 4  }
   0xc   : > { %s8410_s28 = smov [#allocation16]   ;;  %s260_s15 = sshll.u32 %s9763_s1, 4  ;;  %s261_s15 = int_to_ptr.hbm [resolvable:$true] %s260_s15 }
   0xd   : > { %8109 = dma.hbm_to_vmem [thread:$0]  (!%p8492_p5), %s273_s12, 16, %s275_s16, [#allocation11]  }
   0xe   : > { %8115 = dma.hbm_to_vmem [thread:$0]  (!%p8492_p5), %s299_s19, 2560, %s301_s22, [#allocation14], %s8408_s26, %s8408_s26, %s8409_s27  }
   0xf   : > { %s326_s29 = sshll.u32 %s8410_s28, 4  ;;  %s287_s12 = sshll.u32 %s9766_s4, 4  ;;  %s327_s29 = int_to_ptr.vmem [resolvable:$true] %s326_s29  ;;  %s288_s12 = int_to_ptr.hbm [resolvable:$true] %s287_s12 }
  0x10   : > { %8121 = dma.hbm_to_vmem [thread:$0]  (!%p8492_p5), %s325_s25, 5120, %s327_s29, [#allocation17], %s8408_s26, %s8408_s26, %s8409_s27  }
  0x11   : > { %s8411_s16 = smov [#allocation8]   ;;  %s8412_s19 = smov [#allocation12]  }
  0x12   : > { %s262_s21 = sshll.u32 %s8411_s16, 4  ;;  %s289_s22 = sshll.u32 %s8412_s19, 4  ;;  %s263_s21 = int_to_ptr.vmem [resolvable:$true] %s262_s21  ;;  %s290_s22 = int_to_ptr.vmem [resolvable:$true] %s289_s22 }
  0x13   : > { %8106 = dma.hbm_to_vmem [thread:$0]  (!%p8492_p5), %s261_s15, 64, %s263_s21, [#allocation9]  }
  0x14   : > { %s313_s28 = sshll.u32 %s9768_s6, 4  ;;  %s339_s27 = sshll.u32 %s9770_s8, 4  ;;  %s314_s28 = int_to_ptr.hbm [resolvable:$true] %s313_s28  ;;  %s340_s27 = int_to_ptr.hbm [resolvable:$true] %s339_s27 }
  0x15   : > { %8112 = dma.hbm_to_vmem [thread:$0]  (!%p8492_p5), %s288_s12, 16, %s290_s22, [#allocation11]  }
  0x16   : > { %s8413_s29 = smov [#allocation15]   ;;  %s8414_s11 = smov [#allocation18]  }
  0x17   : > { %s315_s10 = sshll.u32 %s8413_s29, 4  ;;  %s341_s15 = sshll.u32 %s8414_s11, 4  ;;  %s316_s10 = int_to_ptr.vmem [resolvable:$true] %s315_s10  ;;  %s342_s15 = int_to_ptr.vmem [resolvable:$true] %s341_s15 }
  0x18   : > { %8118 = dma.hbm_to_vmem [thread:$0]  (!%p8492_p5), %s314_s28, 16, %s316_s10, [#allocation14]  }
  0x19   : > { %8124 = dma.hbm_to_vmem [thread:$0]  (!%p8492_p5), %s340_s27, 16, %s342_s15, [#allocation17]  }
  0x1a   : > { %362 = sbr.rel (%p8481_p3) target bundleno = 1879 (0x757), region = 56 }
  0x1f   : > { %8387 = dma.done.wait (%p8125_p2), [#allocation9], 64  }
  0x20   : > { %8389 = vsyncadd (%p8125_p2), [#allocation9], 4294967232 }
  0x21   : > { %8391 = dma.done.wait (%p8125_p2), [#allocation11], 32  }
  0x22   : > { %8393 = vsyncadd (%p8125_p2), [#allocation11], 4294967264 }
  0x23   : > { %8395 = dma.done.wait (%p8125_p2), [#allocation14], 2576  }
  0x24   : > { %8397 = vsyncadd (%p8125_p2), [#allocation14], 4294964720 }
  0x25   : > { %8399 = dma.done.wait (%p8125_p2), [#allocation17], 5136  }
  0x26   : > { %8401 = vsyncadd (%p8125_p2), [#allocation17], 4294962160  ;;  %p429_p6 = scmp.lt.s32.totalorder %s8476_s13, 1  ;;  %vm886_vm0 = vcmask 1043456   ;;  %v528_v0 = vld [vmem:[#allocation8] sm:$0xf] }
  0x27   : > { %v888_v1 = vsel %vm886_vm0, %v528_v0, 0  ;;  %vm753_vm1 = vcmask 64512   ;;  %vm1297_vm2 = vcmask 516096   ;;  %v8415_v9 = vmov 0.0   ;;  %v8569_v11 = vld [vmem:[#allocation10] ss:$0 sm:$0xff] }
  0x28   : > { %s9775_s13 = smov (!%p429_p6, %s8476_s13), 1  ;;  %897 = vmatpush.bf16.msra.mxu0 %v888_v1  ;;  %8060 = vmatpush.bf16.msra.mxu3 %v888_v1  ;;  %1298 = vst.msk [vmem:[#allocation2 + $0x7] sm:$0x1] %vm1297_vm2, %v8415_v9  ;;  %v7813_v14 = vld [vmem:[%s9765_s3 + $0x58] sm:$0xff]  ;;  %vm1207_vm3 = vcmask 523264   ;;  %v7812_v17 = vld [vmem:[%s9765_s3 + $0x50] sm:$0xff] }
  0x29   : > { %s8073_s14 = smul.u32 352, %s9775_s13  ;;  %4850 = vst [vmem:[#allocation6 + $0x7] sm:$0x1] %v8415_v9  ;;  %2537 = vmatpush.bf16.msra.mxu2 %v7813_v14  ;;  %v7811_v19 = vld [vmem:[%s9765_s3 + $0x48] sm:$0xff]  ;;  %v7810_v22 = vld [vmem:[%s9765_s3 + $0x40] sm:$0xff]  ;;  %vm1295_vm4 = vcmask 519168  }
  0x2a   : > { %4851 = vst [vmem:[#allocation6 + $0x164] sm:$0xff] %v8415_v9  ;;  %s8416_s25 = smov 64   ;;  %vm1784_vm5 = vcmask 1043968   ;;  %vm1474_vm6 = vcmask 518144   ;;  %vm1828_vm7 = vcmask 1042944   ;;  %vm2739_vm8 = vcmask 521216  }
  0x2b   : > { %s8551_s18 = scalar_lea.vmem %s9762_s0, %s8073_s14  ;;  %2741 = vst.msk [vmem:[#allocation4 + $0x7] sm:$0x1] %vm1297_vm2, %v8415_v9  ;;  %vm2874_vm9 = vcmask 517120   ;;  %vm3183_vm10 = vcmask 1041920  }
  0x2c   : > { %v7714_v2 = vld [vmem:[%s8551_s18] sm:$0xff]  ;;  %v7715_v3 = vld [vmem:[%s8551_s18 + $0x8] sm:$0xff]  ;;  %v7716_v4 = vld [vmem:[%s8551_s18 + $0x10] sm:$0xff]  ;;  %2742 = vst.msk [vmem:[#allocation4 + $0x166] sm:$0x1] %vm1297_vm2, %v8415_v9 }
  0x2d   : > { %6676 = vmatmul.msk.bf16.vlgmr.msra.gmra.mxu0 %vm753_vm1, %v7714_v2  ;;  %v7717_v5 = vld [vmem:[%s8551_s18 + $0x18] sm:$0xff]  ;;  %v7718_v6 = vld [vmem:[%s8551_s18 + $0x20] sm:$0xff]  ;;  %v7719_v7 = vld [vmem:[%s8551_s18 + $0x28] sm:$0xff]  ;;  %2538 = vmatpush.bf16.msra.mxu2 %v7812_v17 }
  0x2e   : > { %v7720_v8 = vld [vmem:[%s8551_s18 + $0x30] sm:$0xff]  ;;  %v7721_v10 = vld [vmem:[%s8551_s18 + $0x38] sm:$0xff]  ;;  %v7722_v12 = vld [vmem:[%s8551_s18 + $0x40] sm:$0xff] }
  0x2f   : > { %v7723_v23 = vld [vmem:[%s8551_s18 + $0x48] sm:$0xff]  ;;  %v7724_v36 = vld [vmem:[%s8551_s18 + $0x50] sm:$0xff]  ;;  %v7725_v52 = vld [vmem:[%s8551_s18 + $0x58] sm:$0xff] }
  0x30   : > { %v7726_v1 = vld [vmem:[%s8551_s18 + $0x60] sm:$0xff] }
  0x31   : > { %2539 = vmatpush.bf16.msra.mxu2 %v7811_v19 }
  0x35   : > { %2540 = vmatpush.bf16.msra.mxu2 %v7810_v22 }
  0x3d   : > { %6677 = vmatmul.msk.bf16.gmra.mxu0 %vm753_vm1, %v7715_v3 }
  0x4d   : > { %6678 = vmatmul.msk.bf16.gmra.mxu0 %vm753_vm1, %v7716_v4 }
  0x5d   : > { %6679 = vmatmul.msk.bf16.gmra.mxu0 %vm753_vm1, %v7717_v5 }
  0x6d   : > { %6680 = vmatmul.msk.bf16.gmra.mxu0 %vm753_vm1, %v7718_v6 }
  0x7d   : > { %6681 = vmatmul.msk.bf16.gmra.mxu0 %vm753_vm1, %v7719_v7 }
  0x8d   : > { %6682 = vmatmul.msk.bf16.gmra.mxu0 %vm753_vm1, %v7720_v8 }
  0x9d   : > { %6683 = vmatmul.msk.bf16.gmra.mxu0 %vm753_vm1, %v7721_v10 }
  0xaa   : > { %v899_v13 = vpop.f32.mrf.mxu0 }
  0xab   : > { %v900_v15 = vadd.f32 %v8569_v11, %v899_v13 }
  0xad   : > { %v1119_v16 = vmax.f32 %v900_v15, 0.0  ;;  %6684 = vmatmul.msk.bf16.gmra.mxu0 %vm753_vm1, %v7722_v12 }
  0xaf   : > { %1208 = vst.msk [vmem:[#allocation2 + $0x8] sm:$0xff] %vm1207_vm3, %v1119_v16 }
  0xb2   : > { %v901_v18 = vpop.f32.mrf.mxu0 }
  0xb3   : > { %v902_v20 = vadd.f32 %v8569_v11, %v901_v18  ;;  %v7727_v18 = vld [vmem:[%s8551_s18 + $0x68] sm:$0xff] }
  0xb5   : > { %v1120_v21 = vmax.f32 %v902_v20, 0.0 }
  0xb7   : > { %1209 = vst.msk [vmem:[#allocation2 + $0x10] sm:$0xff] %vm1207_vm3, %v1120_v21 }
  0xba   : > { %v904_v24 = vpop.f32.mrf.mxu0 }
  0xbb   : > { %v905_v25 = vadd.f32 %v8569_v11, %v904_v24 }
  0xbd   : > { %v1121_v26 = vmax.f32 %v905_v25, 0.0  ;;  %6685 = vmatmul.msk.bf16.gmra.mxu0 %vm753_vm1, %v7723_v23 }
  0xbe   : > { %v1831_v27 = vld [vmem:[#allocation2 + $0x9] ss:$2 sm:$0xff]  ;;  %v1477_v28 = vld [vmem:[#allocation2 + $0x8] ss:$2 sm:$0xff] }
  0xbf   : > { %v1300_v29 = vld [vmem:[#allocation2 + $0x7] ss:$2 sm:$0xff]  ;;  %v1918_v30 = vpack.c.bf16 %v1831_v27, %v1831_v27  ;;  %1210 = vst.msk [vmem:[#allocation2 + $0x18] sm:$0xff] %vm1207_vm3, %v1121_v26  ;;  %v1564_v31 = vpack.c.bf16 %v1477_v28, %v1477_v28 }
  0xc0   : > { %v1387_v32 = vpack.c.bf16 %v1300_v29, %v1300_v29 }
  0xc1   : > { %1652 = vrot.lane.b32.xlu0 %v1564_v31, %s8416_s25  ;;  %1962 = vst.msk [vmem:[#allocation3 + $0x4] sm:$0xf] %vm1295_vm4, %v1918_v30  ;;  %v7728_v31 = vld [vmem:[%s8551_s18 + $0x70] sm:$0xff] }
  0xc2   : > { %v906_v33 = vpop.f32.mrf.mxu0  ;;  %1431 = vst.msk [vmem:[#allocation3] sm:$0xf] %vm1295_vm4, %v1387_v32 }
  0xc3   : > { %v907_v34 = vadd.f32 %v8569_v11, %v906_v33 }
  0xc5   : > { %v1122_v35 = vmax.f32 %v907_v34, 0.0 }
  0xc7   : > { %1211 = vst.msk [vmem:[#allocation2 + $0x20] sm:$0xff] %vm1207_vm3, %v1122_v35  ;;  %v7809_v35 = vld [vmem:[%s9765_s3 + $0x38] sm:$0xff] }
  0xc8   : > { %v7758_v49 = vld [vmem:[#allocation3 + $0x4] sm:$0xf]  ;;  %2414 = vmatpush.bf16.msra.mxu1 %v7809_v35  ;;  %8061 = vmatpush.bf16.msrb.mxu3 %v7809_v35 }
  0xca   : > { %v909_v37 = vpop.f32.mrf.mxu0 }
  0xcb   : > { %v910_v38 = vadd.f32 %v8569_v11, %v909_v37 }
  0xcd   : > { %v1123_v39 = vmax.f32 %v910_v38, 0.0  ;;  %6686 = vmatmul.msk.bf16.gmra.mxu0 %vm753_vm1, %v7724_v36 }
  0xce   : > { %v1833_v40 = vld [vmem:[#allocation2 + $0x19] ss:$2 sm:$0xff]  ;;  %v1479_v41 = vld [vmem:[#allocation2 + $0x18] ss:$2 sm:$0xff] }
  0xcf   : > { %v1302_v42 = vld [vmem:[#allocation2 + $0x17] ss:$2 sm:$0xff]  ;;  %v1919_v43 = vpack.c.bf16 %v1833_v40, %v1833_v40  ;;  %1212 = vst.msk [vmem:[#allocation2 + $0x28] sm:$0xff] %vm1207_vm3, %v1123_v39  ;;  %v1565_v44 = vpack.c.bf16 %v1479_v41, %v1479_v41 }
  0xd0   : > { %v1388_v45 = vpack.c.bf16 %v1302_v42, %v1302_v42  ;;  %v7808_v42 = vld [vmem:[%s9765_s3 + $0x30] sm:$0xff] }
  0xd1   : > { %1654 = vrot.lane.b32.xlu0 %v1565_v44, %s8416_s25  ;;  %1963 = vst.msk [vmem:[#allocation3 + $0xc] sm:$0xf] %vm1295_vm4, %v1919_v43  ;;  %2415 = vmatpush.bf16.msra.mxu1 %v7808_v42 }
  0xd2   : > { %v911_v46 = vpop.f32.mrf.mxu0  ;;  %1432 = vst.msk [vmem:[#allocation3 + $0x8] sm:$0xf] %vm1295_vm4, %v1388_v45  ;;  %8062 = vmatpush.bf16.msrb.mxu3 %v7808_v42 }
  0xd3   : > { %v912_v47 = vadd.f32 %v8569_v11, %v911_v46  ;;  %v7807_v46 = vld [vmem:[%s9765_s3 + $0x28] sm:$0xff] }
  0xd5   : > { %v1124_v48 = vmax.f32 %v912_v47, 0.0  ;;  %2416 = vmatpush.bf16.msra.mxu1 %v7807_v46 }
  0xd6   : > { %8063 = vmatpush.bf16.msrb.mxu3 %v7807_v46 }
  0xd7   : > { %1213 = vst.msk [vmem:[#allocation2 + $0x30] sm:$0xff] %vm1207_vm3, %v1124_v48 }
  0xd8   : > { %v6724_v50 = vld [vmem:[#allocation3 + $0x8] sm:$0xf0] }
  0xd9   : > { %v6727_v51 = vor.u32 %v7758_v49, %v6724_v50  ;;  %v7729_v50 = vld [vmem:[%s8551_s18 + $0x78] sm:$0xff] }
  0xda   : > { %v914_v53 = vpop.f32.mrf.mxu0 }
  0xdb   : > { %v915_v54 = vadd.f32 %v8569_v11, %v914_v53  ;;  %6944 = vmatmul.msk.bf16.vlgmr.msra.gmra.mxu2 %vm1207_vm3, %v6727_v51 }
  0xdd   : > { %v1125_v55 = vmax.f32 %v915_v54, 0.0  ;;  %6687 = vmatmul.msk.bf16.gmra.mxu0 %vm753_vm1, %v7725_v52  ;;  %v7806_v52 = vld [vmem:[%s9765_s3 + $0x20] sm:$0xff] }
  0xde   : > { %v1835_v56 = vld [vmem:[#allocation2 + $0x29] ss:$2 sm:$0xff]  ;;  %v1481_v57 = vld [vmem:[#allocation2 + $0x28] ss:$2 sm:$0xff]  ;;  %2417 = vmatpush.bf16.msra.mxu1 %v7806_v52  ;;  %8064 = vmatpush.bf16.msrb.mxu3 %v7806_v52 }
  0xdf   : > { %v1304_v58 = vld [vmem:[#allocation2 + $0x27] ss:$2 sm:$0xff]  ;;  %v1920_v59 = vpack.c.bf16 %v1835_v56, %v1835_v56  ;;  %1214 = vst.msk [vmem:[#allocation2 + $0x38] sm:$0xff] %vm1207_vm3, %v1125_v55  ;;  %v1566_v60 = vpack.c.bf16 %v1481_v57, %v1481_v57  ;;  %v7805_v57 = vld [vmem:[%s9765_s3 + $0x18] sm:$0xff] }
  0xe0   : > { %v1389_v61 = vpack.c.bf16 %v1304_v58, %v1304_v58 }
  0xe1   : > { %1964 = vst.msk [vmem:[#allocation3 + $0x14] sm:$0xf] %vm1295_vm4, %v1920_v59  ;;  %1656 = vrot.lane.b32.xlu1 %v1566_v60, %s8416_s25 }
  0xe2   : > { %v916_v62 = vpop.f32.mrf.mxu0  ;;  %1433 = vst.msk [vmem:[#allocation3 + $0x10] sm:$0xf] %vm1295_vm4, %v1389_v61  ;;  %2418 = vmatpush.bf16.msra.mxu1 %v7805_v57  ;;  %8065 = vmatpush.bf16.msrb.mxu3 %v7805_v57 }
  0xe3   : > { %v917_v63 = vadd.f32 %v8569_v11, %v916_v62 }
  0xe5   : > { %v1126_v0 = vmax.f32 %v917_v63, 0.0  ;;  %v7804_v63 = vld [vmem:[%s9765_s3 + $0x10] sm:$0xff] }
  0xe6   : > { %2419 = vmatpush.bf16.msra.mxu1 %v7804_v63  ;;  %8066 = vmatpush.bf16.msrb.mxu3 %v7804_v63 }
  0xe7   : > { %1215 = vst.msk [vmem:[#allocation2 + $0x40] sm:$0xff] %vm1207_vm3, %v1126_v0 }
  0xe8   : > { %v7760_v15 = vld [vmem:[#allocation3 + $0x14] sm:$0xf] }
  0xea   : > { %v919_v2 = vpop.f32.mrf.mxu0 }
  0xeb   : > { %v920_v3 = vadd.f32 %v8569_v11, %v919_v2  ;;  %v7803_v2 = vld [vmem:[%s9765_s3 + $0x8] sm:$0xff] }
  0xec   : > { %2420 = vmatpush.bf16.msra.mxu1 %v7803_v2  ;;  %8067 = vmatpush.bf16.msrb.mxu3 %v7803_v2 }
  0xed   : > { %v1127_v4 = vmax.f32 %v920_v3, 0.0  ;;  %6688 = vmatmul.msk.bf16.gmra.mxu0 %vm753_vm1, %v7726_v1  ;;  %v7730_v3 = vld [vmem:[%s8551_s18 + $0x80] sm:$0xff] }
  0xee   : > { %v1837_v5 = vld [vmem:[#allocation2 + $0x39] ss:$2 sm:$0xff]  ;;  %v1483_v6 = vld [vmem:[#allocation2 + $0x38] ss:$2 sm:$0xff] }
  0xef   : > { %v1306_v7 = vld [vmem:[#allocation2 + $0x37] ss:$2 sm:$0xff]  ;;  %v1921_v8 = vpack.c.bf16 %v1837_v5, %v1837_v5  ;;  %1216 = vst.msk [vmem:[#allocation2 + $0x48] sm:$0xff] %vm1207_vm3, %v1127_v4  ;;  %v1567_v9 = vpack.c.bf16 %v1483_v6, %v1483_v6 }
  0xf0   : > { %v1390_v10 = vpack.c.bf16 %v1306_v7, %v1306_v7  ;;  %v7802_v5 = vld [vmem:[%s9765_s3] sm:$0xff] }
  0xf1   : > { %1965 = vst.msk [vmem:[#allocation3 + $0x1c] sm:$0xf] %vm1295_vm4, %v1921_v8  ;;  %1658 = vrot.lane.b32.xlu1 %v1567_v9, %s8416_s25  ;;  %2421 = vmatpush.bf16.msra.mxu1 %v7802_v5 }
  0xf2   : > { %v921_v12 = vpop.f32.mrf.mxu0  ;;  %1434 = vst.msk [vmem:[#allocation3 + $0x18] sm:$0xf] %vm1295_vm4, %v1390_v10  ;;  %8068 = vmatpush.bf16.msrb.mxu3 %v7802_v5 }
  0xf3   : > { %v922_v13 = vadd.f32 %v8569_v11, %v921_v12 }
  0xf5   : > { %v1128_v14 = vmax.f32 %v922_v13, 0.0 }
  0xf7   : > { %1217 = vst.msk [vmem:[#allocation2 + $0x50] sm:$0xff] %vm1207_vm3, %v1128_v14 }
  0xf8   : > { %v6732_v16 = vld [vmem:[#allocation3 + $0x18] sm:$0xf0] }
  0xf9   : > { %v6735_v17 = vor.u32 %v7760_v15, %v6732_v16 }
  0xfa   : > { %v924_v19 = vpop.f32.mrf.mxu0 }
  0xfb   : > { %v925_v20 = vadd.f32 %v8569_v11, %v924_v19  ;;  %6945 = vmatmul.msk.bf16.gmra.mxu2 %vm1207_vm3, %v6735_v17 }
  0xfd   : > { %v1129_v21 = vmax.f32 %v925_v20, 0.0  ;;  %6689 = vmatmul.msk.bf16.gmra.mxu0 %vm753_vm1, %v7727_v18 }
  0xfe   : > { %v1839_v22 = vld [vmem:[#allocation2 + $0x49] ss:$2 sm:$0xff]  ;;  %v1485_v23 = vld [vmem:[#allocation2 + $0x48] ss:$2 sm:$0xff] }
  0xff   : > { %v1308_v24 = vld [vmem:[#allocation2 + $0x47] ss:$2 sm:$0xff]  ;;  %v1922_v25 = vpack.c.bf16 %v1839_v22, %v1839_v22  ;;  %1218 = vst.msk [vmem:[#allocation2 + $0x58] sm:$0xff] %vm1207_vm3, %v1129_v21  ;;  %v1568_v26 = vpack.c.bf16 %v1485_v23, %v1485_v23 }
 0x100   : > { %v1391_v27 = vpack.c.bf16 %v1308_v24, %v1308_v24  ;;  %v7731_v22 = vld [vmem:[%s8551_s18 + $0x88] sm:$0xff] }
 0x101   : > { %1966 = vst.msk [vmem:[#allocation3 + $0x24] sm:$0xf] %vm1295_vm4, %v1922_v25  ;;  %1660 = vrot.lane.b32.xlu2 %v1568_v26, %s8416_s25 }
 0x102   : > { %v926_v28 = vpop.f32.mrf.mxu0  ;;  %1435 = vst.msk [vmem:[#allocation3 + $0x20] sm:$0xf] %vm1295_vm4, %v1391_v27 }
 0x103   : > { %v927_v29 = vadd.f32 %v8569_v11, %v926_v28 }
 0x105   : > { %v1130_v30 = vmax.f32 %v927_v29, 0.0 }
 0x107   : > { %1219 = vst.msk [vmem:[#allocation2 + $0x60] sm:$0xff] %vm1207_vm3, %v1130_v30 }
 0x108   : > { %v7762_v47 = vld [vmem:[#allocation3 + $0x24] sm:$0xf] }
 0x10a   : > { %v929_v32 = vpop.f32.mrf.mxu0 }
 0x10b   : > { %v930_v33 = vadd.f32 %v8569_v11, %v929_v32 }
 0x10d   : > { %v1131_v34 = vmax.f32 %v930_v33, 0.0  ;;  %6690 = vmatmul.msk.bf16.gmra.mxu0 %vm753_vm1, %v7728_v31 }
 0x10e   : > { %v1841_v36 = vld [vmem:[#allocation2 + $0x59] ss:$2 sm:$0xff]  ;;  %v1487_v37 = vld [vmem:[#allocation2 + $0x58] ss:$2 sm:$0xff] }
 0x10f   : > { %v1310_v38 = vld [vmem:[#allocation2 + $0x57] ss:$2 sm:$0xff]  ;;  %v1923_v39 = vpack.c.bf16 %v1841_v36, %v1841_v36  ;;  %1220 = vst.msk [vmem:[#allocation2 + $0x68] sm:$0xff] %vm1207_vm3, %v1131_v34  ;;  %v1569_v40 = vpack.c.bf16 %v1487_v37, %v1487_v37 }
 0x110   : > { %v1392_v41 = vpack.c.bf16 %v1310_v38, %v1310_v38  ;;  %v7732_v36 = vld [vmem:[%s8551_s18 + $0x90] sm:$0xff] }
 0x111   : > { %1967 = vst.msk [vmem:[#allocation3 + $0x2c] sm:$0xf] %vm1295_vm4, %v1923_v39  ;;  %1662 = vrot.lane.b32.xlu2 %v1569_v40, %s8416_s25 }
 0x112   : > { %v931_v43 = vpop.f32.mrf.mxu0  ;;  %1436 = vst.msk [vmem:[#allocation3 + $0x28] sm:$0xf] %vm1295_vm4, %v1392_v41 }
 0x113   : > { %v932_v44 = vadd.f32 %v8569_v11, %v931_v43 }
 0x115   : > { %v1132_v45 = vmax.f32 %v932_v44, 0.0 }
 0x117   : > { %1221 = vst.msk [vmem:[#allocation2 + $0x70] sm:$0xff] %vm1207_vm3, %v1132_v45 }
 0x118   : > { %v6740_v48 = vld [vmem:[#allocation3 + $0x28] sm:$0xf0] }
 0x119   : > { %v6743_v49 = vor.u32 %v7762_v47, %v6740_v48 }
 0x11a   : > { %v934_v51 = vpop.f32.mrf.mxu0 }
 0x11b   : > { %v935_v53 = vadd.f32 %v8569_v11, %v934_v51  ;;  %6946 = vmatmul.msk.bf16.gmra.mxu2 %vm1207_vm3, %v6743_v49 }
 0x11d   : > { %v1133_v54 = vmax.f32 %v935_v53, 0.0  ;;  %6691 = vmatmul.msk.bf16.gmra.mxu0 %vm753_vm1, %v7729_v50 }
 0x11e   : > { %v1843_v55 = vld [vmem:[#allocation2 + $0x69] ss:$2 sm:$0xff]  ;;  %v1489_v56 = vld [vmem:[#allocation2 + $0x68] ss:$2 sm:$0xff] }
 0x11f   : > { %v1924_v58 = vpack.c.bf16 %v1843_v55, %v1843_v55  ;;  %1222 = vst.msk [vmem:[#allocation2 + $0x78] sm:$0xff] %vm1207_vm3, %v1133_v54  ;;  %v1570_v59 = vpack.c.bf16 %v1489_v56, %v1489_v56  ;;  %v1312_v60 = vld [vmem:[#allocation2 + $0x67] ss:$2 sm:$0xff]  ;;  %v7733_v56 = vld [vmem:[%s8551_s18 + $0x98] sm:$0xff] }
 0x120   : > { %v1393_v61 = vpack.c.bf16 %v1312_v60, %v1312_v60 }
 0x121   : > { %1968 = vst.msk [vmem:[#allocation3 + $0x34] sm:$0xf] %vm1295_vm4, %v1924_v58  ;;  %1664 = vrot.lane.b32.xlu0 %v1570_v59, %s8416_s25 }
 0x122   : > { %v936_v62 = vpop.f32.mrf.mxu0  ;;  %1437 = vst.msk [vmem:[#allocation3 + $0x30] sm:$0xf] %vm1295_vm4, %v1393_v61 }
 0x123   : > { %v937_v0 = vadd.f32 %v8569_v11, %v936_v62 }
 0x125   : > { %v1134_v1 = vmax.f32 %v937_v0, 0.0 }
 0x127   : > { %1223 = vst.msk [vmem:[#allocation2 + $0x80] sm:$0xff] %vm1207_vm3, %v1134_v1 }
 0x128   : > { %v7764_v19 = vld [vmem:[#allocation3 + $0x34] sm:$0xf] }
 0x12a   : > { %v939_v4 = vpop.f32.mrf.mxu0 }
 0x12b   : > { %v940_v6 = vadd.f32 %v8569_v11, %v939_v4 }
 0x12d   : > { %v1135_v7 = vmax.f32 %v940_v6, 0.0  ;;  %6692 = vmatmul.msk.bf16.gmra.mxu0 %vm753_vm1, %v7730_v3 }
 0x12e   : > { %v1845_v8 = vld [vmem:[#allocation2 + $0x79] ss:$2 sm:$0xff]  ;;  %v1491_v9 = vld [vmem:[#allocation2 + $0x78] ss:$2 sm:$0xff] }
 0x12f   : > { %v1314_v10 = vld [vmem:[#allocation2 + $0x77] ss:$2 sm:$0xff]  ;;  %v1925_v12 = vpack.c.bf16 %v1845_v8, %v1845_v8  ;;  %1224 = vst.msk [vmem:[#allocation2 + $0x88] sm:$0xff] %vm1207_vm3, %v1135_v7  ;;  %v1571_v13 = vpack.c.bf16 %v1491_v9, %v1491_v9 }
 0x130   : > { %v1394_v14 = vpack.c.bf16 %v1314_v10, %v1314_v10  ;;  %v7734_v7 = vld [vmem:[%s8551_s18 + $0xa0] sm:$0xff] }
 0x131   : > { %1969 = vst.msk [vmem:[#allocation3 + $0x3c] sm:$0xf] %vm1295_vm4, %v1925_v12  ;;  %1666 = vrot.lane.b32.xlu1 %v1571_v13, %s8416_s25 }
 0x132   : > { %v941_v15 = vpop.f32.mrf.mxu0  ;;  %1438 = vst.msk [vmem:[#allocation3 + $0x38] sm:$0xf] %vm1295_vm4, %v1394_v14 }
 0x133   : > { %v942_v16 = vadd.f32 %v8569_v11, %v941_v15  ;;  %v1653_v17 = vpop.permute.xlu0 %1652 }
 0x134   : > { %1785 = vst.msk [vmem:[#allocation3] sm:$0xf] %vm1784_vm5, %v1653_v17 }
 0x135   : > { %v1136_v18 = vmax.f32 %v942_v16, 0.0 }
 0x137   : > { %1225 = vst.msk [vmem:[#allocation2 + $0x90] sm:$0xff] %vm1207_vm3, %v1136_v18 }
 0x138   : > { %v6748_v20 = vld [vmem:[#allocation3 + $0x38] sm:$0xf0] }
 0x139   : > { %v6751_v21 = vor.u32 %v7764_v19, %v6748_v20 }
 0x13a   : > { %v944_v23 = vpop.f32.mrf.mxu0 }
 0x13b   : > { %v945_v24 = vadd.f32 %v8569_v11, %v944_v23  ;;  %6947 = vmatmul.msk.bf16.gmra.mxu2 %vm1207_vm3, %v6751_v21  ;;  %v6722_v39 = vld [vmem:[#allocation3] sm:$0xf] }
 0x13d   : > { %v1137_v25 = vmax.f32 %v945_v24, 0.0  ;;  %6693 = vmatmul.msk.bf16.gmra.mxu0 %vm753_vm1, %v7731_v22 }
 0x13e   : > { %v1847_v26 = vld [vmem:[#allocation2 + $0x89] ss:$2 sm:$0xff]  ;;  %v1493_v27 = vld [vmem:[#allocation2 + $0x88] ss:$2 sm:$0xff] }
 0x13f   : > { %v1316_v28 = vld [vmem:[#allocation2 + $0x87] ss:$2 sm:$0xff]  ;;  %v1926_v29 = vpack.c.bf16 %v1847_v26, %v1847_v26  ;;  %1226 = vst.msk [vmem:[#allocation2 + $0x98] sm:$0xff] %vm1207_vm3, %v1137_v25  ;;  %v1572_v30 = vpack.c.bf16 %v1493_v27, %v1493_v27 }
 0x140   : > { %v1395_v31 = vpack.c.bf16 %v1316_v28, %v1316_v28  ;;  %v7735_v28 = vld [vmem:[%s8551_s18 + $0xa8] sm:$0xff] }
 0x141   : > { %1970 = vst.msk [vmem:[#allocation3 + $0x44] sm:$0xf] %vm1295_vm4, %v1926_v29  ;;  %1668 = vrot.lane.b32.xlu2 %v1572_v30, %s8416_s25 }
 0x142   : > { %v946_v32 = vpop.f32.mrf.mxu0  ;;  %1439 = vst.msk [vmem:[#allocation3 + $0x40] sm:$0xf] %vm1295_vm4, %v1395_v31 }
 0x143   : > { %v947_v33 = vadd.f32 %v8569_v11, %v946_v32  ;;  %v1655_v34 = vpop.permute.xlu0 %1654 }
 0x144   : > { %1786 = vst.msk [vmem:[#allocation3 + $0x8] sm:$0xf] %vm1784_vm5, %v1655_v34 }
 0x145   : > { %v1138_v35 = vmax.f32 %v947_v33, 0.0 }
 0x147   : > { %1227 = vst.msk [vmem:[#allocation2 + $0xa0] sm:$0xff] %vm1207_vm3, %v1138_v35 }
 0x148   : > { %v7766_v53 = vld [vmem:[#allocation3 + $0x44] sm:$0xf] }
 0x14a   : > { %v949_v37 = vpop.f32.mrf.mxu0 }
 0x14b   : > { %v950_v38 = vadd.f32 %v8569_v11, %v949_v37  ;;  %v7759_v40 = vld [vmem:[#allocation3 + $0x4] sm:$0xf0] }
 0x14c   : > { %v6723_v41 = vor.u32 %v7759_v40, %v6722_v39 }
 0x14d   : > { %v1139_v42 = vmax.f32 %v950_v38, 0.0  ;;  %6694 = vmatmul.msk.bf16.gmra.mxu0 %vm753_vm1, %v7732_v36 }
 0x14e   : > { %v1849_v43 = vld [vmem:[#allocation2 + $0x99] ss:$2 sm:$0xff]  ;;  %2422 = vmatmul.bf16.vlgmr.msra.gmra.mxu1 %v6723_v41  ;;  %v1495_v44 = vld [vmem:[#allocation2 + $0x98] ss:$2 sm:$0xff] }
 0x14f   : > { %v1318_v45 = vld [vmem:[#allocation2 + $0x97] ss:$2 sm:$0xff]  ;;  %v1927_v46 = vpack.c.bf16 %v1849_v43, %v1849_v43  ;;  %1228 = vst.msk [vmem:[#allocation2 + $0xa8] sm:$0xff] %vm1207_vm3, %v1139_v42  ;;  %v1573_v47 = vpack.c.bf16 %v1495_v44, %v1495_v44 }
 0x150   : > { %v1396_v48 = vpack.c.bf16 %v1318_v45, %v1318_v45  ;;  %v7736_v44 = vld [vmem:[%s8551_s18 + $0xb0] sm:$0xff] }
 0x151   : > { %1971 = vst.msk [vmem:[#allocation3 + $0x4c] sm:$0xf] %vm1295_vm4, %v1927_v46  ;;  %1670 = vrot.lane.b32.xlu0 %v1573_v47, %s8416_s25 }
 0x152   : > { %v951_v49 = vpop.f32.mrf.mxu0  ;;  %1440 = vst.msk [vmem:[#allocation3 + $0x48] sm:$0xf] %vm1295_vm4, %v1396_v48 }
 0x153   : > { %v952_v50 = vadd.f32 %v8569_v11, %v951_v49  ;;  %v1657_v51 = vpop.permute.xlu1 %1656 }
 0x154   : > { %1787 = vst.msk [vmem:[#allocation3 + $0x10] sm:$0xf] %vm1784_vm5, %v1657_v51 }
 0x155   : > { %v1140_v52 = vmax.f32 %v952_v50, 0.0 }
 0x157   : > { %1229 = vst.msk [vmem:[#allocation2 + $0xb0] sm:$0xff] %vm1207_vm3, %v1140_v52 }
 0x158   : > { %v6756_v54 = vld [vmem:[#allocation3 + $0x48] sm:$0xf0] }
 0x159   : > { %v6759_v55 = vor.u32 %v7766_v53, %v6756_v54 }
 0x15a   : > { %v954_v57 = vpop.f32.mrf.mxu0 }
 0x15b   : > { %v955_v58 = vadd.f32 %v8569_v11, %v954_v57  ;;  %v1661_v59 = vpop.permute.xlu2 %1660  ;;  %6948 = vmatmul.msk.bf16.gmra.mxu2 %vm1207_vm3, %v6759_v55  ;;  %v6730_v12 = vld [vmem:[#allocation3 + $0x10] sm:$0xf] }
 0x15c   : > { %1789 = vst.msk [vmem:[#allocation3 + $0x20] sm:$0xf] %vm1784_vm5, %v1661_v59 }
 0x15d   : > { %v1141_v60 = vmax.f32 %v955_v58, 0.0  ;;  %6695 = vmatmul.msk.bf16.gmra.mxu0 %vm753_vm1, %v7733_v56 }
 0x15e   : > { %v1851_v61 = vld [vmem:[#allocation2 + $0xa9] ss:$2 sm:$0xff]  ;;  %v1497_v62 = vld [vmem:[#allocation2 + $0xa8] ss:$2 sm:$0xff] }
 0x15f   : > { %v1320_v63 = vld [vmem:[#allocation2 + $0xa7] ss:$2 sm:$0xff]  ;;  %v1928_v0 = vpack.c.bf16 %v1851_v61, %v1851_v61  ;;  %1230 = vst.msk [vmem:[#allocation2 + $0xb8] sm:$0xff] %vm1207_vm3, %v1141_v60  ;;  %v1574_v1 = vpack.c.bf16 %v1497_v62, %v1497_v62  ;;  %v7737_v61 = vld [vmem:[%s8551_s18 + $0xb8] sm:$0xff] }
 0x160   : > { %v1397_v2 = vpack.c.bf16 %v1320_v63, %v1320_v63 }
 0x161   : > { %1972 = vst.msk [vmem:[#allocation3 + $0x54] sm:$0xf] %vm1295_vm4, %v1928_v0  ;;  %1672 = vrot.lane.b32.xlu1 %v1574_v1, %s8416_s25 }
 0x162   : > { %v956_v3 = vpop.f32.mrf.mxu0  ;;  %1441 = vst.msk [vmem:[#allocation3 + $0x50] sm:$0xf] %vm1295_vm4, %v1397_v2 }
 0x163   : > { %v957_v4 = vadd.f32 %v8569_v11, %v956_v3  ;;  %v1659_v5 = vpop.permute.xlu1 %1658  ;;  %v6738_v32 = vld [vmem:[#allocation3 + $0x20] sm:$0xf] }
 0x164   : > { %1788 = vst.msk [vmem:[#allocation3 + $0x18] sm:$0xf] %vm1784_vm5, %v1659_v5 }
 0x165   : > { %v1142_v6 = vmax.f32 %v957_v4, 0.0 }
 0x167   : > { %1231 = vst.msk [vmem:[#allocation2 + $0xc0] sm:$0xff] %vm1207_vm3, %v1142_v6 }
 0x168   : > { %v7768_v25 = vld [vmem:[#allocation3 + $0x54] sm:$0xf] }
 0x16a   : > { %v959_v8 = vpop.f32.mrf.mxu0 }
 0x16b   : > { %v960_v9 = vadd.f32 %v8569_v11, %v959_v8  ;;  %v1663_v10 = vpop.permute.xlu2 %1662  ;;  %v7761_v13 = vld [vmem:[#allocation3 + $0x14] sm:$0xf0] }
 0x16c   : > { %1790 = vst.msk [vmem:[#allocation3 + $0x28] sm:$0xf] %vm1784_vm5, %v1663_v10  ;;  %v6731_v14 = vor.u32 %v7761_v13, %v6730_v12  ;;  %v7738_v13 = vld [vmem:[%s8551_s18 + $0xc0] sm:$0xff] }
 0x16d   : > { %v1143_v15 = vmax.f32 %v960_v9, 0.0  ;;  %6696 = vmatmul.msk.bf16.gmra.mxu0 %vm753_vm1, %v7734_v7 }
 0x16e   : > { %v1853_v16 = vld [vmem:[#allocation2 + $0xb9] ss:$2 sm:$0xff]  ;;  %2427 = vmatmul.bf16.gmra.mxu1 %v6731_v14  ;;  %v1499_v17 = vld [vmem:[#allocation2 + $0xb8] ss:$2 sm:$0xff] }
 0x16f   : > { %v1322_v18 = vld [vmem:[#allocation2 + $0xb7] ss:$2 sm:$0xff]  ;;  %v1929_v19 = vpack.c.bf16 %v1853_v16, %v1853_v16  ;;  %1232 = vst.msk [vmem:[#allocation2 + $0xc8] sm:$0xff] %vm1207_vm3, %v1143_v15  ;;  %v1575_v20 = vpack.c.bf16 %v1499_v17, %v1499_v17 }
 0x170   : > { %v1398_v21 = vpack.c.bf16 %v1322_v18, %v1322_v18 }
 0x171   : > { %1973 = vst.msk [vmem:[#allocation3 + $0x5c] sm:$0xf] %vm1295_vm4, %v1929_v19  ;;  %1674 = vrot.lane.b32.xlu2 %v1575_v20, %s8416_s25 }
 0x172   : > { %v961_v22 = vpop.f32.mrf.mxu0  ;;  %1442 = vst.msk [vmem:[#allocation3 + $0x58] sm:$0xf] %vm1295_vm4, %v1398_v21 }
 0x173   : > { %v962_v23 = vadd.f32 %v8569_v11, %v961_v22  ;;  %v7763_v29 = vld [vmem:[#allocation3 + $0x24] sm:$0xf0] }
 0x174   : > { %v6739_v33 = vor.u32 %v7763_v29, %v6738_v32  ;;  %v7739_v32 = vld [vmem:[%s8551_s18 + $0xc8] sm:$0xff] }
 0x175   : > { %v1144_v24 = vmax.f32 %v962_v23, 0.0 }
 0x177   : > { %1233 = vst.msk [vmem:[#allocation2 + $0xd0] sm:$0xff] %vm1207_vm3, %v1144_v24 }
 0x178   : > { %v6764_v26 = vld [vmem:[#allocation3 + $0x58] sm:$0xf0] }
 0x179   : > { %v6767_v27 = vor.u32 %v7768_v25, %v6764_v26 }
 0x17a   : > { %v964_v30 = vpop.f32.mrf.mxu0 }
 0x17b   : > { %v965_v31 = vadd.f32 %v8569_v11, %v964_v30  ;;  %6949 = vmatmul.msk.bf16.gmra.mxu2 %vm1207_vm3, %v6767_v27 }
 0x17d   : > { %v1145_v34 = vmax.f32 %v965_v31, 0.0  ;;  %6697 = vmatmul.msk.bf16.gmra.mxu0 %vm753_vm1, %v7735_v28 }
 0x17e   : > { %v1855_v35 = vld [vmem:[#allocation2 + $0xc9] ss:$2 sm:$0xff]  ;;  %2432 = vmatmul.bf16.gmra.mxu1 %v6739_v33  ;;  %v1501_v36 = vld [vmem:[#allocation2 + $0xc8] ss:$2 sm:$0xff] }
 0x17f   : > { %v1324_v37 = vld [vmem:[#allocation2 + $0xc7] ss:$2 sm:$0xff]  ;;  %v1930_v38 = vpack.c.bf16 %v1855_v35, %v1855_v35  ;;  %1234 = vst.msk [vmem:[#allocation2 + $0xd8] sm:$0xff] %vm1207_vm3, %v1145_v34  ;;  %v1576_v39 = vpack.c.bf16 %v1501_v36, %v1501_v36 }
 0x180   : > { %v1399_v40 = vpack.c.bf16 %v1324_v37, %v1324_v37 }
 0x181   : > { %1974 = vst.msk [vmem:[#allocation3 + $0x64] sm:$0xf] %vm1295_vm4, %v1930_v38  ;;  %1676 = vrot.lane.b32.xlu0 %v1576_v39, %s8416_s25 }
 0x182   : > { %v966_v41 = vpop.f32.mrf.mxu0  ;;  %1443 = vst.msk [vmem:[#allocation3 + $0x60] sm:$0xf] %vm1295_vm4, %v1399_v40 }
 0x183   : > { %v967_v42 = vadd.f32 %v8569_v11, %v966_v41 }
 0x185   : > { %v1146_v43 = vmax.f32 %v967_v42, 0.0 }
 0x187   : > { %1235 = vst.msk [vmem:[#allocation2 + $0xe0] sm:$0xff] %vm1207_vm3, %v1146_v43 }
 0x188   : > { %v7770_v58 = vld [vmem:[#allocation3 + $0x64] sm:$0xf] }
 0x18a   : > { %v969_v45 = vpop.f32.mrf.mxu0 }
 0x18b   : > { %v970_v46 = vadd.f32 %v8569_v11, %v969_v45 }
 0x18d   : > { %v1147_v47 = vmax.f32 %v970_v46, 0.0  ;;  %6698 = vmatmul.msk.bf16.gmra.mxu0 %vm753_vm1, %v7736_v44  ;;  %v8784_v46 = vld [vmem:[#allocation12] ss:$0 sm:$0xff] }
 0x18e   : > { %v1857_v48 = vld [vmem:[#allocation2 + $0xd9] ss:$2 sm:$0xff]  ;;  %v1503_v49 = vld [vmem:[#allocation2 + $0xd8] ss:$2 sm:$0xff] }
 0x18f   : > { %v1326_v50 = vld [vmem:[#allocation2 + $0xd7] ss:$2 sm:$0xff]  ;;  %v1931_v51 = vpack.c.bf16 %v1857_v48, %v1857_v48  ;;  %1236 = vst.msk [vmem:[#allocation2 + $0xe8] sm:$0xff] %vm1207_vm3, %v1147_v47  ;;  %v1577_v52 = vpack.c.bf16 %v1503_v49, %v1503_v49  ;;  %v2542_v48 = vpop.f32.mrf.mxu2 }
 0x190   : > { %v1400_v53 = vpack.c.bf16 %v1326_v50, %v1326_v50  ;;  %v7740_v47 = vld [vmem:[%s8551_s18 + $0xd0] sm:$0xff] }
 0x191   : > { %1975 = vst.msk [vmem:[#allocation3 + $0x6c] sm:$0xf] %vm1295_vm4, %v1931_v51  ;;  %1678 = vrot.lane.b32.xlu1 %v1577_v52, %s8416_s25 }
 0x192   : > { %v971_v54 = vpop.f32.mrf.mxu0  ;;  %1444 = vst.msk [vmem:[#allocation3 + $0x68] sm:$0xf] %vm1295_vm4, %v1400_v53 }
 0x193   : > { %v972_v55 = vadd.f32 %v8569_v11, %v971_v54  ;;  %v1665_v56 = vpop.permute.xlu0 %1664 }
 0x194   : > { %1791 = vst.msk [vmem:[#allocation3 + $0x30] sm:$0xf] %vm1784_vm5, %v1665_v56 }
 0x195   : > { %v1148_v57 = vmax.f32 %v972_v55, 0.0 }
 0x197   : > { %1237 = vst.msk [vmem:[#allocation2 + $0xf0] sm:$0xff] %vm1207_vm3, %v1148_v57 }
 0x198   : > { %v6772_v59 = vld [vmem:[#allocation3 + $0x68] sm:$0xf0] }
 0x199   : > { %v6775_v60 = vor.u32 %v7770_v58, %v6772_v59 }
 0x19a   : > { %v974_v62 = vpop.f32.mrf.mxu0 }
 0x19b   : > { %v975_v63 = vadd.f32 %v8569_v11, %v974_v62  ;;  %v1669_v0 = vpop.permute.xlu2 %1668  ;;  %6950 = vmatmul.msk.bf16.gmra.mxu2 %vm1207_vm3, %v6775_v60  ;;  %v6746_v16 = vld [vmem:[#allocation3 + $0x30] sm:$0xf] }
 0x19c   : > { %1793 = vst.msk [vmem:[#allocation3 + $0x40] sm:$0xf] %vm1784_vm5, %v1669_v0 }
 0x19d   : > { %v1149_v1 = vmax.f32 %v975_v63, 0.0  ;;  %6699 = vmatmul.msk.bf16.gmra.mxu0 %vm753_vm1, %v7737_v61 }
 0x19e   : > { %v1859_v2 = vld [vmem:[#allocation2 + $0xe9] ss:$2 sm:$0xff]  ;;  %v1505_v3 = vld [vmem:[#allocation2 + $0xe8] ss:$2 sm:$0xff] }
 0x19f   : > { %v1328_v4 = vld [vmem:[#allocation2 + $0xe7] ss:$2 sm:$0xff]  ;;  %v1932_v5 = vpack.c.bf16 %v1859_v2, %v1859_v2  ;;  %1238 = vst.msk [vmem:[#allocation2 + $0xf8] sm:$0xff] %vm1207_vm3, %v1149_v1  ;;  %v1578_v6 = vpack.c.bf16 %v1505_v3, %v1505_v3 }
 0x1a0   : > { %v1401_v7 = vpack.c.bf16 %v1328_v4, %v1328_v4 }
 0x1a1   : > { %1976 = vst.msk [vmem:[#allocation3 + $0x74] sm:$0xf] %vm1295_vm4, %v1932_v5  ;;  %1680 = vrot.lane.b32.xlu2 %v1578_v6, %s8416_s25 }
 0x1a2   : > { %v976_v8 = vpop.f32.mrf.mxu0  ;;  %1445 = vst.msk [vmem:[#allocation3 + $0x70] sm:$0xf] %vm1295_vm4, %v1401_v7  ;;  %v2544_v7 = vpop.f32.mrf.mxu2 }
 0x1a3   : > { %v977_v9 = vadd.f32 %v8569_v11, %v976_v8  ;;  %v1667_v10 = vpop.permute.xlu1 %1666  ;;  %v6754_v53 = vld [vmem:[#allocation3 + $0x40] sm:$0xf] }
 0x1a4   : > { %1792 = vst.msk [vmem:[#allocation3 + $0x38] sm:$0xf] %vm1784_vm5, %v1667_v10 }
 0x1a5   : > { %v1150_v12 = vmax.f32 %v977_v9, 0.0 }
 0x1a7   : > { %1239 = vst.msk [vmem:[#allocation2 + $0x100] sm:$0xff] %vm1207_vm3, %v1150_v12 }
 0x1a8   : > { %v7772_v29 = vld [vmem:[#allocation3 + $0x74] sm:$0xf] }
 0x1aa   : > { %v979_v14 = vpop.f32.mrf.mxu0 }
 0x1ab   : > { %v980_v15 = vadd.f32 %v8569_v11, %v979_v14  ;;  %v7765_v17 = vld [vmem:[#allocation3 + $0x34] sm:$0xf0] }
 0x1ac   : > { %v6747_v18 = vor.u32 %v7765_v17, %v6746_v16 }
 0x1ad   : > { %v1151_v19 = vmax.f32 %v980_v15, 0.0  ;;  %6700 = vmatmul.msk.bf16.gmra.mxu0 %vm753_vm1, %v7738_v13  ;;  %v7741_v15 = vld [vmem:[%s8551_s18 + $0xd8] sm:$0xff] }
 0x1ae   : > { %v1861_v20 = vld [vmem:[#allocation2 + $0xf9] ss:$2 sm:$0xff]  ;;  %2437 = vmatmul.bf16.gmra.mxu1 %v6747_v18  ;;  %v1507_v21 = vld [vmem:[#allocation2 + $0xf8] ss:$2 sm:$0xff] }
 0x1af   : > { %v1330_v22 = vld [vmem:[#allocation2 + $0xf7] ss:$2 sm:$0xff]  ;;  %v1933_v23 = vpack.c.bf16 %v1861_v20, %v1861_v20  ;;  %1240 = vst.msk [vmem:[#allocation2 + $0x108] sm:$0xff] %vm1207_vm3, %v1151_v19  ;;  %v1579_v24 = vpack.c.bf16 %v1507_v21, %v1507_v21 }
 0x1b0   : > { %v1402_v25 = vpack.c.bf16 %v1330_v22, %v1330_v22 }
 0x1b1   : > { %1977 = vst.msk [vmem:[#allocation3 + $0x7c] sm:$0xf] %vm1295_vm4, %v1933_v23  ;;  %1682 = vrot.lane.b32.xlu0 %v1579_v24, %s8416_s25 }
 0x1b2   : > { %v981_v26 = vpop.f32.mrf.mxu0  ;;  %1446 = vst.msk [vmem:[#allocation3 + $0x78] sm:$0xf] %vm1295_vm4, %v1402_v25 }
 0x1b3   : > { %v982_v27 = vadd.f32 %v8569_v11, %v981_v26 }
 0x1b5   : > { %v1152_v28 = vmax.f32 %v982_v27, 0.0 }
 0x1b7   : > { %1241 = vst.msk [vmem:[#allocation2 + $0x110] sm:$0xff] %vm1207_vm3, %v1152_v28 }
 0x1b8   : > { %v6780_v30 = vld [vmem:[#allocation3 + $0x78] sm:$0xf0] }
 0x1b9   : > { %v6783_v31 = vor.u32 %v7772_v29, %v6780_v30 }
 0x1ba   : > { %v984_v33 = vpop.f32.mrf.mxu0 }
 0x1bb   : > { %v985_v34 = vadd.f32 %v8569_v11, %v984_v33  ;;  %6951 = vmatmul.msk.bf16.gmra.mxu2 %vm1207_vm3, %v6783_v31 }
 0x1bd   : > { %v1153_v35 = vmax.f32 %v985_v34, 0.0  ;;  %6701 = vmatmul.msk.bf16.gmra.mxu0 %vm753_vm1, %v7739_v32 }
 0x1be   : > { %v1863_v36 = vld [vmem:[#allocation2 + $0x109] ss:$2 sm:$0xff]  ;;  %v1509_v37 = vld [vmem:[#allocation2 + $0x108] ss:$2 sm:$0xff] }
 0x1bf   : > { %v1332_v38 = vld [vmem:[#allocation2 + $0x107] ss:$2 sm:$0xff]  ;;  %v1934_v39 = vpack.c.bf16 %v1863_v36, %v1863_v36  ;;  %1242 = vst.msk [vmem:[#allocation2 + $0x118] sm:$0xff] %vm1207_vm3, %v1153_v35  ;;  %v1580_v40 = vpack.c.bf16 %v1509_v37, %v1509_v37 }
 0x1c0   : > { %v1403_v41 = vpack.c.bf16 %v1332_v38, %v1332_v38 }
 0x1c1   : > { %1978 = vst.msk [vmem:[#allocation3 + $0x84] sm:$0xf] %vm1295_vm4, %v1934_v39  ;;  %1684 = vrot.lane.b32.xlu1 %v1580_v40, %s8416_s25  ;;  %v2547_v39 = vpop.f32.mrf.mxu2  ;;  %v7742_v40 = vld [vmem:[%s8551_s18 + $0xe0] sm:$0xff] }
 0x1c2   : > { %v986_v42 = vpop.f32.mrf.mxu0  ;;  %1447 = vst.msk [vmem:[#allocation3 + $0x80] sm:$0xf] %vm1295_vm4, %v1403_v41 }
 0x1c3   : > { %v987_v43 = vadd.f32 %v8569_v11, %v986_v42  ;;  %v1671_v44 = vpop.permute.xlu0 %1670  ;;  %v8816_v42 = vld [vmem:[#allocation10] ss:$0 sm:$0xff] }
 0x1c4   : > { %1794 = vst.msk [vmem:[#allocation3 + $0x48] sm:$0xf] %vm1784_vm5, %v1671_v44 }
 0x1c5   : > { %v1154_v45 = vmax.f32 %v987_v43, 0.0 }
 0x1c7   : > { %1243 = vst.msk [vmem:[#allocation2 + $0x120] sm:$0xff] %vm1207_vm3, %v1154_v45 }
 0x1c8   : > { %v7774_v12 = vld [vmem:[#allocation3 + $0x84] sm:$0xf] }
 0x1ca   : > { %v989_v49 = vpop.f32.mrf.mxu0 }
 0x1cb   : > { %v990_v50 = vadd.f32 %v8569_v11, %v989_v49  ;;  %v1675_v51 = vpop.permute.xlu2 %1674  ;;  %v2423_v52 = vpop.f32.mrf.mxu1  ;;  %v7767_v54 = vld [vmem:[#allocation3 + $0x44] sm:$0xf0] }
 0x1cc   : > { %1796 = vst.msk [vmem:[#allocation3 + $0x58] sm:$0xf] %vm1784_vm5, %v1675_v51  ;;  %v2424_v55 = vadd.f32 %v8784_v46, %v2423_v52  ;;  %v6755_v56 = vor.u32 %v7767_v54, %v6754_v53 }
 0x1cd   : > { %v1155_v57 = vmax.f32 %v990_v50, 0.0  ;;  %6702 = vmatmul.msk.bf16.gmra.mxu0 %vm753_vm1, %v7740_v47 }
 0x1ce   : > { %v1865_v58 = vld [vmem:[#allocation2 + $0x119] ss:$2 sm:$0xff]  ;;  %v2543_v59 = vadd.f32 %v2542_v48, %v2424_v55  ;;  %2442 = vmatmul.bf16.gmra.mxu1 %v6755_v56  ;;  %v1511_v60 = vld [vmem:[#allocation2 + $0x118] ss:$2 sm:$0xff]  ;;  %v2549_v55 = vpop.f32.mrf.mxu2 }
 0x1cf   : > { %v1334_v61 = vld [vmem:[#allocation2 + $0x117] ss:$2 sm:$0xff]  ;;  %v1935_v62 = vpack.c.bf16 %v1865_v58, %v1865_v58  ;;  %1244 = vst.msk [vmem:[#allocation2 + $0x128] sm:$0xff] %vm1207_vm3, %v1155_v57  ;;  %v1581_v63 = vpack.c.bf16 %v1511_v60, %v1511_v60 }
 0x1d0   : > { %v1404_v0 = vpack.c.bf16 %v1334_v61, %v1334_v61  ;;  %v2652_v1 = vmax.f32 %v2543_v59, 0.0 }
 0x1d1   : > { %1979 = vst.msk [vmem:[#allocation3 + $0x8c] sm:$0xf] %vm1295_vm4, %v1935_v62  ;;  %1686 = vrot.lane.b32.xlu2 %v1581_v63, %s8416_s25 }
 0x1d2   : > { %2696 = vst.msk [vmem:[#allocation4 + $0x8] sm:$0xff] %vm1207_vm3, %v2652_v1  ;;  %v991_v2 = vpop.f32.mrf.mxu0 }
 0x1d3   : > { %v992_v3 = vadd.f32 %v8569_v11, %v991_v2  ;;  %v1673_v4 = vpop.permute.xlu1 %1672  ;;  %v2425_v5 = vpop.f32.mrf.mxu1  ;;  %1448 = vst.msk [vmem:[#allocation3 + $0x88] sm:$0xf] %vm1295_vm4, %v1404_v0  ;;  %v7769_v21 = vld [vmem:[#allocation3 + $0x54] sm:$0xf0] }
 0x1d4   : > { %1795 = vst.msk [vmem:[#allocation3 + $0x50] sm:$0xf] %vm1784_vm5, %v1673_v4  ;;  %v2426_v6 = vadd.f32 %v8784_v46, %v2425_v5  ;;  %v7743_v4 = vld [vmem:[%s8551_s18 + $0xe8] sm:$0xff] }
 0x1d5   : > { %v1156_v8 = vmax.f32 %v992_v3, 0.0 }
 0x1d6   : > { %v2545_v9 = vadd.f32 %v2544_v7, %v2426_v6  ;;  %v2552_v5 = vpop.f32.mrf.mxu2 }
 0x1d7   : > { %1245 = vst.msk [vmem:[#allocation2 + $0x130] sm:$0xff] %vm1207_vm3, %v1156_v8 }
 0x1d8   : > { %v2653_v10 = vmax.f32 %v2545_v9, 0.0  ;;  %v6788_v13 = vld [vmem:[#allocation3 + $0x88] sm:$0xf0] }
 0x1d9   : > { %v6791_v14 = vor.u32 %v7774_v12, %v6788_v13  ;;  %v2743_v16 = vld [vmem:[#allocation4 + $0x7] sm:$0xff] }
 0x1da   : > { %2697 = vst.msk [vmem:[#allocation4 + $0x10] sm:$0xff] %vm1207_vm3, %v2653_v10  ;;  %v994_v17 = vpop.f32.mrf.mxu0  ;;  %v2787_v18 = vpack.c.bf16 %v2743_v16, %v2743_v16 }
 0x1db   : > { %v995_v19 = vadd.f32 %v8569_v11, %v994_v17  ;;  %6952 = vmatmul.msk.bf16.gmra.mxu2 %vm1207_vm3, %v6791_v14  ;;  %v6762_v20 = vld [vmem:[#allocation3 + $0x50] sm:$0xf] }
 0x1dc   : > { %v6763_v22 = vor.u32 %v7769_v21, %v6762_v20  ;;  %2831 = vst.msk [vmem:[#allocation5] sm:$0xf] %vm1295_vm4, %v2787_v18 }
 0x1dd   : > { %v1157_v23 = vmax.f32 %v995_v19, 0.0  ;;  %6703 = vmatmul.msk.bf16.gmra.mxu0 %vm753_vm1, %v7741_v15 }
 0x1de   : > { %v1867_v24 = vld [vmem:[#allocation2 + $0x129] ss:$2 sm:$0xff]  ;;  %2447 = vmatmul.bf16.gmra.mxu1 %v6763_v22  ;;  %v1513_v25 = vld [vmem:[#allocation2 + $0x128] ss:$2 sm:$0xff] }
 0x1df   : > { %v1336_v26 = vld [vmem:[#allocation2 + $0x127] ss:$2 sm:$0xff]  ;;  %v1936_v27 = vpack.c.bf16 %v1867_v24, %v1867_v24  ;;  %1246 = vst.msk [vmem:[#allocation2 + $0x138] sm:$0xff] %vm1207_vm3, %v1157_v23  ;;  %v1582_v28 = vpack.c.bf16 %v1513_v25, %v1513_v25 }
 0x1e0   : > { %v1405_v29 = vpack.c.bf16 %v1336_v26, %v1336_v26 }
 0x1e1   : > { %1980 = vst.msk [vmem:[#allocation3 + $0x94] sm:$0xf] %vm1295_vm4, %v1936_v27  ;;  %v3625_v30 = vld [vmem:[#allocation4 + $0xb] sm:$0xff]  ;;  %1688 = vrot.lane.b32.xlu0 %v1582_v28, %s8416_s25 }
 0x1e2   : > { %v3669_v31 = vpack.c.bf16 %v3625_v30, %v3625_v30  ;;  %v996_v32 = vpop.f32.mrf.mxu0  ;;  %1449 = vst.msk [vmem:[#allocation3 + $0x90] sm:$0xf] %vm1295_vm4, %v1405_v29  ;;  %v2744_v33 = vld [vmem:[#allocation4 + $0xf] sm:$0xff] }
 0x1e3   : > { %v3185_v34 = vld [vmem:[#allocation4 + $0x9] sm:$0xff]  ;;  %v997_v35 = vadd.f32 %v8569_v11, %v996_v32  ;;  %v2788_v36 = vpack.c.bf16 %v2744_v33, %v2744_v33 }
 0x1e4   : > { %v3229_v37 = vpack.c.bf16 %v3185_v34, %v3185_v34  ;;  %3713 = vst.msk [vmem:[#allocation5 + $0x8] sm:$0xf] %vm1295_vm4, %v3669_v31 }
 0x1e5   : > { %v1158_v38 = vmax.f32 %v997_v35, 0.0  ;;  %2832 = vst.msk [vmem:[#allocation5 + $0xc] sm:$0xf] %vm1295_vm4, %v2788_v36  ;;  %v2554_v36 = vpop.f32.mrf.mxu2 }
 0x1e6   : > { %3273 = vst.msk [vmem:[#allocation5 + $0x4] sm:$0xf] %vm1295_vm4, %v3229_v37 }
 0x1e7   : > { %1247 = vst.msk [vmem:[#allocation2 + $0x140] sm:$0xff] %vm1207_vm3, %v1158_v38 }
 0x1e8   : > { %v7776_v0 = vld [vmem:[#allocation3 + $0x94] sm:$0xf] }
 0x1ea   : > { %v999_v41 = vpop.f32.mrf.mxu0 }
 0x1eb   : > { %v1000_v43 = vadd.f32 %v8816_v42, %v999_v41  ;;  %v2428_v44 = vpop.f32.mrf.mxu1 }
 0x1ec   : > { %v2429_v11 = vadd.f32 %v8784_v46, %v2428_v44 }
 0x1ed   : > { %v1159_v45 = vmax.f32 %v1000_v43, 0.0  ;;  %6704 = vmatmul.msk.bf16.gmra.mxu0 %vm753_vm1, %v7742_v40  ;;  %v7744_v43 = vld [vmem:[%s8551_s18 + $0xf0] sm:$0xff] }
 0x1ee   : > { %v1869_v47 = vld [vmem:[#allocation2 + $0x139] ss:$2 sm:$0xff]  ;;  %v2548_v48 = vadd.f32 %v2547_v39, %v2429_v11  ;;  %v1515_v49 = vld [vmem:[#allocation2 + $0x138] ss:$2 sm:$0xff] }
 0x1ef   : > { %v1338_v50 = vld [vmem:[#allocation2 + $0x137] ss:$2 sm:$0xff]  ;;  %v1937_v51 = vpack.c.bf16 %v1869_v47, %v1869_v47  ;;  %1248 = vst.msk [vmem:[#allocation2 + $0x148] sm:$0xff] %vm1207_vm3, %v1159_v45  ;;  %v1583_v52 = vpack.c.bf16 %v1515_v49, %v1515_v49 }
 0x1f0   : > { %v1406_v53 = vpack.c.bf16 %v1338_v50, %v1338_v50  ;;  %v2654_v54 = vmax.f32 %v2548_v48, 0.0 }
 0x1f1   : > { %1981 = vst.msk [vmem:[#allocation3 + $0x9c] sm:$0xf] %vm1295_vm4, %v1937_v51  ;;  %1690 = vrot.lane.b32.xlu1 %v1583_v52, %s8416_s25 }
 0x1f2   : > { %2698 = vst.msk [vmem:[#allocation4 + $0x18] sm:$0xff] %vm1207_vm3, %v2654_v54  ;;  %v1001_v56 = vpop.f32.mrf.mxu0 }
 0x1f3   : > { %v1002_v57 = vadd.f32 %v8816_v42, %v1001_v56  ;;  %v1677_v58 = vpop.permute.xlu0 %1676  ;;  %v2430_v59 = vpop.f32.mrf.mxu1  ;;  %1450 = vst.msk [vmem:[#allocation3 + $0x98] sm:$0xf] %vm1295_vm4, %v1406_v53 }
 0x1f4   : > { %1797 = vst.msk [vmem:[#allocation3 + $0x60] sm:$0xf] %vm1784_vm5, %v1677_v58  ;;  %v2431_v60 = vadd.f32 %v8784_v46, %v2430_v59 }
 0x1f5   : > { %v1160_v61 = vmax.f32 %v1002_v57, 0.0 }
 0x1f6   : > { %v2550_v62 = vadd.f32 %v2549_v55, %v2431_v60 }
 0x1f7   : > { %1249 = vst.msk [vmem:[#allocation2 + $0x150] sm:$0xff] %vm1207_vm3, %v1160_v61 }
 0x1f8   : > { %v2655_v63 = vmax.f32 %v2550_v62, 0.0  ;;  %v6796_v1 = vld [vmem:[#allocation3 + $0x98] sm:$0xf0] }
 0x1f9   : > { %v3626_v2 = vld [vmem:[#allocation4 + $0x13] sm:$0xff]  ;;  %v6799_v3 = vor.u32 %v7776_v0, %v6796_v1 }
 0x1fa   : > { %v3670_v6 = vpack.c.bf16 %v3626_v2, %v3626_v2  ;;  %2699 = vst.msk [vmem:[#allocation4 + $0x20] sm:$0xff] %vm1207_vm3, %v2655_v63  ;;  %v1004_v7 = vpop.f32.mrf.mxu0  ;;  %v3186_v8 = vld [vmem:[#allocation4 + $0x11] sm:$0xff] }
 0x1fb   : > { %v1005_v9 = vadd.f32 %v8816_v42, %v1004_v7  ;;  %v1681_v10 = vpop.permute.xlu2 %1680  ;;  %v2433_v12 = vpop.f32.mrf.mxu1  ;;  %6953 = vmatmul.msk.bf16.gmra.mxu2 %vm1207_vm3, %v6799_v3  ;;  %v3230_v14 = vpack.c.bf16 %v3186_v8, %v3186_v8  ;;  %v2745_v25 = vld [vmem:[#allocation4 + $0x17] sm:$0xff]  ;;  %v6770_v50 = vld [vmem:[#allocation3 + $0x60] sm:$0xf] }
 0x1fc   : > { %3714 = vst.msk [vmem:[#allocation5 + $0x14] sm:$0xf] %vm1295_vm4, %v3670_v6  ;;  %v2434_v13 = vadd.f32 %v8784_v46, %v2433_v12  ;;  %v2789_v35 = vpack.c.bf16 %v2745_v25, %v2745_v25  ;;  %v2557_v25 = vpop.f32.mrf.mxu2 }
 0x1fd   : > { %v1161_v15 = vmax.f32 %v1005_v9, 0.0  ;;  %1799 = vst.msk [vmem:[#allocation3 + $0x70] sm:$0xf] %vm1784_vm5, %v1681_v10  ;;  %6705 = vmatmul.msk.bf16.gmra.mxu0 %vm753_vm1, %v7743_v4  ;;  %v7745_v9 = vld [vmem:[%s8551_s18 + $0xf8] sm:$0xff] }
 0x1fe   : > { %v1871_v16 = vld [vmem:[#allocation2 + $0x149] ss:$2 sm:$0xff]  ;;  %v2553_v17 = vadd.f32 %v2552_v5, %v2434_v13  ;;  %v1517_v18 = vld [vmem:[#allocation2 + $0x148] ss:$2 sm:$0xff]  ;;  %3274 = vst.msk [vmem:[#allocation5 + $0x10] sm:$0xf] %vm1295_vm4, %v3230_v14 }
 0x1ff   : > { %v1340_v19 = vld [vmem:[#allocation2 + $0x147] ss:$2 sm:$0xff]  ;;  %v1938_v20 = vpack.c.bf16 %v1871_v16, %v1871_v16  ;;  %1250 = vst.msk [vmem:[#allocation2 + $0x158] sm:$0xff] %vm1207_vm3, %v1161_v15  ;;  %v1584_v21 = vpack.c.bf16 %v1517_v18, %v1517_v18 }
 0x200   : > { %v1407_v22 = vpack.c.bf16 %v1340_v19, %v1340_v19  ;;  %v2656_v23 = vmax.f32 %v2553_v17, 0.0  ;;  %2833 = vst.msk [vmem:[#allocation5 + $0x18] sm:$0xf] %vm1295_vm4, %v2789_v35 }
 0x201   : > { %1982 = vst.msk [vmem:[#allocation3 + $0xa4] sm:$0xf] %vm1295_vm4, %v1938_v20  ;;  %v3627_v24 = vld [vmem:[#allocation4 + $0x1b] sm:$0xff]  ;;  %1692 = vrot.lane.b32.xlu2 %v1584_v21, %s8416_s25 }
 0x202   : > { %v3671_v26 = vpack.c.bf16 %v3627_v24, %v3627_v24  ;;  %2700 = vst.msk [vmem:[#allocation4 + $0x28] sm:$0xff] %vm1207_vm3, %v2656_v23  ;;  %v1006_v27 = vpop.f32.mrf.mxu0  ;;  %v3187_v28 = vld [vmem:[#allocation4 + $0x19] sm:$0xff] }
 0x203   : > { %v2746_v29 = vld [vmem:[#allocation4 + $0x1f] sm:$0xff]  ;;  %v1007_v30 = vadd.f32 %v8816_v42, %v1006_v27  ;;  %v1679_v31 = vpop.permute.xlu1 %1678  ;;  %v2435_v32 = vpop.f32.mrf.mxu1  ;;  %1451 = vst.msk [vmem:[#allocation3 + $0xa0] sm:$0xf] %vm1295_vm4, %v1407_v22  ;;  %v3231_v33 = vpack.c.bf16 %v3187_v28, %v3187_v28 }
 0x204   : > { %3715 = vst.msk [vmem:[#allocation5 + $0x20] sm:$0xf] %vm1295_vm4, %v3671_v26  ;;  %v2436_v34 = vadd.f32 %v8784_v46, %v2435_v32  ;;  %v2790_v38 = vpack.c.bf16 %v2746_v29, %v2746_v29  ;;  %v7746_v24 = vld [vmem:[%s8551_s18 + $0x100] sm:$0xff] }
 0x205   : > { %v1162_v37 = vmax.f32 %v1007_v30, 0.0  ;;  %1798 = vst.msk [vmem:[#allocation3 + $0x68] sm:$0xf] %vm1784_vm5, %v1679_v31  ;;  %v6778_v30 = vld [vmem:[#allocation3 + $0x70] sm:$0xf] }
 0x206   : > { %v2555_v39 = vadd.f32 %v2554_v36, %v2436_v34  ;;  %3275 = vst.msk [vmem:[#allocation5 + $0x1c] sm:$0xf] %vm1295_vm4, %v3231_v33 }
 0x207   : > { %1251 = vst.msk [vmem:[#allocation2 + $0x160] sm:$0xff] %vm1207_vm3, %v1162_v37 }
 0x208   : > { %v2657_v40 = vmax.f32 %v2555_v39, 0.0  ;;  %2834 = vst.msk [vmem:[#allocation5 + $0x24] sm:$0xf] %vm1295_vm4, %v2790_v38  ;;  %v7778_v6 = vld [vmem:[#allocation3 + $0xa4] sm:$0xf] }
 0x209   : > { %v3628_v41 = vld [vmem:[#allocation4 + $0x23] sm:$0xff] }
 0x20a   : > { %v3672_v44 = vpack.c.bf16 %v3628_v41, %v3628_v41  ;;  %2701 = vst.msk [vmem:[#allocation4 + $0x30] sm:$0xff] %vm1207_vm3, %v2657_v40  ;;  %v1009_v11 = vpop.f32.mrf.mxu0  ;;  %v3188_v45 = vld [vmem:[#allocation4 + $0x21] sm:$0xff] }
 0x20b   : > { %v2747_v47 = vld [vmem:[#allocation4 + $0x27] sm:$0xff]  ;;  %v1010_v48 = vadd.f32 %v8816_v42, %v1009_v11  ;;  %v3232_v49 = vpack.c.bf16 %v3188_v45, %v3188_v45 }
 0x20c   : > { %3716 = vst.msk [vmem:[#allocation5 + $0x2c] sm:$0xf] %vm1295_vm4, %v3672_v44  ;;  %v7771_v51 = vld [vmem:[#allocation3 + $0x64] sm:$0xf0]  ;;  %v2791_v52 = vpack.c.bf16 %v2747_v47, %v2747_v47 }
 0x20d   : > { %v1163_v53 = vmax.f32 %v1010_v48, 0.0  ;;  %6706 = vmatmul.msk.bf16.gmra.mxu0 %vm753_vm1, %v7744_v43  ;;  %v6771_v54 = vor.u32 %v7771_v51, %v6770_v50  ;;  %3276 = vst.msk [vmem:[#allocation5 + $0x28] sm:$0xf] %vm1295_vm4, %v3232_v49  ;;  %v2559_v49 = vpop.f32.mrf.mxu2 }
 0x20e   : > { %v1873_v55 = vld [vmem:[#allocation2 + $0x159] ss:$2 sm:$0xff]  ;;  %v1519_v56 = vld [vmem:[#allocation2 + $0x158] ss:$2 sm:$0xff]  ;;  %2835 = vst.msk [vmem:[#allocation5 + $0x30] sm:$0xf] %vm1295_vm4, %v2791_v52 }
 0x20f   : > { %v1342_v57 = vld [vmem:[#allocation2 + $0x157] ss:$2 sm:$0xff]  ;;  %v1939_v58 = vpack.c.bf16 %v1873_v55, %v1873_v55  ;;  %1252 = vst.msk [vmem:[#allocation2 + $0x168] sm:$0xff] %vm1207_vm3, %v1163_v53  ;;  %2452 = vmatmul.bf16.gmra.mxu1 %v6771_v54  ;;  %v1585_v59 = vpack.c.bf16 %v1519_v56, %v1519_v56 }
 0x210   : > { %v1408_v60 = vpack.c.bf16 %v1342_v57, %v1342_v57  ;;  %v7747_v57 = vld [vmem:[%s8551_s18 + $0x108] sm:$0xff] }
 0x211   : > { %1983 = vst.msk [vmem:[#allocation3 + $0xac] sm:$0xf] %vm1295_vm4, %v1939_v58  ;;  %v3629_v61 = vld [vmem:[#allocation4 + $0x2b] sm:$0xff]  ;;  %1694 = vrot.lane.b32.xlu0 %v1585_v59, %s8416_s25 }
 0x212   : > { %v3673_v62 = vpack.c.bf16 %v3629_v61, %v3629_v61  ;;  %v1011_v63 = vpop.f32.mrf.mxu0  ;;  %1452 = vst.msk [vmem:[#allocation3 + $0xa8] sm:$0xf] %vm1295_vm4, %v1408_v60  ;;  %v2748_v0 = vld [vmem:[#allocation4 + $0x2f] sm:$0xff] }
 0x213   : > { %v3189_v1 = vld [vmem:[#allocation4 + $0x29] sm:$0xff]  ;;  %v1012_v2 = vadd.f32 %v8816_v42, %v1011_v63  ;;  %v2792_v3 = vpack.c.bf16 %v2748_v0, %v2748_v0 }
 0x214   : > { %v3233_v4 = vpack.c.bf16 %v3189_v1, %v3189_v1  ;;  %3717 = vst.msk [vmem:[#allocation5 + $0x38] sm:$0xf] %vm1295_vm4, %v3673_v62 }
 0x215   : > { %v1164_v5 = vmax.f32 %v1012_v2, 0.0  ;;  %2836 = vst.msk [vmem:[#allocation5 + $0x3c] sm:$0xf] %vm1295_vm4, %v2792_v3 }
 0x216   : > { %3277 = vst.msk [vmem:[#allocation5 + $0x34] sm:$0xf] %vm1295_vm4, %v3233_v4 }
 0x217   : > { %1253 = vst.msk [vmem:[#allocation2 + $0x170] sm:$0xff] %vm1207_vm3, %v1164_v5 }
 0x218   : > { %v6804_v7 = vld [vmem:[#allocation3 + $0xa8] sm:$0xf0] }
 0x219   : > { %v6807_v8 = vor.u32 %v7778_v6, %v6804_v7 }
 0x21a   : > { %v1014_v10 = vpop.f32.mrf.mxu0 }
 0x21b   : > { %v1015_v12 = vadd.f32 %v8816_v42, %v1014_v10  ;;  %6954 = vmatmul.msk.bf16.gmra.mxu2 %vm1207_vm3, %v6807_v8 }
 0x21d   : > { %v1165_v13 = vmax.f32 %v1015_v12, 0.0  ;;  %6707 = vmatmul.msk.bf16.gmra.mxu0 %vm753_vm1, %v7745_v9 }
 0x21e   : > { %v1875_v14 = vld [vmem:[#allocation2 + $0x169] ss:$2 sm:$0xff]  ;;  %v1521_v15 = vld [vmem:[#allocation2 + $0x168] ss:$2 sm:$0xff] }
 0x21f   : > { %v1344_v16 = vld [vmem:[#allocation2 + $0x167] ss:$2 sm:$0xff]  ;;  %v1940_v17 = vpack.c.bf16 %v1875_v14, %v1875_v14  ;;  %1254 = vst.msk [vmem:[#allocation2 + $0x178] sm:$0xff] %vm1207_vm3, %v1165_v13  ;;  %v1586_v18 = vpack.c.bf16 %v1521_v15, %v1521_v15 }
 0x220   : > { %v1409_v19 = vpack.c.bf16 %v1344_v16, %v1344_v16 }
 0x221   : > { %1984 = vst.msk [vmem:[#allocation3 + $0xb4] sm:$0xf] %vm1295_vm4, %v1940_v17  ;;  %1696 = vrot.lane.b32.xlu1 %v1586_v18, %s8416_s25 }
 0x222   : > { %v1016_v20 = vpop.f32.mrf.mxu0  ;;  %1453 = vst.msk [vmem:[#allocation3 + $0xb0] sm:$0xf] %vm1295_vm4, %v1409_v19 }
 0x223   : > { %v1017_v21 = vadd.f32 %v8816_v42, %v1016_v20  ;;  %v1683_v22 = vpop.permute.xlu0 %1682 }
 0x224   : > { %1800 = vst.msk [vmem:[#allocation3 + $0x78] sm:$0xf] %vm1784_vm5, %v1683_v22  ;;  %v7748_v22 = vld [vmem:[%s8551_s18 + $0x110] sm:$0xff] }
 0x225   : > { %v1166_v23 = vmax.f32 %v1017_v21, 0.0  ;;  %v2562_v21 = vpop.f32.mrf.mxu2 }
 0x227   : > { %1255 = vst.msk [vmem:[#allocation2 + $0x180] sm:$0xff] %vm1207_vm3, %v1166_v23 }
 0x228   : > { %v7780_v53 = vld [vmem:[#allocation3 + $0xb4] sm:$0xf] }
 0x22a   : > { %v1019_v26 = vpop.f32.mrf.mxu0 }
 0x22b   : > { %v1020_v27 = vadd.f32 %v8816_v42, %v1019_v26  ;;  %v1687_v28 = vpop.permute.xlu2 %1686  ;;  %v2438_v29 = vpop.f32.mrf.mxu1  ;;  %v7773_v31 = vld [vmem:[#allocation3 + $0x74] sm:$0xf0] }
 0x22c   : > { %1802 = vst.msk [vmem:[#allocation3 + $0x88] sm:$0xf] %vm1784_vm5, %v1687_v28  ;;  %v2439_v32 = vadd.f32 %v8784_v46, %v2438_v29  ;;  %v6779_v33 = vor.u32 %v7773_v31, %v6778_v30 }
 0x22d   : > { %v1167_v34 = vmax.f32 %v1020_v27, 0.0  ;;  %6708 = vmatmul.msk.bf16.gmra.mxu0 %vm753_vm1, %v7746_v24 }
 0x22e   : > { %v1877_v35 = vld [vmem:[#allocation2 + $0x179] ss:$2 sm:$0xff]  ;;  %v2558_v36 = vadd.f32 %v2557_v25, %v2439_v32  ;;  %2457 = vmatmul.bf16.gmra.mxu1 %v6779_v33  ;;  %v1523_v37 = vld [vmem:[#allocation2 + $0x178] ss:$2 sm:$0xff] }
 0x22f   : > { %v1346_v38 = vld [vmem:[#allocation2 + $0x177] ss:$2 sm:$0xff]  ;;  %v1941_v39 = vpack.c.bf16 %v1877_v35, %v1877_v35  ;;  %1256 = vst.msk [vmem:[#allocation2 + $0x188] sm:$0xff] %vm1207_vm3, %v1167_v34  ;;  %v1587_v40 = vpack.c.bf16 %v1523_v37, %v1523_v37 }
 0x230   : > { %v1410_v41 = vpack.c.bf16 %v1346_v38, %v1346_v38  ;;  %v2658_v43 = vmax.f32 %v2558_v36, 0.0  ;;  %v2564_v36 = vpop.f32.mrf.mxu2 }
 0x231   : > { %1985 = vst.msk [vmem:[#allocation3 + $0xbc] sm:$0xf] %vm1295_vm4, %v1941_v39  ;;  %1698 = vrot.lane.b32.xlu2 %v1587_v40, %s8416_s25 }
 0x232   : > { %2702 = vst.msk [vmem:[#allocation4 + $0x38] sm:$0xff] %vm1207_vm3, %v2658_v43  ;;  %v1021_v44 = vpop.f32.mrf.mxu0 }
 0x233   : > { %v1022_v11 = vadd.f32 %v8816_v42, %v1021_v44  ;;  %v1685_v45 = vpop.permute.xlu1 %1684  ;;  %v2440_v47 = vpop.f32.mrf.mxu1  ;;  %1454 = vst.msk [vmem:[#allocation3 + $0xb8] sm:$0xf] %vm1295_vm4, %v1410_v41  ;;  %v7775_v0 = vld [vmem:[#allocation3 + $0x84] sm:$0xf0] }
 0x234   : > { %1801 = vst.msk [vmem:[#allocation3 + $0x80] sm:$0xf] %vm1784_vm5, %v1685_v45  ;;  %v2441_v48 = vadd.f32 %v8784_v46, %v2440_v47 }
 0x235   : > { %v1168_v50 = vmax.f32 %v1022_v11, 0.0 }
 0x236   : > { %v2560_v51 = vadd.f32 %v2559_v49, %v2441_v48 }
 0x237   : > { %1257 = vst.msk [vmem:[#allocation2 + $0x190] sm:$0xff] %vm1207_vm3, %v1168_v50  ;;  %v7749_v50 = vld [vmem:[%s8551_s18 + $0x118] sm:$0xff] }
 0x238   : > { %v2659_v52 = vmax.f32 %v2560_v51, 0.0  ;;  %v6812_v54 = vld [vmem:[#allocation3 + $0xb8] sm:$0xf0]  ;;  %v2567_v51 = vpop.f32.mrf.mxu2 }
 0x239   : > { %v3630_v55 = vld [vmem:[#allocation4 + $0x33] sm:$0xff]  ;;  %v6815_v56 = vor.u32 %v7780_v53, %v6812_v54 }
 0x23a   : > { %v3674_v58 = vpack.c.bf16 %v3630_v55, %v3630_v55  ;;  %2703 = vst.msk [vmem:[#allocation4 + $0x40] sm:$0xff] %vm1207_vm3, %v2659_v52  ;;  %v1024_v59 = vpop.f32.mrf.mxu0  ;;  %v2749_v60 = vld [vmem:[#allocation4 + $0x37] sm:$0xff] }
 0x23b   : > { %v3190_v61 = vld [vmem:[#allocation4 + $0x31] sm:$0xff]  ;;  %v1025_v62 = vadd.f32 %v8816_v42, %v1024_v59  ;;  %6955 = vmatmul.msk.bf16.gmra.mxu2 %vm1207_vm3, %v6815_v56  ;;  %v6786_v63 = vld [vmem:[#allocation3 + $0x80] sm:$0xf]  ;;  %v2793_v1 = vpack.c.bf16 %v2749_v60, %v2749_v60 }
 0x23c   : > { %3718 = vst.msk [vmem:[#allocation5 + $0x44] sm:$0xf] %vm1295_vm4, %v3674_v58  ;;  %v6787_v2 = vor.u32 %v7775_v0, %v6786_v63  ;;  %v3234_v3 = vpack.c.bf16 %v3190_v61, %v3190_v61 }
 0x23d   : > { %v1169_v4 = vmax.f32 %v1025_v62, 0.0  ;;  %6709 = vmatmul.msk.bf16.gmra.mxu0 %vm753_vm1, %v7747_v57  ;;  %2837 = vst.msk [vmem:[#allocation5 + $0x48] sm:$0xf] %vm1295_vm4, %v2793_v1 }
 0x23e   : > { %v1879_v5 = vld [vmem:[#allocation2 + $0x189] ss:$2 sm:$0xff]  ;;  %2462 = vmatmul.bf16.gmra.mxu1 %v6787_v2  ;;  %v1525_v6 = vld [vmem:[#allocation2 + $0x188] ss:$2 sm:$0xff]  ;;  %3278 = vst.msk [vmem:[#allocation5 + $0x40] sm:$0xf] %vm1295_vm4, %v3234_v3 }
 0x23f   : > { %v1348_v7 = vld [vmem:[#allocation2 + $0x187] ss:$2 sm:$0xff]  ;;  %v1942_v8 = vpack.c.bf16 %v1879_v5, %v1879_v5  ;;  %1258 = vst.msk [vmem:[#allocation2 + $0x198] sm:$0xff] %vm1207_vm3, %v1169_v4  ;;  %v1588_v9 = vpack.c.bf16 %v1525_v6, %v1525_v6 }
 0x240   : > { %v1411_v10 = vpack.c.bf16 %v1348_v7, %v1348_v7 }
 0x241   : > { %1986 = vst.msk [vmem:[#allocation3 + $0xc4] sm:$0xf] %vm1295_vm4, %v1942_v8  ;;  %v3631_v12 = vld [vmem:[#allocation4 + $0x3b] sm:$0xff]  ;;  %1700 = vrot.lane.b32.xlu0 %v1588_v9, %s8416_s25 }
 0x242   : > { %v3675_v13 = vpack.c.bf16 %v3631_v12, %v3631_v12  ;;  %v1026_v14 = vpop.f32.mrf.mxu0  ;;  %1455 = vst.msk [vmem:[#allocation3 + $0xc0] sm:$0xf] %vm1295_vm4, %v1411_v10  ;;  %v2750_v15 = vld [vmem:[#allocation4 + $0x3f] sm:$0xff] }
 0x243   : > { %v3191_v16 = vld [vmem:[#allocation4 + $0x39] sm:$0xff]  ;;  %v1027_v17 = vadd.f32 %v8816_v42, %v1026_v14  ;;  %v2794_v18 = vpack.c.bf16 %v2750_v15, %v2750_v15 }
 0x244   : > { %v3235_v19 = vpack.c.bf16 %v3191_v16, %v3191_v16  ;;  %3719 = vst.msk [vmem:[#allocation5 + $0x50] sm:$0xf] %vm1295_vm4, %v3675_v13 }
 0x245   : > { %v1170_v20 = vmax.f32 %v1027_v17, 0.0  ;;  %2838 = vst.msk [vmem:[#allocation5 + $0x54] sm:$0xf] %vm1295_vm4, %v2794_v18  ;;  %v2569_v18 = vpop.f32.mrf.mxu2 }
 0x246   : > { %3279 = vst.msk [vmem:[#allocation5 + $0x4c] sm:$0xf] %vm1295_vm4, %v3235_v19 }
 0x247   : > { %1259 = vst.msk [vmem:[#allocation2 + $0x1a0] sm:$0xff] %vm1207_vm3, %v1170_v20 }
 0x248   : > { %v7782_v45 = vld [vmem:[#allocation3 + $0xc4] sm:$0xf] }
 0x24a   : > { %v1029_v23 = vpop.f32.mrf.mxu0 }
 0x24b   : > { %v1030_v24 = vadd.f32 %v8816_v42, %v1029_v23  ;;  %v2443_v25 = vpop.f32.mrf.mxu1 }
 0x24c   : > { %v2444_v26 = vadd.f32 %v8784_v46, %v2443_v25 }
 0x24d   : > { %v1171_v27 = vmax.f32 %v1030_v24, 0.0  ;;  %6710 = vmatmul.msk.bf16.gmra.mxu0 %vm753_vm1, %v7748_v22  ;;  %v7750_v24 = vld [vmem:[%s8551_s18 + $0x120] sm:$0xff] }
 0x24e   : > { %v1881_v28 = vld [vmem:[#allocation2 + $0x199] ss:$2 sm:$0xff]  ;;  %v2563_v29 = vadd.f32 %v2562_v21, %v2444_v26  ;;  %v1527_v30 = vld [vmem:[#allocation2 + $0x198] ss:$2 sm:$0xff] }
 0x24f   : > { %v1350_v31 = vld [vmem:[#allocation2 + $0x197] ss:$2 sm:$0xff]  ;;  %v1943_v32 = vpack.c.bf16 %v1881_v28, %v1881_v28  ;;  %1260 = vst.msk [vmem:[#allocation2 + $0x1a8] sm:$0xff] %vm1207_vm3, %v1171_v27  ;;  %v1589_v33 = vpack.c.bf16 %v1527_v30, %v1527_v30 }
 0x250   : > { %v1412_v34 = vpack.c.bf16 %v1350_v31, %v1350_v31  ;;  %v2660_v35 = vmax.f32 %v2563_v29, 0.0 }
 0x251   : > { %1987 = vst.msk [vmem:[#allocation3 + $0xcc] sm:$0xf] %vm1295_vm4, %v1943_v32  ;;  %1702 = vrot.lane.b32.xlu1 %v1589_v33, %s8416_s25 }
 0x252   : > { %2704 = vst.msk [vmem:[#allocation4 + $0x48] sm:$0xff] %vm1207_vm3, %v2660_v35  ;;  %v1031_v37 = vpop.f32.mrf.mxu0 }
 0x253   : > { %v1032_v38 = vadd.f32 %v8816_v42, %v1031_v37  ;;  %v1689_v39 = vpop.permute.xlu0 %1688  ;;  %v2445_v40 = vpop.f32.mrf.mxu1  ;;  %1456 = vst.msk [vmem:[#allocation3 + $0xc8] sm:$0xf] %vm1295_vm4, %v1412_v34 }
 0x254   : > { %1803 = vst.msk [vmem:[#allocation3 + $0x90] sm:$0xf] %vm1784_vm5, %v1689_v39  ;;  %v2446_v41 = vadd.f32 %v8784_v46, %v2445_v40  ;;  %v7756_v39 = vld [vmem:[%s8551_s18 + $0x150] sm:$0xff] }
 0x255   : > { %v1172_v43 = vmax.f32 %v1032_v38, 0.0  ;;  %6718 = vmatmul.msk.bf16.vlgmr.msra.gmra.mxu3 %vm753_vm1, %v7756_v39  ;;  %v7753_v39 = vld [vmem:[%s8551_s18 + $0x138] sm:$0xff] }
 0x256   : > { %v2565_v44 = vadd.f32 %v2564_v36, %v2446_v41 }
 0x257   : > { %1261 = vst.msk [vmem:[#allocation2 + $0x1b0] sm:$0xff] %vm1207_vm3, %v1172_v43 }
 0x258   : > { %v2661_v11 = vmax.f32 %v2565_v44, 0.0  ;;  %v6820_v47 = vld [vmem:[#allocation3 + $0xc8] sm:$0xf0] }
 0x259   : > { %v3632_v48 = vld [vmem:[#allocation4 + $0x43] sm:$0xff]  ;;  %v6823_v49 = vor.u32 %v7782_v45, %v6820_v47 }
 0x25a   : > { %v3676_v52 = vpack.c.bf16 %v3632_v48, %v3632_v48  ;;  %2705 = vst.msk [vmem:[#allocation4 + $0x50] sm:$0xff] %vm1207_vm3, %v2661_v11  ;;  %v1034_v53 = vpop.f32.mrf.mxu0  ;;  %v3192_v54 = vld [vmem:[#allocation4 + $0x41] sm:$0xff]  ;;  %v8163_v11 = vld [vmem:[%s9765_s3 + $0x58] sm:$0xff] }
 0x25b   : > { %v1035_v55 = vadd.f32 %v8816_v42, %v1034_v53  ;;  %v1693_v56 = vpop.permute.xlu2 %1692  ;;  %v2448_v57 = vpop.f32.mrf.mxu1  ;;  %6956 = vmatmul.msk.bf16.gmra.mxu2 %vm1207_vm3, %v6823_v49  ;;  %v3236_v59 = vpack.c.bf16 %v3192_v54, %v3192_v54  ;;  %v2751_v6 = vld [vmem:[#allocation4 + $0x47] sm:$0xff]  ;;  %v6794_v31 = vld [vmem:[#allocation3 + $0x90] sm:$0xf]  ;;  %8069 = vmatpush.bf16.msra.mxu3 %v8163_v11 }
 0x25c   : > { %3720 = vst.msk [vmem:[#allocation5 + $0x5c] sm:$0xf] %vm1295_vm4, %v3676_v52  ;;  %v2449_v58 = vadd.f32 %v8784_v46, %v2448_v57  ;;  %v2795_v17 = vpack.c.bf16 %v2751_v6, %v2751_v6  ;;  %v8164_v52 = vld [vmem:[%s9765_s3 + $0x50] sm:$0xff] }
 0x25d   : > { %v1173_v60 = vmax.f32 %v1035_v55, 0.0  ;;  %1805 = vst.msk [vmem:[#allocation3 + $0xa0] sm:$0xf] %vm1784_vm5, %v1693_v56  ;;  %6711 = vmatmul.msk.bf16.gmra.mxu0 %vm753_vm1, %v7749_v50  ;;  %v7751_v56 = vld [vmem:[%s8551_s18 + $0x128] sm:$0xff] }
 0x25e   : > { %v1883_v61 = vld [vmem:[#allocation2 + $0x1a9] ss:$2 sm:$0xff]  ;;  %v2568_v62 = vadd.f32 %v2567_v51, %v2449_v58  ;;  %v1529_v63 = vld [vmem:[#allocation2 + $0x1a8] ss:$2 sm:$0xff]  ;;  %3280 = vst.msk [vmem:[#allocation5 + $0x58] sm:$0xf] %vm1295_vm4, %v3236_v59 }
 0x25f   : > { %v1352_v0 = vld [vmem:[#allocation2 + $0x1a7] ss:$2 sm:$0xff]  ;;  %v1944_v1 = vpack.c.bf16 %v1883_v61, %v1883_v61  ;;  %1262 = vst.msk [vmem:[#allocation2 + $0x1b8] sm:$0xff] %vm1207_vm3, %v1173_v60  ;;  %v1590_v2 = vpack.c.bf16 %v1529_v63, %v1529_v63  ;;  %8070 = vmatpush.bf16.msra.mxu3 %v8164_v52  ;;  %v7757_v63 = vld [vmem:[%s8551_s18 + $0x158] sm:$0x30] }
 0x260   : > { %v1413_v3 = vpack.c.bf16 %v1352_v0, %v1352_v0  ;;  %v2662_v4 = vmax.f32 %v2568_v62, 0.0  ;;  %2839 = vst.msk [vmem:[#allocation5 + $0x60] sm:$0xf] %vm1295_vm4, %v2795_v17  ;;  %v8165_v58 = vld [vmem:[%s9765_s3 + $0x48] sm:$0xff]  ;;  %v6674_v62 = vld [vmem:[%s8551_s18 + $0x158] sm:$0xf] }
 0x261   : > { %1988 = vst.msk [vmem:[#allocation3 + $0xd4] sm:$0xf] %vm1295_vm4, %v1944_v1  ;;  %v3633_v5 = vld [vmem:[#allocation4 + $0x4b] sm:$0xff]  ;;  %1704 = vrot.lane.b32.xlu1 %v1590_v2, %s8416_s25  ;;  %v8166_v0 = vld [vmem:[%s9765_s3 + $0x40] sm:$0xff]  ;;  %v6675_v2 = vor.u32 %v7757_v63, %v6674_v62 }
 0x262   : > { %v3677_v7 = vpack.c.bf16 %v3633_v5, %v3633_v5  ;;  %2706 = vst.msk [vmem:[#allocation4 + $0x58] sm:$0xff] %vm1207_vm3, %v2662_v4  ;;  %v1036_v8 = vpop.f32.mrf.mxu0  ;;  %v3193_v9 = vld [vmem:[#allocation4 + $0x49] sm:$0xff] }
 0x263   : > { %v2752_v10 = vld [vmem:[#allocation4 + $0x4f] sm:$0xff]  ;;  %v1037_v12 = vadd.f32 %v8816_v42, %v1036_v8  ;;  %v1691_v13 = vpop.permute.xlu1 %1690  ;;  %v2450_v14 = vpop.f32.mrf.mxu1  ;;  %1457 = vst.msk [vmem:[#allocation3 + $0xd0] sm:$0xf] %vm1295_vm4, %v1413_v3  ;;  %v3237_v15 = vpack.c.bf16 %v3193_v9, %v3193_v9  ;;  %8071 = vmatpush.bf16.msra.mxu3 %v8165_v58 }
 0x264   : > { %3721 = vst.msk [vmem:[#allocation5 + $0x68] sm:$0xf] %vm1295_vm4, %v3677_v7  ;;  %v2451_v16 = vadd.f32 %v8784_v46, %v2450_v14  ;;  %v2796_v20 = vpack.c.bf16 %v2752_v10, %v2752_v10  ;;  %v7752_v9 = vld [vmem:[%s8551_s18 + $0x130] sm:$0xff]  ;;  %v6802_v14 = vld [vmem:[#allocation3 + $0xa0] sm:$0xf] }
 0x265   : > { %v1174_v19 = vmax.f32 %v1037_v12, 0.0  ;;  %1804 = vst.msk [vmem:[#allocation3 + $0x98] sm:$0xf] %vm1784_vm5, %v1691_v13  ;;  %6719 = vmatmul.msk.bf16.gmra.mxu3 %vm753_vm1, %v6675_v2  ;;  %v7754_v2 = vld [vmem:[%s8551_s18 + $0x140] sm:$0xff] }
 0x266   : > { %v2570_v21 = vadd.f32 %v2569_v18, %v2451_v16  ;;  %3281 = vst.msk [vmem:[#allocation5 + $0x64] sm:$0xf] %vm1295_vm4, %v3237_v15  ;;  %v2572_v16 = vpop.f32.mrf.mxu2 }
 0x267   : > { %1263 = vst.msk [vmem:[#allocation2 + $0x1c0] sm:$0xff] %vm1207_vm3, %v1174_v19  ;;  %8072 = vmatpush.bf16.msra.mxu3 %v8166_v0 }
 0x268   : > { %v2663_v22 = vmax.f32 %v2570_v21, 0.0  ;;  %2840 = vst.msk [vmem:[#allocation5 + $0x6c] sm:$0xf] %vm1295_vm4, %v2796_v20  ;;  %v7784_v53 = vld [vmem:[#allocation3 + $0xd4] sm:$0xf] }
 0x269   : > { %v3634_v23 = vld [vmem:[#allocation4 + $0x53] sm:$0xff] }
 0x26a   : > { %v3678_v25 = vpack.c.bf16 %v3634_v23, %v3634_v23  ;;  %2707 = vst.msk [vmem:[#allocation4 + $0x60] sm:$0xff] %vm1207_vm3, %v2663_v22  ;;  %v1039_v26 = vpop.f32.mrf.mxu0  ;;  %v3194_v27 = vld [vmem:[#allocation4 + $0x51] sm:$0xff] }
 0x26b   : > { %v2753_v28 = vld [vmem:[#allocation4 + $0x57] sm:$0xff]  ;;  %v1040_v29 = vadd.f32 %v8816_v42, %v1039_v26  ;;  %v3238_v30 = vpack.c.bf16 %v3194_v27, %v3194_v27 }
 0x26c   : > { %3722 = vst.msk [vmem:[#allocation5 + $0x74] sm:$0xf] %vm1295_vm4, %v3678_v25  ;;  %v7777_v32 = vld [vmem:[#allocation3 + $0x94] sm:$0xf0]  ;;  %v2797_v33 = vpack.c.bf16 %v2753_v28, %v2753_v28 }
 0x26d   : > { %v1175_v34 = vmax.f32 %v1040_v29, 0.0  ;;  %6712 = vmatmul.msk.bf16.gmra.mxu0 %vm753_vm1, %v7750_v24  ;;  %v6795_v35 = vor.u32 %v7777_v32, %v6794_v31  ;;  %3282 = vst.msk [vmem:[#allocation5 + $0x70] sm:$0xf] %vm1295_vm4, %v3238_v30 }
 0x26e   : > { %v1885_v36 = vld [vmem:[#allocation2 + $0x1b9] ss:$2 sm:$0xff]  ;;  %2841 = vst.msk [vmem:[#allocation5 + $0x78] sm:$0xf] %vm1295_vm4, %v2797_v33  ;;  %v2574_v33 = vpop.f32.mrf.mxu2 }
 0x26f   : > { %v1354_v37 = vld [vmem:[#allocation2 + $0x1b7] ss:$2 sm:$0xff]  ;;  %v1945_v38 = vpack.c.bf16 %v1885_v36, %v1885_v36  ;;  %1264 = vst.msk [vmem:[#allocation2 + $0x1c8] sm:$0xff] %vm1207_vm3, %v1175_v34  ;;  %2467 = vmatmul.bf16.gmra.mxu1 %v6795_v35 }
 0x270   : > { %v1414_v40 = vpack.c.bf16 %v1354_v37, %v1354_v37 }
 0x271   : > { %1989 = vst.msk [vmem:[#allocation3 + $0xdc] sm:$0xf] %vm1295_vm4, %v1945_v38  ;;  %v3635_v41 = vld [vmem:[#allocation4 + $0x5b] sm:$0xff] }
 0x272   : > { %v3679_v43 = vpack.c.bf16 %v3635_v41, %v3635_v41  ;;  %v1041_v44 = vpop.f32.mrf.mxu0  ;;  %1458 = vst.msk [vmem:[#allocation3 + $0xd8] sm:$0xf] %vm1295_vm4, %v1414_v40  ;;  %v2754_v45 = vld [vmem:[#allocation4 + $0x5f] sm:$0xff] }
 0x273   : > { %v3195_v47 = vld [vmem:[#allocation4 + $0x59] sm:$0xff]  ;;  %v1042_v48 = vadd.f32 %v8816_v42, %v1041_v44  ;;  %v2798_v49 = vpack.c.bf16 %v2754_v45, %v2754_v45 }
 0x274   : > { %v3239_v50 = vpack.c.bf16 %v3195_v47, %v3195_v47  ;;  %3723 = vst.msk [vmem:[#allocation5 + $0x80] sm:$0xf] %vm1295_vm4, %v3679_v43 }
 0x275   : > { %v1176_v51 = vmax.f32 %v1042_v48, 0.0  ;;  %2842 = vst.msk [vmem:[#allocation5 + $0x84] sm:$0xf] %vm1295_vm4, %v2798_v49 }
 0x276   : > { %3283 = vst.msk [vmem:[#allocation5 + $0x7c] sm:$0xf] %vm1295_vm4, %v3239_v50 }
 0x277   : > { %1265 = vst.msk [vmem:[#allocation2 + $0x1d0] sm:$0xff] %vm1207_vm3, %v1176_v51 }
 0x278   : > { %v6828_v54 = vld [vmem:[#allocation3 + $0xd8] sm:$0xf0] }
 0x279   : > { %v6831_v55 = vor.u32 %v7784_v53, %v6828_v54 }
 0x27a   : > { %v1044_v57 = vpop.f32.mrf.mxu0 }
 0x27b   : > { %v1045_v59 = vadd.f32 %v8816_v42, %v1044_v57  ;;  %6957 = vmatmul.msk.bf16.gmra.mxu2 %vm1207_vm3, %v6831_v55 }
 0x27d   : > { %v1177_v60 = vmax.f32 %v1045_v59, 0.0  ;;  %6713 = vmatmul.msk.bf16.gmra.mxu0 %vm753_vm1, %v7751_v56 }
 0x27e   : > { %v1887_v61 = vld [vmem:[#allocation2 + $0x1c9] ss:$2 sm:$0xff] }
 0x27f   : > { %v1946_v1 = vpack.c.bf16 %v1887_v61, %v1887_v61  ;;  %1266 = vst.msk [vmem:[#allocation2 + $0x1d8] sm:$0xff] %vm1207_vm3, %v1177_v60  ;;  %v1356_v3 = vld [vmem:[#allocation2 + $0x1c7] ss:$2 sm:$0xff] }
 0x280   : > { %v1415_v4 = vpack.c.bf16 %v1356_v3, %v1356_v3 }
 0x281   : > { %1990 = vst.msk [vmem:[#allocation3 + $0xe4] sm:$0xf] %vm1295_vm4, %v1946_v1  ;;  %v2577_v1 = vpop.f32.mrf.mxu2 }
 0x282   : > { %v1046_v5 = vpop.f32.mrf.mxu0  ;;  %1459 = vst.msk [vmem:[#allocation3 + $0xe0] sm:$0xf] %vm1295_vm4, %v1415_v4 }
 0x283   : > { %v1047_v6 = vadd.f32 %v8816_v42, %v1046_v5  ;;  %v1695_v7 = vpop.permute.xlu0 %1694 }
 0x284   : > { %1806 = vst.msk [vmem:[#allocation3 + $0xa8] sm:$0xf] %vm1784_vm5, %v1695_v7 }
 0x285   : > { %v1178_v8 = vmax.f32 %v1047_v6, 0.0  ;;  %v9018_v6 = vld [vmem:[#allocation12] ss:$0 sm:$0xff] }
 0x287   : > { %1267 = vst.msk [vmem:[#allocation2 + $0x1e0] sm:$0xff] %vm1207_vm3, %v1178_v8 }
 0x288   : > { %v7786_v35 = vld [vmem:[#allocation3 + $0xe4] sm:$0xf] }
 0x28a   : > { %v1049_v10 = vpop.f32.mrf.mxu0 }
 0x28b   : > { %v1050_v12 = vadd.f32 %v8816_v42, %v1049_v10  ;;  %v1699_v13 = vpop.permute.xlu2 %1698  ;;  %v7779_v15 = vld [vmem:[#allocation3 + $0xa4] sm:$0xf0] }
 0x28c   : > { %1808 = vst.msk [vmem:[#allocation3 + $0xb8] sm:$0xf] %vm1784_vm5, %v1699_v13  ;;  %v2453_v17 = vpop.f32.mrf.mxu1  ;;  %v6803_v18 = vor.u32 %v7779_v15, %v6802_v14 }
 0x28d   : > { %v1179_v19 = vmax.f32 %v1050_v12, 0.0  ;;  %v2454_v20 = vadd.f32 %v8784_v46, %v2453_v17  ;;  %6714 = vmatmul.msk.bf16.gmra.mxu0 %vm753_vm1, %v7752_v9 }
 0x28e   : > { %v1889_v21 = vld [vmem:[#allocation2 + $0x1d9] ss:$2 sm:$0xff]  ;;  %2472 = vmatmul.bf16.gmra.mxu1 %v6803_v18 }
 0x28f   : > { %v1358_v22 = vld [vmem:[#allocation2 + $0x1d7] ss:$2 sm:$0xff]  ;;  %v1947_v23 = vpack.c.bf16 %v1889_v21, %v1889_v21  ;;  %1268 = vst.msk [vmem:[#allocation2 + $0x1e8] sm:$0xff] %vm1207_vm3, %v1179_v19  ;;  %v2573_v24 = vadd.f32 %v2572_v16, %v2454_v20  ;;  %v2579_v16 = vpop.f32.mrf.mxu2 }
 0x290   : > { %v1416_v25 = vpack.c.bf16 %v1358_v22, %v1358_v22 }
 0x291   : > { %1991 = vst.msk [vmem:[#allocation3 + $0xec] sm:$0xf] %vm1295_vm4, %v1947_v23  ;;  %v2664_v26 = vmax.f32 %v2573_v24, 0.0 }
 0x292   : > { %v1051_v27 = vpop.f32.mrf.mxu0  ;;  %1460 = vst.msk [vmem:[#allocation3 + $0xe8] sm:$0xf] %vm1295_vm4, %v1416_v25 }
 0x293   : > { %2708 = vst.msk [vmem:[#allocation4 + $0x68] sm:$0xff] %vm1207_vm3, %v2664_v26  ;;  %v1052_v28 = vadd.f32 %v8816_v42, %v1051_v27  ;;  %v1697_v29 = vpop.permute.xlu1 %1696 }
 0x294   : > { %1807 = vst.msk [vmem:[#allocation3 + $0xb0] sm:$0xf] %vm1784_vm5, %v1697_v29  ;;  %v2455_v30 = vpop.f32.mrf.mxu1  ;;  %v7755_v29 = vld [vmem:[%s8551_s18 + $0x148] sm:$0xff]  ;;  %s8074_s18 = smul.u32 88, %s9775_s13 }
 0x295   : > { %v1180_v31 = vmax.f32 %v1052_v28, 0.0  ;;  %v2456_v32 = vadd.f32 %v8784_v46, %v2455_v30  ;;  %v7781_v46 = vld [vmem:[#allocation3 + $0xb4] sm:$0xf0] }
 0x296   : > { %s9708_s17 = scalar_lea.vmem %s9771_s9, %s8074_s18 }
 0x297   : > { %1269 = vst.msk [vmem:[#allocation2 + $0x1f0] sm:$0xff] %vm1207_vm3, %v1180_v31  ;;  %v2575_v34 = vadd.f32 %v2574_v33, %v2456_v32  ;;  %v2582_v33 = vpop.f32.mrf.mxu2 }
 0x298   : > { %v6836_v36 = vld [vmem:[#allocation3 + $0xe8] sm:$0xf0] }
 0x299   : > { %v2665_v37 = vmax.f32 %v2575_v34, 0.0  ;;  %v6839_v38 = vor.u32 %v7786_v35, %v6836_v36  ;;  %v9032_v34 = vld [vmem:[#allocation10] ss:$0 sm:$0xff] }
 0x29a   : > { %v3636_v40 = vld [vmem:[#allocation4 + $0x63] sm:$0xff]  ;;  %v1054_v41 = vpop.f32.mrf.mxu0 }
 0x29b   : > { %v3680_v43 = vpack.c.bf16 %v3636_v40, %v3636_v40  ;;  %2709 = vst.msk [vmem:[#allocation4 + $0x70] sm:$0xff] %vm1207_vm3, %v2665_v37  ;;  %v1055_v44 = vadd.f32 %v8816_v42, %v1054_v41  ;;  %6958 = vmatmul.msk.bf16.gmra.mxu2 %vm1207_vm3, %v6839_v38  ;;  %v6810_v11 = vld [vmem:[#allocation3 + $0xb0] sm:$0xf]  ;;  %v2755_v45 = vld [vmem:[#allocation4 + $0x67] sm:$0xff] }
 0x29c   : > { %v6811_v47 = vor.u32 %v7781_v46, %v6810_v11  ;;  %v2799_v48 = vpack.c.bf16 %v2755_v45, %v2755_v45  ;;  %v3196_v49 = vld [vmem:[#allocation4 + $0x61] sm:$0xff] }
 0x29d   : > { %3724 = vst.msk [vmem:[#allocation5 + $0x8c] sm:$0xf] %vm1295_vm4, %v3680_v43  ;;  %v1181_v50 = vmax.f32 %v1055_v44, 0.0  ;;  %6715 = vmatmul.msk.bf16.gmra.mxu0 %vm753_vm1, %v7753_v39  ;;  %v3240_v55 = vpack.c.bf16 %v3196_v49, %v3196_v49 }
 0x29e   : > { %v1891_v51 = vld [vmem:[#allocation2 + $0x1e9] ss:$2 sm:$0xff]  ;;  %2477 = vmatmul.bf16.gmra.mxu1 %v6811_v47  ;;  %2843 = vst.msk [vmem:[#allocation5 + $0x90] sm:$0xf] %vm1295_vm4, %v2799_v48 }
 0x29f   : > { %v1360_v52 = vld [vmem:[#allocation2 + $0x1e7] ss:$2 sm:$0xff]  ;;  %v1948_v53 = vpack.c.bf16 %v1891_v51, %v1891_v51  ;;  %1270 = vst.msk [vmem:[#allocation2 + $0x1f8] sm:$0xff] %vm1207_vm3, %v1181_v50 }
 0x2a0   : > { %v1417_v54 = vpack.c.bf16 %v1360_v52, %v1360_v52  ;;  %3284 = vst.msk [vmem:[#allocation5 + $0x88] sm:$0xf] %vm1295_vm4, %v3240_v55  ;;  %v7895_v48 = vld [vmem:[#allocation13 + $0x78] sm:$0xff] }
 0x2a1   : > { %1992 = vst.msk [vmem:[#allocation3 + $0xf4] sm:$0xf] %vm1295_vm4, %v1948_v53  ;;  %4524 = vmatpush.bf16.msrb.mxu2 %v7895_v48 }
 0x2a2   : > { %v3637_v56 = vld [vmem:[#allocation4 + $0x6b] sm:$0xff]  ;;  %v1056_v57 = vpop.f32.mrf.mxu0  ;;  %1461 = vst.msk [vmem:[#allocation3 + $0xf0] sm:$0xf] %vm1295_vm4, %v1417_v54 }
 0x2a3   : > { %v3681_v58 = vpack.c.bf16 %v3637_v56, %v3637_v56  ;;  %v1057_v59 = vadd.f32 %v8816_v42, %v1056_v57  ;;  %v2756_v60 = vld [vmem:[#allocation4 + $0x6f] sm:$0xff] }
 0x2a4   : > { %v3197_v61 = vld [vmem:[#allocation4 + $0x69] sm:$0xff]  ;;  %v2800_v62 = vpack.c.bf16 %v2756_v60, %v2756_v60 }
 0x2a5   : > { %v3241_v63 = vpack.c.bf16 %v3197_v61, %v3197_v61  ;;  %3725 = vst.msk [vmem:[#allocation5 + $0x98] sm:$0xf] %vm1295_vm4, %v3681_v58  ;;  %v1182_v0 = vmax.f32 %v1057_v59, 0.0  ;;  %v2584_v59 = vpop.f32.mrf.mxu2 }
 0x2a6   : > { %2844 = vst.msk [vmem:[#allocation5 + $0x9c] sm:$0xf] %vm1295_vm4, %v2800_v62 }
 0x2a7   : > { %1271 = vst.msk [vmem:[#allocation2 + $0x200] sm:$0xff] %vm1207_vm3, %v1182_v0 }
 0x2a8   : > { %3285 = vst.msk [vmem:[#allocation5 + $0x94] sm:$0xf] %vm1295_vm4, %v3241_v63  ;;  %v7788_v25 = vld [vmem:[#allocation3 + $0xf4] sm:$0xf] }
 0x2aa   : > { %v1059_v3 = vpop.f32.mrf.mxu0 }
 0x2ab   : > { %v1060_v4 = vadd.f32 %v8816_v42, %v1059_v3  ;;  %v2458_v5 = vpop.f32.mrf.mxu1 }
 0x2ac   : > { %v2459_v7 = vadd.f32 %v9018_v6, %v2458_v5 }
 0x2ad   : > { %v1183_v8 = vmax.f32 %v1060_v4, 0.0  ;;  %6716 = vmatmul.msk.bf16.gmra.mxu0 %vm753_vm1, %v7754_v2 }
 0x2ae   : > { %v1893_v9 = vld [vmem:[#allocation2 + $0x1f9] ss:$2 sm:$0xff]  ;;  %v2578_v10 = vadd.f32 %v2577_v1, %v2459_v7 }
 0x2af   : > { %v1362_v12 = vld [vmem:[#allocation2 + $0x1f7] ss:$2 sm:$0xff]  ;;  %v1949_v13 = vpack.c.bf16 %v1893_v9, %v1893_v9  ;;  %1272 = vst.msk [vmem:[#allocation2 + $0x208] sm:$0xff] %vm1207_vm3, %v1183_v8 }
 0x2b0   : > { %v1418_v14 = vpack.c.bf16 %v1362_v12, %v1362_v12  ;;  %v2666_v15 = vmax.f32 %v2578_v10, 0.0 }
 0x2b1   : > { %1993 = vst.msk [vmem:[#allocation3 + $0xfc] sm:$0xf] %vm1295_vm4, %v1949_v13 }
 0x2b2   : > { %2710 = vst.msk [vmem:[#allocation4 + $0x78] sm:$0xff] %vm1207_vm3, %v2666_v15  ;;  %v1061_v17 = vpop.f32.mrf.mxu0 }
 0x2b3   : > { %v1062_v18 = vadd.f32 %v8816_v42, %v1061_v17  ;;  %v1701_v19 = vpop.permute.xlu0 %1700  ;;  %v2460_v20 = vpop.f32.mrf.mxu1  ;;  %1462 = vst.msk [vmem:[#allocation3 + $0xf8] sm:$0xf] %vm1295_vm4, %v1418_v14 }
 0x2b4   : > { %1809 = vst.msk [vmem:[#allocation3 + $0xc0] sm:$0xf] %vm1784_vm5, %v1701_v19  ;;  %v2461_v21 = vadd.f32 %v9018_v6, %v2460_v20 }
 0x2b5   : > { %v1184_v22 = vmax.f32 %v1062_v18, 0.0 }
 0x2b6   : > { %v2580_v23 = vadd.f32 %v2579_v16, %v2461_v21 }
 0x2b7   : > { %1273 = vst.msk [vmem:[#allocation2 + $0x210] sm:$0xff] %vm1207_vm3, %v1184_v22 }
 0x2b8   : > { %v2667_v24 = vmax.f32 %v2580_v23, 0.0  ;;  %v6844_v26 = vld [vmem:[#allocation3 + $0xf8] sm:$0xf0] }
 0x2b9   : > { %v3638_v27 = vld [vmem:[#allocation4 + $0x73] sm:$0xff]  ;;  %v6847_v28 = vor.u32 %v7788_v25, %v6844_v26 }
 0x2ba   : > { %v3682_v30 = vpack.c.bf16 %v3638_v27, %v3638_v27  ;;  %2711 = vst.msk [vmem:[#allocation4 + $0x80] sm:$0xff] %vm1207_vm3, %v2667_v24  ;;  %v1064_v42 = vpop.f32.mrf.mxu0  ;;  %v3198_v31 = vld [vmem:[#allocation4 + $0x71] sm:$0xff] }
 0x2bb   : > { %v2757_v32 = vld [vmem:[#allocation4 + $0x77] sm:$0xff]  ;;  %v1065_v35 = vadd.f32 %v9032_v34, %v1064_v42  ;;  %v2463_v36 = vpop.f32.mrf.mxu1  ;;  %6959 = vmatmul.msk.bf16.gmra.mxu2 %vm1207_vm3, %v6847_v28  ;;  %v3242_v37 = vpack.c.bf16 %v3198_v31, %v3198_v31  ;;  %v6818_v7 = vld [vmem:[#allocation3 + $0xc0] sm:$0xf] }
 0x2bc   : > { %3726 = vst.msk [vmem:[#allocation5 + $0xa4] sm:$0xf] %vm1295_vm4, %v3682_v30  ;;  %v2464_v38 = vadd.f32 %v9018_v6, %v2463_v36  ;;  %v2801_v39 = vpack.c.bf16 %v2757_v32, %v2757_v32  ;;  %v7899_v32 = vld [vmem:[#allocation13 + $0x98] sm:$0xff] }
 0x2bd   : > { %v1185_v40 = vmax.f32 %v1065_v35, 0.0  ;;  %6717 = vmatmul.msk.bf16.gmra.mxu0 %vm753_vm1, %v7755_v29  ;;  %3286 = vst.msk [vmem:[#allocation5 + $0xa0] sm:$0xf] %vm1295_vm4, %v3242_v37  ;;  %4647 = vmatpush.bf16.msrb.mxu1 %v7899_v32 }
 0x2be   : > { %v1895_v41 = vld [vmem:[#allocation2 + $0x209] ss:$2 sm:$0xff]  ;;  %v2583_v43 = vadd.f32 %v2582_v33, %v2464_v38  ;;  %2845 = vst.msk [vmem:[#allocation5 + $0xa8] sm:$0xf] %vm1295_vm4, %v2801_v39 }
 0x2bf   : > { %v1364_v44 = vld [vmem:[#allocation2 + $0x207] ss:$2 sm:$0xff]  ;;  %v1950_v11 = vpack.c.bf16 %v1895_v41, %v1895_v41  ;;  %1274 = vst.msk [vmem:[#allocation2 + $0x218] sm:$0xff] %vm1207_vm3, %v1185_v40 }
 0x2c0   : > { %v1419_v46 = vpack.c.bf16 %v1364_v44, %v1364_v44  ;;  %v2668_v45 = vmax.f32 %v2583_v43, 0.0  ;;  %v7894_v41 = vld [vmem:[#allocation13 + $0x70] sm:$0xff] }
 0x2c1   : > { %1994 = vst.msk [vmem:[#allocation3 + $0x104] sm:$0xf] %vm1295_vm4, %v1950_v11  ;;  %v3639_v47 = vld [vmem:[#allocation4 + $0x7b] sm:$0xff]  ;;  %4525 = vmatpush.bf16.msrb.mxu2 %v7894_v41  ;;  %v2587_v11 = vpop.f32.mrf.mxu2 }
 0x2c2   : > { %v3683_v49 = vpack.c.bf16 %v3639_v47, %v3639_v47  ;;  %2712 = vst.msk [vmem:[#allocation4 + $0x88] sm:$0xff] %vm1207_vm3, %v2668_v45  ;;  %v1066_v50 = vpop.f32.mrf.mxu0  ;;  %v3199_v51 = vld [vmem:[#allocation4 + $0x79] sm:$0xff] }
 0x2c3   : > { %v2758_v52 = vld [vmem:[#allocation4 + $0x7f] sm:$0xff]  ;;  %v1067_v53 = vadd.f32 %v9032_v34, %v1066_v50  ;;  %v1703_v54 = vpop.permute.xlu1 %1702  ;;  %v2465_v55 = vpop.f32.mrf.mxu1  ;;  %1463 = vst.msk [vmem:[#allocation3 + $0x100] sm:$0xf] %vm1295_vm4, %v1419_v46  ;;  %v3243_v56 = vpack.c.bf16 %v3199_v51, %v3199_v51 }
 0x2c4   : > { %3727 = vst.msk [vmem:[#allocation5 + $0xb0] sm:$0xf] %vm1295_vm4, %v3683_v49  ;;  %v2466_v57 = vadd.f32 %v9018_v6, %v2465_v55  ;;  %v2802_v58 = vpack.c.bf16 %v2758_v52, %v2758_v52 }
 0x2c5   : > { %v1186_v60 = vmax.f32 %v1067_v53, 0.0  ;;  %1810 = vst.msk [vmem:[#allocation3 + $0xc8] sm:$0xf] %vm1784_vm5, %v1703_v54 }
 0x2c6   : > { %v2585_v61 = vadd.f32 %v2584_v59, %v2466_v57  ;;  %3287 = vst.msk [vmem:[#allocation5 + $0xac] sm:$0xf] %vm1295_vm4, %v3243_v56 }
 0x2c7   : > { %1275 = vst.msk [vmem:[#allocation2 + $0x220] sm:$0xff] %vm1207_vm3, %v1186_v60 }
 0x2c8   : > { %v2669_v62 = vmax.f32 %v2585_v61, 0.0  ;;  %2846 = vst.msk [vmem:[#allocation5 + $0xb4] sm:$0xf] %vm1295_vm4, %v2802_v58  ;;  %v7790_v27 = vld [vmem:[#allocation3 + $0x104] sm:$0xf] }
 0x2c9   : > { %v3640_v63 = vld [vmem:[#allocation4 + $0x83] sm:$0xff]  ;;  %v2589_v60 = vpop.f32.mrf.mxu2 }
 0x2ca   : > { %v3684_v0 = vpack.c.bf16 %v3640_v63, %v3640_v63  ;;  %2713 = vst.msk [vmem:[#allocation4 + $0x90] sm:$0xff] %vm1207_vm3, %v2669_v62  ;;  %v1069_v1 = vpop.f32.mrf.mxu0  ;;  %v3200_v2 = vld [vmem:[#allocation4 + $0x81] sm:$0xff] }
 0x2cb   : > { %v2759_v3 = vld [vmem:[#allocation4 + $0x87] sm:$0xff]  ;;  %v1070_v4 = vadd.f32 %v9032_v34, %v1069_v1  ;;  %v3244_v5 = vpack.c.bf16 %v3200_v2, %v3200_v2 }
 0x2cc   : > { %3728 = vst.msk [vmem:[#allocation5 + $0xbc] sm:$0xf] %vm1295_vm4, %v3684_v0  ;;  %v7783_v8 = vld [vmem:[#allocation3 + $0xc4] sm:$0xf0]  ;;  %v2803_v9 = vpack.c.bf16 %v2759_v3, %v2759_v3 }
 0x2cd   : > { %v1187_v10 = vmax.f32 %v1070_v4, 0.0  ;;  %v6819_v12 = vor.u32 %v7783_v8, %v6818_v7  ;;  %3288 = vst.msk [vmem:[#allocation5 + $0xb8] sm:$0xf] %vm1295_vm4, %v3244_v5 }
 0x2ce   : > { %v1897_v13 = vld [vmem:[#allocation2 + $0x219] ss:$2 sm:$0xff]  ;;  %2847 = vst.msk [vmem:[#allocation5 + $0xc0] sm:$0xf] %vm1295_vm4, %v2803_v9 }
 0x2cf   : > { %v1366_v14 = vld [vmem:[#allocation2 + $0x217] ss:$2 sm:$0xff]  ;;  %v1951_v15 = vpack.c.bf16 %v1897_v13, %v1897_v13  ;;  %1276 = vst.msk [vmem:[#allocation2 + $0x228] sm:$0xff] %vm1207_vm3, %v1187_v10  ;;  %2482 = vmatmul.bf16.gmra.mxu1 %v6819_v12 }
 0x2d0   : > { %v1420_v16 = vpack.c.bf16 %v1366_v14, %v1366_v14 }
 0x2d1   : > { %1995 = vst.msk [vmem:[#allocation3 + $0x10c] sm:$0xf] %vm1295_vm4, %v1951_v15  ;;  %v3641_v17 = vld [vmem:[#allocation4 + $0x8b] sm:$0xff] }
 0x2d2   : > { %v3685_v18 = vpack.c.bf16 %v3641_v17, %v3641_v17  ;;  %v1071_v19 = vpop.f32.mrf.mxu0  ;;  %1464 = vst.msk [vmem:[#allocation3 + $0x108] sm:$0xf] %vm1295_vm4, %v1420_v16  ;;  %v2760_v20 = vld [vmem:[#allocation4 + $0x8f] sm:$0xff] }
 0x2d3   : > { %v3201_v21 = vld [vmem:[#allocation4 + $0x89] sm:$0xff]  ;;  %v1072_v22 = vadd.f32 %v9032_v34, %v1071_v19  ;;  %v1705_v23 = vpop.permute.xlu1 %1704  ;;  %v2804_v24 = vpack.c.bf16 %v2760_v20, %v2760_v20 }
 0x2d4   : > { %3729 = vst.msk [vmem:[#allocation5 + $0xc8] sm:$0xf] %vm1295_vm4, %v3685_v18  ;;  %v3245_v25 = vpack.c.bf16 %v3201_v21, %v3201_v21 }
 0x2d5   : > { %v1188_v26 = vmax.f32 %v1072_v22, 0.0  ;;  %1811 = vst.msk [vmem:[#allocation3 + $0xd0] sm:$0xf] %vm1784_vm5, %v1705_v23 }
 0x2d6   : > { %2848 = vst.msk [vmem:[#allocation5 + $0xcc] sm:$0xf] %vm1295_vm4, %v2804_v24 }
 0x2d7   : > { %1277 = vst.msk [vmem:[#allocation2 + $0x230] sm:$0xff] %vm1207_vm3, %v1188_v26 }
 0x2d8   : > { %v6852_v28 = vld [vmem:[#allocation3 + $0x108] sm:$0xf0]  ;;  %3289 = vst.msk [vmem:[#allocation5 + $0xc4] sm:$0xf] %vm1295_vm4, %v3245_v25  ;;  %v1109_v57 = vpop.f32.mrf.mxu3 }
 0x2d9   : > { %v6855_v29 = vor.u32 %v7790_v27, %v6852_v28  ;;  %v1110_v18 = vadd.f32 %v9032_v34, %v1109_v57 }
 0x2da   : > { %v1074_v30 = vpop.f32.mrf.mxu0 }
 0x2db   : > { %v1075_v42 = vadd.f32 %v9032_v34, %v1074_v30  ;;  %6960 = vmatmul.msk.bf16.gmra.mxu2 %vm1207_vm3, %v6855_v29  ;;  %v1203_v23 = vmax.f32 %v1110_v18, 0.0 }
 0x2dd   : > { %v1189_v31 = vmax.f32 %v1075_v42, 0.0  ;;  %1292 = vst.msk [vmem:[#allocation2 + $0x2a8] sm:$0xff] %vm1207_vm3, %v1203_v23 }
 0x2de   : > { %v1899_v33 = vld [vmem:[#allocation2 + $0x229] ss:$2 sm:$0xff] }
 0x2df   : > { %v1368_v35 = vld [vmem:[#allocation2 + $0x227] ss:$2 sm:$0xff]  ;;  %v1952_v36 = vpack.c.bf16 %v1899_v33, %v1899_v33  ;;  %1278 = vst.msk [vmem:[#allocation2 + $0x238] sm:$0xff] %vm1207_vm3, %v1189_v31  ;;  %v2592_v31 = vpop.f32.mrf.mxu2 }
 0x2e0   : > { %v1421_v37 = vpack.c.bf16 %v1368_v35, %v1368_v35  ;;  %v1111_v8 = vpop.f32.mrf.mxu3 }
 0x2e1   : > { %1996 = vst.msk [vmem:[#allocation3 + $0x114] sm:$0xf] %vm1295_vm4, %v1952_v36  ;;  %v1112_v26 = vadd.f32 %v9032_v34, %v1111_v8 }
 0x2e2   : > { %v1076_v38 = vpop.f32.mrf.mxu0  ;;  %1465 = vst.msk [vmem:[#allocation3 + $0x110] sm:$0xf] %vm1295_vm4, %v1421_v37 }
 0x2e3   : > { %v1077_v39 = vadd.f32 %v9032_v34, %v1076_v38  ;;  %v1204_v30 = vmax.f32 %v1112_v26, 0.0 }
 0x2e5   : > { %v1190_v40 = vmax.f32 %v1077_v39, 0.0  ;;  %1293 = vst.msk [vmem:[#allocation2 + $0x2b0] sm:$0xff] %vm1207_vm3, %v1204_v30 }
 0x2e7   : > { %1279 = vst.msk [vmem:[#allocation2 + $0x240] sm:$0xff] %vm1207_vm3, %v1190_v40 }
 0x2e8   : > { %v7792_v62 = vld [vmem:[#allocation3 + $0x114] sm:$0xf]  ;;  %v1114_v27 = vpop.f32.mrf.mxu3 }
 0x2e9   : > { %v1115_v39 = vadd.f32 %v9032_v34, %v1114_v27 }
 0x2ea   : > { %v1079_v43 = vpop.f32.mrf.mxu0 }
 0x2eb   : > { %v1080_v44 = vadd.f32 %v9032_v34, %v1079_v43 }
 0x2ec   : > { %v2468_v46 = vpop.f32.mrf.mxu1 }
 0x2ed   : > { %v1191_v45 = vmax.f32 %v1080_v44, 0.0  ;;  %v2469_v47 = vadd.f32 %v9018_v6, %v2468_v46 }
 0x2ee   : > { %v1901_v48 = vld [vmem:[#allocation2 + $0x239] ss:$2 sm:$0xff] }
 0x2ef   : > { %v1370_v49 = vld [vmem:[#allocation2 + $0x237] ss:$2 sm:$0xff]  ;;  %v1953_v50 = vpack.c.bf16 %v1901_v48, %v1901_v48  ;;  %1280 = vst.msk [vmem:[#allocation2 + $0x248] sm:$0xff] %vm1207_vm3, %v1191_v45  ;;  %v2588_v51 = vadd.f32 %v2587_v11, %v2469_v47  ;;  %v1205_v48 = vmax.f32 %v1115_v39, 0.0 }
 0x2f0   : > { %v1422_v52 = vpack.c.bf16 %v1370_v49, %v1370_v49  ;;  %v1116_v37 = vpop.f32.mrf.mxu3  ;;  %v1915_v11 = vld [vmem:[#allocation2 + $0x2a9] ss:$2 sm:$0xff] }
 0x2f1   : > { %1997 = vst.msk [vmem:[#allocation3 + $0x11c] sm:$0xf] %vm1295_vm4, %v1953_v50  ;;  %v2670_v53 = vmax.f32 %v2588_v51, 0.0  ;;  %v1117_v40 = vadd.f32 %v9032_v34, %v1116_v37  ;;  %v1960_v47 = vpack.c.bf16 %v1915_v11, %v1915_v11 }
 0x2f2   : > { %v1081_v54 = vpop.f32.mrf.mxu0  ;;  %1466 = vst.msk [vmem:[#allocation3 + $0x118] sm:$0xf] %vm1295_vm4, %v1422_v52  ;;  %v2594_v52 = vpop.f32.mrf.mxu2 }
 0x2f3   : > { %2714 = vst.msk [vmem:[#allocation4 + $0x98] sm:$0xff] %vm1207_vm3, %v2670_v53  ;;  %v1082_v55 = vadd.f32 %v9032_v34, %v1081_v54  ;;  %v1206_v49 = vmax.f32 %v1117_v40, 0.0 }
 0x2f4   : > { %v2470_v56 = vpop.f32.mrf.mxu1  ;;  %2004 = vst.msk [vmem:[#allocation3 + $0x154] sm:$0xf] %vm1295_vm4, %v1960_v47 }
 0x2f5   : > { %v1192_v58 = vmax.f32 %v1082_v55, 0.0  ;;  %v2471_v59 = vadd.f32 %v9018_v6, %v2470_v56  ;;  %1294 = vst.msk [vmem:[#allocation2 + $0x2b8] sm:$0xff] %vm1207_vm3, %v1205_v48  ;;  %v7893_v56 = vld [vmem:[#allocation13 + $0x68] sm:$0xff] }
 0x2f6   : > { %1296 = vst.msk [vmem:[#allocation2 + $0x2c0] sm:$0xf] %vm1295_vm4, %v1206_v49  ;;  %4526 = vmatpush.bf16.msrb.mxu2 %v7893_v56 }
 0x2f7   : > { %1281 = vst.msk [vmem:[#allocation2 + $0x250] sm:$0xff] %vm1207_vm3, %v1192_v58  ;;  %v2590_v61 = vadd.f32 %v2589_v60, %v2471_v59 }
 0x2f8   : > { %v6860_v63 = vld [vmem:[#allocation3 + $0x118] sm:$0xf0] }
 0x2f9   : > { %v2671_v0 = vmax.f32 %v2590_v61, 0.0  ;;  %v6863_v1 = vor.u32 %v7792_v62, %v6860_v63 }
 0x2fa   : > { %v3642_v2 = vld [vmem:[#allocation4 + $0x93] sm:$0xff]  ;;  %v1084_v3 = vpop.f32.mrf.mxu0 }
 0x2fb   : > { %v3686_v4 = vpack.c.bf16 %v3642_v2, %v3642_v2  ;;  %2715 = vst.msk [vmem:[#allocation4 + $0xa0] sm:$0xff] %vm1207_vm3, %v2671_v0  ;;  %v1085_v5 = vadd.f32 %v9032_v34, %v1084_v3  ;;  %6961 = vmatmul.msk.bf16.gmra.mxu2 %vm1207_vm3, %v6863_v1  ;;  %v2761_v7 = vld [vmem:[#allocation4 + $0x97] sm:$0xff] }
 0x2fc   : > { %v2805_v9 = vpack.c.bf16 %v2761_v7, %v2761_v7  ;;  %v3202_v10 = vld [vmem:[#allocation4 + $0x91] sm:$0xff] }
 0x2fd   : > { %3730 = vst.msk [vmem:[#allocation5 + $0xd4] sm:$0xf] %vm1295_vm4, %v3686_v4  ;;  %v1193_v12 = vmax.f32 %v1085_v5, 0.0  ;;  %v3246_v17 = vpack.c.bf16 %v3202_v10, %v3202_v10  ;;  %v2597_v4 = vpop.f32.mrf.mxu2  ;;  %v1563_v56 = vld [vmem:[#allocation2 + $0x2b8] ss:$2 sm:$0x3f] }
 0x2fe   : > { %v1903_v13 = vld [vmem:[#allocation2 + $0x249] ss:$2 sm:$0xff]  ;;  %2849 = vst.msk [vmem:[#allocation5 + $0xd8] sm:$0xf] %vm1295_vm4, %v2805_v9 }
 0x2ff   : > { %v1372_v14 = vld [vmem:[#allocation2 + $0x247] ss:$2 sm:$0xff]  ;;  %v1954_v15 = vpack.c.bf16 %v1903_v13, %v1903_v13  ;;  %1282 = vst.msk [vmem:[#allocation2 + $0x258] sm:$0xff] %vm1207_vm3, %v1193_v12 }
 0x300   : > { %v1423_v16 = vpack.c.bf16 %v1372_v14, %v1372_v14  ;;  %3290 = vst.msk [vmem:[#allocation5 + $0xd0] sm:$0xf] %vm1295_vm4, %v3246_v17 }
 0x301   : > { %1998 = vst.msk [vmem:[#allocation3 + $0x124] sm:$0xf] %vm1295_vm4, %v1954_v15 }
 0x302   : > { %v3643_v19 = vld [vmem:[#allocation4 + $0x9b] sm:$0xff]  ;;  %v1086_v20 = vpop.f32.mrf.mxu0  ;;  %1467 = vst.msk [vmem:[#allocation3 + $0x120] sm:$0xf] %vm1295_vm4, %v1423_v16 }
 0x303   : > { %v3687_v21 = vpack.c.bf16 %v3643_v19, %v3643_v19  ;;  %v1087_v22 = vadd.f32 %v9032_v34, %v1086_v20  ;;  %v2762_v24 = vld [vmem:[#allocation4 + $0x9f] sm:$0xff] }
 0x304   : > { %v3203_v25 = vld [vmem:[#allocation4 + $0x99] sm:$0xff]  ;;  %v2806_v29 = vpack.c.bf16 %v2762_v24, %v2762_v24 }
 0x305   : > { %3731 = vst.msk [vmem:[#allocation5 + $0xe0] sm:$0xf] %vm1295_vm4, %v3687_v21  ;;  %v1194_v28 = vmax.f32 %v1087_v22, 0.0  ;;  %v3247_v42 = vpack.c.bf16 %v3203_v25, %v3203_v25  ;;  %v7898_v22 = vld [vmem:[#allocation13 + $0x90] sm:$0xff] }
 0x306   : > { %2850 = vst.msk [vmem:[#allocation5 + $0xe4] sm:$0xf] %vm1295_vm4, %v2806_v29  ;;  %4648 = vmatpush.bf16.msrb.mxu1 %v7898_v22 }
 0x307   : > { %1283 = vst.msk [vmem:[#allocation2 + $0x260] sm:$0xff] %vm1207_vm3, %v1194_v28 }
 0x308   : > { %3291 = vst.msk [vmem:[#allocation5 + $0xdc] sm:$0xf] %vm1295_vm4, %v3247_v42  ;;  %v7794_v60 = vld [vmem:[#allocation3 + $0x124] sm:$0xf]  ;;  %v1531_v42 = vld [vmem:[#allocation2 + $0x1b8] ss:$2 sm:$0xff] }
 0x30a   : > { %v1089_v32 = vpop.f32.mrf.mxu0 }
 0x30b   : > { %v1090_v33 = vadd.f32 %v9032_v34, %v1089_v32  ;;  %v2473_v35 = vpop.f32.mrf.mxu1  ;;  %v2599_v32 = vpop.f32.mrf.mxu2 }
 0x30c   : > { %v2474_v36 = vadd.f32 %v9018_v6, %v2473_v35 }
 0x30d   : > { %v1195_v38 = vmax.f32 %v1090_v33, 0.0 }
 0x30e   : > { %v1905_v41 = vld [vmem:[#allocation2 + $0x259] ss:$2 sm:$0xff]  ;;  %v2593_v43 = vadd.f32 %v2592_v31, %v2474_v36  ;;  %v1591_v36 = vpack.c.bf16 %v1531_v42, %v1531_v42 }
 0x30f   : > { %v1955_v44 = vpack.c.bf16 %v1905_v41, %v1905_v41  ;;  %1284 = vst.msk [vmem:[#allocation2 + $0x268] sm:$0xff] %vm1207_vm3, %v1195_v38  ;;  %v1374_v46 = vld [vmem:[#allocation2 + $0x257] ss:$2 sm:$0xff] }
 0x310   : > { %v2672_v45 = vmax.f32 %v2593_v43, 0.0  ;;  %v1424_v51 = vpack.c.bf16 %v1374_v46, %v1374_v46  ;;  %v1533_v46 = vld [vmem:[#allocation2 + $0x1c8] ss:$2 sm:$0xff] }
 0x311   : > { %1999 = vst.msk [vmem:[#allocation3 + $0x12c] sm:$0xf] %vm1295_vm4, %v1955_v44 }
 0x312   : > { %2716 = vst.msk [vmem:[#allocation4 + $0xa8] sm:$0xff] %vm1207_vm3, %v2672_v45  ;;  %v1091_v50 = vpop.f32.mrf.mxu0 }
 0x313   : > { %v1092_v53 = vadd.f32 %v9032_v34, %v1091_v50  ;;  %v2475_v54 = vpop.f32.mrf.mxu1  ;;  %1468 = vst.msk [vmem:[#allocation3 + $0x128] sm:$0xf] %vm1295_vm4, %v1424_v51  ;;  %v2602_v42 = vpop.f32.mrf.mxu2 }
 0x314   : > { %v2476_v55 = vadd.f32 %v9018_v6, %v2475_v54 }
 0x315   : > { %v1196_v57 = vmax.f32 %v1092_v53, 0.0 }
 0x316   : > { %v2595_v58 = vadd.f32 %v2594_v52, %v2476_v55  ;;  %v1592_v52 = vpack.c.bf16 %v1533_v46, %v1533_v46 }
 0x317   : > { %1285 = vst.msk [vmem:[#allocation2 + $0x270] sm:$0xff] %vm1207_vm3, %v1196_v57 }
 0x318   : > { %v2673_v59 = vmax.f32 %v2595_v58, 0.0  ;;  %v6868_v61 = vld [vmem:[#allocation3 + $0x128] sm:$0xf0] }
 0x319   : > { %v3644_v62 = vld [vmem:[#allocation4 + $0xa3] sm:$0xff]  ;;  %v6871_v63 = vor.u32 %v7794_v60, %v6868_v61 }
 0x31a   : > { %v3688_v0 = vpack.c.bf16 %v3644_v62, %v3644_v62  ;;  %2717 = vst.msk [vmem:[#allocation4 + $0xb0] sm:$0xff] %vm1207_vm3, %v2673_v59  ;;  %v1094_v1 = vpop.f32.mrf.mxu0  ;;  %v3204_v2 = vld [vmem:[#allocation4 + $0xa1] sm:$0xff]  ;;  %v1386_v59 = vld [vmem:[#allocation2 + $0x2b7] ss:$2 sm:$0x3f] }
 0x31b   : > { %v2763_v3 = vld [vmem:[#allocation4 + $0xa7] sm:$0xff]  ;;  %v1095_v5 = vadd.f32 %v9032_v34, %v1094_v1  ;;  %v2478_v7 = vpop.f32.mrf.mxu1  ;;  %6962 = vmatmul.msk.bf16.gmra.mxu2 %vm1207_vm3, %v6871_v63  ;;  %v3248_v8 = vpack.c.bf16 %v3204_v2, %v3204_v2  ;;  %v1430_v62 = vpack.c.bf16 %v1386_v59, %v1386_v59  ;;  %v1917_v63 = vld [vmem:[#allocation2 + $0x2b9] ss:$2 sm:$0x3f] }
 0x31c   : > { %3732 = vst.msk [vmem:[#allocation5 + $0xec] sm:$0xf] %vm1295_vm4, %v3688_v0  ;;  %v2479_v9 = vadd.f32 %v9018_v6, %v2478_v7  ;;  %v2807_v10 = vpack.c.bf16 %v2763_v3, %v2763_v3  ;;  %v1961_v1 = vpack.c.bf16 %v1917_v63, %v1917_v63 }
 0x31d   : > { %v1197_v12 = vmax.f32 %v1095_v5, 0.0  ;;  %3292 = vst.msk [vmem:[#allocation5 + $0xe8] sm:$0xf] %vm1295_vm4, %v3248_v8 }
 0x31e   : > { %v1907_v13 = vld [vmem:[#allocation2 + $0x269] ss:$2 sm:$0xff]  ;;  %v2598_v14 = vadd.f32 %v2597_v4, %v2479_v9  ;;  %v1553_v15 = vld [vmem:[#allocation2 + $0x268] ss:$2 sm:$0xff]  ;;  %2851 = vst.msk [vmem:[#allocation5 + $0xf0] sm:$0xf] %vm1295_vm4, %v2807_v10  ;;  %v1607_v4 = vpack.c.bf16 %v1563_v56, %v1563_v56 }
 0x31f   : > { %v1376_v16 = vld [vmem:[#allocation2 + $0x267] ss:$2 sm:$0xff]  ;;  %v1956_v17 = vpack.c.bf16 %v1907_v13, %v1907_v13  ;;  %1286 = vst.msk [vmem:[#allocation2 + $0x278] sm:$0xff] %vm1207_vm3, %v1197_v12  ;;  %v1602_v18 = vpack.c.bf16 %v1553_v15, %v1553_v15  ;;  %v1541_v13 = vld [vmem:[#allocation2 + $0x208] ss:$2 sm:$0xff] }
 0x320   : > { %v1425_v19 = vpack.c.bf16 %v1376_v16, %v1376_v16  ;;  %v2674_v20 = vmax.f32 %v2598_v14, 0.0  ;;  %1475 = vst.msk [vmem:[#allocation3 + $0x158] sm:$0x7] %vm1474_vm6, %v1430_v62  ;;  %v7892_v15 = vld [vmem:[#allocation13 + $0x60] sm:$0xff]  ;;  %v3319_v62 = vld [vmem:[#allocation4 + $0x1a] sm:$0xff] }
 0x321   : > { %2000 = vst.msk [vmem:[#allocation3 + $0x134] sm:$0xf] %vm1295_vm4, %v1956_v17  ;;  %v3645_v21 = vld [vmem:[#allocation4 + $0xab] sm:$0xff]  ;;  %1728 = vrot.lane.b32.xlu2 %v1602_v18, %s8416_s25  ;;  %v1596_v17 = vpack.c.bf16 %v1541_v13, %v1541_v13  ;;  %4527 = vmatpush.bf16.msrb.mxu2 %v7892_v15 }
 0x322   : > { %v3689_v23 = vpack.c.bf16 %v3645_v21, %v3645_v21  ;;  %2718 = vst.msk [vmem:[#allocation4 + $0xb8] sm:$0xff] %vm1207_vm3, %v2674_v20  ;;  %v1096_v24 = vpop.f32.mrf.mxu0  ;;  %v3205_v25 = vld [vmem:[#allocation4 + $0xa9] sm:$0xff] }
 0x323   : > { %v2764_v26 = vld [vmem:[#allocation4 + $0xaf] sm:$0xff]  ;;  %v1097_v27 = vadd.f32 %v9032_v34, %v1096_v24  ;;  %v2480_v28 = vpop.f32.mrf.mxu1  ;;  %1469 = vst.msk [vmem:[#allocation3 + $0x130] sm:$0xf] %vm1295_vm4, %v1425_v19  ;;  %v3249_v29 = vpack.c.bf16 %v3205_v25, %v3205_v25 }
 0x324   : > { %3733 = vst.msk [vmem:[#allocation5 + $0xf8] sm:$0xf] %vm1295_vm4, %v3689_v23  ;;  %v2481_v30 = vadd.f32 %v9018_v6, %v2480_v28  ;;  %v2808_v31 = vpack.c.bf16 %v2764_v26, %v2764_v26  ;;  %v1547_v25 = vld [vmem:[#allocation2 + $0x238] ss:$2 sm:$0xff] }
 0x325   : > { %v1198_v33 = vmax.f32 %v1097_v27, 0.0  ;;  %3293 = vst.msk [vmem:[#allocation5 + $0xf4] sm:$0xf] %vm1295_vm4, %v3249_v29  ;;  %v1535_v26 = vld [vmem:[#allocation2 + $0x1d8] ss:$2 sm:$0xff]  ;;  %v1599_v28 = vpack.c.bf16 %v1547_v25, %v1547_v25 }
 0x326   : > { %v2600_v35 = vadd.f32 %v2599_v32, %v2481_v30  ;;  %2852 = vst.msk [vmem:[#allocation5 + $0xfc] sm:$0xf] %vm1295_vm4, %v2808_v31  ;;  %v1593_v29 = vpack.c.bf16 %v1535_v26, %v1535_v26  ;;  %v1549_v30 = vld [vmem:[#allocation2 + $0x248] ss:$2 sm:$0xff]  ;;  %v1551_v15 = vld [vmem:[#allocation2 + $0x258] ss:$2 sm:$0xff] }
 0x327   : > { %1287 = vst.msk [vmem:[#allocation2 + $0x280] sm:$0xff] %vm1207_vm3, %v1198_v33  ;;  %v1537_v33 = vld [vmem:[#allocation2 + $0x1e8] ss:$2 sm:$0xff] }
 0x328   : > { %v2675_v37 = vmax.f32 %v2600_v35, 0.0  ;;  %2005 = vst.msk [vmem:[#allocation3 + $0x15c] sm:$0x7] %vm1474_vm6, %v1961_v1  ;;  %v7796_v7 = vld [vmem:[#allocation3 + $0x134] sm:$0xf]  ;;  %v2876_v1 = vld [vmem:[#allocation4 + $0x8] sm:$0xff] }
 0x329   : > { %v3646_v38 = vld [vmem:[#allocation4 + $0xb3] sm:$0xff]  ;;  %1706 = vrot.lane.b32.xlu2 %v1591_v36, %s8416_s25  ;;  %v1600_v36 = vpack.c.bf16 %v1549_v30, %v1549_v30 }
 0x32a   : > { %v3690_v39 = vpack.c.bf16 %v3646_v38, %v3646_v38  ;;  %2719 = vst.msk [vmem:[#allocation4 + $0xc0] sm:$0xff] %vm1207_vm3, %v2675_v37  ;;  %v1099_v40 = vpop.f32.mrf.mxu0  ;;  %v3206_v41 = vld [vmem:[#allocation4 + $0xb1] sm:$0xff] }
 0x32b   : > { %v2765_v43 = vld [vmem:[#allocation4 + $0xb7] sm:$0xff]  ;;  %v1100_v44 = vadd.f32 %v9032_v34, %v1099_v40  ;;  %v3250_v11 = vpack.c.bf16 %v3206_v41, %v3206_v41 }
 0x32c   : > { %3734 = vst.msk [vmem:[#allocation5 + $0x104] sm:$0xf] %vm1295_vm4, %v3690_v39  ;;  %v2809_v45 = vpack.c.bf16 %v2765_v43, %v2765_v43 }
 0x32d   : > { %v1199_v47 = vmax.f32 %v1100_v44, 0.0  ;;  %3294 = vst.msk [vmem:[#allocation5 + $0x100] sm:$0xf] %vm1295_vm4, %v3250_v11  ;;  %v1594_v44 = vpack.c.bf16 %v1537_v33, %v1537_v33  ;;  %v3325_v33 = vld [vmem:[#allocation4 + $0x4a] sm:$0xff] }
 0x32e   : > { %v1909_v48 = vld [vmem:[#allocation2 + $0x279] ss:$2 sm:$0xff]  ;;  %v1555_v49 = vld [vmem:[#allocation2 + $0x278] ss:$2 sm:$0xff]  ;;  %2853 = vst.msk [vmem:[#allocation5 + $0x108] sm:$0xf] %vm1295_vm4, %v2809_v45 }
 0x32f   : > { %v1378_v50 = vld [vmem:[#allocation2 + $0x277] ss:$2 sm:$0xff]  ;;  %v1957_v51 = vpack.c.bf16 %v1909_v48, %v1909_v48  ;;  %1288 = vst.msk [vmem:[#allocation2 + $0x288] sm:$0xff] %vm1207_vm3, %v1199_v47  ;;  %v1603_v53 = vpack.c.bf16 %v1555_v49, %v1555_v49  ;;  %v7891_v45 = vld [vmem:[#allocation13 + $0x58] sm:$0xff] }
 0x330   : > { %v1426_v54 = vpack.c.bf16 %v1378_v50, %v1378_v50  ;;  %v1561_v48 = vld [vmem:[#allocation2 + $0x2a8] ss:$2 sm:$0xff]  ;;  %v3318_v49 = vld [vmem:[#allocation4 + $0x12] sm:$0xff]  ;;  %4528 = vmatpush.bf16.msrb.mxu2 %v7891_v45 }
 0x331   : > { %2001 = vst.msk [vmem:[#allocation3 + $0x13c] sm:$0xf] %vm1295_vm4, %v1957_v51  ;;  %v3647_v55 = vld [vmem:[#allocation4 + $0xbb] sm:$0xff]  ;;  %1708 = vrot.lane.b32.xlu2 %v1592_v52, %s8416_s25  ;;  %1730 = vrot.lane.b32.xlu0 %v1603_v53, %s8416_s25  ;;  %v2604_v52 = vpop.f32.mrf.mxu2 }
 0x332   : > { %v3691_v57 = vpack.c.bf16 %v3647_v55, %v3647_v55  ;;  %v1101_v58 = vpop.f32.mrf.mxu0  ;;  %v2766_v60 = vld [vmem:[#allocation4 + $0xbf] sm:$0xff]  ;;  %1470 = vst.msk [vmem:[#allocation3 + $0x138] sm:$0xf] %vm1295_vm4, %v1426_v54  ;;  %v1543_v51 = vld [vmem:[#allocation2 + $0x218] ss:$2 sm:$0xff]  ;;  %v1606_v54 = vpack.c.bf16 %v1561_v48, %v1561_v48  ;;  %v3362_v55 = vpack.c.bf16 %v3318_v49, %v3318_v49 }
 0x333   : > { %v1102_v61 = vadd.f32 %v9032_v34, %v1101_v58  ;;  %v3207_v0 = vld [vmem:[#allocation4 + $0xb9] sm:$0xff]  ;;  %v2810_v2 = vpack.c.bf16 %v2766_v60, %v2766_v60  ;;  %v1597_v56 = vpack.c.bf16 %v1543_v51, %v1543_v51  ;;  %v6826_v48 = vld [vmem:[#allocation3 + $0xd0] sm:$0xf]  ;;  %v2888_v51 = vld [vmem:[#allocation4 + $0x68] sm:$0xff] }
 0x334   : > { %3735 = vst.msk [vmem:[#allocation5 + $0x110] sm:$0xf] %vm1295_vm4, %v3691_v57  ;;  %v3251_v5 = vpack.c.bf16 %v3207_v0, %v3207_v0 }
 0x335   : > { %v1200_v3 = vmax.f32 %v1102_v61, 0.0  ;;  %2854 = vst.msk [vmem:[#allocation5 + $0x114] sm:$0xf] %vm1295_vm4, %v2810_v2 }
 0x336   : > { %3295 = vst.msk [vmem:[#allocation5 + $0x10c] sm:$0xf] %vm1295_vm4, %v3251_v5 }
 0x337   : > { %1289 = vst.msk [vmem:[#allocation2 + $0x290] sm:$0xff] %vm1207_vm3, %v1200_v3  ;;  %v3363_v3 = vpack.c.bf16 %v3319_v62, %v3319_v62 }
 0x338   : > { %v6876_v8 = vld [vmem:[#allocation3 + $0x138] sm:$0xf0] }
 0x339   : > { %1738 = vrot.lane.b32.xlu2 %v1607_v4, %s8416_s25  ;;  %v6879_v9 = vor.u32 %v7796_v7, %v6876_v8  ;;  %v2920_v4 = vpack.c.bf16 %v2876_v1, %v2876_v1  ;;  %v2885_v1 = vld [vmem:[#allocation4 + $0x50] sm:$0xff] }
 0x33a   : > { %v1104_v10 = vpop.f32.mrf.mxu0 }
 0x33b   : > { %v1105_v12 = vadd.f32 %v9032_v34, %v1104_v10  ;;  %6963 = vmatmul.msk.bf16.gmra.mxu2 %vm1207_vm3, %v6879_v9  ;;  %v1545_v10 = vld [vmem:[#allocation2 + $0x228] ss:$2 sm:$0xff] }
 0x33d   : > { %v1201_v14 = vmax.f32 %v1105_v12, 0.0  ;;  %v2881_v12 = vld [vmem:[#allocation4 + $0x30] sm:$0xff] }
 0x33e   : > { %v1911_v16 = vld [vmem:[#allocation2 + $0x289] ss:$2 sm:$0xff]  ;;  %v1557_v18 = vld [vmem:[#allocation2 + $0x288] ss:$2 sm:$0xff] }
 0x33f   : > { %v1380_v19 = vld [vmem:[#allocation2 + $0x287] ss:$2 sm:$0xff]  ;;  %v1958_v20 = vpack.c.bf16 %v1911_v16, %v1911_v16  ;;  %1290 = vst.msk [vmem:[#allocation2 + $0x298] sm:$0xff] %vm1207_vm3, %v1201_v14  ;;  %v1604_v21 = vpack.c.bf16 %v1557_v18, %v1557_v18  ;;  %v1598_v18 = vpack.c.bf16 %v1545_v10, %v1545_v10 }
 0x340   : > { %v1427_v22 = vpack.c.bf16 %v1380_v19, %v1380_v19  ;;  %v7978_v16 = vld [vmem:[#allocation16 + $0xb8] sm:$0xff]  ;;  %v2925_v19 = vpack.c.bf16 %v2881_v12, %v2881_v12  ;;  %v2886_v10 = vld [vmem:[#allocation4 + $0x58] sm:$0xff]  ;;  %v2889_v12 = vld [vmem:[#allocation4 + $0x70] sm:$0xff] }
 0x341   : > { %2002 = vst.msk [vmem:[#allocation3 + $0x144] sm:$0xf] %vm1295_vm4, %v1958_v20  ;;  %1716 = vrot.lane.b32.xlu2 %v1596_v17, %s8416_s25  ;;  %1732 = vrot.lane.b32.xlu0 %v1604_v21, %s8416_s25  ;;  %v7897_v17 = vld [vmem:[#allocation13 + $0x88] sm:$0xff]  ;;  %v1601_v20 = vpack.c.bf16 %v1551_v15, %v1551_v15  ;;  %v2882_v21 = vld [vmem:[#allocation4 + $0x38] sm:$0xff]  ;;  %v2930_v15 = vpack.c.bf16 %v2886_v10, %v2886_v10 }
 0x342   : > { %v1106_v23 = vpop.f32.mrf.mxu0  ;;  %1471 = vst.msk [vmem:[#allocation3 + $0x140] sm:$0xf] %vm1295_vm4, %v1427_v22  ;;  %6097 = vmatpush.bf16.msrb.mxu0 %v7978_v16  ;;  %4649 = vmatpush.bf16.msrb.mxu1 %v7897_v17  ;;  %v2877_v22 = vld [vmem:[#allocation4 + $0x10] sm:$0xff]  ;;  %v2933_v16 = vpack.c.bf16 %v2889_v12, %v2889_v12 }
 0x343   : > { %v1107_v24 = vadd.f32 %v9032_v34, %v1106_v23  ;;  %v2878_v23 = vld [vmem:[#allocation4 + $0x18] sm:$0xff]  ;;  %v2921_v25 = vpack.c.bf16 %v2877_v22, %v2877_v22 }
 0x344   : > { %v2922_v26 = vpack.c.bf16 %v2878_v23, %v2878_v23  ;;  %v2890_v23 = vld [vmem:[#allocation4 + $0x78] sm:$0xff] }
 0x345   : > { %v1202_v27 = vmax.f32 %v1107_v24, 0.0  ;;  %v2926_v24 = vpack.c.bf16 %v2882_v21, %v2882_v21 }
 0x347   : > { %1291 = vst.msk [vmem:[#allocation2 + $0x2a0] sm:$0xff] %vm1207_vm3, %v1202_v27  ;;  %v3324_v27 = vld [vmem:[#allocation4 + $0x42] sm:$0xff] }
 0x348   : > { %v3368_v30 = vpack.c.bf16 %v3324_v27, %v3324_v27 }
 0x349   : > { %1722 = vrot.lane.b32.xlu2 %v1599_v28, %s8416_s25  ;;  %1710 = vrot.lane.b32.xlu0 %v1593_v29, %s8416_s25  ;;  %v3317_v28 = vld [vmem:[#allocation4 + $0xa] sm:$0xff]  ;;  %v3320_v29 = vld [vmem:[#allocation4 + $0x22] sm:$0xff] }
 0x34c   : > { %v2483_v31 = vpop.f32.mrf.mxu1 }
 0x34d   : > { %v2484_v32 = vadd.f32 %v9018_v6, %v2483_v31  ;;  %v3364_v31 = vpack.c.bf16 %v3320_v29, %v3320_v29  ;;  %v3336_v29 = vld [vmem:[#allocation4 + $0xa2] sm:$0xff] }
 0x34e   : > { %v1913_v35 = vld [vmem:[#allocation2 + $0x299] ss:$2 sm:$0xff]  ;;  %v1559_v34 = vld [vmem:[#allocation2 + $0x298] ss:$2 sm:$0xff] }
 0x34f   : > { %v1382_v37 = vld [vmem:[#allocation2 + $0x297] ss:$2 sm:$0xff]  ;;  %v1959_v38 = vpack.c.bf16 %v1913_v35, %v1913_v35  ;;  %v2603_v39 = vadd.f32 %v2602_v42, %v2484_v32  ;;  %v1605_v40 = vpack.c.bf16 %v1559_v34, %v1559_v34  ;;  %v1384_v43 = vld [vmem:[#allocation2 + $0x2a7] ss:$2 sm:$0xff]  ;;  %v3361_v42 = vpack.c.bf16 %v3317_v28, %v3317_v28 }
 0x350   : > { %v1428_v41 = vpack.c.bf16 %v1382_v37, %v1382_v37  ;;  %v1429_v11 = vpack.c.bf16 %v1384_v43, %v1384_v43  ;;  %v2879_v35 = vld [vmem:[#allocation4 + $0x20] sm:$0xff]  ;;  %v7890_v34 = vld [vmem:[#allocation13 + $0x50] sm:$0xff]  ;;  %v3369_v37 = vpack.c.bf16 %v3325_v33, %v3325_v33  ;;  %v2880_v43 = vld [vmem:[#allocation4 + $0x28] sm:$0xff] }
 0x351   : > { %2003 = vst.msk [vmem:[#allocation3 + $0x14c] sm:$0xf] %vm1295_vm4, %v1959_v38  ;;  %v2676_v46 = vmax.f32 %v2603_v39, 0.0  ;;  %1724 = vrot.lane.b32.xlu2 %v1600_v36, %s8416_s25  ;;  %1734 = vrot.lane.b32.xlu1 %v1605_v40, %s8416_s25  ;;  %v3321_v36 = vld [vmem:[#allocation4 + $0x2a] sm:$0xff]  ;;  %v2923_v38 = vpack.c.bf16 %v2879_v35, %v2879_v35 }
 0x352   : > { %1712 = vrot.lane.b32.xlu0 %v1594_v44, %s8416_s25  ;;  %1472 = vst.msk [vmem:[#allocation3 + $0x148] sm:$0xf] %vm1295_vm4, %v1428_v41  ;;  %v3365_v39 = vpack.c.bf16 %v3321_v36, %v3321_v36  ;;  %4529 = vmatpush.bf16.msrb.mxu2 %v7890_v34  ;;  %v2887_v41 = vld [vmem:[#allocation4 + $0x60] sm:$0xff] }
 0x353   : > { %2720 = vst.msk [vmem:[#allocation4 + $0xc8] sm:$0xff] %vm1207_vm3, %v2676_v46  ;;  %v2883_v44 = vld [vmem:[#allocation4 + $0x40] sm:$0xff]  ;;  %v2924_v46 = vpack.c.bf16 %v2880_v43, %v2880_v43 }
 0x354   : > { %v2485_v47 = vpop.f32.mrf.mxu1  ;;  %1473 = vst.msk [vmem:[#allocation3 + $0x150] sm:$0xf] %vm1295_vm4, %v1429_v11  ;;  %v2931_v11 = vpack.c.bf16 %v2887_v41, %v2887_v41  ;;  %v2927_v45 = vpack.c.bf16 %v2883_v44, %v2883_v44  ;;  %v7977_v36 = vld [vmem:[#allocation16 + $0xb0] sm:$0xff] }
 0x355   : > { %v2486_v50 = vadd.f32 %v9018_v6, %v2485_v47  ;;  %v1539_v6 = vld [vmem:[#allocation2 + $0x1f8] ss:$2 sm:$0xff]  ;;  %6098 = vmatpush.bf16.msrb.mxu0 %v7977_v36 }
 0x356   : > { %v1595_v2 = vpack.c.bf16 %v1539_v6, %v1539_v6 }
 0x357   : > { %v2605_v53 = vadd.f32 %v2604_v52, %v2486_v50  ;;  %v3322_v52 = vld [vmem:[#allocation4 + $0x32] sm:$0xff] }
 0x359   : > { %v2677_v57 = vmax.f32 %v2605_v53, 0.0  ;;  %1736 = vrot.lane.b32.xlu1 %v1606_v54, %s8416_s25  ;;  %3451 = vrot.lane.b32.xlu2 %v3362_v55, %s8416_s25  ;;  %v2884_v53 = vld [vmem:[#allocation4 + $0x48] sm:$0xff]  ;;  %v2932_v54 = vpack.c.bf16 %v2888_v51, %v2888_v51  ;;  %v3366_v55 = vpack.c.bf16 %v3322_v52, %v3322_v52  ;;  %v2899_v51 = vld [vmem:[#allocation4 + $0xc0] sm:$0xff] }
 0x35a   : > { %v3648_v58 = vld [vmem:[#allocation4 + $0xc3] sm:$0xff]  ;;  %1718 = vrot.lane.b32.xlu0 %v1597_v56, %s8416_s25  ;;  %v2928_v56 = vpack.c.bf16 %v2884_v53, %v2884_v53 }
 0x35b   : > { %v3692_v59 = vpack.c.bf16 %v3648_v58, %v3648_v58  ;;  %2721 = vst.msk [vmem:[#allocation4 + $0xd0] sm:$0xff] %vm1207_vm3, %v2677_v57  ;;  %v2767_v60 = vld [vmem:[#allocation4 + $0xc7] sm:$0xff]  ;;  %v3330_v58 = vld [vmem:[#allocation4 + $0x72] sm:$0xff] }
 0x35c   : > { %v3208_v61 = vld [vmem:[#allocation4 + $0xc1] sm:$0xff]  ;;  %v2811_v63 = vpack.c.bf16 %v2767_v60, %v2767_v60  ;;  %v3326_v60 = vld [vmem:[#allocation4 + $0x52] sm:$0xff] }
 0x35d   : > { %v3252_v0 = vpack.c.bf16 %v3208_v61, %v3208_v61  ;;  %3736 = vst.msk [vmem:[#allocation5 + $0x11c] sm:$0xf] %vm1295_vm4, %v3692_v59  ;;  %v3323_v59 = vld [vmem:[#allocation4 + $0x3a] sm:$0xff]  ;;  %v3374_v61 = vpack.c.bf16 %v3330_v58, %v3330_v58  ;;  %v3370_v62 = vpack.c.bf16 %v3326_v60, %v3326_v60  ;;  %v2892_v52 = vld [vmem:[#allocation4 + $0x88] sm:$0xff] }
 0x35e   : > { %2855 = vst.msk [vmem:[#allocation5 + $0x120] sm:$0xf] %vm1295_vm4, %v2811_v63  ;;  %v3367_v6 = vpack.c.bf16 %v3323_v59, %v3323_v59  ;;  %v2895_v53 = vld [vmem:[#allocation4 + $0xa0] sm:$0xff] }
 0x35f   : > { %3296 = vst.msk [vmem:[#allocation5 + $0x118] sm:$0xf] %vm1295_vm4, %v3252_v0  ;;  %v3331_v0 = vld [vmem:[#allocation4 + $0x7a] sm:$0xff] }
 0x361   : > { %1714 = vrot.lane.b32.xlu1 %v1595_v2, %s8416_s25  ;;  %3453 = vrot.lane.b32.xlu2 %v3363_v3, %s8416_s25  ;;  %v3327_v2 = vld [vmem:[#allocation4 + $0x5a] sm:$0xff]  ;;  %v3375_v3 = vpack.c.bf16 %v3331_v0, %v3331_v0  ;;  %v2896_v0 = vld [vmem:[#allocation4 + $0xa8] sm:$0xff] }
 0x362   : > { %v3649_v5 = vld [vmem:[#allocation4 + $0xcb] sm:$0xff]  ;;  %3008 = vrot.lane.b32.xlu0 %v2920_v4, %s8416_s25  ;;  %v2929_v4 = vpack.c.bf16 %v2885_v1, %v2885_v1 }
 0x363   : > { %v3693_v7 = vpack.c.bf16 %v3649_v5, %v3649_v5  ;;  %v2768_v8 = vld [vmem:[#allocation4 + $0xcf] sm:$0xff]  ;;  %v3371_v5 = vpack.c.bf16 %v3327_v2, %v3327_v2  ;;  %v7887_v2 = vld [vmem:[#allocation13 + $0x38] sm:$0xff] }
 0x364   : > { %v3209_v9 = vld [vmem:[#allocation4 + $0xc9] sm:$0xff]  ;;  %v2812_v13 = vpack.c.bf16 %v2768_v8, %v2768_v8 }
 0x365   : > { %v3253_v14 = vpack.c.bf16 %v3209_v9, %v3209_v9  ;;  %3737 = vst.msk [vmem:[#allocation5 + $0x128] sm:$0xf] %vm1295_vm4, %v3693_v7  ;;  %v2893_v9 = vld [vmem:[#allocation4 + $0x90] sm:$0xff] }
 0x366   : > { %2856 = vst.msk [vmem:[#allocation5 + $0x12c] sm:$0xf] %vm1295_vm4, %v2812_v13  ;;  %v7889_v13 = vld [vmem:[#allocation13 + $0x48] sm:$0xff] }
 0x367   : > { %3297 = vst.msk [vmem:[#allocation5 + $0x124] sm:$0xf] %vm1295_vm4, %v3253_v14  ;;  %v2937_v14 = vpack.c.bf16 %v2893_v9, %v2893_v9  ;;  %4530 = vmatpush.bf16.msrb.mxu2 %v7889_v13  ;;  %v3335_v13 = vld [vmem:[#allocation4 + $0x9a] sm:$0xff] }
 0x369   : > { %1720 = vrot.lane.b32.xlu1 %v1598_v18, %s8416_s25  ;;  %3018 = vrot.lane.b32.xlu2 %v2925_v19, %s8416_s25  ;;  %v2894_v18 = vld [vmem:[#allocation4 + $0x98] sm:$0xff]  ;;  %v3328_v19 = vld [vmem:[#allocation4 + $0x62] sm:$0xff] }
 0x36a   : > { %1726 = vrot.lane.b32.xlu0 %v1601_v20, %s8416_s25 }
 0x371   : > { %3020 = vrot.lane.b32.xlu2 %v2926_v24, %s8416_s25  ;;  %3010 = vrot.lane.b32.xlu1 %v2921_v25, %s8416_s25  ;;  %v2938_v24 = vpack.c.bf16 %v2894_v18, %v2894_v18  ;;  %v3372_v25 = vpack.c.bf16 %v3328_v19, %v3328_v19 }
 0x372   : > { %3012 = vrot.lane.b32.xlu0 %v2922_v26, %s8416_s25  ;;  %v2934_v26 = vpack.c.bf16 %v2890_v23, %v2890_v23 }
 0x379   : > { %3463 = vrot.lane.b32.xlu2 %v3368_v30, %s8416_s25  ;;  %3449 = vrot.lane.b32.xlu1 %v3361_v42, %s8416_s25  ;;  %v3329_v30 = vld [vmem:[#allocation4 + $0x6a] sm:$0xff]  ;;  %v3332_v42 = vld [vmem:[#allocation4 + $0x82] sm:$0xff] }
 0x37a   : > { %3455 = vrot.lane.b32.xlu0 %v3364_v31, %s8416_s25  ;;  %v7896_v31 = vld [vmem:[#allocation13 + $0x80] sm:$0xff]  ;;  %v3373_v33 = vpack.c.bf16 %v3329_v30, %v3329_v30  ;;  %v3376_v35 = vpack.c.bf16 %v3332_v42, %v3332_v42  ;;  %v3339_v30 = vld [vmem:[#allocation4 + $0xba] sm:$0xff] }
 0x37b   : > { %v1729_v32 = vpop.permute.xlu2 %1728  ;;  %4650 = vmatpush.bf16.msrb.mxu1 %v7896_v31  ;;  %v7883_v42 = vld [vmem:[#allocation13 + $0x18] sm:$0xff] }
 0x37c   : > { %1823 = vst.msk [vmem:[#allocation3 + $0x130] sm:$0xf] %vm1784_vm5, %v1729_v32  ;;  %v3380_v32 = vpack.c.bf16 %v3336_v29, %v3336_v29  ;;  %v2897_v29 = vld [vmem:[#allocation4 + $0xb0] sm:$0xff] }
 0x37d   : > { %v2941_v31 = vpack.c.bf16 %v2897_v29, %v2897_v29  ;;  %v9288_v29 = vld [vmem:[#allocation12] ss:$0 sm:$0xff] }
 0x381   : > { %3465 = vrot.lane.b32.xlu2 %v3369_v37, %s8416_s25  ;;  %3014 = vrot.lane.b32.xlu1 %v2923_v38, %s8416_s25  ;;  %v3337_v38 = vld [vmem:[#allocation4 + $0xaa] sm:$0xff] }
 0x382   : > { %3457 = vrot.lane.b32.xlu0 %v3365_v39, %s8416_s25  ;;  %v2891_v39 = vld [vmem:[#allocation4 + $0x80] sm:$0xff]  ;;  %v3381_v41 = vpack.c.bf16 %v3337_v38, %v3337_v38  ;;  %v2898_v38 = vld [vmem:[#allocation4 + $0xb8] sm:$0xff] }
 0x383   : > { %v1707_v40 = vpop.permute.xlu2 %1706  ;;  %v6874_v20 = vld [vmem:[#allocation3 + $0x130] sm:$0xf]  ;;  %v2935_v43 = vpack.c.bf16 %v2891_v39, %v2891_v39 }
 0x384   : > { %1812 = vst.msk [vmem:[#allocation3 + $0xd8] sm:$0xf] %vm1784_vm5, %v1707_v40  ;;  %v3333_v40 = vld [vmem:[#allocation4 + $0x8a] sm:$0xff] }
 0x385   : > { %v3377_v44 = vpack.c.bf16 %v3333_v40, %v3333_v40  ;;  %v2901_v39 = vld [vmem:[#allocation4 + $0xd0] sm:$0xff] }
 0x386   : > { %v7881_v40 = vld [vmem:[#allocation13 + $0x8] sm:$0xff] }
 0x389   : > { %3030 = vrot.lane.b32.xlu2 %v2931_v11, %s8416_s25  ;;  %3016 = vrot.lane.b32.xlu1 %v2924_v46, %s8416_s25 }
 0x38a   : > { %3022 = vrot.lane.b32.xlu0 %v2927_v45, %s8416_s25 }
 0x38b   : > { %v1709_v47 = vpop.permute.xlu2 %1708  ;;  %v7785_v49 = vld [vmem:[#allocation3 + $0xd4] sm:$0xf0] }
 0x38c   : > { %1813 = vst.msk [vmem:[#allocation3 + $0xe0] sm:$0xf] %vm1784_vm5, %v1709_v47  ;;  %v6827_v50 = vor.u32 %v7785_v49, %v6826_v48  ;;  %v9229_v48 = vpop.f32.mrf.mxu2 }
 0x38e   : > { %2487 = vmatmul.bf16.gmra.mxu1 %v6827_v50 }
 0x391   : > { %3032 = vrot.lane.b32.xlu2 %v2932_v54, %s8416_s25  ;;  %3459 = vrot.lane.b32.xlu1 %v3366_v55, %s8416_s25  ;;  %v2943_v54 = vpack.c.bf16 %v2899_v51, %v2899_v51  ;;  %v2936_v55 = vpack.c.bf16 %v2892_v52, %v2892_v52  ;;  %v7798_v51 = vld [vmem:[#allocation3 + $0x144] sm:$0xf] }
 0x392   : > { %3024 = vrot.lane.b32.xlu0 %v2928_v56, %s8416_s25  ;;  %v2939_v56 = vpack.c.bf16 %v2895_v53, %v2895_v53 }
 0x393   : > { %v1739_v57 = vpop.permute.xlu2 %1738  ;;  %v6834_v45 = vld [vmem:[#allocation3 + $0xe0] sm:$0xf] }
 0x394   : > { %1829 = vst.msk [vmem:[#allocation3 + $0x158] sm:$0x7] %vm1828_vm7, %v1739_v57  ;;  %v9239_v1 = vpop.f32.mrf.mxu2 }
 0x399   : > { %3475 = vrot.lane.b32.xlu2 %v3374_v61, %s8416_s25  ;;  %3461 = vrot.lane.b32.xlu1 %v3367_v6, %s8416_s25 }
 0x39a   : > { %3467 = vrot.lane.b32.xlu0 %v3370_v62, %s8416_s25  ;;  %v2900_v62 = vld [vmem:[#allocation4 + $0xc8] sm:$0xff] }
 0x39b   : > { %v1717_v63 = vpop.permute.xlu2 %1716 }
 0x39c   : > { %1817 = vst.msk [vmem:[#allocation3 + $0x100] sm:$0xf] %vm1784_vm5, %v1717_v63  ;;  %v3334_v63 = vld [vmem:[#allocation4 + $0x92] sm:$0xff] }
 0x3a1   : > { %3477 = vrot.lane.b32.xlu2 %v3375_v3, %s8416_s25  ;;  %3026 = vrot.lane.b32.xlu1 %v2929_v4, %s8416_s25  ;;  %v7888_v3 = vld [vmem:[#allocation13 + $0x40] sm:$0xff]  ;;  %v2944_v4 = vpack.c.bf16 %v2900_v62, %v2900_v62 }
 0x3a2   : > { %3469 = vrot.lane.b32.xlu0 %v3371_v5, %s8416_s25  ;;  %v3378_v5 = vpack.c.bf16 %v3334_v63, %v3334_v63  ;;  %4531 = vmatpush.bf16.msrb.mxu2 %v7888_v3  ;;  %v7800_v3 = vld [vmem:[#allocation3 + $0x154] sm:$0xf] }
 0x3a3   : > { %v1723_v7 = vpop.permute.xlu2 %1722  ;;  %v1731_v8 = vpop.permute.xlu0 %1730 }
 0x3a4   : > { %1820 = vst.msk [vmem:[#allocation3 + $0x118] sm:$0xf] %vm1784_vm5, %v1723_v7  ;;  %v2940_v7 = vpack.c.bf16 %v2896_v0, %v2896_v0 }
 0x3a5   : > { %1824 = vst.msk [vmem:[#allocation3 + $0x138] sm:$0xf] %vm1784_vm5, %v1731_v8  ;;  %v7886_v8 = vld [vmem:[#allocation13 + $0x30] sm:$0xff] }
 0x3a9   : > { %3042 = vrot.lane.b32.xlu2 %v2937_v14, %s8416_s25  ;;  %3028 = vrot.lane.b32.xlu1 %v2930_v15, %s8416_s25  ;;  %v3338_v14 = vld [vmem:[#allocation4 + $0xb2] sm:$0xff]  ;;  %v9247_v15 = vpop.f32.mrf.mxu2 }
 0x3aa   : > { %3034 = vrot.lane.b32.xlu0 %v2933_v16, %s8416_s25  ;;  %v7885_v16 = vld [vmem:[#allocation13 + $0x28] sm:$0xff]  ;;  %v3382_v18 = vpack.c.bf16 %v3338_v14, %v3338_v14  ;;  %v7962_v14 = vld [vmem:[#allocation16 + $0x38] sm:$0xff] }
 0x3ab   : > { %v1725_v17 = vpop.permute.xlu2 %1724 }
 0x3ac   : > { %1821 = vst.msk [vmem:[#allocation3 + $0x120] sm:$0xf] %vm1784_vm5, %v1725_v17  ;;  %v7797_v21 = vld [vmem:[#allocation3 + $0x134] sm:$0xf0]  ;;  %v3379_v17 = vpack.c.bf16 %v3335_v13, %v3335_v13 }
 0x3ad   : > { %v6875_v22 = vor.u32 %v7797_v21, %v6874_v20  ;;  %v7801_v20 = vld [vmem:[#allocation3 + $0x154] sm:$0x70]  ;;  %v7884_v21 = vld [vmem:[#allocation13 + $0x20] sm:$0xff] }
 0x3af   : > { %2517 = vmatmul.bf16.vlgmr.msrb.gmra.mxu3 %v6875_v22 }
 0x3b0   : > { %4405 = vmatpush.bf16.msrb.mxu3 %v7887_v2 }
 0x3b1   : > { %3044 = vrot.lane.b32.xlu2 %v2938_v24, %s8416_s25  ;;  %3471 = vrot.lane.b32.xlu1 %v3372_v25, %s8416_s25 }
 0x3b2   : > { %3036 = vrot.lane.b32.xlu0 %v2934_v26, %s8416_s25 }
 0x3b3   : > { %v1733_v27 = vpop.permute.xlu0 %1732  ;;  %v3452_v28 = vpop.permute.xlu2 %3451 }
 0x3b4   : > { %1825 = vst.msk [vmem:[#allocation3 + $0x140] sm:$0xf] %vm1784_vm5, %v1733_v27  ;;  %4406 = vmatpush.bf16.msrb.mxu3 %v7886_v8 }
 0x3b5   : > { %3582 = vst.msk [vmem:[#allocation5 + $0x10] sm:$0xf] %vm1784_vm5, %v3452_v28 }
 0x3b8   : > { %4407 = vmatpush.bf16.msrb.mxu3 %v7885_v16 }
 0x3b9   : > { %3487 = vrot.lane.b32.xlu2 %v3380_v32, %s8416_s25  ;;  %3473 = vrot.lane.b32.xlu1 %v3373_v33, %s8416_s25  ;;  %v9255_v32 = vpop.f32.mrf.mxu2  ;;  %v3383_v33 = vpack.c.bf16 %v3339_v30, %v3339_v30 }
 0x3ba   : > { %3479 = vrot.lane.b32.xlu0 %v3376_v35, %s8416_s25  ;;  %v7882_v35 = vld [vmem:[#allocation13 + $0x10] sm:$0xff] }
 0x3bb   : > { %v1711_v34 = vpop.permute.xlu0 %1710  ;;  %v3454_v37 = vpop.permute.xlu2 %3453  ;;  %v6882_v59 = vld [vmem:[#allocation3 + $0x140] sm:$0xf] }
 0x3bc   : > { %1814 = vst.msk [vmem:[#allocation3 + $0xe8] sm:$0xf] %vm1784_vm5, %v1711_v34  ;;  %4408 = vmatpush.bf16.msrb.mxu3 %v7884_v21  ;;  %v6970_v62 = vld [vmem:[#allocation5 + $0xc] sm:$0xf0] }
 0x3bd   : > { %3583 = vst.msk [vmem:[#allocation5 + $0x1c] sm:$0xf] %vm1784_vm5, %v3454_v37 }
 0x3c0   : > { %4409 = vmatpush.bf16.msrb.mxu3 %v7883_v42 }
 0x3c1   : > { %3489 = vrot.lane.b32.xlu2 %v3381_v41, %s8416_s25  ;;  %3038 = vrot.lane.b32.xlu1 %v2935_v43, %s8416_s25  ;;  %v2942_v41 = vpack.c.bf16 %v2898_v38, %v2898_v38  ;;  %v9262_v43 = vpop.f32.mrf.mxu2 }
 0x3c2   : > { %3481 = vrot.lane.b32.xlu0 %v3377_v44, %s8416_s25  ;;  %v2945_v44 = vpack.c.bf16 %v2901_v39, %v2901_v39 }
 0x3c3   : > { %v1735_v11 = vpop.permute.xlu1 %1734  ;;  %v3019_v46 = vpop.permute.xlu2 %3018  ;;  %v7787_v47 = vld [vmem:[#allocation3 + $0xe4] sm:$0xf0] }
 0x3c4   : > { %1826 = vst.msk [vmem:[#allocation3 + $0x148] sm:$0xf] %vm1784_vm5, %v1735_v11  ;;  %v1713_v49 = vpop.permute.xlu0 %1712  ;;  %v6835_v50 = vor.u32 %v7787_v47, %v6834_v45  ;;  %4410 = vmatpush.bf16.msrb.mxu3 %v7882_v35  ;;  %v7880_v11 = vld [vmem:[#allocation13] sm:$0xff] }
 0x3c5   : > { %1815 = vst.msk [vmem:[#allocation3 + $0xf0] sm:$0xf] %vm1784_vm5, %v1713_v49  ;;  %v6884_v45 = vld [vmem:[#allocation3 + $0x148] sm:$0xf0] }
 0x3c6   : > { %3145 = vst.msk [vmem:[#allocation5 + $0x3c] sm:$0xf] %vm1784_vm5, %v3019_v46  ;;  %2492 = vmatmul.bf16.gmra.mxu1 %v6835_v50  ;;  %v6850_v50 = vld [vmem:[#allocation3 + $0x100] sm:$0xf] }
 0x3c8   : > { %4411 = vmatpush.bf16.msrb.mxu3 %v7881_v40 }
 0x3c9   : > { %3054 = vrot.lane.b32.xlu2 %v2943_v54, %s8416_s25  ;;  %3040 = vrot.lane.b32.xlu1 %v2936_v55, %s8416_s25  ;;  %v6887_v54 = vor.u32 %v7798_v51, %v6884_v45  ;;  %v3340_v55 = vld [vmem:[#allocation4 + $0xc2] sm:$0xff] }
 0x3ca   : > { %3046 = vrot.lane.b32.xlu0 %v2939_v56, %s8416_s25  ;;  %v3384_v56 = vpack.c.bf16 %v3340_v55, %v3340_v55 }
 0x3cb   : > { %v1737_v57 = vpop.permute.xlu1 %1736  ;;  %v3021_v58 = vpop.permute.xlu2 %3020  ;;  %v7799_v60 = vld [vmem:[#allocation3 + $0x144] sm:$0xf0] }
 0x3cc   : > { %1827 = vst.msk [vmem:[#allocation3 + $0x150] sm:$0xf] %vm1784_vm5, %v1737_v57  ;;  %v1719_v61 = vpop.permute.xlu0 %1718  ;;  %v6883_v6 = vor.u32 %v7799_v60, %v6882_v59  ;;  %v6842_v24 = vld [vmem:[#allocation3 + $0xf0] sm:$0xf]  ;;  %4412 = vmatpush.bf16.msrb.mxu3 %v7880_v11  ;;  %v9271_v57 = vpop.f32.mrf.mxu2 }
 0x3cd   : > { %1818 = vst.msk [vmem:[#allocation3 + $0x108] sm:$0xf] %vm1784_vm5, %v1719_v61  ;;  %v3341_v60 = vld [vmem:[#allocation4 + $0xca] sm:$0xff] }
 0x3ce   : > { %3146 = vst.msk [vmem:[#allocation5 + $0x48] sm:$0xf] %vm1784_vm5, %v3021_v58  ;;  %2522 = vmatmul.bf16.gmra.mxu3 %v6883_v6  ;;  %v3385_v0 = vpack.c.bf16 %v3341_v60, %v3341_v60 }
 0x3d1   : > { %3056 = vrot.lane.b32.xlu2 %v2944_v4, %s8416_s25  ;;  %3483 = vrot.lane.b32.xlu1 %v3378_v5, %s8416_s25  ;;  %v6892_v4 = vld [vmem:[#allocation3 + $0x158] sm:$0x70] }
 0x3d2   : > { %3048 = vrot.lane.b32.xlu0 %v2940_v7, %s8416_s25  ;;  %v6895_v13 = vor.u32 %v7800_v3, %v6892_v4 }
 0x3d3   : > { %v1715_v9 = vpop.permute.xlu1 %1714  ;;  %v3464_v10 = vpop.permute.xlu2 %3463  ;;  %v6890_v19 = vld [vmem:[#allocation3 + $0x150] sm:$0xf] }
 0x3d4   : > { %1816 = vst.msk [vmem:[#allocation3 + $0xf8] sm:$0xf] %vm1784_vm5, %v1715_v9  ;;  %v3009_v12 = vpop.permute.xlu0 %3008  ;;  %v6891_v28 = vor.u32 %v7801_v20, %v6890_v19  ;;  %v7791_v46 = vld [vmem:[#allocation3 + $0x104] sm:$0xf0]  ;;  %v9277_v5 = vpop.f32.mrf.mxu2  ;;  %v7793_v9 = vld [vmem:[#allocation3 + $0x114] sm:$0xf0] }
 0x3d5   : > { %3588 = vst.msk [vmem:[#allocation5 + $0x58] sm:$0xf] %vm1784_vm5, %v3464_v10  ;;  %v6851_v53 = vor.u32 %v7791_v46, %v6850_v50  ;;  %v7817_v20 = vld [vmem:[#allocation5 + $0x1c] sm:$0xf] }
 0x3d6   : > { %3140 = vst.msk [vmem:[#allocation5] sm:$0xf] %vm1784_vm5, %v3009_v12 }
 0x3d9   : > { %3485 = vrot.lane.b32.xlu1 %v3379_v17, %s8416_s25 }
 0x3da   : > { %3491 = vrot.lane.b32.xlu0 %v3382_v18, %s8416_s25 }
 0x3db   : > { %v1721_v22 = vpop.permute.xlu1 %1720  ;;  %v3466_v23 = vpop.permute.xlu2 %3465  ;;  %v7789_v25 = vld [vmem:[#allocation3 + $0xf4] sm:$0xf0] }
 0x3dc   : > { %1819 = vst.msk [vmem:[#allocation3 + $0x110] sm:$0xf] %vm1784_vm5, %v1721_v22  ;;  %v1727_v26 = vpop.permute.xlu0 %1726  ;;  %v6843_v27 = vor.u32 %v7789_v25, %v6842_v24  ;;  %v9284_v21 = vpop.f32.mrf.mxu2 }
 0x3dd   : > { %3589 = vst.msk [vmem:[#allocation5 + $0x64] sm:$0xf] %vm1784_vm5, %v3466_v23 }
 0x3de   : > { %1822 = vst.msk [vmem:[#allocation3 + $0x128] sm:$0xf] %vm1784_vm5, %v1727_v26  ;;  %2497 = vmatmul.bf16.gmra.mxu1 %v6843_v27  ;;  %2527 = vmatmul.bf16.gmra.mxu3 %v6891_v28  ;;  %v6866_v27 = vld [vmem:[#allocation3 + $0x120] sm:$0xf]  ;;  %v6968_v28 = vld [vmem:[#allocation5] sm:$0xf] }
 0x3e1   : > { %3050 = vrot.lane.b32.xlu1 %v2941_v31, %s8416_s25 }
 0x3e2   : > { %3493 = vrot.lane.b32.xlu0 %v3383_v33, %s8416_s25 }
 0x3e3   : > { %v3031_v36 = vpop.permute.xlu2 %3030  ;;  %v3011_v34 = vpop.permute.xlu1 %3010  ;;  %v6858_v2 = vld [vmem:[#allocation3 + $0x110] sm:$0xf] }
 0x3e4   : > { %3151 = vst.msk [vmem:[#allocation5 + $0x84] sm:$0xf] %vm1784_vm5, %v3031_v36  ;;  %v3013_v37 = vpop.permute.xlu0 %3012  ;;  %v6859_v12 = vor.u32 %v7793_v9, %v6858_v2  ;;  %v9292_v36 = vpop.f32.mrf.mxu2 }
 0x3e5   : > { %3141 = vst.msk [vmem:[#allocation5 + $0xc] sm:$0xf] %vm1784_vm5, %v3011_v34  ;;  %v7795_v23 = vld [vmem:[#allocation3 + $0x124] sm:$0xf0] }
 0x3e6   : > { %3142 = vst.msk [vmem:[#allocation5 + $0x18] sm:$0xf] %vm1784_vm5, %v3013_v37  ;;  %v6867_v33 = vor.u32 %v7795_v23, %v6866_v27  ;;  %v7976_v37 = vld [vmem:[#allocation16 + $0xa8] sm:$0xff] }
 0x3e7   : > { %6099 = vmatpush.bf16.msrb.mxu0 %v7976_v37 }
 0x3e9   : > { %3052 = vrot.lane.b32.xlu1 %v2942_v41, %s8416_s25 }
 0x3ea   : > { %3058 = vrot.lane.b32.xlu0 %v2945_v44, %s8416_s25 }
 0x3eb   : > { %v3033_v47 = vpop.permute.xlu2 %3032  ;;  %v3450_v49 = vpop.permute.xlu1 %3449 }
 0x3ec   : > { %3152 = vst.msk [vmem:[#allocation5 + $0x90] sm:$0xf] %vm1784_vm5, %v3033_v47  ;;  %v3456_v52 = vpop.permute.xlu0 %3455  ;;  %v7815_v24 = vld [vmem:[#allocation5 + $0x8] sm:$0xf0] }
 0x3ed   : > { %3581 = vst.msk [vmem:[#allocation5 + $0x4] sm:$0xf] %vm1784_vm5, %v3450_v49  ;;  %v6969_v35 = vor.u32 %v7815_v24, %v6968_v28  ;;  %v9303_v49 = vpop.f32.mrf.mxu2  ;;  %v7006_v24 = vld [vmem:[#allocation5 + $0x54] sm:$0xf0] }
 0x3ee   : > { %3584 = vst.msk [vmem:[#allocation5 + $0x28] sm:$0xf] %vm1784_vm5, %v3456_v52  ;;  %2502 = vmatmul.bf16.gmra.mxu1 %v6851_v53  ;;  %6964 = vmatmul.msk.bf16.vlgmr.msra.gmra.mxu3 %vm1207_vm3, %v6887_v54  ;;  %v7816_v52 = vld [vmem:[#allocation5 + $0x10] sm:$0xf0] }
 0x3ef   : > { %5969 = vmatpush.bf16.msra.mxu3 %v7962_v14 }
 0x3f1   : > { %3495 = vrot.lane.b32.xlu1 %v3384_v56, %s8416_s25 }
 0x3f3   : > { %v3476_v58 = vpop.permute.xlu2 %3475  ;;  %v3015_v59 = vpop.permute.xlu1 %3014 }
 0x3f4   : > { %3594 = vst.msk [vmem:[#allocation5 + $0xa0] sm:$0xf] %vm1784_vm5, %v3476_v58  ;;  %v3458_v61 = vpop.permute.xlu0 %3457  ;;  %v7814_v6 = vld [vmem:[#allocation5 + $0x4] sm:$0xf] }
 0x3f5   : > { %3143 = vst.msk [vmem:[#allocation5 + $0x24] sm:$0xf] %vm1784_vm5, %v3015_v59  ;;  %v6973_v63 = vor.u32 %v7814_v6, %v6970_v62  ;;  %v6982_v16 = vld [vmem:[#allocation5 + $0x24] sm:$0xf0] }
 0x3f6   : > { %3585 = vst.msk [vmem:[#allocation5 + $0x34] sm:$0xf] %vm1784_vm5, %v3458_v61  ;;  %v6985_v22 = vor.u32 %v7817_v20, %v6982_v16  ;;  %v6976_v62 = vld [vmem:[#allocation5 + $0x8] sm:$0xf] }
 0x3f7   : > { %4532 = vmatmul.bf16.vlgmr.msrb.gmra.mxu2 %v6973_v63  ;;  %v6977_v3 = vor.u32 %v7816_v52, %v6976_v62 }
 0x3f9   : > { %3497 = vrot.lane.b32.xlu1 %v3385_v0, %s8416_s25 }
 0x3fb   : > { %v3478_v7 = vpop.permute.xlu2 %3477  ;;  %v3017_v8 = vpop.permute.xlu1 %3016 }
 0x3fc   : > { %3595 = vst.msk [vmem:[#allocation5 + $0xac] sm:$0xf] %vm1784_vm5, %v3478_v7  ;;  %v3023_v10 = vpop.permute.xlu0 %3022  ;;  %v7818_v51 = vld [vmem:[#allocation5 + $0x20] sm:$0xf0] }
 0x3fd   : > { %3144 = vst.msk [vmem:[#allocation5 + $0x30] sm:$0xf] %vm1784_vm5, %v3017_v8  ;;  %v7820_v45 = vld [vmem:[#allocation5 + $0x34] sm:$0xf]  ;;  %v9312_v8 = vpop.f32.mrf.mxu2 }
 0x3fe   : > { %3147 = vst.msk [vmem:[#allocation5 + $0x54] sm:$0xf] %vm1784_vm5, %v3023_v10  ;;  %2507 = vmatmul.bf16.gmra.mxu1 %v6859_v12  ;;  %6965 = vmatmul.msk.bf16.gmra.mxu3 %vm1207_vm3, %v6895_v13 }
 0x403   : > { %v3043_v17 = vpop.permute.xlu2 %3042  ;;  %v3460_v18 = vpop.permute.xlu1 %3459 }
 0x404   : > { %3157 = vst.msk [vmem:[#allocation5 + $0xcc] sm:$0xf] %vm1784_vm5, %v3043_v17  ;;  %v3025_v19 = vpop.permute.xlu0 %3024 }
 0x405   : > { %3586 = vst.msk [vmem:[#allocation5 + $0x40] sm:$0xf] %vm1784_vm5, %v3460_v18  ;;  %v9324_v28 = vpop.f32.mrf.mxu2 }
 0x406   : > { %3148 = vst.msk [vmem:[#allocation5 + $0x60] sm:$0xf] %vm1784_vm5, %v3025_v19 }
 0x407   : > { %4537 = vmatmul.bf16.gmra.mxu2 %v6985_v22 }
 0x40b   : > { %v2488_v25 = vpop.f32.mrf.mxu1  ;;  %v3045_v26 = vpop.permute.xlu2 %3044 }
 0x40c   : > { %v2489_v30 = vadd.f32 %v9288_v29, %v2488_v25  ;;  %3158 = vst.msk [vmem:[#allocation5 + $0xd8] sm:$0xf] %vm1784_vm5, %v3045_v26  ;;  %v3462_v42 = vpop.permute.xlu1 %3461  ;;  %v3468_v31 = vpop.permute.xlu0 %3467  ;;  %v6994_v39 = vld [vmem:[#allocation5 + $0x3c] sm:$0xf0] }
 0x40d   : > { %3587 = vst.msk [vmem:[#allocation5 + $0x4c] sm:$0xf] %vm1784_vm5, %v3462_v42  ;;  %v7819_v42 = vld [vmem:[#allocation5 + $0x28] sm:$0xf0] }
 0x40e   : > { %v2608_v34 = vadd.f32 %v9229_v48, %v2489_v30  ;;  %3590 = vst.msk [vmem:[#allocation5 + $0x70] sm:$0xf] %vm1784_vm5, %v3468_v31  ;;  %2512 = vmatmul.bf16.gmra.mxu1 %v6867_v33  ;;  %4413 = vmatmul.bf16.vlgmr.msrb.gmra.mxu3 %v6969_v35  ;;  %v6997_v48 = vor.u32 %v7820_v45, %v6994_v39  ;;  %v6992_v30 = vld [vmem:[#allocation5 + $0x30] sm:$0xf]  ;;  %v7821_v33 = vld [vmem:[#allocation5 + $0x38] sm:$0xf0] }
 0x40f   : > { %v6988_v35 = vld [vmem:[#allocation5 + $0x20] sm:$0xf]  ;;  %v6993_v39 = vor.u32 %v7821_v33, %v6992_v30 }
 0x410   : > { %v2678_v38 = vmax.f32 %v2608_v34, 0.0  ;;  %v7961_v34 = vld [vmem:[#allocation16 + $0x30] sm:$0xff] }
 0x411   : > { %5970 = vmatpush.bf16.msra.mxu3 %v7961_v34 }
 0x412   : > { %2722 = vst.msk [vmem:[#allocation4 + $0xd8] sm:$0xff] %vm1207_vm3, %v2678_v38 }
 0x413   : > { %v2490_v40 = vpop.f32.mrf.mxu1  ;;  %v3488_v41 = vpop.permute.xlu2 %3487 }
 0x414   : > { %v2491_v44 = vadd.f32 %v9288_v29, %v2490_v40  ;;  %3600 = vst.msk [vmem:[#allocation5 + $0xe8] sm:$0xf] %vm1784_vm5, %v3488_v41  ;;  %v3027_v11 = vpop.permute.xlu1 %3026  ;;  %v3470_v46 = vpop.permute.xlu0 %3469  ;;  %v7823_v17 = vld [vmem:[#allocation5 + $0x4c] sm:$0xf]  ;;  %v6989_v40 = vor.u32 %v7819_v42, %v6988_v35 }
 0x415   : > { %3149 = vst.msk [vmem:[#allocation5 + $0x6c] sm:$0xf] %vm1784_vm5, %v3027_v11  ;;  %v7009_v26 = vor.u32 %v7823_v17, %v7006_v24  ;;  %v2637_v41 = vpop.f32.mrf.mxu2  ;;  %v7018_v11 = vld [vmem:[#allocation5 + $0x6c] sm:$0xf0]  ;;  %v7825_v17 = vld [vmem:[#allocation5 + $0x58] sm:$0xf0] }
 0x416   : > { %v2610_v47 = vadd.f32 %v9239_v1, %v2491_v44  ;;  %3591 = vst.msk [vmem:[#allocation5 + $0x7c] sm:$0xf] %vm1784_vm5, %v3470_v46  ;;  %v6980_v1 = vld [vmem:[#allocation5 + $0x18] sm:$0xf] }
 0x417   : > { %4542 = vmatmul.bf16.gmra.mxu2 %v6997_v48  ;;  %v6981_v2 = vor.u32 %v7818_v51, %v6980_v1 }
 0x418   : > { %v2679_v50 = vmax.f32 %v2610_v47, 0.0  ;;  %v7826_v47 = vld [vmem:[#allocation5 + $0x64] sm:$0xf] }
 0x419   : > { %v3650_v53 = vld [vmem:[#allocation4 + $0xd3] sm:$0xff]  ;;  %v7021_v51 = vor.u32 %v7826_v47, %v7018_v11 }
 0x41a   : > { %v3342_v54 = vld [vmem:[#allocation4 + $0xd2] sm:$0xff]  ;;  %v3694_v56 = vpack.c.bf16 %v3650_v53, %v3650_v53  ;;  %2723 = vst.msk [vmem:[#allocation4 + $0xe0] sm:$0xff] %vm1207_vm3, %v2679_v50  ;;  %v7824_v53 = vld [vmem:[#allocation5 + $0x50] sm:$0xf0] }
 0x41b   : > { %v2902_v55 = vld [vmem:[#allocation4 + $0xd8] sm:$0xff]  ;;  %v3386_v58 = vpack.c.bf16 %v3342_v54, %v3342_v54  ;;  %v3490_v6 = vpop.permute.xlu2 %3489  ;;  %v7822_v54 = vld [vmem:[#allocation5 + $0x40] sm:$0xf0] }
 0x41c   : > { %v2946_v59 = vpack.c.bf16 %v2902_v55, %v2902_v55  ;;  %v3210_v60 = vld [vmem:[#allocation4 + $0xd1] sm:$0xff]  ;;  %3738 = vst.msk [vmem:[#allocation5 + $0x134] sm:$0xf] %vm1295_vm4, %v3694_v56  ;;  %v3029_v63 = vpop.permute.xlu1 %3028  ;;  %v3035_v0 = vpop.permute.xlu0 %3034 }
 0x41d   : > { %v2769_v61 = vld [vmem:[#allocation4 + $0xd7] sm:$0xff]  ;;  %3499 = vrot.lane.b32.xlu2 %v3386_v58, %s8416_s25  ;;  %v3254_v4 = vpack.c.bf16 %v3210_v60, %v3210_v60  ;;  %3601 = vst.msk [vmem:[#allocation5 + $0xf4] sm:$0xf] %vm1784_vm5, %v3490_v6  ;;  %v2639_v56 = vpop.f32.mrf.mxu2  ;;  %v7000_v60 = vld [vmem:[#allocation5 + $0x38] sm:$0xf] }
 0x41e   : > { %3060 = vrot.lane.b32.xlu0 %v2946_v59, %s8416_s25  ;;  %v2813_v7 = vpack.c.bf16 %v2769_v61, %v2769_v61  ;;  %3150 = vst.msk [vmem:[#allocation5 + $0x78] sm:$0xf] %vm1784_vm5, %v3029_v63  ;;  %4418 = vmatmul.bf16.gmra.mxu3 %v6981_v2  ;;  %v7004_v59 = vld [vmem:[#allocation5 + $0x48] sm:$0xf]  ;;  %v7001_v62 = vor.u32 %v7822_v54, %v7000_v60 }
 0x41f   : > { %7310 = vmatmul.msk.bf16.vlgmr.msrb.gmra.mxu1 %vm1207_vm3, %v6977_v3  ;;  %3153 = vst.msk [vmem:[#allocation5 + $0x9c] sm:$0xf] %vm1784_vm5, %v3035_v0  ;;  %v7005_v1 = vor.u32 %v7824_v53, %v7004_v59 }
 0x420   : > { %3298 = vst.msk [vmem:[#allocation5 + $0x130] sm:$0xf] %vm1295_vm4, %v3254_v4 }
 0x421   : > { %v3651_v9 = vld [vmem:[#allocation4 + $0xdb] sm:$0xff]  ;;  %2857 = vst.msk [vmem:[#allocation5 + $0x138] sm:$0xf] %vm1295_vm4, %v2813_v7 }
 0x422   : > { %v3343_v10 = vld [vmem:[#allocation4 + $0xda] sm:$0xff]  ;;  %v3695_v13 = vpack.c.bf16 %v3651_v9, %v3651_v9 }
 0x423   : > { %v2903_v12 = vld [vmem:[#allocation4 + $0xe0] sm:$0xff]  ;;  %v3387_v14 = vpack.c.bf16 %v3343_v10, %v3343_v10  ;;  %v3055_v20 = vpop.permute.xlu2 %3054 }
 0x424   : > { %v2947_v16 = vpack.c.bf16 %v2903_v12, %v2903_v12  ;;  %v3211_v18 = vld [vmem:[#allocation4 + $0xd9] sm:$0xff]  ;;  %3739 = vst.msk [vmem:[#allocation5 + $0x140] sm:$0xf] %vm1295_vm4, %v3695_v13  ;;  %v3472_v22 = vpop.permute.xlu1 %3471  ;;  %v3037_v23 = vpop.permute.xlu0 %3036  ;;  %v7829_v10 = vld [vmem:[#allocation5 + $0x7c] sm:$0xf] }
 0x425   : > { %v2770_v19 = vld [vmem:[#allocation4 + $0xdf] sm:$0xff]  ;;  %3501 = vrot.lane.b32.xlu2 %v3387_v14, %s8416_s25  ;;  %v3255_v25 = vpack.c.bf16 %v3211_v18, %v3211_v18  ;;  %3163 = vst.msk [vmem:[#allocation5 + $0x114] sm:$0xf] %vm1784_vm5, %v3055_v20 }
 0x426   : > { %3062 = vrot.lane.b32.xlu1 %v2947_v16, %s8416_s25  ;;  %v2814_v27 = vpack.c.bf16 %v2770_v19, %v2770_v19  ;;  %3592 = vst.msk [vmem:[#allocation5 + $0x88] sm:$0xf] %vm1784_vm5, %v3472_v22  ;;  %v7827_v19 = vld [vmem:[#allocation5 + $0x68] sm:$0xf0] }
 0x427   : > { %3154 = vst.msk [vmem:[#allocation5 + $0xa8] sm:$0xf] %vm1784_vm5, %v3037_v23  ;;  %4547 = vmatmul.bf16.gmra.mxu2 %v7009_v26  ;;  %v7012_v26 = vld [vmem:[#allocation5 + $0x50] sm:$0xf] }
 0x428   : > { %3299 = vst.msk [vmem:[#allocation5 + $0x13c] sm:$0xf] %vm1295_vm4, %v3255_v25  ;;  %v7016_v25 = vld [vmem:[#allocation5 + $0x60] sm:$0xf]  ;;  %v7013_v33 = vor.u32 %v7825_v17, %v7012_v26 }
 0x429   : > { %2858 = vst.msk [vmem:[#allocation5 + $0x144] sm:$0xf] %vm1295_vm4, %v2814_v27 }
 0x42b   : > { %v3057_v31 = vpop.permute.xlu2 %3056 }
 0x42c   : > { %3164 = vst.msk [vmem:[#allocation5 + $0x120] sm:$0xf] %vm1784_vm5, %v3057_v31  ;;  %v3474_v37 = vpop.permute.xlu1 %3473  ;;  %v3480_v38 = vpop.permute.xlu0 %3479  ;;  %v7017_v31 = vor.u32 %v7827_v19, %v7016_v25 }
 0x42d   : > { %3593 = vst.msk [vmem:[#allocation5 + $0x94] sm:$0xf] %vm1784_vm5, %v3474_v37  ;;  %v7030_v2 = vld [vmem:[#allocation5 + $0x84] sm:$0xf0] }
 0x42e   : > { %3596 = vst.msk [vmem:[#allocation5 + $0xb8] sm:$0xf] %vm1784_vm5, %v3480_v38  ;;  %4423 = vmatmul.bf16.gmra.mxu3 %v6993_v39  ;;  %v7033_v12 = vor.u32 %v7829_v10, %v7030_v2 }
 0x42f   : > { %7311 = vmatmul.msk.bf16.gmra.mxu1 %vm1207_vm3, %v6989_v40 }
 0x432   : > { %v2518_v44 = vpop.f32.mrf.mxu3 }
 0x433   : > { %v2519_v46 = vadd.f32 %v9288_v29, %v2518_v44 }
 0x434   : > { %v3039_v45 = vpop.permute.xlu1 %3038  ;;  %v3482_v48 = vpop.permute.xlu0 %3481 }
 0x435   : > { %v2638_v50 = vadd.f32 %v2637_v41, %v2519_v46  ;;  %3155 = vst.msk [vmem:[#allocation5 + $0xb4] sm:$0xf] %vm1784_vm5, %v3039_v45  ;;  %v7832_v46 = vld [vmem:[#allocation5 + $0x94] sm:$0xf] }
 0x436   : > { %3597 = vst.msk [vmem:[#allocation5 + $0xc4] sm:$0xf] %vm1784_vm5, %v3482_v48 }
 0x437   : > { %v2690_v52 = vmax.f32 %v2638_v50, 0.0  ;;  %4552 = vmatmul.bf16.gmra.mxu2 %v7021_v51  ;;  %v7042_v51 = vld [vmem:[#allocation5 + $0x9c] sm:$0xf0] }
 0x438   : > { %v7045_v54 = vor.u32 %v7832_v46, %v7042_v51  ;;  %v7036_v46 = vld [vmem:[#allocation5 + $0x80] sm:$0xf] }
 0x439   : > { %2734 = vst.msk [vmem:[#allocation4 + $0x138] sm:$0xff] %vm1207_vm3, %v2690_v52  ;;  %v7960_v52 = vld [vmem:[#allocation16 + $0x28] sm:$0xff] }
 0x43a   : > { %v2520_v55 = vpop.f32.mrf.mxu3  ;;  %5971 = vmatpush.bf16.msra.mxu3 %v7960_v52 }
 0x43b   : > { %v2521_v58 = vadd.f32 %v9288_v29, %v2520_v55  ;;  %v7028_v55 = vld [vmem:[#allocation5 + $0x78] sm:$0xf] }
 0x43c   : > { %v3041_v61 = vpop.permute.xlu1 %3040  ;;  %v3047_v6 = vpop.permute.xlu0 %3046 }
 0x43d   : > { %v2640_v63 = vadd.f32 %v2639_v56, %v2521_v58  ;;  %3156 = vst.msk [vmem:[#allocation5 + $0xc0] sm:$0xf] %vm1784_vm5, %v3041_v61  ;;  %v7828_v56 = vld [vmem:[#allocation5 + $0x70] sm:$0xf0] }
 0x43e   : > { %3159 = vst.msk [vmem:[#allocation5 + $0xe4] sm:$0xf] %vm1784_vm5, %v3047_v6  ;;  %4428 = vmatmul.bf16.gmra.mxu3 %v7005_v1 }
 0x43f   : > { %7312 = vmatmul.msk.bf16.gmra.mxu1 %vm1207_vm3, %v7001_v62  ;;  %v2691_v0 = vmax.f32 %v2640_v63, 0.0  ;;  %v7024_v63 = vld [vmem:[#allocation5 + $0x68] sm:$0xf] }
 0x441   : > { %2735 = vst.msk [vmem:[#allocation4 + $0x140] sm:$0xff] %vm1207_vm3, %v2691_v0 }
 0x443   : > { %v2493_v3 = vpop.f32.mrf.mxu1 }
 0x444   : > { %v2494_v4 = vadd.f32 %v9288_v29, %v2493_v3  ;;  %v3484_v7 = vpop.permute.xlu1 %3483  ;;  %v3049_v9 = vpop.permute.xlu0 %3048 }
 0x445   : > { %3598 = vst.msk [vmem:[#allocation5 + $0xd0] sm:$0xf] %vm1784_vm5, %v3484_v7  ;;  %v7025_v7 = vor.u32 %v7828_v56, %v7024_v63 }
 0x446   : > { %v2613_v13 = vadd.f32 %v9247_v15, %v2494_v4  ;;  %3160 = vst.msk [vmem:[#allocation5 + $0xf0] sm:$0xf] %vm1784_vm5, %v3049_v9  ;;  %v7830_v4 = vld [vmem:[#allocation5 + $0x80] sm:$0xf0] }
 0x447   : > { %4557 = vmatmul.bf16.gmra.mxu2 %v7033_v12 }
 0x448   : > { %v3663_v14 = vld [vmem:[#allocation4 + $0x13b] sm:$0xff]  ;;  %v2680_v16 = vmax.f32 %v2613_v13, 0.0 }
 0x449   : > { %v3707_v18 = vpack.c.bf16 %v3663_v14, %v3663_v14  ;;  %v3223_v20 = vld [vmem:[#allocation4 + $0x139] sm:$0xff]  ;;  %v7029_v14 = vor.u32 %v7830_v4, %v7028_v55 }
 0x44a   : > { %v2782_v22 = vld [vmem:[#allocation4 + $0x13f] sm:$0xff]  ;;  %2724 = vst.msk [vmem:[#allocation4 + $0xe8] sm:$0xff] %vm1207_vm3, %v2680_v16  ;;  %v3267_v23 = vpack.c.bf16 %v3223_v20, %v3223_v20 }
 0x44b   : > { %3751 = vst.msk [vmem:[#allocation5 + $0x1d0] sm:$0xf] %vm1295_vm4, %v3707_v18  ;;  %v2495_v24 = vpop.f32.mrf.mxu1  ;;  %v2826_v27 = vpack.c.bf16 %v2782_v22, %v2782_v22  ;;  %v7054_v20 = vld [vmem:[#allocation5 + $0xb4] sm:$0xf0] }
 0x44c   : > { %v2496_v15 = vadd.f32 %v9288_v29, %v2495_v24  ;;  %v3486_v30 = vpop.permute.xlu1 %3485  ;;  %v3492_v42 = vpop.permute.xlu0 %3491  ;;  %3311 = vst.msk [vmem:[#allocation5 + $0x1cc] sm:$0xf] %vm1295_vm4, %v3267_v23 }
 0x44d   : > { %3599 = vst.msk [vmem:[#allocation5 + $0xdc] sm:$0xf] %vm1784_vm5, %v3486_v30  ;;  %v7831_v30 = vld [vmem:[#allocation5 + $0x88] sm:$0xf0] }
 0x44e   : > { %v2615_v35 = vadd.f32 %v9255_v32, %v2496_v15  ;;  %3602 = vst.msk [vmem:[#allocation5 + $0x100] sm:$0xf] %vm1784_vm5, %v3492_v42  ;;  %4433 = vmatmul.bf16.gmra.mxu3 %v7017_v31  ;;  %v7833_v15 = vld [vmem:[#allocation5 + $0x98] sm:$0xf0] }
 0x44f   : > { %7313 = vmatmul.msk.bf16.gmra.mxu1 %vm1207_vm3, %v7013_v33  ;;  %2870 = vst.msk [vmem:[#allocation5 + $0x1d4] sm:$0xf] %vm1295_vm4, %v2826_v27 }
 0x450   : > { %v2681_v34 = vmax.f32 %v2615_v35, 0.0 }
 0x451   : > { %v3652_v37 = vld [vmem:[#allocation4 + $0xe3] sm:$0xff]  ;;  %v9353_v38 = vpop.f32.mrf.mxu3 }
 0x452   : > { %v2904_v39 = vld [vmem:[#allocation4 + $0xe8] sm:$0xff]  ;;  %v3696_v41 = vpack.c.bf16 %v3652_v37, %v3652_v37  ;;  %2725 = vst.msk [vmem:[#allocation4 + $0xf0] sm:$0xff] %vm1207_vm3, %v2681_v34  ;;  %v2524_v52 = vadd.f32 %v9288_v29, %v9353_v38 }
 0x453   : > { %v3344_v40 = vld [vmem:[#allocation4 + $0xe2] sm:$0xff]  ;;  %v2948_v44 = vpack.c.bf16 %v2904_v39, %v2904_v39 }
 0x454   : > { %v3388_v11 = vpack.c.bf16 %v3344_v40, %v3344_v40  ;;  %v2771_v32 = vld [vmem:[#allocation4 + $0xe7] sm:$0xff]  ;;  %3740 = vst.msk [vmem:[#allocation5 + $0x14c] sm:$0xf] %vm1295_vm4, %v3696_v41  ;;  %v3051_v47 = vpop.permute.xlu1 %3050  ;;  %v3494_v50 = vpop.permute.xlu0 %3493 }
 0x455   : > { %v3212_v45 = vld [vmem:[#allocation4 + $0xe1] sm:$0xff]  ;;  %v2815_v48 = vpack.c.bf16 %v2771_v32, %v2771_v32  ;;  %3064 = vrot.lane.b32.xlu1 %v2948_v44, %s8416_s25  ;;  %3161 = vst.msk [vmem:[#allocation5 + $0xfc] sm:$0xf] %vm1784_vm5, %v3051_v47 }
 0x456   : > { %3503 = vrot.lane.b32.xlu0 %v3388_v11, %s8416_s25  ;;  %v3256_v53 = vpack.c.bf16 %v3212_v45, %v3212_v45  ;;  %3603 = vst.msk [vmem:[#allocation5 + $0x10c] sm:$0xf] %vm1784_vm5, %v3494_v50  ;;  %v7040_v11 = vld [vmem:[#allocation5 + $0x90] sm:$0xf]  ;;  %v7037_v50 = vor.u32 %v7831_v30, %v7036_v46 }
 0x457   : > { %4562 = vmatmul.bf16.gmra.mxu2 %v7045_v54  ;;  %2859 = vst.msk [vmem:[#allocation5 + $0x150] sm:$0xf] %vm1295_vm4, %v2815_v48  ;;  %v7041_v47 = vor.u32 %v7833_v15, %v7040_v11  ;;  %v7975_v54 = vld [vmem:[#allocation16 + $0xa0] sm:$0xff]  ;;  %v7048_v15 = vld [vmem:[#allocation5 + $0x98] sm:$0xf] }
 0x458   : > { %3300 = vst.msk [vmem:[#allocation5 + $0x148] sm:$0xf] %vm1295_vm4, %v3256_v53  ;;  %6100 = vmatpush.bf16.msrb.mxu0 %v7975_v54 }
 0x459   : > { %v3653_v58 = vld [vmem:[#allocation4 + $0xeb] sm:$0xff]  ;;  %v9363_v59 = vpop.f32.mrf.mxu3 }
 0x45a   : > { %v2905_v60 = vld [vmem:[#allocation4 + $0xf0] sm:$0xff]  ;;  %v3697_v6 = vpack.c.bf16 %v3653_v58, %v3653_v58 }
 0x45b   : > { %v3345_v61 = vld [vmem:[#allocation4 + $0xea] sm:$0xff]  ;;  %v2949_v1 = vpack.c.bf16 %v2905_v60, %v2905_v60  ;;  %v2498_v3 = vpop.f32.mrf.mxu1 }
 0x45c   : > { %v3389_v62 = vpack.c.bf16 %v3345_v61, %v3345_v61  ;;  %v2772_v0 = vld [vmem:[#allocation4 + $0xef] sm:$0xff]  ;;  %3741 = vst.msk [vmem:[#allocation5 + $0x158] sm:$0xf] %vm1295_vm4, %v3697_v6  ;;  %v2499_v10 = vadd.f32 %v9288_v29, %v2498_v3  ;;  %v3053_v12 = vpop.permute.xlu1 %3052  ;;  %v3059_v13 = vpop.permute.xlu0 %3058 }
 0x45d   : > { %v3213_v2 = vld [vmem:[#allocation4 + $0xe9] sm:$0xff]  ;;  %v2816_v9 = vpack.c.bf16 %v2772_v0, %v2772_v0  ;;  %3066 = vrot.lane.b32.xlu2 %v2949_v1, %s8416_s25  ;;  %3162 = vst.msk [vmem:[#allocation5 + $0x108] sm:$0xf] %vm1784_vm5, %v3053_v12 }
 0x45e   : > { %3505 = vrot.lane.b32.xlu0 %v3389_v62, %s8416_s25  ;;  %v3257_v16 = vpack.c.bf16 %v3213_v2, %v3213_v2  ;;  %v2618_v17 = vadd.f32 %v9262_v43, %v2499_v10  ;;  %3165 = vst.msk [vmem:[#allocation5 + $0x12c] sm:$0xf] %vm1784_vm5, %v3059_v13  ;;  %4438 = vmatmul.bf16.gmra.mxu3 %v7029_v14  ;;  %v7835_v43 = vld [vmem:[#allocation5 + $0xac] sm:$0xf]  ;;  %v7066_v62 = vld [vmem:[#allocation5 + $0xcc] sm:$0xf0] }
 0x45f   : > { %7314 = vmatmul.msk.bf16.gmra.mxu1 %vm1207_vm3, %v7025_v7  ;;  %2860 = vst.msk [vmem:[#allocation5 + $0x15c] sm:$0xf] %vm1295_vm4, %v2816_v9  ;;  %v7057_v25 = vor.u32 %v7835_v43, %v7054_v20  ;;  %v7838_v7 = vld [vmem:[#allocation5 + $0xc4] sm:$0xf] }
 0x460   : > { %v2682_v18 = vmax.f32 %v2618_v17, 0.0  ;;  %3301 = vst.msk [vmem:[#allocation5 + $0x154] sm:$0xf] %vm1295_vm4, %v3257_v16  ;;  %v7069_v10 = vor.u32 %v7838_v7, %v7066_v62  ;;  %v7834_v14 = vld [vmem:[#allocation5 + $0xa0] sm:$0xf0]  ;;  %v2526_v16 = vadd.f32 %v9288_v29, %v9363_v59 }
 0x461   : > { %v9375_v19 = vpop.f32.mrf.mxu3 }
 0x462   : > { %2726 = vst.msk [vmem:[#allocation4 + $0xf8] sm:$0xff] %vm1207_vm3, %v2682_v18  ;;  %v7836_v18 = vld [vmem:[#allocation5 + $0xb0] sm:$0xf0] }
 0x463   : > { %v2500_v22 = vpop.f32.mrf.mxu1 }
 0x464   : > { %v2501_v23 = vadd.f32 %v9288_v29, %v2500_v22  ;;  %v3496_v24 = vpop.permute.xlu1 %3495 }
 0x465   : > { %3604 = vst.msk [vmem:[#allocation5 + $0x118] sm:$0xf] %vm1784_vm5, %v3496_v24 }
 0x466   : > { %v2620_v26 = vadd.f32 %v9271_v57, %v2501_v23 }
 0x467   : > { %4567 = vmatmul.bf16.gmra.mxu2 %v7057_v25 }
 0x468   : > { %v2683_v27 = vmax.f32 %v2620_v26, 0.0 }
 0x469   : > { %v3654_v42 = vld [vmem:[#allocation4 + $0xf3] sm:$0xff]  ;;  %v9381_v31 = vpop.f32.mrf.mxu3 }
 0x46a   : > { %v2906_v33 = vld [vmem:[#allocation4 + $0xf8] sm:$0xff]  ;;  %v3698_v34 = vpack.c.bf16 %v3654_v42, %v3654_v42  ;;  %2727 = vst.msk [vmem:[#allocation4 + $0x100] sm:$0xff] %vm1207_vm3, %v2683_v27 }
 0x46b   : > { %v3346_v35 = vld [vmem:[#allocation4 + $0xf2] sm:$0xff]  ;;  %v2950_v37 = vpack.c.bf16 %v2906_v33, %v2906_v33  ;;  %v2503_v44 = vpop.f32.mrf.mxu1 }
 0x46c   : > { %v3390_v39 = vpack.c.bf16 %v3346_v35, %v3346_v35  ;;  %v2773_v40 = vld [vmem:[#allocation4 + $0xf7] sm:$0xff]  ;;  %3742 = vst.msk [vmem:[#allocation5 + $0x164] sm:$0xf] %vm1295_vm4, %v3698_v34  ;;  %v2504_v45 = vadd.f32 %v9288_v29, %v2503_v44  ;;  %v3498_v48 = vpop.permute.xlu1 %3497  ;;  %v7052_v33 = vld [vmem:[#allocation5 + $0xa8] sm:$0xf]  ;;  %v7049_v35 = vor.u32 %v7834_v14, %v7048_v15 }
 0x46d   : > { %v3214_v41 = vld [vmem:[#allocation4 + $0xf1] sm:$0xff]  ;;  %v2817_v57 = vpack.c.bf16 %v2773_v40, %v2773_v40  ;;  %3068 = vrot.lane.b32.xlu2 %v2950_v37, %s8416_s25  ;;  %3605 = vst.msk [vmem:[#allocation5 + $0x124] sm:$0xf] %vm1784_vm5, %v3498_v48  ;;  %v7053_v40 = vor.u32 %v7836_v18, %v7052_v33  ;;  %v7064_v18 = vld [vmem:[#allocation5 + $0xc0] sm:$0xf] }
 0x46e   : > { %v3258_v32 = vpack.c.bf16 %v3214_v41, %v3214_v41  ;;  %3507 = vrot.lane.b32.xlu1 %v3390_v39, %s8416_s25  ;;  %v2623_v51 = vadd.f32 %v9277_v5, %v2504_v45  ;;  %4443 = vmatmul.bf16.gmra.mxu3 %v7041_v47  ;;  %v7959_v41 = vld [vmem:[#allocation16 + $0x20] sm:$0xff]  ;;  %v2529_v47 = vadd.f32 %v9288_v29, %v9375_v19  ;;  %v7060_v15 = vld [vmem:[#allocation5 + $0xb0] sm:$0xf]  ;;  %v7839_v33 = vld [vmem:[#allocation5 + $0xc8] sm:$0xf0] }
 0x46f   : > { %7315 = vmatmul.msk.bf16.gmra.mxu1 %vm1207_vm3, %v7037_v50  ;;  %2861 = vst.msk [vmem:[#allocation5 + $0x168] sm:$0xf] %vm1295_vm4, %v2817_v57  ;;  %5972 = vmatpush.bf16.msra.mxu3 %v7959_v41 }
 0x470   : > { %3302 = vst.msk [vmem:[#allocation5 + $0x160] sm:$0xf] %vm1295_vm4, %v3258_v32  ;;  %v2684_v53 = vmax.f32 %v2623_v51, 0.0 }
 0x471   : > { %v3655_v55 = vld [vmem:[#allocation4 + $0xfb] sm:$0xff]  ;;  %v2642_v56 = vpop.f32.mrf.mxu3 }
 0x472   : > { %v3347_v58 = vld [vmem:[#allocation4 + $0xfa] sm:$0xff]  ;;  %v3699_v61 = vpack.c.bf16 %v3655_v55, %v3655_v55  ;;  %2728 = vst.msk [vmem:[#allocation4 + $0x108] sm:$0xff] %vm1207_vm3, %v2684_v53  ;;  %v2643_v5 = vadd.f32 %v2642_v56, %v2524_v52 }
 0x473   : > { %v2907_v60 = vld [vmem:[#allocation4 + $0x100] sm:$0xff]  ;;  %v3391_v6 = vpack.c.bf16 %v3347_v58, %v3347_v58  ;;  %v2505_v2 = vpop.f32.mrf.mxu1 }
 0x474   : > { %v2951_v1 = vpack.c.bf16 %v2907_v60, %v2907_v60  ;;  %v3215_v63 = vld [vmem:[#allocation4 + $0xf9] sm:$0xff]  ;;  %3743 = vst.msk [vmem:[#allocation5 + $0x170] sm:$0xf] %vm1295_vm4, %v3699_v61  ;;  %v2692_v38 = vmax.f32 %v2643_v5, 0.0  ;;  %v2506_v4 = vadd.f32 %v9288_v29, %v2505_v2  ;;  %v7841_v61 = vld [vmem:[#allocation5 + $0xdc] sm:$0xf] }
 0x475   : > { %v2774_v0 = vld [vmem:[#allocation4 + $0xff] sm:$0xff]  ;;  %v3259_v3 = vpack.c.bf16 %v3215_v63, %v3215_v63  ;;  %v7078_v2 = vld [vmem:[#allocation5 + $0xe4] sm:$0xf0] }
 0x476   : > { %3509 = vrot.lane.b32.xlu1 %v3391_v6, %s8416_s25  ;;  %3070 = vrot.lane.b32.xlu0 %v2951_v1, %s8416_s25  ;;  %v2818_v9 = vpack.c.bf16 %v2774_v0, %v2774_v0  ;;  %2736 = vst.msk [vmem:[#allocation4 + $0x148] sm:$0xff] %vm1207_vm3, %v2692_v38  ;;  %v2625_v12 = vadd.f32 %v9284_v21, %v2506_v4 }
 0x477   : > { %3303 = vst.msk [vmem:[#allocation5 + $0x16c] sm:$0xf] %vm1295_vm4, %v3259_v3  ;;  %v3500_v13 = vpop.permute.xlu2 %3499  ;;  %4572 = vmatmul.bf16.gmra.mxu2 %v7069_v10  ;;  %v7081_v4 = vor.u32 %v7841_v61, %v7078_v2 }
 0x478   : > { %3606 = vst.msk [vmem:[#allocation5 + $0x130] sm:$0xf] %vm1784_vm5, %v3500_v13  ;;  %v2685_v17 = vmax.f32 %v2625_v12, 0.0  ;;  %v7837_v12 = vld [vmem:[#allocation5 + $0xb8] sm:$0xf0] }
 0x479   : > { %2862 = vst.msk [vmem:[#allocation5 + $0x174] sm:$0xf] %vm1295_vm4, %v2818_v9  ;;  %v3656_v20 = vld [vmem:[#allocation4 + $0x103] sm:$0xff]  ;;  %v2644_v22 = vpop.f32.mrf.mxu3 }
 0x47a   : > { %v3348_v23 = vld [vmem:[#allocation4 + $0x102] sm:$0xff]  ;;  %v3700_v43 = vpack.c.bf16 %v3656_v20, %v3656_v20  ;;  %2729 = vst.msk [vmem:[#allocation4 + $0x110] sm:$0xff] %vm1207_vm3, %v2685_v17  ;;  %v2645_v21 = vadd.f32 %v2644_v22, %v2526_v16  ;;  %v9408_v25 = vpop.f32.mrf.mxu2  ;;  %v2531_v16 = vadd.f32 %v9288_v29, %v9381_v31 }
 0x47b   : > { %v2908_v24 = vld [vmem:[#allocation4 + $0x108] sm:$0xff]  ;;  %v3392_v26 = vpack.c.bf16 %v3348_v23, %v3348_v23  ;;  %v2508_v59 = vpop.f32.mrf.mxu1 }
 0x47c   : > { %v2952_v27 = vpack.c.bf16 %v2908_v24, %v2908_v24  ;;  %v3216_v30 = vld [vmem:[#allocation4 + $0x101] sm:$0xff]  ;;  %3744 = vst.msk [vmem:[#allocation5 + $0x17c] sm:$0xf] %vm1295_vm4, %v3700_v43  ;;  %v2693_v37 = vmax.f32 %v2645_v21, 0.0  ;;  %v2509_v39 = vadd.f32 %v9288_v29, %v2508_v59  ;;  %v7061_v59 = vor.u32 %v7837_v12, %v7060_v15 }
 0x47d   : > { %v2775_v42 = vld [vmem:[#allocation4 + $0x107] sm:$0xff]  ;;  %v3260_v34 = vpack.c.bf16 %v3216_v30, %v3216_v30  ;;  %3511 = vrot.lane.b32.xlu2 %v3392_v26, %s8416_s25 }
 0x47e   : > { %3072 = vrot.lane.b32.xlu0 %v2952_v27, %s8416_s25  ;;  %v3664_v44 = vld [vmem:[#allocation4 + $0x143] sm:$0xff]  ;;  %v2819_v11 = vpack.c.bf16 %v2775_v42, %v2775_v42  ;;  %2737 = vst.msk [vmem:[#allocation4 + $0x150] sm:$0xff] %vm1207_vm3, %v2693_v37  ;;  %v2628_v57 = vadd.f32 %v9292_v36, %v2509_v39  ;;  %4448 = vmatmul.bf16.gmra.mxu3 %v7053_v40 }
 0x47f   : > { %3304 = vst.msk [vmem:[#allocation5 + $0x178] sm:$0xf] %vm1295_vm4, %v3260_v34  ;;  %v3708_v46 = vpack.c.bf16 %v3664_v44, %v3664_v44  ;;  %v3502_v32 = vpop.permute.xlu2 %3501  ;;  %7316 = vmatmul.msk.bf16.gmra.mxu1 %vm1207_vm3, %v7049_v35  ;;  %v2783_v45 = vld [vmem:[#allocation4 + $0x147] sm:$0xff]  ;;  %v7065_v39 = vor.u32 %v7839_v33, %v7064_v18 }
 0x480   : > { %3607 = vst.msk [vmem:[#allocation5 + $0x13c] sm:$0xf] %vm1784_vm5, %v3502_v32  ;;  %v2827_v48 = vpack.c.bf16 %v2783_v45, %v2783_v45  ;;  %v2686_v50 = vmax.f32 %v2628_v57, 0.0  ;;  %v3224_v3 = vld [vmem:[#allocation4 + $0x141] sm:$0xff] }
 0x481   : > { %3752 = vst.msk [vmem:[#allocation5 + $0x1dc] sm:$0xf] %vm1295_vm4, %v3708_v46  ;;  %v3657_v51 = vld [vmem:[#allocation4 + $0x10b] sm:$0xff]  ;;  %v2647_v52 = vpop.f32.mrf.mxu3  ;;  %v3268_v14 = vpack.c.bf16 %v3224_v3, %v3224_v3 }
 0x482   : > { %v3349_v53 = vld [vmem:[#allocation4 + $0x10a] sm:$0xff]  ;;  %2863 = vst.msk [vmem:[#allocation5 + $0x180] sm:$0xf] %vm1295_vm4, %v2819_v11  ;;  %v3701_v36 = vpack.c.bf16 %v3657_v51, %v3657_v51  ;;  %v2648_v55 = vadd.f32 %v2647_v52, %v2529_v47  ;;  %v9424_v56 = vpop.f32.mrf.mxu2 }
 0x483   : > { %v2909_v54 = vld [vmem:[#allocation4 + $0x110] sm:$0xff]  ;;  %2730 = vst.msk [vmem:[#allocation4 + $0x118] sm:$0xff] %vm1207_vm3, %v2686_v50  ;;  %v3393_v58 = vpack.c.bf16 %v3349_v53, %v3349_v53  ;;  %v2510_v6 = vpop.f32.mrf.mxu1  ;;  %v7090_v47 = vld [vmem:[#allocation5 + $0xfc] sm:$0xf0] }
 0x484   : > { %v2953_v60 = vpack.c.bf16 %v2909_v54, %v2909_v54  ;;  %v3217_v5 = vld [vmem:[#allocation4 + $0x109] sm:$0xff]  ;;  %2871 = vst.msk [vmem:[#allocation5 + $0x1e0] sm:$0xf] %vm1295_vm4, %v2827_v48  ;;  %v2694_v63 = vmax.f32 %v2648_v55, 0.0  ;;  %v2511_v0 = vadd.f32 %v9288_v29, %v2510_v6  ;;  %v9453_v48 = vld [vmem:[#allocation15] ss:$0 sm:$0xff] }
 0x485   : > { %v2776_v19 = vld [vmem:[#allocation4 + $0x10f] sm:$0xff]  ;;  %v3261_v1 = vpack.c.bf16 %v3217_v5, %v3217_v5  ;;  %3745 = vst.msk [vmem:[#allocation5 + $0x188] sm:$0xf] %vm1295_vm4, %v3701_v36  ;;  %3513 = vrot.lane.b32.xlu2 %v3393_v58, %s8416_s25 }
 0x486   : > { %v2820_v62 = vpack.c.bf16 %v2776_v19, %v2776_v19  ;;  %3074 = vrot.lane.b32.xlu1 %v2953_v60, %s8416_s25  ;;  %v3665_v38 = vld [vmem:[#allocation4 + $0x14b] sm:$0xff]  ;;  %2738 = vst.msk [vmem:[#allocation4 + $0x158] sm:$0xff] %vm1207_vm3, %v2694_v63  ;;  %v2630_v9 = vadd.f32 %v9303_v49, %v2511_v0 }
 0x487   : > { %3305 = vst.msk [vmem:[#allocation5 + $0x184] sm:$0xf] %vm1295_vm4, %v3261_v1  ;;  %v3709_v7 = vpack.c.bf16 %v3665_v38, %v3665_v38  ;;  %v2784_v10 = vld [vmem:[#allocation4 + $0x14f] sm:$0xff]  ;;  %4577 = vmatmul.bf16.gmra.mxu2 %v7081_v4 }
 0x488   : > { %2864 = vst.msk [vmem:[#allocation5 + $0x18c] sm:$0xf] %vm1295_vm4, %v2820_v62  ;;  %v2828_v13 = vpack.c.bf16 %v2784_v10, %v2784_v10  ;;  %v2687_v17 = vmax.f32 %v2630_v9, 0.0  ;;  %v7844_v62 = vld [vmem:[#allocation5 + $0xf4] sm:$0xf]  ;;  %v3225_v15 = vld [vmem:[#allocation4 + $0x149] sm:$0xff] }
 0x489   : > { %3753 = vst.msk [vmem:[#allocation5 + $0x1e8] sm:$0xf] %vm1295_vm4, %v3709_v7  ;;  %v2649_v22 = vpop.f32.mrf.mxu3  ;;  %v7093_v0 = vor.u32 %v7844_v62, %v7090_v47  ;;  %v7840_v9 = vld [vmem:[#allocation5 + $0xd0] sm:$0xf0] }
 0x48a   : > { %v3658_v20 = vld [vmem:[#allocation4 + $0x113] sm:$0xff]  ;;  %2872 = vst.msk [vmem:[#allocation5 + $0x1ec] sm:$0xf] %vm1295_vm4, %v2828_v13  ;;  %v2650_v43 = vadd.f32 %v2649_v22, %v2531_v16  ;;  %v9440_v21 = vpop.f32.mrf.mxu2 }
 0x48b   : > { %v2910_v23 = vld [vmem:[#allocation4 + $0x118] sm:$0xff]  ;;  %v3702_v49 = vpack.c.bf16 %v3658_v20, %v3658_v20  ;;  %2731 = vst.msk [vmem:[#allocation4 + $0x120] sm:$0xff] %vm1207_vm3, %v2687_v17  ;;  %v2513_v42 = vpop.f32.mrf.mxu1 }
 0x48c   : > { %v3350_v24 = vld [vmem:[#allocation4 + $0x112] sm:$0xff]  ;;  %v2954_v26 = vpack.c.bf16 %v2910_v23, %v2910_v23  ;;  %3312 = vst.msk [vmem:[#allocation5 + $0x1d8] sm:$0xf] %vm1295_vm4, %v3268_v14  ;;  %v2695_v34 = vmax.f32 %v2650_v43, 0.0  ;;  %v2514_v37 = vadd.f32 %v9288_v29, %v2513_v42 }
 0x48d   : > { %v3394_v27 = vpack.c.bf16 %v3350_v24, %v3350_v24  ;;  %v2777_v31 = vld [vmem:[#allocation4 + $0x117] sm:$0xff]  ;;  %3746 = vst.msk [vmem:[#allocation5 + $0x194] sm:$0xf] %vm1295_vm4, %v3702_v49 }
 0x48e   : > { %v3218_v30 = vld [vmem:[#allocation4 + $0x111] sm:$0xff]  ;;  %v2821_v35 = vpack.c.bf16 %v2777_v31, %v2777_v31  ;;  %3076 = vrot.lane.b32.xlu1 %v2954_v26, %s8416_s25  ;;  %2740 = vst.msk [vmem:[#allocation4 + $0x160] sm:$0x3f] %vm2739_vm8, %v2695_v34  ;;  %v2633_v11 = vadd.f32 %v9312_v8, %v2514_v37  ;;  %4453 = vmatmul.bf16.gmra.mxu3 %v7065_v39 }
 0x48f   : > { %3515 = vrot.lane.b32.xlu0 %v3394_v27, %s8416_s25  ;;  %v3666_v40 = vld [vmem:[#allocation4 + $0x153] sm:$0xff]  ;;  %v3262_v41 = vpack.c.bf16 %v3218_v30, %v3218_v30  ;;  %7317 = vmatmul.msk.bf16.gmra.mxu1 %vm1207_vm3, %v7061_v59  ;;  %v7076_v30 = vld [vmem:[#allocation5 + $0xd8] sm:$0xf] }
 0x490   : > { %2865 = vst.msk [vmem:[#allocation5 + $0x198] sm:$0xf] %vm1295_vm4, %v2821_v35  ;;  %v3710_v44 = vpack.c.bf16 %v3666_v40, %v3666_v40  ;;  %v3061_v46 = vpop.permute.xlu0 %3060  ;;  %v2785_v57 = vld [vmem:[#allocation4 + $0x157] sm:$0xff]  ;;  %v2688_v45 = vmax.f32 %v2633_v11, 0.0  ;;  %v3269_v40 = vpack.c.bf16 %v3225_v15, %v3225_v15 }
 0x491   : > { %3166 = vst.msk [vmem:[#allocation5 + $0x138] sm:$0xf] %vm1784_vm5, %v3061_v46  ;;  %v2829_v32 = vpack.c.bf16 %v2785_v57, %v2785_v57  ;;  %v4414_v51 = vpop.f32.mrf.mxu3  ;;  %v3226_v61 = vld [vmem:[#allocation4 + $0x151] sm:$0xff]  ;;  %v7102_v57 = vld [vmem:[#allocation5 + $0x114] sm:$0xf0] }
 0x492   : > { %3754 = vst.msk [vmem:[#allocation5 + $0x1f4] sm:$0xf] %vm1295_vm4, %v3710_v44  ;;  %v3659_v50 = vld [vmem:[#allocation4 + $0x11b] sm:$0xff]  ;;  %v9457_v54 = vpop.f32.mrf.mxu2  ;;  %v3270_v2 = vpack.c.bf16 %v3226_v61, %v3226_v61  ;;  %v4415_v38 = vadd.f32 %v9453_v48, %v4414_v51 }
 0x493   : > { %v2911_v52 = vld [vmem:[#allocation4 + $0x120] sm:$0xff]  ;;  %3306 = vst.msk [vmem:[#allocation5 + $0x190] sm:$0xf] %vm1295_vm4, %v3262_v41  ;;  %v3703_v8 = vpack.c.bf16 %v3659_v50, %v3659_v50  ;;  %v2515_v5 = vpop.f32.mrf.mxu1 }
 0x494   : > { %v3351_v53 = vld [vmem:[#allocation4 + $0x11a] sm:$0xff]  ;;  %2732 = vst.msk [vmem:[#allocation4 + $0x128] sm:$0xff] %vm1207_vm3, %v2688_v45  ;;  %v2955_v36 = vpack.c.bf16 %v2911_v52, %v2911_v52  ;;  %v2516_v1 = vadd.f32 %v9288_v29, %v2515_v5  ;;  %v7842_v29 = vld [vmem:[#allocation5 + $0xe0] sm:$0xf0]  ;;  %v4534_v24 = vadd.f32 %v9408_v25, %v4415_v38 }
 0x495   : > { %v3395_v55 = vpack.c.bf16 %v3351_v53, %v3351_v53  ;;  %v2778_v58 = vld [vmem:[#allocation4 + $0x11f] sm:$0xff]  ;;  %2873 = vst.msk [vmem:[#allocation5 + $0x1f8] sm:$0xf] %vm1295_vm4, %v2829_v32  ;;  %v7077_v25 = vor.u32 %v7842_v29, %v7076_v30 }
 0x496   : > { %v3219_v60 = vld [vmem:[#allocation4 + $0x119] sm:$0xff]  ;;  %v2822_v19 = vpack.c.bf16 %v2778_v58, %v2778_v58  ;;  %3747 = vst.msk [vmem:[#allocation5 + $0x1a0] sm:$0xf] %vm1295_vm4, %v3703_v8  ;;  %3078 = vrot.lane.b32.xlu2 %v2955_v36, %s8416_s25  ;;  %v2635_v4 = vadd.f32 %v9324_v28, %v2516_v1  ;;  %v3228_v10 = vld [vmem:[#allocation4 + $0x161] sm:$0xf] }
 0x497   : > { %v3263_v6 = vpack.c.bf16 %v3219_v60, %v3219_v60  ;;  %3517 = vrot.lane.b32.xlu0 %v3395_v55, %s8416_s25  ;;  %v3667_v63 = vld [vmem:[#allocation4 + $0x15b] sm:$0xff]  ;;  %4582 = vmatmul.bf16.gmra.mxu2 %v7093_v0  ;;  %v3272_v13 = vpack.c.bf16 %v3228_v10, %v3228_v10  ;;  %v3668_v14 = vld [vmem:[#allocation4 + $0x163] sm:$0xf]  ;;  %v7072_v28 = vld [vmem:[#allocation5 + $0xc8] sm:$0xf] }
 0x498   : > { %2866 = vst.msk [vmem:[#allocation5 + $0x1a4] sm:$0xf] %vm1295_vm4, %v2822_v19  ;;  %v3711_v3 = vpack.c.bf16 %v3667_v63, %v3667_v63  ;;  %v3063_v7 = vpop.permute.xlu1 %3062  ;;  %v2689_v12 = vmax.f32 %v2635_v4, 0.0  ;;  %v3712_v33 = vpack.c.bf16 %v3668_v14, %v3668_v14  ;;  %v3227_v35 = vld [vmem:[#allocation4 + $0x159] sm:$0xff]  ;;  %v7073_v37 = vor.u32 %v7840_v9, %v7072_v28  ;;  %v7974_v10 = vld [vmem:[#allocation16 + $0x98] sm:$0xff] }
 0x499   : > { %3307 = vst.msk [vmem:[#allocation5 + $0x19c] sm:$0xf] %vm1295_vm4, %v3263_v6  ;;  %v4416_v17 = vpop.f32.mrf.mxu3  ;;  %v2786_v39 = vld [vmem:[#allocation4 + $0x15f] sm:$0xf]  ;;  %v3271_v11 = vpack.c.bf16 %v3227_v35, %v3227_v35  ;;  %6101 = vmatpush.bf16.msrb.mxu0 %v7974_v10 }
 0x49a   : > { %3167 = vst.msk [vmem:[#allocation5 + $0x144] sm:$0xf] %vm1784_vm5, %v3063_v7  ;;  %v9472_v23 = vpop.f32.mrf.mxu2  ;;  %v4417_v41 = vadd.f32 %v9453_v48, %v4416_v17  ;;  %v2830_v46 = vpack.c.bf16 %v2786_v39, %v2786_v39  ;;  %v2914_v9 = vld [vmem:[#allocation4 + $0x138] sm:$0xff]  ;;  %v7843_v17 = vld [vmem:[#allocation5 + $0xe8] sm:$0xf0]  ;;  %v3356_v35 = vld [vmem:[#allocation4 + $0x142] sm:$0xff] }
 0x49b   : > { %3755 = vst.msk [vmem:[#allocation5 + $0x200] sm:$0xf] %vm1295_vm4, %v3711_v3  ;;  %v3660_v16 = vld [vmem:[#allocation4 + $0x123] sm:$0xff]  ;;  %v2958_v28 = vpack.c.bf16 %v2914_v9, %v2914_v9  ;;  %v7973_v15 = vld [vmem:[#allocation16 + $0x90] sm:$0xff] }
 0x49c   : > { %v3352_v18 = vld [vmem:[#allocation4 + $0x122] sm:$0xff]  ;;  %3314 = vst.msk [vmem:[#allocation5 + $0x1f0] sm:$0xf] %vm1295_vm4, %v3270_v2  ;;  %v3704_v22 = vpack.c.bf16 %v3660_v16, %v3660_v16  ;;  %v4652_v31 = vpop.f32.mrf.mxu1  ;;  %v4536_v8 = vadd.f32 %v9424_v56, %v4417_v41  ;;  %v7847_v56 = vld [vmem:[#allocation5 + $0x10c] sm:$0xf] }
 0x49d   : > { %v2912_v20 = vld [vmem:[#allocation4 + $0x128] sm:$0xff]  ;;  %2733 = vst.msk [vmem:[#allocation4 + $0x130] sm:$0xff] %vm1207_vm3, %v2689_v12  ;;  %v3396_v49 = vpack.c.bf16 %v3352_v18, %v3352_v18  ;;  %v4653_v34 = vadd.f32 %v4652_v31, %v4534_v24  ;;  %v7105_v3 = vor.u32 %v7847_v56, %v7102_v57  ;;  %v2915_v12 = vld [vmem:[#allocation4 + $0x140] sm:$0xff]  ;;  %6102 = vmatpush.bf16.msrb.mxu0 %v7973_v15  ;;  %v3358_v56 = vld [vmem:[#allocation4 + $0x152] sm:$0xff] }
 0x49e   : > { %v2956_v43 = vpack.c.bf16 %v2912_v20, %v2912_v20  ;;  %v2779_v26 = vld [vmem:[#allocation4 + $0x127] sm:$0xff]  ;;  %3316 = vst.msk [vmem:[#allocation5 + $0x208] sm:$0x3] %vm2874_vm9, %v3272_v13  ;;  %4458 = vmatmul.bf16.gmra.mxu3 %v7077_v25  ;;  %v3355_v13 = vld [vmem:[#allocation4 + $0x13a] sm:$0xff] }
 0x49f   : > { %v3220_v27 = vld [vmem:[#allocation4 + $0x121] sm:$0xff]  ;;  %v2823_v42 = vpack.c.bf16 %v2779_v26, %v2779_v26  ;;  %3748 = vst.msk [vmem:[#allocation5 + $0x1ac] sm:$0xf] %vm1295_vm4, %v3704_v22  ;;  %3519 = vrot.lane.b32.xlu1 %v3396_v49, %s8416_s25  ;;  %v4762_v44 = vmax.f32 %v4653_v34, 0.0  ;;  %7318 = vmatmul.msk.bf16.gmra.mxu1 %vm1207_vm3, %v7073_v37  ;;  %v2959_v49 = vpack.c.bf16 %v2915_v12, %v2915_v12  ;;  %v7088_v26 = vld [vmem:[#allocation5 + $0xf0] sm:$0xf] }
 0x4a0   : > { %v3264_v59 = vpack.c.bf16 %v3220_v27, %v3220_v27  ;;  %3080 = vrot.lane.b32.xlu2 %v2956_v43, %s8416_s25  ;;  %3756 = vst.msk [vmem:[#allocation5 + $0x20c] sm:$0x3] %vm2874_vm9, %v3712_v33  ;;  %v7845_v16 = vld [vmem:[#allocation5 + $0xf8] sm:$0xf0]  ;;  %v7084_v22 = vld [vmem:[#allocation5 + $0xe0] sm:$0xf]  ;;  %v3399_v43 = vpack.c.bf16 %v3355_v13, %v3355_v13  ;;  %v3402_v12 = vpack.c.bf16 %v3358_v56, %v3358_v56 }
 0x4a1   : > { %2867 = vst.msk [vmem:[#allocation5 + $0x1b0] sm:$0xf] %vm1295_vm4, %v2823_v42  ;;  %v4419_v47 = vpop.f32.mrf.mxu3  ;;  %v7958_v27 = vld [vmem:[#allocation16 + $0x18] sm:$0xff]  ;;  %v7089_v30 = vor.u32 %v7845_v16, %v7088_v26  ;;  %v7085_v42 = vor.u32 %v7843_v17, %v7084_v22 }
 0x4a2   : > { %3308 = vst.msk [vmem:[#allocation5 + $0x1a8] sm:$0xf] %vm1295_vm4, %v3264_v59  ;;  %v9485_v53 = vpop.f32.mrf.mxu2  ;;  %v4420_v4 = vadd.f32 %v9453_v48, %v4419_v47  ;;  %v7986_v59 = vld [vmem:[#allocation16 + $0xf8] sm:$0xff]  ;;  %5973 = vmatpush.bf16.msra.mxu3 %v7958_v27  ;;  %v3400_v47 = vpack.c.bf16 %v3356_v35, %v3356_v35 }
 0x4a3   : > { %4806 = vst [vmem:[#allocation6 + $0x8] sm:$0xff] %v4762_v44  ;;  %v2916_v44 = vld [vmem:[#allocation4 + $0x148] sm:$0xff]  ;;  %6161 = vmatpush.bf16.msra.mxu2 %v7986_v59  ;;  %v7096_v16 = vld [vmem:[#allocation5 + $0xf8] sm:$0xf] }
 0x4a4   : > { %v3661_v32 = vld [vmem:[#allocation4 + $0x12b] sm:$0xff]  ;;  %v3662_v45 = vld [vmem:[#allocation4 + $0x133] sm:$0xff]  ;;  %3313 = vst.msk [vmem:[#allocation5 + $0x1e4] sm:$0xf] %vm1295_vm4, %v3269_v40  ;;  %v4654_v61 = vpop.f32.mrf.mxu1  ;;  %v4539_v20 = vadd.f32 %v9440_v21, %v4420_v4 }
 0x4a5   : > { %v2913_v50 = vld [vmem:[#allocation4 + $0x130] sm:$0xff]  ;;  %v3705_v51 = vpack.c.bf16 %v3661_v32, %v3661_v32  ;;  %v3706_v52 = vpack.c.bf16 %v3662_v45, %v3662_v45  ;;  %3315 = vst.msk [vmem:[#allocation5 + $0x1fc] sm:$0xf] %vm1295_vm4, %v3271_v11  ;;  %v4655_v0 = vadd.f32 %v4654_v61, %v4536_v8  ;;  %v7846_v4 = vld [vmem:[#allocation5 + $0x100] sm:$0xf0] }
 0x4a6   : > { %v2957_v36 = vpack.c.bf16 %v2913_v50, %v2913_v50  ;;  %v3353_v55 = vld [vmem:[#allocation4 + $0x12a] sm:$0xff]  ;;  %v3354_v58 = vld [vmem:[#allocation4 + $0x132] sm:$0xff]  ;;  %2875 = vst.msk [vmem:[#allocation5 + $0x204] sm:$0x3] %vm2874_vm9, %v2830_v46 }
 0x4a7   : > { %v3222_v60 = vld [vmem:[#allocation4 + $0x131] sm:$0xff]  ;;  %v3397_v5 = vpack.c.bf16 %v3353_v55, %v3353_v55  ;;  %v3398_v19 = vpack.c.bf16 %v3354_v58, %v3354_v58  ;;  %v3221_v1 = vld [vmem:[#allocation4 + $0x129] sm:$0xff]  ;;  %3749 = vst.msk [vmem:[#allocation5 + $0x1b8] sm:$0xf] %vm1295_vm4, %v3705_v51  ;;  %v4763_v7 = vmax.f32 %v4655_v0, 0.0  ;;  %4587 = vmatmul.bf16.gmra.mxu2 %v7105_v3 }
 0x4a8   : > { %v3266_v6 = vpack.c.bf16 %v3222_v60, %v3222_v60  ;;  %v2780_v62 = vld [vmem:[#allocation4 + $0x12f] sm:$0xff]  ;;  %v2781_v63 = vld [vmem:[#allocation4 + $0x137] sm:$0xff]  ;;  %3082 = vrot.lane.b32.xlu0 %v2957_v36, %s8416_s25  ;;  %v3265_v2 = vpack.c.bf16 %v3221_v1, %v3221_v1  ;;  %3750 = vst.msk [vmem:[#allocation5 + $0x1c4] sm:$0xf] %vm1295_vm4, %v3706_v52  ;;  %v2960_v52 = vpack.c.bf16 %v2916_v44, %v2916_v44  ;;  %v7994_v60 = vld [vmem:[#allocation16 + $0x138] sm:$0xff] }
 0x4a9   : > { %3521 = vrot.lane.b32.xlu1 %v3397_v5, %s8416_s25  ;;  %3523 = vrot.lane.b32.xlu2 %v3398_v19, %s8416_s25  ;;  %v2824_v38 = vpack.c.bf16 %v2780_v62, %v2780_v62  ;;  %v2825_v29 = vpack.c.bf16 %v2781_v63, %v2781_v63  ;;  %4807 = vst [vmem:[#allocation6 + $0x10] sm:$0xff] %v4763_v7  ;;  %v4421_v14 = vpop.f32.mrf.mxu3  ;;  %v2917_v11 = vld [vmem:[#allocation4 + $0x150] sm:$0xff]  ;;  %v7114_v50 = vld [vmem:[#allocation5 + $0x12c] sm:$0xf0]  ;;  %v7850_v58 = vld [vmem:[#allocation5 + $0x124] sm:$0xf] }
 0x4aa   : > { %3310 = vst.msk [vmem:[#allocation5 + $0x1c0] sm:$0xf] %vm1295_vm4, %v3266_v6  ;;  %v9499_v18 = vpop.f32.mrf.mxu2  ;;  %v4422_v21 = vadd.f32 %v9453_v48, %v4421_v14  ;;  %v7972_v46 = vld [vmem:[#allocation16 + $0x88] sm:$0xff]  ;;  %v2961_v8 = vpack.c.bf16 %v2917_v11, %v2917_v11  ;;  %v7971_v36 = vld [vmem:[#allocation16 + $0x80] sm:$0xff]  ;;  %v7117_v61 = vor.u32 %v7850_v58, %v7114_v50  ;;  %6225 = vmatpush.bf16.msra.mxu1 %v7994_v60  ;;  %v7848_v14 = vld [vmem:[#allocation5 + $0x110] sm:$0xf0] }
 0x4ab   : > { %3309 = vst.msk [vmem:[#allocation5 + $0x1b4] sm:$0xf] %vm1295_vm4, %v3265_v2  ;;  %6103 = vmatpush.bf16.msrb.mxu0 %v7972_v46  ;;  %v3357_v6 = vld [vmem:[#allocation4 + $0x14a] sm:$0xff]  ;;  %v2918_v2 = vld [vmem:[#allocation4 + $0x158] sm:$0xff] }
 0x4ac   : > { %2868 = vst.msk [vmem:[#allocation5 + $0x1bc] sm:$0xf] %vm1295_vm4, %v2824_v38  ;;  %v4657_v24 = vpop.f32.mrf.mxu1  ;;  %v4541_v45 = vadd.f32 %v9457_v54, %v4422_v21  ;;  %v7100_v38 = vld [vmem:[#allocation5 + $0x108] sm:$0xf]  ;;  %v3401_v9 = vpack.c.bf16 %v3357_v6, %v3357_v6  ;;  %v2962_v13 = vpack.c.bf16 %v2918_v2, %v2918_v2  ;;  %v7112_v6 = vld [vmem:[#allocation5 + $0x120] sm:$0xf] }
 0x4ad   : > { %2869 = vst.msk [vmem:[#allocation5 + $0x1c8] sm:$0xf] %vm1295_vm4, %v2825_v29  ;;  %v4658_v31 = vadd.f32 %v4657_v24, %v4539_v20  ;;  %v7101_v20 = vor.u32 %v7848_v14, %v7100_v38 }
 0x4ae   : > { %4463 = vmatmul.bf16.gmra.mxu3 %v7089_v30  ;;  %v3359_v30 = vld [vmem:[#allocation4 + $0x15a] sm:$0xff] }
 0x4af   : > { %v4764_v33 = vmax.f32 %v4658_v31, 0.0  ;;  %7319 = vmatmul.msk.bf16.gmra.mxu1 %vm1207_vm3, %v7085_v42  ;;  %6104 = vmatpush.bf16.msrb.mxu0 %v7971_v36  ;;  %v3360_v42 = vld [vmem:[#allocation4 + $0x162] sm:$0xf]  ;;  %v7108_v36 = vld [vmem:[#allocation5 + $0x110] sm:$0xf] }
 0x4b0   : > { %3084 = vrot.lane.b32.xlu0 %v2958_v28, %s8416_s25  ;;  %v4854_v34 = vld [vmem:[#allocation6 + $0x7] ss:$2 sm:$0xff]  ;;  %v4942_v25 = vld [vmem:[#allocation6 + $0x8] ss:$2 sm:$0xff]  ;;  %v7097_v28 = vor.u32 %v7846_v4, %v7096_v16 }
 0x4b1   : > { %3086 = vrot.lane.b32.xlu1 %v2959_v49, %s8416_s25  ;;  %3525 = vrot.lane.b32.xlu2 %v3399_v43, %s8416_s25  ;;  %v5030_v37 = vld [vmem:[#allocation6 + $0x9] ss:$2 sm:$0xff]  ;;  %v4897_v39 = vpack.c.bf16 %v4854_v34, %v4854_v34  ;;  %v4985_v40 = vpack.c.bf16 %v4942_v25, %v4942_v25  ;;  %4808 = vst [vmem:[#allocation6 + $0x18] sm:$0xff] %v4764_v33  ;;  %v4424_v57 = vpop.f32.mrf.mxu3 }
 0x4b2   : > { %v5073_v41 = vpack.c.bf16 %v5030_v37, %v5030_v37  ;;  %v9508_v32 = vpop.f32.mrf.mxu2  ;;  %v4425_v54 = vadd.f32 %v9453_v48, %v4424_v57  ;;  %v3403_v25 = vpack.c.bf16 %v3359_v30, %v3359_v30  ;;  %v3404_v37 = vpack.c.bf16 %v3360_v42, %v3360_v42  ;;  %v7854_v30 = vld [vmem:[#allocation5 + $0x140] sm:$0xf0] }
 0x4b3   : > { %4919 = vst [vmem:[#allocation7] sm:$0xf] %v4897_v39 }
 0x4b4   : > { %5007 = vst [vmem:[#allocation7 + $0x4] sm:$0xf] %v4985_v40  ;;  %v4659_v51 = vpop.f32.mrf.mxu1  ;;  %v4544_v29 = vadd.f32 %v9472_v23, %v4425_v54  ;;  %v2919_v23 = vld [vmem:[#allocation4 + $0x160] sm:$0xf] }
 0x4b5   : > { %5095 = vst [vmem:[#allocation7 + $0x8] sm:$0xf] %v5073_v41  ;;  %v4660_v55 = vadd.f32 %v4659_v51, %v4541_v45  ;;  %v2963_v35 = vpack.c.bf16 %v2919_v23, %v2919_v23  ;;  %v7849_v51 = vld [vmem:[#allocation5 + $0x118] sm:$0xf0] }
 0x4b7   : > { %v4765_v5 = vmax.f32 %v4660_v55, 0.0  ;;  %v3067_v19 = vpop.permute.xlu2 %3066  ;;  %4592 = vmatmul.bf16.gmra.mxu2 %v7117_v61  ;;  %v7851_v55 = vld [vmem:[#allocation5 + $0x128] sm:$0xf0] }
 0x4b8   : > { %3527 = vrot.lane.b32.xlu0 %v3400_v47, %s8416_s25  ;;  %v5118_v1 = vld [vmem:[#allocation6 + $0xa] ss:$2 sm:$0xff]  ;;  %v5206_v62 = vld [vmem:[#allocation6 + $0xb] ss:$2 sm:$0xff]  ;;  %3169 = vst.msk [vmem:[#allocation5 + $0x15c] sm:$0xf] %vm1784_vm5, %v3067_v19  ;;  %v7109_v19 = vor.u32 %v7849_v51, %v7108_v36 }
 0x4b9   : > { %3088 = vrot.lane.b32.xlu1 %v2960_v52, %s8416_s25  ;;  %3090 = vrot.lane.b32.xlu2 %v2961_v8, %s8416_s25  ;;  %v5161_v63 = vpack.c.bf16 %v5118_v1, %v5118_v1  ;;  %v5249_v0 = vpack.c.bf16 %v5206_v62, %v5206_v62  ;;  %4809 = vst [vmem:[#allocation6 + $0x20] sm:$0xff] %v4765_v5  ;;  %v4426_v3 = vpop.f32.mrf.mxu3 }
 0x4ba   : > { %v9516_v7 = vpop.f32.mrf.mxu2  ;;  %v4427_v22 = vadd.f32 %v9453_v48, %v4426_v3  ;;  %v7113_v1 = vor.u32 %v7851_v55, %v7112_v6  ;;  %v7993_v55 = vld [vmem:[#allocation16 + $0x130] sm:$0xff] }
 0x4bb   : > { %5183 = vst [vmem:[#allocation7 + $0xc] sm:$0xf] %v5161_v63  ;;  %6226 = vmatpush.bf16.msra.mxu1 %v7993_v55 }
 0x4bc   : > { %5271 = vst [vmem:[#allocation7 + $0x10] sm:$0xf] %v5249_v0  ;;  %v4662_v10 = vpop.f32.mrf.mxu1  ;;  %v4546_v33 = vadd.f32 %v9485_v53, %v4427_v22  ;;  %v7342_v60 = vld [vmem:[#allocation7 + $0x8] sm:$0xf] }
 0x4bd   : > { %v4663_v17 = vadd.f32 %v4662_v10, %v4544_v29 }
 0x4be   : > { %4468 = vmatmul.bf16.gmra.mxu3 %v7101_v20  ;;  %v7957_v20 = vld [vmem:[#allocation16 + $0x10] sm:$0xff] }
 0x4bf   : > { %v4766_v24 = vmax.f32 %v4663_v17, 0.0  ;;  %7320 = vmatmul.msk.bf16.gmra.mxu1 %vm1207_vm3, %v7097_v28  ;;  %5974 = vmatpush.bf16.msra.mxu3 %v7957_v20 }
 0x4c0   : > { %3529 = vrot.lane.b32.xlu0 %v3401_v9, %s8416_s25  ;;  %v4856_v49 = vld [vmem:[#allocation6 + $0x17] ss:$2 sm:$0xff]  ;;  %v4944_v43 = vld [vmem:[#allocation6 + $0x18] ss:$2 sm:$0xff] }
 0x4c1   : > { %3531 = vrot.lane.b32.xlu1 %v3402_v12, %s8416_s25  ;;  %3092 = vrot.lane.b32.xlu2 %v2962_v13, %s8416_s25  ;;  %v5032_v26 = vld [vmem:[#allocation6 + $0x19] ss:$2 sm:$0xff]  ;;  %v4898_v27 = vpack.c.bf16 %v4856_v49, %v4856_v49  ;;  %v4986_v15 = vpack.c.bf16 %v4944_v43, %v4944_v43  ;;  %4810 = vst [vmem:[#allocation6 + $0x28] sm:$0xff] %v4766_v24  ;;  %v4429_v59 = vpop.f32.mrf.mxu3  ;;  %v7853_v12 = vld [vmem:[#allocation5 + $0x13c] sm:$0xf] }
 0x4c2   : > { %v5074_v31 = vpack.c.bf16 %v5032_v26, %v5032_v26  ;;  %v9524_v21 = vpop.f32.mrf.mxu2  ;;  %v4430_v40 = vadd.f32 %v9453_v48, %v4429_v59  ;;  %v7120_v59 = vld [vmem:[#allocation5 + $0x128] sm:$0xf] }
 0x4c3   : > { %4920 = vst [vmem:[#allocation7 + $0x14] sm:$0xf] %v4898_v27  ;;  %v7852_v27 = vld [vmem:[#allocation5 + $0x130] sm:$0xf0] }
 0x4c4   : > { %5008 = vst [vmem:[#allocation7 + $0x18] sm:$0xf] %v4986_v15  ;;  %v4664_v34 = vpop.f32.mrf.mxu1  ;;  %v4549_v8 = vadd.f32 %v9499_v18, %v4430_v40 }
 0x4c5   : > { %5096 = vst [vmem:[#allocation7 + $0x1c] sm:$0xf] %v5074_v31  ;;  %v4665_v39 = vadd.f32 %v4664_v34, %v4546_v33  ;;  %v7985_v33 = vld [vmem:[#allocation16 + $0xf0] sm:$0xff] }
 0x4c6   : > { %v7124_v34 = vld [vmem:[#allocation5 + $0x138] sm:$0xf]  ;;  %6162 = vmatpush.bf16.msra.mxu2 %v7985_v33 }
 0x4c7   : > { %v4767_v41 = vmax.f32 %v4665_v39, 0.0  ;;  %v3069_v44 = vpop.permute.xlu2 %3068  ;;  %v3065_v11 = vpop.permute.xlu1 %3064 }
 0x4c8   : > { %3094 = vrot.lane.b32.xlu0 %v2963_v35, %s8416_s25  ;;  %v5120_v46 = vld [vmem:[#allocation6 + $0x1a] ss:$2 sm:$0xff]  ;;  %v5208_v53 = vld [vmem:[#allocation6 + $0x1b] ss:$2 sm:$0xff]  ;;  %3170 = vst.msk [vmem:[#allocation5 + $0x168] sm:$0xf] %vm1784_vm5, %v3069_v44  ;;  %v3504_v57 = vpop.permute.xlu0 %3503 }
 0x4c9   : > { %3533 = vrot.lane.b32.xlu1 %v3403_v25, %s8416_s25  ;;  %3535 = vrot.lane.b32.xlu2 %v3404_v37, %s8416_s25  ;;  %v5162_v45 = vpack.c.bf16 %v5120_v46, %v5120_v46  ;;  %v5250_v47 = vpack.c.bf16 %v5208_v53, %v5208_v53  ;;  %4811 = vst [vmem:[#allocation6 + $0x30] sm:$0xff] %v4767_v41  ;;  %v4431_v50 = vpop.f32.mrf.mxu3 }
 0x4ca   : > { %3168 = vst.msk [vmem:[#allocation5 + $0x150] sm:$0xf] %vm1784_vm5, %v3065_v11  ;;  %v9533_v52 = vpop.f32.mrf.mxu2  ;;  %v4432_v62 = vadd.f32 %v9453_v48, %v4431_v50  ;;  %v7121_v25 = vor.u32 %v7852_v27, %v7120_v59  ;;  %v7125_v37 = vor.u32 %v7854_v30, %v7124_v34 }
 0x4cb   : > { %5184 = vst [vmem:[#allocation7 + $0x20] sm:$0xf] %v5162_v45 }
 0x4cc   : > { %5272 = vst [vmem:[#allocation7 + $0x24] sm:$0xf] %v5250_v47  ;;  %v4667_v58 = vpop.f32.mrf.mxu1  ;;  %v7903_v61 = vld [vmem:[#allocation7 + $0x18] sm:$0xf0]  ;;  %v4551_v10 = vadd.f32 %v9508_v32, %v4432_v62  ;;  %v7855_v62 = vld [vmem:[#allocation5 + $0x148] sm:$0xf0] }
 0x4cd   : > { %3608 = vst.msk [vmem:[#allocation5 + $0x148] sm:$0xf] %vm1784_vm5, %v3504_v57  ;;  %v4668_v54 = vadd.f32 %v4667_v58, %v4549_v8  ;;  %v7343_v5 = vor.u32 %v7903_v61, %v7342_v60 }
 0x4ce   : > { %4473 = vmatmul.bf16.gmra.mxu3 %v7113_v1 }
 0x4cf   : > { %v4768_v63 = vmax.f32 %v4668_v54, 0.0  ;;  %6105 = vmatmul.bf16.vlgmr.msrb.gmra.mxu0 %v7343_v5  ;;  %7321 = vmatmul.msk.bf16.gmra.mxu1 %vm1207_vm3, %v7109_v19 }
 0x4d0   : > { %v4858_v18 = vld [vmem:[#allocation6 + $0x27] ss:$2 sm:$0xff]  ;;  %v4946_v0 = vld [vmem:[#allocation6 + $0x28] ss:$2 sm:$0xff]  ;;  %v3506_v2 = vpop.permute.xlu0 %3505 }
 0x4d1   : > { %v5034_v56 = vld [vmem:[#allocation6 + $0x29] ss:$2 sm:$0xff]  ;;  %v4899_v3 = vpack.c.bf16 %v4858_v18, %v4858_v18  ;;  %v4987_v38 = vpack.c.bf16 %v4946_v0, %v4946_v0  ;;  %4812 = vst [vmem:[#allocation6 + $0x38] sm:$0xff] %v4768_v63  ;;  %v4434_v29 = vpop.f32.mrf.mxu3 }
 0x4d2   : > { %v5075_v4 = vpack.c.bf16 %v5034_v56, %v5034_v56  ;;  %3609 = vst.msk [vmem:[#allocation5 + $0x154] sm:$0xf] %vm1784_vm5, %v3506_v2  ;;  %v9540_v9 = vpop.f32.mrf.mxu2  ;;  %v4435_v28 = vadd.f32 %v9453_v48, %v4434_v29  ;;  %v7132_v0 = vld [vmem:[#allocation5 + $0x140] sm:$0xf]  ;;  %v7136_v56 = vld [vmem:[#allocation5 + $0x150] sm:$0xf] }
 0x4d3   : > { %4921 = vst [vmem:[#allocation7 + $0x28] sm:$0xf] %v4899_v3 }
 0x4d4   : > { %5009 = vst [vmem:[#allocation7 + $0x2c] sm:$0xf] %v4987_v38  ;;  %v7126_v13 = vld [vmem:[#allocation5 + $0x144] sm:$0xf0]  ;;  %v4669_v14 = vpop.f32.mrf.mxu1  ;;  %v4554_v31 = vadd.f32 %v9516_v7, %v4435_v28 }
 0x4d5   : > { %5097 = vst [vmem:[#allocation7 + $0x30] sm:$0xf] %v5075_v4  ;;  %v7129_v16 = vor.u32 %v7853_v12, %v7126_v13  ;;  %v4670_v17 = vadd.f32 %v4669_v14, %v4551_v10  ;;  %v7133_v13 = vor.u32 %v7855_v62, %v7132_v0  ;;  %v7857_v14 = vld [vmem:[#allocation5 + $0x158] sm:$0xf0] }
 0x4d7   : > { %4597 = vmatmul.bf16.gmra.mxu2 %v7129_v16  ;;  %v4769_v22 = vmax.f32 %v4670_v17, 0.0  ;;  %v3512_v24 = vpop.permute.xlu2 %3511  ;;  %v7137_v17 = vor.u32 %v7857_v14, %v7136_v56 }
 0x4d8   : > { %v5122_v23 = vld [vmem:[#allocation6 + $0x2a] ss:$2 sm:$0xff]  ;;  %v5210_v49 = vld [vmem:[#allocation6 + $0x2b] ss:$2 sm:$0xff]  ;;  %3612 = vst.msk [vmem:[#allocation5 + $0x178] sm:$0xf] %vm1784_vm5, %v3512_v24 }
 0x4d9   : > { %v5163_v43 = vpack.c.bf16 %v5122_v23, %v5122_v23  ;;  %v5251_v32 = vpack.c.bf16 %v5210_v49, %v5210_v49  ;;  %4813 = vst [vmem:[#allocation6 + $0x40] sm:$0xff] %v4769_v22  ;;  %v4436_v26 = vpop.f32.mrf.mxu3  ;;  %v7856_v4 = vld [vmem:[#allocation5 + $0x154] sm:$0xf] }
 0x4da   : > { %v9545_v15 = vpop.f32.mrf.mxu2  ;;  %v4437_v39 = vadd.f32 %v9453_v48, %v4436_v26 }
 0x4db   : > { %5185 = vst [vmem:[#allocation7 + $0x34] sm:$0xf] %v5163_v43 }
 0x4dc   : > { %5273 = vst [vmem:[#allocation7 + $0x38] sm:$0xf] %v5251_v32  ;;  %v4672_v42 = vpop.f32.mrf.mxu1  ;;  %v4556_v51 = vadd.f32 %v9524_v21, %v4437_v39  ;;  %v7362_v3 = vld [vmem:[#allocation7 + $0x30] sm:$0xf] }
 0x4dd   : > { %v4673_v35 = vadd.f32 %v4672_v42, %v4554_v31 }
 0x4de   : > { %4478 = vmatmul.bf16.gmra.mxu3 %v7125_v37 }
 0x4df   : > { %v4770_v40 = vmax.f32 %v4673_v35, 0.0  ;;  %v3514_v41 = vpop.permute.xlu2 %3513  ;;  %7322 = vmatmul.msk.bf16.gmra.mxu1 %vm1207_vm3, %v7121_v25 }
 0x4e0   : > { %v3508_v44 = vpop.permute.xlu1 %3507  ;;  %v4860_v11 = vld [vmem:[#allocation6 + $0x37] ss:$2 sm:$0xff]  ;;  %v4948_v46 = vld [vmem:[#allocation6 + $0x38] ss:$2 sm:$0xff]  ;;  %3613 = vst.msk [vmem:[#allocation5 + $0x184] sm:$0xf] %vm1784_vm5, %v3514_v41 }
 0x4e1   : > { %v5036_v7 = vld [vmem:[#allocation6 + $0x39] ss:$2 sm:$0xff]  ;;  %v4900_v53 = vpack.c.bf16 %v4860_v11, %v4860_v11  ;;  %v4988_v57 = vpack.c.bf16 %v4948_v46, %v4948_v46  ;;  %4814 = vst [vmem:[#allocation6 + $0x48] sm:$0xff] %v4770_v40  ;;  %v4439_v47 = vpop.f32.mrf.mxu3 }
 0x4e2   : > { %v5076_v45 = vpack.c.bf16 %v5036_v7, %v5036_v7  ;;  %v9551_v50 = vpop.f32.mrf.mxu2  ;;  %3610 = vst.msk [vmem:[#allocation5 + $0x160] sm:$0xf] %vm1784_vm5, %v3508_v44  ;;  %v4440_v58 = vadd.f32 %v9453_v48, %v4439_v47  ;;  %v7858_v44 = vld [vmem:[#allocation5 + $0x160] sm:$0xf0] }
 0x4e3   : > { %4922 = vst [vmem:[#allocation7 + $0x3c] sm:$0xf] %v4900_v53 }
 0x4e4   : > { %5010 = vst [vmem:[#allocation7 + $0x40] sm:$0xf] %v4988_v57  ;;  %v4674_v8 = vpop.f32.mrf.mxu1  ;;  %v4559_v18 = vadd.f32 %v9533_v52, %v4440_v58  ;;  %v7144_v57 = vld [vmem:[#allocation5 + $0x158] sm:$0xf] }
 0x4e5   : > { %5098 = vst [vmem:[#allocation7 + $0x44] sm:$0xf] %v5076_v45  ;;  %v4675_v36 = vadd.f32 %v4674_v8, %v4556_v51  ;;  %v7150_v45 = vld [vmem:[#allocation5 + $0x174] sm:$0xf0]  ;;  %v7145_v51 = vor.u32 %v7858_v44, %v7144_v57  ;;  %v7148_v8 = vld [vmem:[#allocation5 + $0x168] sm:$0xf] }
 0x4e7   : > { %v4771_v60 = vmax.f32 %v4675_v36, 0.0 }
 0x4e8   : > { %v3510_v61 = vpop.permute.xlu1 %3509  ;;  %v3071_v54 = vpop.permute.xlu0 %3070  ;;  %v5124_v5 = vld [vmem:[#allocation6 + $0x3a] ss:$2 sm:$0xff]  ;;  %v5212_v19 = vld [vmem:[#allocation6 + $0x3b] ss:$2 sm:$0xff] }
 0x4e9   : > { %3611 = vst.msk [vmem:[#allocation5 + $0x16c] sm:$0xf] %vm1784_vm5, %v3510_v61  ;;  %v5164_v6 = vpack.c.bf16 %v5124_v5, %v5124_v5  ;;  %v5252_v1 = vpack.c.bf16 %v5212_v19, %v5212_v19  ;;  %v4441_v21 = vpop.f32.mrf.mxu3  ;;  %v7138_v29 = vld [vmem:[#allocation5 + $0x15c] sm:$0xf0] }
 0x4ea   : > { %4815 = vst [vmem:[#allocation6 + $0x50] sm:$0xff] %v4771_v60  ;;  %v9558_v63 = vpop.f32.mrf.mxu2  ;;  %v7141_v16 = vor.u32 %v7856_v4, %v7138_v29  ;;  %v4442_v20 = vadd.f32 %v9453_v48, %v4441_v21  ;;  %v7984_v4 = vld [vmem:[#allocation16 + $0xe8] sm:$0xff] }
 0x4eb   : > { %3171 = vst.msk [vmem:[#allocation5 + $0x174] sm:$0xf] %vm1784_vm5, %v3071_v54  ;;  %6163 = vmatpush.bf16.msra.mxu2 %v7984_v4 }
 0x4ec   : > { %5186 = vst [vmem:[#allocation7 + $0x48] sm:$0xf] %v5164_v6  ;;  %v4677_v2 = vpop.f32.mrf.mxu1  ;;  %v7908_v38 = vld [vmem:[#allocation7 + $0x40] sm:$0xf0]  ;;  %4602 = vmatmul.bf16.gmra.mxu2 %v7141_v16  ;;  %v4561_v31 = vadd.f32 %v9540_v9, %v4442_v20 }
 0x4ed   : > { %5274 = vst [vmem:[#allocation7 + $0x4c] sm:$0xf] %v5252_v1  ;;  %v4678_v10 = vadd.f32 %v4677_v2, %v4559_v18  ;;  %v7363_v12 = vor.u32 %v7908_v38, %v7362_v3  ;;  %v7956_v38 = vld [vmem:[#allocation16 + $0x8] sm:$0xff] }
 0x4ee   : > { %4483 = vmatmul.bf16.gmra.mxu3 %v7137_v17 }
 0x4ef   : > { %v4772_v28 = vmax.f32 %v4678_v10, 0.0  ;;  %6110 = vmatmul.bf16.gmra.mxu0 %v7363_v12  ;;  %7323 = vmatmul.msk.bf16.gmra.mxu1 %vm1207_vm3, %v7133_v13 }
 0x4f0   : > { %v3079_v22 = vpop.permute.xlu2 %3078  ;;  %v3073_v27 = vpop.permute.xlu0 %3072  ;;  %v7859_v11 = vld [vmem:[#allocation5 + $0x16c] sm:$0xf]  ;;  %5975 = vmatpush.bf16.msra.mxu3 %v7956_v38 }
 0x4f1   : > { %v4862_v52 = vld [vmem:[#allocation6 + $0x47] ss:$2 sm:$0xff]  ;;  %v4950_v24 = vld [vmem:[#allocation6 + $0x48] ss:$2 sm:$0xff]  ;;  %4816 = vst [vmem:[#allocation6 + $0x58] sm:$0xff] %v4772_v28  ;;  %v4444_v26 = vpop.f32.mrf.mxu3  ;;  %v7153_v55 = vor.u32 %v7859_v11, %v7150_v45 }
 0x4f2   : > { %v5038_v23 = vld [vmem:[#allocation6 + $0x49] ss:$2 sm:$0xff]  ;;  %v4901_v49 = vpack.c.bf16 %v4862_v52, %v4862_v52  ;;  %v4989_v43 = vpack.c.bf16 %v4950_v24, %v4950_v24  ;;  %3175 = vst.msk [vmem:[#allocation5 + $0x1a4] sm:$0xf] %vm1784_vm5, %v3079_v22  ;;  %v9565_v30 = vpop.f32.mrf.mxu2  ;;  %v4445_v33 = vadd.f32 %v9453_v48, %v4444_v26  ;;  %v7860_v7 = vld [vmem:[#allocation5 + $0x170] sm:$0xf0] }
 0x4f3   : > { %v5077_v32 = vpack.c.bf16 %v5038_v23, %v5038_v23  ;;  %3172 = vst.msk [vmem:[#allocation5 + $0x180] sm:$0xf] %vm1784_vm5, %v3073_v27  ;;  %v7149_v58 = vor.u32 %v7860_v7, %v7148_v8  ;;  %v7156_v22 = vld [vmem:[#allocation5 + $0x170] sm:$0xf]  ;;  %v7861_v52 = vld [vmem:[#allocation5 + $0x178] sm:$0xf0] }
 0x4f4   : > { %4923 = vst [vmem:[#allocation7 + $0x50] sm:$0xf] %v4901_v49  ;;  %v4679_v42 = vpop.f32.mrf.mxu1  ;;  %v4564_v46 = vadd.f32 %v9545_v15, %v4445_v33  ;;  %v7992_v26 = vld [vmem:[#allocation16 + $0x128] sm:$0xff]  ;;  %v7862_v33 = vld [vmem:[#allocation5 + $0x184] sm:$0xf] }
 0x4f5   : > { %5011 = vst [vmem:[#allocation7 + $0x54] sm:$0xf] %v4989_v43  ;;  %v4680_v59 = vadd.f32 %v4679_v42, %v4561_v31  ;;  %v7157_v42 = vor.u32 %v7861_v52, %v7156_v22  ;;  %6227 = vmatpush.bf16.msra.mxu1 %v7992_v26 }
 0x4f6   : > { %5099 = vst [vmem:[#allocation7 + $0x58] sm:$0xf] %v5077_v32 }
 0x4f7   : > { %v4773_v35 = vmax.f32 %v4680_v59, 0.0 }
 0x4f8   : > { %v3075_v34 = vpop.permute.xlu1 %3074  ;;  %v5126_v37 = vld [vmem:[#allocation6 + $0x4a] ss:$2 sm:$0xff]  ;;  %v5214_v39 = vld [vmem:[#allocation6 + $0x4b] ss:$2 sm:$0xff] }
 0x4f9   : > { %3173 = vst.msk [vmem:[#allocation5 + $0x18c] sm:$0xf] %vm1784_vm5, %v3075_v34  ;;  %v5165_v40 = vpack.c.bf16 %v5126_v37, %v5126_v37  ;;  %v5253_v41 = vpack.c.bf16 %v5214_v39, %v5214_v39  ;;  %v4446_v9 = vpop.f32.mrf.mxu3 }
 0x4fa   : > { %v3081_v25 = vpop.permute.xlu2 %3080  ;;  %4817 = vst [vmem:[#allocation6 + $0x60] sm:$0xff] %v4773_v35  ;;  %v9572_v36 = vpop.f32.mrf.mxu2  ;;  %v4447_v60 = vadd.f32 %v9453_v48, %v4446_v9  ;;  %v7160_v59 = vld [vmem:[#allocation5 + $0x180] sm:$0xf] }
 0x4fb   : > { %3176 = vst.msk [vmem:[#allocation5 + $0x1b0] sm:$0xf] %vm1784_vm5, %v3081_v25 }
 0x4fc   : > { %5187 = vst [vmem:[#allocation7 + $0x5c] sm:$0xf] %v5165_v40  ;;  %v4682_v53 = vpop.f32.mrf.mxu1  ;;  %4607 = vmatmul.bf16.gmra.mxu2 %v7153_v55  ;;  %v4566_v56 = vadd.f32 %v9551_v50, %v4447_v60 }
 0x4fd   : > { %5275 = vst [vmem:[#allocation7 + $0x60] sm:$0xf] %v5253_v41  ;;  %v4683_v47 = vadd.f32 %v4682_v53, %v4564_v46  ;;  %v7382_v23 = vld [vmem:[#allocation7 + $0x58] sm:$0xf] }
 0x4fe   : > { %4488 = vmatmul.bf16.gmra.mxu3 %v7149_v58 }
 0x4ff   : > { %v4774_v61 = vmax.f32 %v4683_v47, 0.0  ;;  %7324 = vmatmul.msk.bf16.gmra.mxu1 %vm1207_vm3, %v7145_v51  ;;  %v9593_v51 = vld [vmem:[#allocation15] ss:$0 sm:$0xff] }
 0x500   : > { %v3077_v54 = vpop.permute.xlu1 %3076  ;;  %v7863_v49 = vld [vmem:[#allocation5 + $0x188] sm:$0xf0] }
 0x501   : > { %v3516_v5 = vpop.permute.xlu0 %3515  ;;  %v4864_v15 = vld [vmem:[#allocation6 + $0x57] ss:$2 sm:$0xff]  ;;  %v4952_v19 = vld [vmem:[#allocation6 + $0x58] ss:$2 sm:$0xff]  ;;  %4818 = vst [vmem:[#allocation6 + $0x68] sm:$0xff] %v4774_v61  ;;  %v4449_v0 = vpop.f32.mrf.mxu3  ;;  %v7161_v34 = vor.u32 %v7863_v49, %v7160_v59 }
 0x502   : > { %v5040_v6 = vld [vmem:[#allocation6 + $0x59] ss:$2 sm:$0xff]  ;;  %v4902_v21 = vpack.c.bf16 %v4864_v15, %v4864_v15  ;;  %v4990_v62 = vpack.c.bf16 %v4952_v19, %v4952_v19  ;;  %3174 = vst.msk [vmem:[#allocation5 + $0x198] sm:$0xf] %vm1784_vm5, %v3077_v54  ;;  %v4450_v29 = vadd.f32 %v9453_v48, %v4449_v0  ;;  %v9582_v20 = vpop.f32.mrf.mxu2 }
 0x503   : > { %v3524_v1 = vpop.permute.xlu2 %3523  ;;  %v5078_v18 = vpack.c.bf16 %v5040_v6, %v5040_v6  ;;  %3614 = vst.msk [vmem:[#allocation5 + $0x190] sm:$0xf] %vm1784_vm5, %v3516_v5 }
 0x504   : > { %4924 = vst [vmem:[#allocation7 + $0x64] sm:$0xf] %v4902_v21  ;;  %v4684_v2 = vpop.f32.mrf.mxu1  ;;  %v4569_v24 = vadd.f32 %v9558_v63, %v4450_v29  ;;  %v7866_v29 = vld [vmem:[#allocation5 + $0x1a0] sm:$0xf0] }
 0x505   : > { %5012 = vst [vmem:[#allocation7 + $0x68] sm:$0xf] %v4990_v62  ;;  %v4685_v3 = vadd.f32 %v4684_v2, %v4566_v56  ;;  %v7168_v56 = vld [vmem:[#allocation5 + $0x188] sm:$0xf] }
 0x506   : > { %5100 = vst [vmem:[#allocation7 + $0x6c] sm:$0xf] %v5078_v18 }
 0x507   : > { %3618 = vst.msk [vmem:[#allocation5 + $0x1c0] sm:$0xf] %vm1784_vm5, %v3524_v1  ;;  %v4775_v10 = vmax.f32 %v4685_v3, 0.0  ;;  %v7864_v1 = vld [vmem:[#allocation5 + $0x190] sm:$0xf0] }
 0x508   : > { %v5128_v13 = vld [vmem:[#allocation6 + $0x5a] ss:$2 sm:$0xff]  ;;  %v5216_v14 = vld [vmem:[#allocation6 + $0x5b] ss:$2 sm:$0xff]  ;;  %v7169_v4 = vor.u32 %v7864_v1, %v7168_v56  ;;  %v7983_v56 = vld [vmem:[#allocation16 + $0xe0] sm:$0xff] }
 0x509   : > { %v3518_v12 = vpop.permute.xlu0 %3517  ;;  %v5166_v50 = vpack.c.bf16 %v5128_v13, %v5128_v13  ;;  %v5254_v17 = vpack.c.bf16 %v5216_v14, %v5216_v14  ;;  %4819 = vst [vmem:[#allocation6 + $0x70] sm:$0xff] %v4775_v10  ;;  %v4451_v28 = vpop.f32.mrf.mxu3  ;;  %v7172_v62 = vld [vmem:[#allocation5 + $0x198] sm:$0xf]  ;;  %6164 = vmatpush.bf16.msra.mxu2 %v7983_v56 }
 0x50a   : > { %3615 = vst.msk [vmem:[#allocation5 + $0x19c] sm:$0xf] %vm1784_vm5, %v3518_v12  ;;  %v7162_v35 = vld [vmem:[#allocation5 + $0x18c] sm:$0xf0]  ;;  %v4452_v25 = vadd.f32 %v9453_v48, %v4451_v28  ;;  %v9589_v48 = vpop.f32.mrf.mxu2  ;;  %v7173_v10 = vor.u32 %v7866_v29, %v7172_v62 }
 0x50b   : > { %v3526_v16 = vpop.permute.xlu2 %3525  ;;  %5188 = vst [vmem:[#allocation7 + $0x70] sm:$0xf] %v5166_v50  ;;  %v7165_v37 = vor.u32 %v7862_v33, %v7162_v35 }
 0x50c   : > { %3619 = vst.msk [vmem:[#allocation5 + $0x1cc] sm:$0xf] %vm1784_vm5, %v3526_v16  ;;  %v4687_v43 = vpop.f32.mrf.mxu1  ;;  %v4571_v57 = vadd.f32 %v9565_v30, %v4452_v25 }
 0x50d   : > { %5276 = vst [vmem:[#allocation7 + $0x74] sm:$0xf] %v5254_v17  ;;  %v7913_v32 = vld [vmem:[#allocation7 + $0x68] sm:$0xf0]  ;;  %v4688_v27 = vadd.f32 %v4687_v43, %v4569_v24  ;;  %4612 = vmatmul.bf16.gmra.mxu2 %v7165_v37 }
 0x50e   : > { %v7383_v31 = vor.u32 %v7913_v32, %v7382_v23  ;;  %4493 = vmatmul.bf16.gmra.mxu3 %v7161_v34 }
 0x50f   : > { %v4776_v39 = vmax.f32 %v4688_v27, 0.0  ;;  %7325 = vmatmul.msk.bf16.gmra.mxu1 %vm1207_vm3, %v7157_v42 }
 0x510   : > { %6115 = vmatmul.bf16.gmra.mxu0 %v7383_v31  ;;  %v4866_v40 = vld [vmem:[#allocation6 + $0x67] ss:$2 sm:$0xff]  ;;  %v4954_v41 = vld [vmem:[#allocation6 + $0x68] ss:$2 sm:$0xff] }
 0x511   : > { %v3520_v63 = vpop.permute.xlu1 %3519  ;;  %v5042_v9 = vld [vmem:[#allocation6 + $0x69] ss:$2 sm:$0xff]  ;;  %v4903_v11 = vpack.c.bf16 %v4866_v40, %v4866_v40  ;;  %v4991_v46 = vpack.c.bf16 %v4954_v41, %v4954_v41  ;;  %4820 = vst [vmem:[#allocation6 + $0x78] sm:$0xff] %v4776_v39  ;;  %v4454_v53 = vpop.f32.mrf.mxu3 }
 0x512   : > { %v5079_v7 = vpack.c.bf16 %v5042_v9, %v5042_v9  ;;  %3616 = vst.msk [vmem:[#allocation5 + $0x1a8] sm:$0xf] %vm1784_vm5, %v3520_v63  ;;  %v4455_v8 = vadd.f32 %v9593_v51, %v4454_v53  ;;  %v7865_v18 = vld [vmem:[#allocation5 + $0x19c] sm:$0xf]  ;;  %v9599_v2 = vpop.f32.mrf.mxu2  ;;  %v7180_v39 = vld [vmem:[#allocation5 + $0x1a0] sm:$0xf] }
 0x513   : > { %v3091_v44 = vpop.permute.xlu2 %3090  ;;  %4925 = vst [vmem:[#allocation7 + $0x78] sm:$0xf] %v4903_v11  ;;  %v7867_v63 = vld [vmem:[#allocation5 + $0x1a8] sm:$0xf0] }
 0x514   : > { %5013 = vst [vmem:[#allocation7 + $0x7c] sm:$0xf] %v4991_v46  ;;  %v4689_v45 = vpop.f32.mrf.mxu1  ;;  %v4574_v21 = vadd.f32 %v9572_v36, %v4455_v8  ;;  %v7955_v46 = vld [vmem:[#allocation16] sm:$0xff] }
 0x515   : > { %5101 = vst [vmem:[#allocation7 + $0x80] sm:$0xf] %v5079_v7  ;;  %v4690_v47 = vadd.f32 %v4689_v45, %v4571_v57  ;;  %v7181_v57 = vor.u32 %v7867_v63, %v7180_v39  ;;  %v7184_v45 = vld [vmem:[#allocation5 + $0x1b0] sm:$0xf]  ;;  %5976 = vmatpush.bf16.msra.mxu3 %v7955_v46 }
 0x516   : > { %3181 = vst.msk [vmem:[#allocation5 + $0x1ec] sm:$0xf] %vm1784_vm5, %v3091_v44 }
 0x517   : > { %v4777_v55 = vmax.f32 %v4690_v47, 0.0  ;;  %v7186_v47 = vld [vmem:[#allocation5 + $0x1bc] sm:$0xf0] }
 0x518   : > { %v5130_v60 = vld [vmem:[#allocation6 + $0x6a] ss:$2 sm:$0xff]  ;;  %v5218_v61 = vld [vmem:[#allocation6 + $0x6b] ss:$2 sm:$0xff] }
 0x519   : > { %v5167_v5 = vpack.c.bf16 %v5130_v60, %v5130_v60  ;;  %v5255_v15 = vpack.c.bf16 %v5218_v61, %v5218_v61  ;;  %4821 = vst [vmem:[#allocation6 + $0x80] sm:$0xff] %v4777_v55  ;;  %v4456_v19 = vpop.f32.mrf.mxu3  ;;  %v7174_v6 = vld [vmem:[#allocation5 + $0x1a4] sm:$0xf0] }
 0x51a   : > { %v3083_v58 = vpop.permute.xlu0 %3082  ;;  %v7177_v3 = vor.u32 %v7865_v18, %v7174_v6  ;;  %v4457_v12 = vadd.f32 %v9593_v51, %v4456_v19  ;;  %v9607_v26 = vpop.f32.mrf.mxu2 }
 0x51b   : > { %v3522_v54 = vpop.permute.xlu1 %3521  ;;  %3177 = vst.msk [vmem:[#allocation5 + $0x1bc] sm:$0xf] %vm1784_vm5, %v3083_v58  ;;  %v3093_v30 = vpop.permute.xlu2 %3092 }
 0x51c   : > { %3617 = vst.msk [vmem:[#allocation5 + $0x1b4] sm:$0xf] %vm1784_vm5, %v3522_v54  ;;  %v4692_v0 = vpop.f32.mrf.mxu1  ;;  %v4576_v49 = vadd.f32 %v9582_v20, %v4457_v12  ;;  %v7402_v37 = vld [vmem:[#allocation7 + $0x80] sm:$0xf] }
 0x51d   : > { %5189 = vst [vmem:[#allocation7 + $0x84] sm:$0xf] %v5167_v5  ;;  %v4693_v38 = vadd.f32 %v4692_v0, %v4574_v21  ;;  %4617 = vmatmul.bf16.gmra.mxu2 %v7177_v3 }
 0x51e   : > { %5277 = vst [vmem:[#allocation7 + $0x88] sm:$0xf] %v5255_v15  ;;  %4498 = vmatmul.bf16.gmra.mxu3 %v7173_v10 }
 0x51f   : > { %3182 = vst.msk [vmem:[#allocation5 + $0x1f8] sm:$0xf] %vm1784_vm5, %v3093_v30  ;;  %v4778_v13 = vmax.f32 %v4693_v38, 0.0  ;;  %7326 = vmatmul.msk.bf16.gmra.mxu1 %vm1207_vm3, %v7169_v4 }
 0x520   : > { %v4868_v14 = vld [vmem:[#allocation6 + $0x77] ss:$2 sm:$0xff]  ;;  %v4956_v16 = vld [vmem:[#allocation6 + $0x78] ss:$2 sm:$0xff] }
 0x521   : > { %v5044_v50 = vld [vmem:[#allocation6 + $0x79] ss:$2 sm:$0xff]  ;;  %v4904_v28 = vpack.c.bf16 %v4868_v14, %v4868_v14  ;;  %v4992_v22 = vpack.c.bf16 %v4956_v16, %v4956_v16  ;;  %4822 = vst [vmem:[#allocation6 + $0x88] sm:$0xff] %v4778_v13  ;;  %v4459_v24 = vpop.f32.mrf.mxu3  ;;  %v7192_v14 = vld [vmem:[#allocation5 + $0x1b8] sm:$0xf] }
 0x522   : > { %v3085_v36 = vpop.permute.xlu0 %3084  ;;  %v5080_v52 = vpack.c.bf16 %v5044_v50, %v5044_v50  ;;  %v4460_v27 = vadd.f32 %v9593_v51, %v4459_v24  ;;  %v7869_v9 = vld [vmem:[#allocation5 + $0x1b8] sm:$0xf0]  ;;  %v4585_v30 = vpop.f32.mrf.mxu2  ;;  %v7870_v16 = vld [vmem:[#allocation5 + $0x1c0] sm:$0xf0] }
 0x523   : > { %v3087_v17 = vpop.permute.xlu1 %3086  ;;  %4926 = vst [vmem:[#allocation7 + $0x8c] sm:$0xf] %v4904_v28  ;;  %v3536_v23 = vpop.permute.xlu2 %3535  ;;  %v7868_v40 = vld [vmem:[#allocation5 + $0x1b4] sm:$0xf]  ;;  %v7185_v8 = vor.u32 %v7869_v9, %v7184_v45  ;;  %v7982_v9 = vld [vmem:[#allocation16 + $0xd8] sm:$0xff] }
 0x524   : > { %3179 = vst.msk [vmem:[#allocation5 + $0x1d4] sm:$0xf] %vm1784_vm5, %v3087_v17  ;;  %v4694_v43 = vpop.f32.mrf.mxu1  ;;  %v4579_v41 = vadd.f32 %v9589_v48, %v4460_v27  ;;  %v7189_v58 = vor.u32 %v7868_v40, %v7186_v47  ;;  %6165 = vmatpush.bf16.msra.mxu2 %v7982_v9 }
 0x525   : > { %5014 = vst [vmem:[#allocation7 + $0x90] sm:$0xf] %v4992_v22  ;;  %v4695_v32 = vadd.f32 %v4694_v43, %v4576_v49  ;;  %v7193_v43 = vor.u32 %v7870_v16, %v7192_v14 }
 0x526   : > { %5102 = vst [vmem:[#allocation7 + $0x94] sm:$0xf] %v5080_v52 }
 0x527   : > { %3624 = vst.msk [vmem:[#allocation5 + $0x208] sm:$0x3] %vm3183_vm10, %v3536_v23  ;;  %v4779_v31 = vmax.f32 %v4695_v32, 0.0  ;;  %v7991_v23 = vld [vmem:[#allocation16 + $0x120] sm:$0xff]  ;;  %v7871_v32 = vld [vmem:[#allocation5 + $0x1cc] sm:$0xf] }
 0x528   : > { %3178 = vst.msk [vmem:[#allocation5 + $0x1c8] sm:$0xf] %vm1784_vm5, %v3085_v36  ;;  %v5132_v59 = vld [vmem:[#allocation6 + $0x7a] ss:$2 sm:$0xff]  ;;  %v5220_v33 = vld [vmem:[#allocation6 + $0x7b] ss:$2 sm:$0xff]  ;;  %6228 = vmatpush.bf16.msra.mxu1 %v7991_v23 }
 0x529   : > { %v5168_v20 = vpack.c.bf16 %v5132_v59, %v5132_v59  ;;  %v5256_v34 = vpack.c.bf16 %v5220_v33, %v5220_v33  ;;  %4823 = vst [vmem:[#allocation6 + $0x90] sm:$0xff] %v4779_v31  ;;  %v4461_v25 = vpop.f32.mrf.mxu3 }
 0x52a   : > { %v3528_v42 = vpop.permute.xlu0 %3527  ;;  %v4462_v55 = vadd.f32 %v9593_v51, %v4461_v25  ;;  %v4588_v50 = vpop.f32.mrf.mxu2 }
 0x52b   : > { %v3089_v35 = vpop.permute.xlu1 %3088  ;;  %3620 = vst.msk [vmem:[#allocation5 + $0x1d8] sm:$0xf] %vm1784_vm5, %v3528_v42  ;;  %v7872_v22 = vld [vmem:[#allocation5 + $0x1d0] sm:$0xf0] }
 0x52c   : > { %3180 = vst.msk [vmem:[#allocation5 + $0x1e0] sm:$0xf] %vm1784_vm5, %v3089_v35  ;;  %v4697_v44 = vpop.f32.mrf.mxu1  ;;  %v4581_v62 = vadd.f32 %v9599_v2, %v4462_v55  ;;  %v7204_v55 = vld [vmem:[#allocation5 + $0x1d0] sm:$0xf] }
 0x52d   : > { %5190 = vst [vmem:[#allocation7 + $0x98] sm:$0xf] %v5168_v20  ;;  %v7918_v11 = vld [vmem:[#allocation7 + $0x90] sm:$0xf0]  ;;  %v4698_v7 = vadd.f32 %v4697_v44, %v4579_v41  ;;  %4622 = vmatmul.bf16.gmra.mxu2 %v7189_v58  ;;  %v7873_v58 = vld [vmem:[#allocation5 + $0x1d8] sm:$0xf0] }
 0x52e   : > { %5278 = vst [vmem:[#allocation7 + $0x9c] sm:$0xf] %v5256_v34  ;;  %v7403_v53 = vor.u32 %v7918_v11, %v7402_v37  ;;  %4503 = vmatmul.bf16.gmra.mxu3 %v7185_v8 }
 0x52f   : > { %v4780_v60 = vmax.f32 %v4698_v7, 0.0  ;;  %7327 = vmatmul.msk.bf16.gmra.mxu1 %vm1207_vm3, %v7181_v57  ;;  %v7196_v28 = vld [vmem:[#allocation5 + $0x1c8] sm:$0xf] }
 0x530   : > { %6120 = vmatmul.bf16.gmra.mxu0 %v7403_v53  ;;  %v4870_v61 = vld [vmem:[#allocation6 + $0x87] ss:$2 sm:$0xff]  ;;  %v4958_v54 = vld [vmem:[#allocation6 + $0x88] ss:$2 sm:$0xff]  ;;  %v7197_v27 = vor.u32 %v7872_v22, %v7196_v28 }
 0x531   : > { %v5046_v5 = vld [vmem:[#allocation6 + $0x89] ss:$2 sm:$0xff]  ;;  %v4905_v19 = vpack.c.bf16 %v4870_v61, %v4870_v61  ;;  %v4993_v6 = vpack.c.bf16 %v4958_v54, %v4958_v54  ;;  %4824 = vst [vmem:[#allocation6 + $0x98] sm:$0xff] %v4780_v60  ;;  %v4464_v21 = vpop.f32.mrf.mxu3 }
 0x532   : > { %v3530_v48 = vpop.permute.xlu0 %3529  ;;  %v5081_v1 = vpack.c.bf16 %v5046_v5, %v5046_v5  ;;  %v4465_v3 = vadd.f32 %v9593_v51, %v4464_v21  ;;  %v7198_v52 = vld [vmem:[#allocation5 + $0x1d4] sm:$0xf0]  ;;  %v4590_v40 = vpop.f32.mrf.mxu2 }
 0x533   : > { %v3532_v15 = vpop.permute.xlu1 %3531  ;;  %4927 = vst [vmem:[#allocation7 + $0xa0] sm:$0xf] %v4905_v19  ;;  %v7201_v42 = vor.u32 %v7871_v32, %v7198_v52  ;;  %v7208_v8 = vld [vmem:[#allocation5 + $0x1e0] sm:$0xf] }
 0x534   : > { %3622 = vst.msk [vmem:[#allocation5 + $0x1f0] sm:$0xf] %vm1784_vm5, %v3532_v15  ;;  %v4699_v18 = vpop.f32.mrf.mxu1  ;;  %v4584_v17 = vadd.f32 %v9607_v26, %v4465_v3  ;;  %v7981_v15 = vld [vmem:[#allocation16 + $0xd0] sm:$0xff] }
 0x535   : > { %5015 = vst [vmem:[#allocation7 + $0xa4] sm:$0xf] %v4993_v6  ;;  %v4700_v0 = vadd.f32 %v4699_v18, %v4581_v62  ;;  %v7875_v6 = vld [vmem:[#allocation5 + $0x1e8] sm:$0xf0]  ;;  %6166 = vmatpush.bf16.msra.mxu2 %v7981_v15 }
 0x536   : > { %5103 = vst [vmem:[#allocation7 + $0xa8] sm:$0xf] %v5081_v1  ;;  %v7205_v1 = vor.u32 %v7873_v58, %v7204_v55  ;;  %v7209_v21 = vor.u32 %v7875_v6, %v7208_v8  ;;  %v7980_v62 = vld [vmem:[#allocation16 + $0xc8] sm:$0xff]  ;;  %v7989_v58 = vld [vmem:[#allocation16 + $0x110] sm:$0xff] }
 0x537   : > { %3621 = vst.msk [vmem:[#allocation5 + $0x1e4] sm:$0xf] %vm1784_vm5, %v3530_v48  ;;  %v4781_v38 = vmax.f32 %v4700_v0, 0.0  ;;  %v7879_v6 = vld [vmem:[#allocation5 + $0x208] sm:$0x30] }
 0x538   : > { %v5134_v29 = vld [vmem:[#allocation6 + $0x8a] ss:$2 sm:$0xff]  ;;  %v5222_v10 = vld [vmem:[#allocation6 + $0x8b] ss:$2 sm:$0xff] }
 0x539   : > { %v5169_v13 = vpack.c.bf16 %v5134_v29, %v5134_v29  ;;  %v5257_v36 = vpack.c.bf16 %v5222_v10, %v5222_v10  ;;  %4825 = vst [vmem:[#allocation6 + $0xa0] sm:$0xff] %v4781_v38  ;;  %v4466_v2 = vpop.f32.mrf.mxu3  ;;  %6167 = vmatpush.bf16.msra.mxu2 %v7980_v62 }
 0x53a   : > { %v3095_v4 = vpop.permute.xlu0 %3094  ;;  %v4467_v31 = vadd.f32 %v9593_v51, %v4466_v2  ;;  %v4593_v18 = vpop.f32.mrf.mxu2 }
 0x53b   : > { %v3534_v12 = vpop.permute.xlu1 %3533  ;;  %3184 = vst.msk [vmem:[#allocation5 + $0x204] sm:$0x3] %vm3183_vm10, %v3095_v4  ;;  %v7210_v47 = vld [vmem:[#allocation5 + $0x1ec] sm:$0xf0] }
 0x53c   : > { %3623 = vst.msk [vmem:[#allocation5 + $0x1fc] sm:$0xf] %vm1784_vm5, %v3534_v12  ;;  %v4702_v24 = vpop.f32.mrf.mxu1  ;;  %v4586_v39 = vadd.f32 %v4585_v30, %v4467_v31 }
 0x53d   : > { %5191 = vst [vmem:[#allocation7 + $0xac] sm:$0xf] %v5169_v13  ;;  %v4703_v49 = vadd.f32 %v4702_v24, %v4584_v17  ;;  %4627 = vmatmul.bf16.gmra.mxu2 %v7201_v42  ;;  %v7422_v61 = vld [vmem:[#allocation7 + $0xa8] sm:$0xf] }
 0x53e   : > { %5279 = vst [vmem:[#allocation7 + $0xb0] sm:$0xf] %v5257_v36  ;;  %4508 = vmatmul.bf16.gmra.mxu3 %v7197_v27  ;;  %v7874_v60 = vld [vmem:[#allocation5 + $0x1e4] sm:$0xf]  ;;  %v7216_v42 = vld [vmem:[#allocation5 + $0x1e8] sm:$0xf] }
 0x53f   : > { %v4782_v59 = vmax.f32 %v4703_v49, 0.0  ;;  %7328 = vmatmul.msk.bf16.gmra.mxu1 %vm1207_vm3, %v7193_v43  ;;  %v7213_v56 = vor.u32 %v7874_v60, %v7210_v47  ;;  %v7876_v43 = vld [vmem:[#allocation5 + $0x1f0] sm:$0xf0] }
 0x540   : > { %v4872_v33 = vld [vmem:[#allocation6 + $0x97] ss:$2 sm:$0xff]  ;;  %v4960_v35 = vld [vmem:[#allocation6 + $0x98] ss:$2 sm:$0xff] }
 0x541   : > { %v5048_v26 = vld [vmem:[#allocation6 + $0x99] ss:$2 sm:$0xff]  ;;  %v4906_v20 = vpack.c.bf16 %v4872_v33, %v4872_v33  ;;  %v4994_v34 = vpack.c.bf16 %v4960_v35, %v4960_v35  ;;  %4826 = vst [vmem:[#allocation6 + $0xa8] sm:$0xff] %v4782_v59  ;;  %v4469_v37 = vpop.f32.mrf.mxu3  ;;  %v7970_v35 = vld [vmem:[#allocation16 + $0x78] sm:$0xff] }
 0x542   : > { %v5082_v25 = vpack.c.bf16 %v5048_v26, %v5048_v26  ;;  %v4470_v44 = vadd.f32 %v9593_v51, %v4469_v37  ;;  %v4595_v24 = vpop.f32.mrf.mxu2  ;;  %v7878_v31 = vld [vmem:[#allocation5 + $0x200] sm:$0x30]  ;;  %v7990_v26 = vld [vmem:[#allocation16 + $0x118] sm:$0xff]  ;;  %v7222_v37 = vld [vmem:[#allocation5 + $0x204] sm:$0x30]  ;;  %6033 = vmatpush.bf16.msrb.mxu3 %v7970_v35 }
 0x543   : > { %4928 = vst [vmem:[#allocation7 + $0xb4] sm:$0xf] %v4906_v20  ;;  %v7877_v59 = vld [vmem:[#allocation5 + $0x1fc] sm:$0xf]  ;;  %6229 = vmatpush.bf16.msra.mxu1 %v7990_v26 }
 0x544   : > { %5016 = vst [vmem:[#allocation7 + $0xb8] sm:$0xf] %v4994_v34  ;;  %v4704_v63 = vpop.f32.mrf.mxu1  ;;  %v4589_v48 = vadd.f32 %v4588_v50, %v4470_v44  ;;  %v7979_v50 = vld [vmem:[#allocation16 + $0xc0] sm:$0xff]  ;;  %v7220_v34 = vld [vmem:[#allocation5 + $0x1f8] sm:$0xf] }
 0x545   : > { %5104 = vst [vmem:[#allocation7 + $0xbc] sm:$0xf] %v5082_v25  ;;  %v4705_v41 = vadd.f32 %v4704_v63, %v4586_v39  ;;  %6168 = vmatpush.bf16.msra.mxu2 %v7979_v50  ;;  %v7217_v25 = vor.u32 %v7876_v43, %v7216_v42  ;;  %v7221_v39 = vor.u32 %v7878_v31, %v7220_v34  ;;  %v7969_v42 = vld [vmem:[#allocation16 + $0x70] sm:$0xff] }
 0x546   : > { %6034 = vmatpush.bf16.msrb.mxu3 %v7969_v42 }
 0x547   : > { %v4783_v11 = vmax.f32 %v4705_v41, 0.0  ;;  %6230 = vmatpush.bf16.msra.mxu1 %v7989_v58 }
 0x548   : > { %v5136_v46 = vld [vmem:[#allocation6 + $0x9a] ss:$2 sm:$0xff]  ;;  %v5224_v7 = vld [vmem:[#allocation6 + $0x9b] ss:$2 sm:$0xff] }
 0x549   : > { %v5170_v53 = vpack.c.bf16 %v5136_v46, %v5136_v46  ;;  %v5258_v57 = vpack.c.bf16 %v5224_v7, %v5224_v7  ;;  %4827 = vst [vmem:[#allocation6 + $0xb0] sm:$0xff] %v4783_v11  ;;  %v4471_v45 = vpop.f32.mrf.mxu3 }
 0x54a   : > { %v4472_v0 = vadd.f32 %v9593_v51, %v4471_v45 }
 0x54b   : > { %5192 = vst [vmem:[#allocation7 + $0xc0] sm:$0xf] %v5170_v53 }
 0x54c   : > { %5280 = vst [vmem:[#allocation7 + $0xc4] sm:$0xf] %v5258_v57  ;;  %v4707_v54 = vpop.f32.mrf.mxu1  ;;  %v7923_v5 = vld [vmem:[#allocation7 + $0xb8] sm:$0xf0]  ;;  %v4591_v2 = vadd.f32 %v4590_v40, %v4472_v0  ;;  %v7225_v40 = vor.u32 %v7877_v59, %v7222_v37 }
 0x54d   : > { %v4708_v30 = vadd.f32 %v4707_v54, %v4589_v48  ;;  %v7423_v19 = vor.u32 %v7923_v5, %v7422_v61  ;;  %4632 = vmatmul.bf16.gmra.mxu2 %v7213_v56  ;;  %v7988_v61 = vld [vmem:[#allocation16 + $0x108] sm:$0xff] }
 0x54e   : > { %4513 = vmatmul.bf16.gmra.mxu3 %v7209_v21  ;;  %6231 = vmatpush.bf16.msra.mxu1 %v7988_v61 }
 0x54f   : > { %v4784_v3 = vmax.f32 %v4708_v30, 0.0  ;;  %6125 = vmatmul.bf16.gmra.mxu0 %v7423_v19  ;;  %7329 = vmatmul.msk.bf16.gmra.mxu1 %vm1207_vm3, %v7205_v1  ;;  %v7228_v19 = vld [vmem:[#allocation5 + $0x200] sm:$0xf]  ;;  %v7902_v1 = vld [vmem:[#allocation7 + $0x10] sm:$0xf0] }
 0x550   : > { %v4874_v38 = vld [vmem:[#allocation6 + $0xa7] ss:$2 sm:$0xff]  ;;  %v4962_v4 = vld [vmem:[#allocation6 + $0xa8] ss:$2 sm:$0xff] }
 0x551   : > { %v5050_v29 = vld [vmem:[#allocation6 + $0xa9] ss:$2 sm:$0xff]  ;;  %v4907_v10 = vpack.c.bf16 %v4874_v38, %v4874_v38  ;;  %v4995_v12 = vpack.c.bf16 %v4962_v4, %v4962_v4  ;;  %4828 = vst [vmem:[#allocation6 + $0xb8] sm:$0xff] %v4784_v3  ;;  %v4474_v36 = vpop.f32.mrf.mxu3 }
 0x552   : > { %v5083_v13 = vpack.c.bf16 %v5050_v29, %v5050_v29  ;;  %v4475_v17 = vadd.f32 %v9593_v51, %v4474_v36  ;;  %v7987_v4 = vld [vmem:[#allocation16 + $0x100] sm:$0xff]  ;;  %v7901_v36 = vld [vmem:[#allocation7 + $0xc] sm:$0xf] }
 0x553   : > { %4929 = vst [vmem:[#allocation7 + $0xc8] sm:$0xf] %v4907_v10  ;;  %6232 = vmatpush.bf16.msra.mxu1 %v7987_v4  ;;  %v7909_v4 = vld [vmem:[#allocation7 + $0x48] sm:$0xf0] }
 0x554   : > { %5017 = vst [vmem:[#allocation7 + $0xcc] sm:$0xf] %v4995_v12  ;;  %v4709_v14 = vpop.f32.mrf.mxu1  ;;  %v4594_v27 = vadd.f32 %v4593_v18, %v4475_v17  ;;  %v7344_v18 = vld [vmem:[#allocation7 + $0x1c] sm:$0xf0]  ;;  %v7229_v12 = vor.u32 %v7879_v6, %v7228_v19 }
 0x555   : > { %5105 = vst [vmem:[#allocation7 + $0xd0] sm:$0xf] %v5083_v13  ;;  %v4710_v16 = vadd.f32 %v4709_v14, %v4591_v2  ;;  %v7334_v13 = vld [vmem:[#allocation7] sm:$0xf] }
 0x556   : > { %v7335_v2 = vor.u32 %v7902_v1, %v7334_v13  ;;  %v7968_v1 = vld [vmem:[#allocation16 + $0x68] sm:$0xff] }
 0x557   : > { %v4785_v28 = vmax.f32 %v4710_v16, 0.0  ;;  %v7347_v16 = vor.u32 %v7901_v36, %v7344_v18  ;;  %6035 = vmatpush.bf16.msrb.mxu3 %v7968_v1  ;;  %v7912_v36 = vld [vmem:[#allocation7 + $0x60] sm:$0xf0] }
 0x558   : > { %v5138_v22 = vld [vmem:[#allocation6 + $0xaa] ss:$2 sm:$0xff]  ;;  %v5226_v52 = vld [vmem:[#allocation6 + $0xab] ss:$2 sm:$0xff] }
 0x559   : > { %v5171_v23 = vpack.c.bf16 %v5138_v22, %v5138_v22  ;;  %v5259_v49 = vpack.c.bf16 %v5226_v52, %v5226_v52  ;;  %4829 = vst [vmem:[#allocation6 + $0xc0] sm:$0xff] %v4785_v28  ;;  %v4476_v32 = vpop.f32.mrf.mxu3 }
 0x55a   : > { %v4477_v63 = vadd.f32 %v9593_v51, %v4476_v32  ;;  %v4598_v57 = vpop.f32.mrf.mxu2 }
 0x55b   : > { %5193 = vst [vmem:[#allocation7 + $0xd4] sm:$0xf] %v5171_v23 }
 0x55c   : > { %5281 = vst [vmem:[#allocation7 + $0xd8] sm:$0xf] %v5259_v49  ;;  %v4712_v33 = vpop.f32.mrf.mxu1  ;;  %v4596_v47 = vadd.f32 %v4595_v24, %v4477_v63  ;;  %v7442_v56 = vld [vmem:[#allocation7 + $0xd0] sm:$0xf] }
 0x55d   : > { %v4713_v20 = vadd.f32 %v4712_v33, %v4594_v27  ;;  %4637 = vmatmul.bf16.gmra.mxu2 %v7225_v40  ;;  %v7907_v40 = vld [vmem:[#allocation7 + $0x38] sm:$0xf0] }
 0x55e   : > { %4518 = vmatmul.bf16.gmra.mxu3 %v7221_v39 }
 0x55f   : > { %v4786_v41 = vmax.f32 %v4713_v20, 0.0  ;;  %7330 = vmatmul.msk.bf16.gmra.mxu1 %vm1207_vm3, %v7217_v25  ;;  %v7904_v25 = vld [vmem:[#allocation7 + $0x20] sm:$0xf0] }
 0x560   : > { %v4876_v9 = vld [vmem:[#allocation6 + $0xb7] ss:$2 sm:$0xff]  ;;  %v4964_v44 = vld [vmem:[#allocation6 + $0xb8] ss:$2 sm:$0xff] }
 0x561   : > { %v5052_v11 = vld [vmem:[#allocation6 + $0xb9] ss:$2 sm:$0xff]  ;;  %v4908_v46 = vpack.c.bf16 %v4876_v9, %v4876_v9  ;;  %v4996_v7 = vpack.c.bf16 %v4964_v44, %v4964_v44  ;;  %4830 = vst [vmem:[#allocation6 + $0xc8] sm:$0xff] %v4786_v41  ;;  %v4479_v45 = vpop.f32.mrf.mxu3 }
 0x562   : > { %v5084_v53 = vpack.c.bf16 %v5052_v11, %v5052_v11  ;;  %v4480_v60 = vadd.f32 %v9593_v51, %v4479_v45  ;;  %v4600_v21 = vpop.f32.mrf.mxu2  ;;  %v7364_v41 = vld [vmem:[#allocation7 + $0x44] sm:$0xf0]  ;;  %v7350_v44 = vld [vmem:[#allocation7 + $0x10] sm:$0xf] }
 0x563   : > { %4930 = vst [vmem:[#allocation7 + $0xdc] sm:$0xf] %v4908_v46  ;;  %v7354_v46 = vld [vmem:[#allocation7 + $0x28] sm:$0xf] }
 0x564   : > { %5018 = vst [vmem:[#allocation7 + $0xe0] sm:$0xf] %v4996_v7  ;;  %v4714_v8 = vpop.f32.mrf.mxu1  ;;  %v4599_v0 = vadd.f32 %v4598_v57, %v4480_v60  ;;  %v7351_v7 = vor.u32 %v7904_v25, %v7350_v44  ;;  %v7355_v57 = vor.u32 %v7907_v40, %v7354_v46  ;;  %v7914_v44 = vld [vmem:[#allocation7 + $0x70] sm:$0xf0]  ;;  %v7917_v46 = vld [vmem:[#allocation7 + $0x88] sm:$0xf0] }
 0x565   : > { %5106 = vst [vmem:[#allocation7 + $0xe4] sm:$0xf] %v5084_v53  ;;  %v4715_v55 = vadd.f32 %v4714_v8, %v4596_v47  ;;  %v7906_v53 = vld [vmem:[#allocation7 + $0x34] sm:$0xf] }
 0x566   : > { %v7367_v47 = vor.u32 %v7906_v53, %v7364_v41  ;;  %v7404_v53 = vld [vmem:[#allocation7 + $0x94] sm:$0xf0] }
 0x567   : > { %v4787_v48 = vmax.f32 %v4715_v55, 0.0 }
 0x568   : > { %v5140_v54 = vld [vmem:[#allocation6 + $0xba] ss:$2 sm:$0xff]  ;;  %v5228_v5 = vld [vmem:[#allocation6 + $0xbb] ss:$2 sm:$0xff] }
 0x569   : > { %v5172_v15 = vpack.c.bf16 %v5140_v54, %v5140_v54  ;;  %v5260_v30 = vpack.c.bf16 %v5228_v5, %v5228_v5  ;;  %4831 = vst [vmem:[#allocation6 + $0xd0] sm:$0xff] %v4787_v48  ;;  %v4481_v62 = vpop.f32.mrf.mxu3 }
 0x56a   : > { %v4482_v14 = vadd.f32 %v9593_v51, %v4481_v62 }
 0x56b   : > { %5194 = vst [vmem:[#allocation7 + $0xe8] sm:$0xf] %v5172_v15 }
 0x56c   : > { %5282 = vst [vmem:[#allocation7 + $0xec] sm:$0xf] %v5260_v30  ;;  %v4717_v3 = vpop.f32.mrf.mxu1  ;;  %v7928_v38 = vld [vmem:[#allocation7 + $0xe0] sm:$0xf0]  ;;  %v4601_v32 = vadd.f32 %v4600_v21, %v4482_v14 }
 0x56d   : > { %v4718_v29 = vadd.f32 %v4717_v3, %v4599_v0  ;;  %v7443_v10 = vor.u32 %v7928_v38, %v7442_v56  ;;  %6169 = vmatmul.bf16.vlgmr.msra.gmra.mxu2 %v7347_v16  ;;  %v7370_v38 = vld [vmem:[#allocation7 + $0x38] sm:$0xf] }
 0x56e   : > { %5977 = vmatmul.bf16.vlgmr.msra.gmra.mxu3 %v7335_v2 }
 0x56f   : > { %v4788_v50 = vmax.f32 %v4718_v29, 0.0  ;;  %6130 = vmatmul.bf16.gmra.mxu0 %v7443_v10  ;;  %7331 = vmatmul.msk.bf16.gmra.mxu1 %vm1207_vm3, %v7229_v12  ;;  %v4603_v49 = vpop.f32.mrf.mxu2  ;;  %v7384_v12 = vld [vmem:[#allocation7 + $0x6c] sm:$0xf0] }
 0x570   : > { %v4878_v17 = vld [vmem:[#allocation6 + $0xc7] ss:$2 sm:$0xff]  ;;  %v4966_v28 = vld [vmem:[#allocation6 + $0xc8] ss:$2 sm:$0xff] }
 0x571   : > { %v5054_v22 = vld [vmem:[#allocation6 + $0xc9] ss:$2 sm:$0xff]  ;;  %v4909_v52 = vpack.c.bf16 %v4878_v17, %v4878_v17  ;;  %v4997_v24 = vpack.c.bf16 %v4966_v28, %v4966_v28  ;;  %4832 = vst [vmem:[#allocation6 + $0xd8] sm:$0xff] %v4788_v50  ;;  %v4484_v43 = vpop.f32.mrf.mxu3  ;;  %v7374_v28 = vld [vmem:[#allocation7 + $0x50] sm:$0xf] }
 0x572   : > { %v5085_v23 = vpack.c.bf16 %v5054_v22, %v5054_v22  ;;  %v4485_v59 = vadd.f32 %v9593_v51, %v4484_v43  ;;  %v7371_v22 = vor.u32 %v7909_v4, %v7370_v38 }
 0x573   : > { %4931 = vst [vmem:[#allocation7 + $0xf0] sm:$0xf] %v4909_v52  ;;  %v7911_v52 = vld [vmem:[#allocation7 + $0x5c] sm:$0xf] }
 0x574   : > { %5019 = vst [vmem:[#allocation7 + $0xf4] sm:$0xf] %v4997_v24  ;;  %v4719_v27 = vpop.f32.mrf.mxu1  ;;  %v4604_v63 = vadd.f32 %v4603_v49, %v4485_v59  ;;  %v7375_v24 = vor.u32 %v7912_v36, %v7374_v28  ;;  %v7424_v28 = vld [vmem:[#allocation7 + $0xbc] sm:$0xf0] }
 0x575   : > { %5107 = vst [vmem:[#allocation7 + $0xf8] sm:$0xf] %v5085_v23  ;;  %v4720_v31 = vadd.f32 %v4719_v27, %v4601_v32  ;;  %v7387_v23 = vor.u32 %v7911_v52, %v7384_v12  ;;  %v7414_v52 = vld [vmem:[#allocation7 + $0xa0] sm:$0xf] }
 0x577   : > { %v4789_v33 = vmax.f32 %v4720_v31, 0.0  ;;  %v4605_v37 = vpop.f32.mrf.mxu2 }
 0x578   : > { %v5142_v35 = vld [vmem:[#allocation6 + $0xca] ss:$2 sm:$0xff]  ;;  %v5230_v26 = vld [vmem:[#allocation6 + $0xcb] ss:$2 sm:$0xff] }
 0x579   : > { %v5173_v20 = vpack.c.bf16 %v5142_v35, %v5142_v35  ;;  %v5261_v34 = vpack.c.bf16 %v5230_v26, %v5230_v26  ;;  %4833 = vst [vmem:[#allocation6 + $0xe0] sm:$0xff] %v4789_v33  ;;  %v4486_v39 = vpop.f32.mrf.mxu3 }
 0x57a   : > { %v4487_v45 = vadd.f32 %v9593_v51, %v4486_v39 }
 0x57b   : > { %5195 = vst [vmem:[#allocation7 + $0xfc] sm:$0xf] %v5173_v20 }
 0x57c   : > { %5283 = vst [vmem:[#allocation7 + $0x100] sm:$0xf] %v5261_v34  ;;  %v4722_v9 = vpop.f32.mrf.mxu1  ;;  %v4606_v30 = vadd.f32 %v4605_v37, %v4487_v45  ;;  %v7462_v14 = vld [vmem:[#allocation7 + $0xf8] sm:$0xf]  ;;  %v7390_v45 = vld [vmem:[#allocation7 + $0x60] sm:$0xf] }
 0x57d   : > { %v4723_v11 = vadd.f32 %v4722_v9, %v4604_v63  ;;  %6174 = vmatmul.bf16.gmra.mxu2 %v7367_v47 }
 0x57e   : > { %5982 = vmatmul.bf16.gmra.mxu3 %v7355_v57 }
 0x57f   : > { %v4790_v8 = vmax.f32 %v4723_v11, 0.0  ;;  %6233 = vmatmul.bf16.vlgmr.msra.gmra.mxu1 %v7351_v7  ;;  %v4608_v5 = vpop.f32.mrf.mxu2 }
 0x580   : > { %v4880_v55 = vld [vmem:[#allocation6 + $0xd7] ss:$2 sm:$0xff]  ;;  %v4968_v58 = vld [vmem:[#allocation6 + $0xd8] ss:$2 sm:$0xff] }
 0x581   : > { %v5056_v60 = vld [vmem:[#allocation6 + $0xd9] ss:$2 sm:$0xff]  ;;  %v4910_v48 = vpack.c.bf16 %v4880_v55, %v4880_v55  ;;  %v4998_v61 = vpack.c.bf16 %v4968_v58, %v4968_v58  ;;  %4834 = vst [vmem:[#allocation6 + $0xe8] sm:$0xff] %v4790_v8  ;;  %v4489_v15 = vpop.f32.mrf.mxu3  ;;  %v7394_v8 = vld [vmem:[#allocation7 + $0x78] sm:$0xf]  ;;  %v7391_v55 = vor.u32 %v7914_v44, %v7390_v45 }
 0x582   : > { %v5086_v54 = vpack.c.bf16 %v5056_v60, %v5056_v60  ;;  %v4490_v21 = vadd.f32 %v9593_v51, %v4489_v15  ;;  %v7967_v58 = vld [vmem:[#allocation16 + $0x60] sm:$0xff] }
 0x583   : > { %4932 = vst [vmem:[#allocation7 + $0x104] sm:$0xf] %v4910_v48  ;;  %v7916_v60 = vld [vmem:[#allocation7 + $0x84] sm:$0xf]  ;;  %6036 = vmatpush.bf16.msrb.mxu3 %v7967_v58  ;;  %v7927_v58 = vld [vmem:[#allocation7 + $0xd8] sm:$0xf0] }
 0x584   : > { %5020 = vst [vmem:[#allocation7 + $0x108] sm:$0xf] %v4998_v61  ;;  %v4724_v19 = vpop.f32.mrf.mxu1  ;;  %v4609_v13 = vadd.f32 %v4608_v5, %v4490_v21  ;;  %v7395_v61 = vor.u32 %v7917_v46, %v7394_v8  ;;  %v7924_v8 = vld [vmem:[#allocation7 + $0xc0] sm:$0xf0] }
 0x585   : > { %5108 = vst [vmem:[#allocation7 + $0x10c] sm:$0xf] %v5086_v54  ;;  %v4725_v6 = vadd.f32 %v4724_v19, %v4606_v30  ;;  %v7407_v54 = vor.u32 %v7916_v60, %v7404_v53 }
 0x587   : > { %v4791_v62 = vmax.f32 %v4725_v6, 0.0  ;;  %v4610_v29 = vpop.f32.mrf.mxu2 }
 0x588   : > { %v5144_v18 = vld [vmem:[#allocation6 + $0xda] ss:$2 sm:$0xff]  ;;  %v5232_v0 = vld [vmem:[#allocation6 + $0xdb] ss:$2 sm:$0xff] }
 0x589   : > { %v5174_v56 = vpack.c.bf16 %v5144_v18, %v5144_v18  ;;  %v5262_v3 = vpack.c.bf16 %v5232_v0, %v5232_v0  ;;  %4835 = vst [vmem:[#allocation6 + $0xf0] sm:$0xff] %v4791_v62  ;;  %v4491_v10 = vpop.f32.mrf.mxu3 }
 0x58a   : > { %v4492_v31 = vadd.f32 %v9593_v51, %v4491_v10 }
 0x58b   : > { %5196 = vst [vmem:[#allocation7 + $0x110] sm:$0xf] %v5174_v56 }
 0x58c   : > { %5284 = vst [vmem:[#allocation7 + $0x114] sm:$0xf] %v5262_v3  ;;  %v4727_v2 = vpop.f32.mrf.mxu1  ;;  %v7933_v16 = vld [vmem:[#allocation7 + $0x108] sm:$0xf0]  ;;  %v4611_v20 = vadd.f32 %v4610_v29, %v4492_v31 }
 0x58d   : > { %v4728_v50 = vadd.f32 %v4727_v2, %v4609_v13  ;;  %v7463_v17 = vor.u32 %v7933_v16, %v7462_v14  ;;  %6179 = vmatmul.bf16.gmra.mxu2 %v7387_v23  ;;  %v7919_v2 = vld [vmem:[#allocation7 + $0x98] sm:$0xf0]  ;;  %v7922_v16 = vld [vmem:[#allocation7 + $0xb0] sm:$0xf0] }
 0x58e   : > { %5987 = vmatmul.bf16.gmra.mxu3 %v7375_v24 }
 0x58f   : > { %v4792_v49 = vmax.f32 %v4728_v50, 0.0  ;;  %6135 = vmatmul.bf16.gmra.mxu0 %v7463_v17  ;;  %6238 = vmatmul.bf16.gmra.mxu1 %v7371_v22  ;;  %v7410_v50 = vld [vmem:[#allocation7 + $0x88] sm:$0xf] }
 0x590   : > { %v4882_v43 = vld [vmem:[#allocation6 + $0xe7] ss:$2 sm:$0xff]  ;;  %v4970_v32 = vld [vmem:[#allocation6 + $0xe8] ss:$2 sm:$0xff]  ;;  %v4613_v26 = vpop.f32.mrf.mxu2 }
 0x591   : > { %v5058_v27 = vld [vmem:[#allocation6 + $0xe9] ss:$2 sm:$0xff]  ;;  %v4911_v42 = vpack.c.bf16 %v4882_v43, %v4882_v43  ;;  %v4999_v59 = vpack.c.bf16 %v4970_v32, %v4970_v32  ;;  %4836 = vst [vmem:[#allocation6 + $0xf8] sm:$0xff] %v4792_v49  ;;  %v4494_v35 = vpop.f32.mrf.mxu3  ;;  %v7411_v43 = vor.u32 %v7919_v2, %v7410_v50  ;;  %v7921_v32 = vld [vmem:[#allocation7 + $0xac] sm:$0xf] }
 0x592   : > { %v5087_v33 = vpack.c.bf16 %v5058_v27, %v5058_v27  ;;  %v4495_v63 = vadd.f32 %v9593_v51, %v4494_v35 }
 0x593   : > { %4933 = vst [vmem:[#allocation7 + $0x118] sm:$0xf] %v4911_v42  ;;  %v7415_v42 = vor.u32 %v7922_v16, %v7414_v52  ;;  %v7929_v52 = vld [vmem:[#allocation7 + $0xe8] sm:$0xf0] }
 0x594   : > { %5021 = vst [vmem:[#allocation7 + $0x11c] sm:$0xf] %v4999_v59  ;;  %v4729_v34 = vpop.f32.mrf.mxu1  ;;  %v4614_v57 = vadd.f32 %v4613_v26, %v4495_v63  ;;  %v7427_v59 = vor.u32 %v7921_v32, %v7424_v28 }
 0x595   : > { %5109 = vst [vmem:[#allocation7 + $0x120] sm:$0xf] %v5087_v33  ;;  %v4730_v25 = vadd.f32 %v4729_v34, %v4611_v20 }
 0x597   : > { %v4793_v40 = vmax.f32 %v4730_v25, 0.0 }
 0x598   : > { %v5146_v37 = vld [vmem:[#allocation6 + $0xea] ss:$2 sm:$0xff]  ;;  %v5234_v39 = vld [vmem:[#allocation6 + $0xeb] ss:$2 sm:$0xff]  ;;  %v4615_v7 = vpop.f32.mrf.mxu2 }
 0x599   : > { %v5175_v41 = vpack.c.bf16 %v5146_v37, %v5146_v37  ;;  %v5263_v9 = vpack.c.bf16 %v5234_v39, %v5234_v39  ;;  %4837 = vst [vmem:[#allocation6 + $0x100] sm:$0xff] %v4793_v40  ;;  %v4496_v11 = vpop.f32.mrf.mxu3 }
 0x59a   : > { %v4497_v5 = vadd.f32 %v9593_v51, %v4496_v11  ;;  %v7966_v11 = vld [vmem:[#allocation16 + $0x58] sm:$0xff] }
 0x59b   : > { %5197 = vst [vmem:[#allocation7 + $0x124] sm:$0xf] %v5175_v41  ;;  %6037 = vmatpush.bf16.msrb.mxu3 %v7966_v11 }
 0x59c   : > { %5285 = vst [vmem:[#allocation7 + $0x128] sm:$0xf] %v5263_v9  ;;  %v4732_v47 = vpop.f32.mrf.mxu1  ;;  %v4616_v56 = vadd.f32 %v4615_v7, %v4497_v5  ;;  %v7482_v23 = vld [vmem:[#allocation7 + $0x120] sm:$0xf] }
 0x59d   : > { %v4733_v48 = vadd.f32 %v4732_v47, %v4614_v57  ;;  %6184 = vmatmul.bf16.gmra.mxu2 %v7407_v54  ;;  %v7430_v54 = vld [vmem:[#allocation7 + $0xb0] sm:$0xf] }
 0x59e   : > { %5992 = vmatmul.bf16.gmra.mxu3 %v7395_v61 }
 0x59f   : > { %6243 = vmatmul.bf16.gmra.mxu1 %v7391_v55  ;;  %v4794_v15 = vmax.f32 %v4733_v48, 0.0  ;;  %v7444_v48 = vld [vmem:[#allocation7 + $0xe4] sm:$0xf0] }
 0x5a0   : > { %v4884_v30 = vld [vmem:[#allocation6 + $0xf7] ss:$2 sm:$0xff]  ;;  %v4972_v19 = vld [vmem:[#allocation6 + $0xf8] ss:$2 sm:$0xff]  ;;  %v4618_v0 = vpop.f32.mrf.mxu2 }
 0x5a1   : > { %v5060_v6 = vld [vmem:[#allocation6 + $0xf9] ss:$2 sm:$0xff]  ;;  %v4912_v1 = vpack.c.bf16 %v4884_v30, %v4884_v30  ;;  %v5000_v21 = vpack.c.bf16 %v4972_v19, %v4972_v19  ;;  %4838 = vst [vmem:[#allocation6 + $0x108] sm:$0xff] %v4794_v15  ;;  %v4499_v18 = vpop.f32.mrf.mxu3  ;;  %v7431_v30 = vor.u32 %v7924_v8, %v7430_v54 }
 0x5a2   : > { %v5088_v62 = vpack.c.bf16 %v5060_v6, %v5060_v6  ;;  %v4500_v4 = vadd.f32 %v9593_v51, %v4499_v18  ;;  %v7434_v15 = vld [vmem:[#allocation7 + $0xc8] sm:$0xf] }
 0x5a3   : > { %4934 = vst [vmem:[#allocation7 + $0x12c] sm:$0xf] %v4912_v1  ;;  %v7435_v6 = vor.u32 %v7927_v58, %v7434_v15 }
 0x5a4   : > { %5022 = vst [vmem:[#allocation7 + $0x130] sm:$0xf] %v5000_v21  ;;  %v4734_v3 = vpop.f32.mrf.mxu1  ;;  %v4619_v22 = vadd.f32 %v4618_v0, %v4500_v4  ;;  %v9643_v21 = vld [vmem:[#allocation15] ss:$0 sm:$0xff] }
 0x5a5   : > { %5110 = vst [vmem:[#allocation7 + $0x134] sm:$0xf] %v5088_v62  ;;  %v4735_v38 = vadd.f32 %v4734_v3, %v4616_v56 }
 0x5a7   : > { %v4795_v29 = vmax.f32 %v4735_v38, 0.0 }
 0x5a8   : > { %v5148_v10 = vld [vmem:[#allocation6 + $0xfa] ss:$2 sm:$0xff]  ;;  %v5236_v12 = vld [vmem:[#allocation6 + $0xfb] ss:$2 sm:$0xff]  ;;  %v4620_v17 = vpop.f32.mrf.mxu2 }
 0x5a9   : > { %v5176_v13 = vpack.c.bf16 %v5148_v10, %v5148_v10  ;;  %v5264_v36 = vpack.c.bf16 %v5236_v12, %v5236_v12  ;;  %4839 = vst [vmem:[#allocation6 + $0x110] sm:$0xff] %v4795_v29  ;;  %v4501_v14 = vpop.f32.mrf.mxu3 }
 0x5aa   : > { %v4502_v33 = vadd.f32 %v9593_v51, %v4501_v14 }
 0x5ab   : > { %5198 = vst [vmem:[#allocation7 + $0x138] sm:$0xf] %v5176_v13 }
 0x5ac   : > { %5286 = vst [vmem:[#allocation7 + $0x13c] sm:$0xf] %v5264_v36  ;;  %v4737_v24 = vpop.f32.mrf.mxu1  ;;  %v7938_v49 = vld [vmem:[#allocation7 + $0x130] sm:$0xf0]  ;;  %v4621_v41 = vadd.f32 %v4620_v17, %v4502_v33 }
 0x5ad   : > { %v4738_v27 = vadd.f32 %v4737_v24, %v4619_v22  ;;  %v7483_v31 = vor.u32 %v7938_v49, %v7482_v23  ;;  %6189 = vmatmul.bf16.gmra.mxu2 %v7427_v59  ;;  %v7454_v23 = vld [vmem:[#allocation7 + $0xf0] sm:$0xf]  ;;  %v7932_v49 = vld [vmem:[#allocation7 + $0x100] sm:$0xf0] }
 0x5ae   : > { %5997 = vmatmul.bf16.gmra.mxu3 %v7415_v42 }
 0x5af   : > { %6248 = vmatmul.bf16.gmra.mxu1 %v7411_v43  ;;  %v4796_v35 = vmax.f32 %v4738_v27, 0.0  ;;  %6140 = vmatmul.bf16.gmra.mxu0 %v7483_v31  ;;  %v7450_v43 = vld [vmem:[#allocation7 + $0xd8] sm:$0xf]  ;;  %v7464_v27 = vld [vmem:[#allocation7 + $0x10c] sm:$0xf0] }
 0x5b0   : > { %v4886_v26 = vld [vmem:[#allocation6 + $0x107] ss:$2 sm:$0xff]  ;;  %v4974_v20 = vld [vmem:[#allocation6 + $0x108] ss:$2 sm:$0xff]  ;;  %v4623_v40 = vpop.f32.mrf.mxu2 }
 0x5b1   : > { %v5062_v34 = vld [vmem:[#allocation6 + $0x109] ss:$2 sm:$0xff]  ;;  %v4913_v25 = vpack.c.bf16 %v4886_v26, %v4886_v26  ;;  %v5001_v37 = vpack.c.bf16 %v4974_v20, %v4974_v20  ;;  %4840 = vst [vmem:[#allocation6 + $0x118] sm:$0xff] %v4796_v35  ;;  %v4504_v63 = vpop.f32.mrf.mxu3  ;;  %v7451_v35 = vor.u32 %v7929_v52, %v7450_v43 }
 0x5b2   : > { %v5089_v39 = vpack.c.bf16 %v5062_v34, %v5062_v34  ;;  %v4505_v46 = vadd.f32 %v9593_v51, %v4504_v63  ;;  %v7926_v51 = vld [vmem:[#allocation7 + $0xd4] sm:$0xf]  ;;  %v7931_v20 = vld [vmem:[#allocation7 + $0xfc] sm:$0xf] }
 0x5b3   : > { %4935 = vst [vmem:[#allocation7 + $0x140] sm:$0xf] %v4913_v25  ;;  %v7447_v1 = vor.u32 %v7926_v51, %v7444_v48  ;;  %v7965_v26 = vld [vmem:[#allocation16 + $0x50] sm:$0xff] }
 0x5b4   : > { %5023 = vst [vmem:[#allocation7 + $0x144] sm:$0xf] %v5001_v37  ;;  %v4739_v9 = vpop.f32.mrf.mxu1  ;;  %v4624_v61 = vadd.f32 %v4623_v40, %v4505_v46  ;;  %v7455_v37 = vor.u32 %v7932_v49, %v7454_v23  ;;  %6038 = vmatpush.bf16.msrb.mxu3 %v7965_v26  ;;  %v7484_v51 = vld [vmem:[#allocation7 + $0x134] sm:$0xf0]  ;;  %v7490_v26 = vld [vmem:[#allocation7 + $0x128] sm:$0xf] }
 0x5b5   : > { %5111 = vst [vmem:[#allocation7 + $0x148] sm:$0xf] %v5089_v39  ;;  %v4740_v44 = vadd.f32 %v4739_v9, %v4621_v41  ;;  %v7467_v39 = vor.u32 %v7931_v20, %v7464_v27 }
 0x5b7   : > { %v4797_v7 = vmax.f32 %v4740_v44, 0.0 }
 0x5b8   : > { %v5150_v53 = vld [vmem:[#allocation6 + $0x10a] ss:$2 sm:$0xff]  ;;  %v5238_v57 = vld [vmem:[#allocation6 + $0x10b] ss:$2 sm:$0xff]  ;;  %v4625_v60 = vpop.f32.mrf.mxu2 }
 0x5b9   : > { %v5177_v45 = vpack.c.bf16 %v5150_v53, %v5150_v53  ;;  %v5265_v47 = vpack.c.bf16 %v5238_v57, %v5238_v57  ;;  %4841 = vst [vmem:[#allocation6 + $0x120] sm:$0xff] %v4797_v7  ;;  %v4506_v55 = vpop.f32.mrf.mxu3 }
 0x5ba   : > { %v4507_v62 = vadd.f32 %v9643_v21, %v4506_v55 }
 0x5bb   : > { %5199 = vst [vmem:[#allocation7 + $0x14c] sm:$0xf] %v5177_v45 }
 0x5bc   : > { %5287 = vst [vmem:[#allocation7 + $0x150] sm:$0xf] %v5265_v47  ;;  %v4742_v5 = vpop.f32.mrf.mxu1  ;;  %v4626_v13 = vadd.f32 %v4625_v60, %v4507_v62  ;;  %v7502_v42 = vld [vmem:[#allocation7 + $0x148] sm:$0xf]  ;;  %v7474_v62 = vld [vmem:[#allocation7 + $0x118] sm:$0xf] }
 0x5bd   : > { %v4743_v19 = vadd.f32 %v4742_v5, %v4624_v61  ;;  %6194 = vmatmul.bf16.gmra.mxu2 %v7447_v1  ;;  %v7934_v5 = vld [vmem:[#allocation7 + $0x110] sm:$0xf0] }
 0x5be   : > { %6002 = vmatmul.bf16.gmra.mxu3 %v7435_v6  ;;  %v7470_v6 = vld [vmem:[#allocation7 + $0x100] sm:$0xf] }
 0x5bf   : > { %6253 = vmatmul.bf16.gmra.mxu1 %v7431_v30  ;;  %v4798_v18 = vmax.f32 %v4743_v19, 0.0  ;;  %v7937_v30 = vld [vmem:[#allocation7 + $0x128] sm:$0xf0] }
 0x5c0   : > { %v4888_v0 = vld [vmem:[#allocation6 + $0x117] ss:$2 sm:$0xff]  ;;  %v4976_v56 = vld [vmem:[#allocation6 + $0x118] ss:$2 sm:$0xff]  ;;  %v4628_v12 = vpop.f32.mrf.mxu2 }
 0x5c1   : > { %v5064_v3 = vld [vmem:[#allocation6 + $0x119] ss:$2 sm:$0xff]  ;;  %v4914_v38 = vpack.c.bf16 %v4888_v0, %v4888_v0  ;;  %v5002_v4 = vpack.c.bf16 %v4976_v56, %v4976_v56  ;;  %4842 = vst [vmem:[#allocation6 + $0x128] sm:$0xff] %v4798_v18  ;;  %v4509_v10 = vpop.f32.mrf.mxu3  ;;  %v7471_v18 = vor.u32 %v7934_v5, %v7470_v6  ;;  %v7936_v0 = vld [vmem:[#allocation7 + $0x124] sm:$0xf] }
 0x5c2   : > { %v5090_v29 = vpack.c.bf16 %v5064_v3, %v5064_v3  ;;  %v4510_v14 = vadd.f32 %v9643_v21, %v4509_v10  ;;  %v7475_v3 = vor.u32 %v7937_v30, %v7474_v62 }
 0x5c3   : > { %4936 = vst [vmem:[#allocation7 + $0x154] sm:$0xf] %v4914_v38  ;;  %v7964_v38 = vld [vmem:[#allocation16 + $0x48] sm:$0xff] }
 0x5c4   : > { %5024 = vst [vmem:[#allocation7 + $0x158] sm:$0xf] %v5002_v4  ;;  %v4744_v36 = vpop.f32.mrf.mxu1  ;;  %v4629_v31 = vadd.f32 %v4628_v12, %v4510_v14  ;;  %6039 = vmatpush.bf16.msrb.mxu3 %v7964_v38 }
 0x5c5   : > { %5112 = vst [vmem:[#allocation7 + $0x15c] sm:$0xf] %v5090_v29  ;;  %v4745_v2 = vadd.f32 %v4744_v36, %v4626_v13  ;;  %v7487_v29 = vor.u32 %v7936_v0, %v7484_v51  ;;  %v7510_v0 = vld [vmem:[#allocation7 + $0x150] sm:$0xf] }
 0x5c7   : > { %v4799_v16 = vmax.f32 %v4745_v2, 0.0 }
 0x5c8   : > { %v5152_v50 = vld [vmem:[#allocation6 + $0x11a] ss:$2 sm:$0xff]  ;;  %v5240_v17 = vld [vmem:[#allocation6 + $0x11b] ss:$2 sm:$0xff]  ;;  %v4630_v32 = vpop.f32.mrf.mxu2 }
 0x5c9   : > { %v5178_v28 = vpack.c.bf16 %v5152_v50, %v5152_v50  ;;  %v5266_v22 = vpack.c.bf16 %v5240_v17, %v5240_v17  ;;  %4843 = vst [vmem:[#allocation6 + $0x130] sm:$0xff] %v4799_v16  ;;  %v4511_v24 = vpop.f32.mrf.mxu3 }
 0x5ca   : > { %v4512_v63 = vadd.f32 %v9643_v21, %v4511_v24 }
 0x5cb   : > { %5200 = vst [vmem:[#allocation7 + $0x160] sm:$0xf] %v5178_v28 }
 0x5cc   : > { %5288 = vst [vmem:[#allocation7 + $0x164] sm:$0xf] %v5266_v22  ;;  %v4747_v59 = vpop.f32.mrf.mxu1  ;;  %v7943_v33 = vld [vmem:[#allocation7 + $0x158] sm:$0xf0]  ;;  %v4631_v57 = vadd.f32 %v4630_v32, %v4512_v63 }
 0x5cd   : > { %v4748_v34 = vadd.f32 %v4747_v59, %v4629_v31  ;;  %v7503_v25 = vor.u32 %v7943_v33, %v7502_v42  ;;  %6199 = vmatmul.bf16.gmra.mxu2 %v7467_v39  ;;  %v7939_v42 = vld [vmem:[#allocation7 + $0x138] sm:$0xf0]  ;;  %v7494_v33 = vld [vmem:[#allocation7 + $0x140] sm:$0xf] }
 0x5ce   : > { %6007 = vmatmul.bf16.gmra.mxu3 %v7455_v37 }
 0x5cf   : > { %6258 = vmatmul.bf16.gmra.mxu1 %v7451_v35  ;;  %v4800_v40 = vmax.f32 %v4748_v34, 0.0  ;;  %6145 = vmatmul.bf16.gmra.mxu0 %v7503_v25  ;;  %v7942_v35 = vld [vmem:[#allocation7 + $0x150] sm:$0xf0]  ;;  %v7963_v25 = vld [vmem:[#allocation16 + $0x40] sm:$0xff] }
 0x5d0   : > { %v4890_v41 = vld [vmem:[#allocation6 + $0x127] ss:$2 sm:$0xff]  ;;  %v4978_v9 = vld [vmem:[#allocation6 + $0x128] ss:$2 sm:$0xff]  ;;  %v4633_v45 = vpop.f32.mrf.mxu2  ;;  %6040 = vmatpush.bf16.msrb.mxu3 %v7963_v25 }
 0x5d1   : > { %v5066_v44 = vld [vmem:[#allocation6 + $0x129] ss:$2 sm:$0xff]  ;;  %v4915_v11 = vpack.c.bf16 %v4890_v41, %v4890_v41  ;;  %v5003_v46 = vpack.c.bf16 %v4978_v9, %v4978_v9  ;;  %4844 = vst [vmem:[#allocation6 + $0x138] sm:$0xff] %v4800_v40  ;;  %v4514_v53 = vpop.f32.mrf.mxu3  ;;  %v7491_v40 = vor.u32 %v7939_v42, %v7490_v26  ;;  %v7941_v41 = vld [vmem:[#allocation7 + $0x14c] sm:$0xf] }
 0x5d2   : > { %v5091_v7 = vpack.c.bf16 %v5066_v44, %v5066_v44  ;;  %v4515_v55 = vadd.f32 %v9643_v21, %v4514_v53  ;;  %v7504_v20 = vld [vmem:[#allocation7 + $0x15c] sm:$0xf0] }
 0x5d3   : > { %4937 = vst [vmem:[#allocation7 + $0x168] sm:$0xf] %v4915_v11  ;;  %v7495_v11 = vor.u32 %v7942_v35, %v7494_v33  ;;  %v7944_v6 = vld [vmem:[#allocation7 + $0x160] sm:$0xf0] }
 0x5d4   : > { %5025 = vst [vmem:[#allocation7 + $0x16c] sm:$0xf] %v5003_v46  ;;  %v4749_v47 = vpop.f32.mrf.mxu1  ;;  %v4634_v19 = vadd.f32 %v4633_v45, %v4515_v55  ;;  %v7507_v46 = vor.u32 %v7941_v41, %v7504_v20 }
 0x5d5   : > { %5113 = vst [vmem:[#allocation7 + $0x170] sm:$0xf] %v5091_v7  ;;  %v4750_v8 = vadd.f32 %v4749_v47, %v4631_v57 }
 0x5d7   : > { %v4801_v58 = vmax.f32 %v4750_v8, 0.0 }
 0x5d8   : > { %v5154_v60 = vld [vmem:[#allocation6 + $0x12a] ss:$2 sm:$0xff]  ;;  %v5242_v48 = vld [vmem:[#allocation6 + $0x12b] ss:$2 sm:$0xff]  ;;  %v4635_v4 = vpop.f32.mrf.mxu2 }
 0x5d9   : > { %v5179_v61 = vpack.c.bf16 %v5154_v60, %v5154_v60  ;;  %v5267_v54 = vpack.c.bf16 %v5242_v48, %v5242_v48  ;;  %4845 = vst [vmem:[#allocation6 + $0x140] sm:$0xff] %v4801_v58  ;;  %v4516_v15 = vpop.f32.mrf.mxu3 }
 0x5da   : > { %v4517_v10 = vadd.f32 %v9643_v21, %v4516_v15 }
 0x5db   : > { %5201 = vst [vmem:[#allocation7 + $0x174] sm:$0xf] %v5179_v61 }
 0x5dc   : > { %5289 = vst [vmem:[#allocation7 + $0x178] sm:$0xf] %v5267_v54  ;;  %v4752_v1 = vpop.f32.mrf.mxu1  ;;  %v4636_v28 = vadd.f32 %v4635_v4, %v4517_v10  ;;  %v7522_v39 = vld [vmem:[#allocation7 + $0x170] sm:$0xf] }
 0x5dd   : > { %v4753_v56 = vadd.f32 %v4752_v1, %v4634_v19  ;;  %6204 = vmatmul.bf16.gmra.mxu2 %v7487_v29 }
 0x5de   : > { %6012 = vmatmul.bf16.gmra.mxu3 %v7475_v3  ;;  %v7511_v3 = vor.u32 %v7944_v6, %v7510_v0 }
 0x5df   : > { %6263 = vmatmul.bf16.gmra.mxu1 %v7471_v18  ;;  %v4802_v12 = vmax.f32 %v4753_v56, 0.0  ;;  %v7514_v56 = vld [vmem:[#allocation7 + $0x168] sm:$0xf] }
 0x5e0   : > { %v4892_v13 = vld [vmem:[#allocation6 + $0x137] ss:$2 sm:$0xff]  ;;  %v4980_v36 = vld [vmem:[#allocation6 + $0x138] ss:$2 sm:$0xff]  ;;  %v4638_v32 = vpop.f32.mrf.mxu2 }
 0x5e1   : > { %v5068_v2 = vld [vmem:[#allocation6 + $0x139] ss:$2 sm:$0xff]  ;;  %v4916_v14 = vpack.c.bf16 %v4892_v13, %v4892_v13  ;;  %v5004_v16 = vpack.c.bf16 %v4980_v36, %v4980_v36  ;;  %4846 = vst [vmem:[#allocation6 + $0x148] sm:$0xff] %v4802_v12  ;;  %v4519_v17 = vpop.f32.mrf.mxu3 }
 0x5e2   : > { %v5092_v50 = vpack.c.bf16 %v5068_v2, %v5068_v2  ;;  %v4520_v24 = vadd.f32 %v9643_v21, %v4519_v17  ;;  %v7946_v38 = vld [vmem:[#allocation7 + $0x174] sm:$0xf] }
 0x5e3   : > { %4938 = vst [vmem:[#allocation7 + $0x17c] sm:$0xf] %v4916_v14 }
 0x5e4   : > { %5026 = vst [vmem:[#allocation7 + $0x180] sm:$0xf] %v5004_v16  ;;  %v4754_v22 = vpop.f32.mrf.mxu1  ;;  %v4639_v34 = vadd.f32 %v4638_v32, %v4520_v24 }
 0x5e5   : > { %5114 = vst [vmem:[#allocation7 + $0x184] sm:$0xf] %v5092_v50  ;;  %v4755_v52 = vadd.f32 %v4754_v22, %v4636_v28 }
 0x5e7   : > { %v4803_v23 = vmax.f32 %v4755_v52, 0.0 }
 0x5e8   : > { %v5156_v49 = vld [vmem:[#allocation6 + $0x13a] ss:$2 sm:$0xff]  ;;  %v5244_v43 = vld [vmem:[#allocation6 + $0x13b] ss:$2 sm:$0xff]  ;;  %v4640_v60 = vpop.f32.mrf.mxu2 }
 0x5e9   : > { %v5180_v27 = vpack.c.bf16 %v5156_v49, %v5156_v49  ;;  %v5268_v31 = vpack.c.bf16 %v5244_v43, %v5244_v43  ;;  %4847 = vst [vmem:[#allocation6 + $0x150] sm:$0xff] %v4803_v23  ;;  %v4521_v59 = vpop.f32.mrf.mxu3  ;;  %v7530_v49 = vld [vmem:[#allocation7 + $0x178] sm:$0xf] }
 0x5ea   : > { %v4522_v7 = vadd.f32 %v9643_v21, %v4521_v59  ;;  %v7947_v62 = vld [vmem:[#allocation7 + $0x178] sm:$0xf0] }
 0x5eb   : > { %5202 = vst [vmem:[#allocation7 + $0x188] sm:$0xf] %v5180_v27  ;;  %v7515_v4 = vor.u32 %v7947_v62, %v7514_v56  ;;  %v7436_v62 = vld [vmem:[#allocation7 + $0xdc] sm:$0xf0] }
 0x5ec   : > { %5290 = vst [vmem:[#allocation7 + $0x18c] sm:$0xf] %v5268_v31  ;;  %v4757_v37 = vpop.f32.mrf.mxu1  ;;  %v7948_v63 = vld [vmem:[#allocation7 + $0x180] sm:$0xf0]  ;;  %v4641_v61 = vadd.f32 %v4640_v60, %v4522_v7  ;;  %v7396_v60 = vld [vmem:[#allocation7 + $0x8c] sm:$0xf0] }
 0x5ed   : > { %v4758_v9 = vadd.f32 %v4757_v37, %v4639_v34  ;;  %v7523_v44 = vor.u32 %v7948_v63, %v7522_v39  ;;  %6209 = vmatmul.bf16.gmra.mxu2 %v7507_v46  ;;  %v7336_v37 = vld [vmem:[#allocation7 + $0x14] sm:$0xf0]  ;;  %v7900_v63 = vld [vmem:[#allocation7 + $0x4] sm:$0xf]  ;;  %v7905_v46 = vld [vmem:[#allocation7 + $0x2c] sm:$0xf] }
 0x5ee   : > { %6017 = vmatmul.bf16.gmra.mxu3 %v7495_v11  ;;  %v7339_v41 = vor.u32 %v7900_v63, %v7336_v37  ;;  %v7356_v11 = vld [vmem:[#allocation7 + $0x3c] sm:$0xf0] }
 0x5ef   : > { %6268 = vmatmul.bf16.gmra.mxu1 %v7491_v40  ;;  %v4804_v53 = vmax.f32 %v4758_v9, 0.0  ;;  %6150 = vmatmul.bf16.gmra.mxu0 %v7523_v44  ;;  %v7359_v7 = vor.u32 %v7905_v46, %v7356_v11 }
 0x5f0   : > { %v4894_v57 = vld [vmem:[#allocation6 + $0x147] ss:$2 sm:$0xff]  ;;  %v4982_v45 = vld [vmem:[#allocation6 + $0x148] ss:$2 sm:$0xff] }
 0x5f1   : > { %v5070_v47 = vld [vmem:[#allocation6 + $0x149] ss:$2 sm:$0xff]  ;;  %v4917_v8 = vpack.c.bf16 %v4894_v57, %v4894_v57  ;;  %v5005_v55 = vpack.c.bf16 %v4982_v45, %v4982_v45  ;;  %4848 = vst [vmem:[#allocation6 + $0x158] sm:$0xff] %v4804_v53  ;;  %v9652_v48 = vpop.f32.mrf.mxu3  ;;  %v7376_v45 = vld [vmem:[#allocation7 + $0x64] sm:$0xf0] }
 0x5f2   : > { %v5093_v58 = vpack.c.bf16 %v5070_v47, %v5070_v47  ;;  %v7524_v18 = vld [vmem:[#allocation7 + $0x184] sm:$0xf0]  ;;  %v7910_v47 = vld [vmem:[#allocation7 + $0x54] sm:$0xf] }
 0x5f3   : > { %4939 = vst [vmem:[#allocation7 + $0x190] sm:$0xf] %v4917_v8  ;;  %v7527_v29 = vor.u32 %v7946_v38, %v7524_v18  ;;  %v7949_v52 = vld [vmem:[#allocation7 + $0x188] sm:$0xf0]  ;;  %v7379_v8 = vor.u32 %v7910_v47, %v7376_v45  ;;  %v7456_v38 = vld [vmem:[#allocation7 + $0x104] sm:$0xf0] }
 0x5f4   : > { %5027 = vst [vmem:[#allocation7 + $0x194] sm:$0xf] %v5005_v55  ;;  %v4759_v54 = vpop.f32.mrf.mxu1  ;;  %v7531_v31 = vor.u32 %v7949_v52, %v7530_v49  ;;  %v7925_v18 = vld [vmem:[#allocation7 + $0xcc] sm:$0xf]  ;;  %v7516_v45 = vld [vmem:[#allocation7 + $0x17c] sm:$0xf0] }
 0x5f5   : > { %5115 = vst [vmem:[#allocation7 + $0x198] sm:$0xf] %v5093_v58  ;;  %v4760_v21 = vadd.f32 %v4759_v54, %v4641_v61  ;;  %v7915_v61 = vld [vmem:[#allocation7 + $0x7c] sm:$0xf]  ;;  %v7439_v0 = vor.u32 %v7925_v18, %v7436_v62 }
 0x5f6   : > { %v7399_v54 = vor.u32 %v7915_v61, %v7396_v60  ;;  %v7945_v60 = vld [vmem:[#allocation7 + $0x16c] sm:$0xf] }
 0x5f7   : > { %v4805_v5 = vmax.f32 %v4760_v21, 0.0 }
 0x5f8   : > { %v5158_v15 = vld [vmem:[#allocation6 + $0x14a] ss:$2 sm:$0xff]  ;;  %v5246_v30 = vld [vmem:[#allocation6 + $0x14b] ss:$2 sm:$0xff] }
 0x5f9   : > { %v5181_v51 = vpack.c.bf16 %v5158_v15, %v5158_v15  ;;  %v5269_v19 = vpack.c.bf16 %v5246_v30, %v5246_v30  ;;  %4849 = vst [vmem:[#allocation6 + $0x160] sm:$0xf] %v4805_v5  ;;  %v9654_v1 = vpop.f32.mrf.mxu3  ;;  %v7416_v15 = vld [vmem:[#allocation7 + $0xb4] sm:$0xf0]  ;;  %v7920_v30 = vld [vmem:[#allocation7 + $0xa4] sm:$0xf] }
 0x5fa   : > { %v7534_v27 = vld [vmem:[#allocation7 + $0x190] sm:$0xf] }
 0x5fb   : > { %5203 = vst [vmem:[#allocation7 + $0x19c] sm:$0xf] %v5181_v51  ;;  %v7419_v51 = vor.u32 %v7920_v30, %v7416_v15 }
 0x5fc   : > { %5291 = vst [vmem:[#allocation7 + $0x1a0] sm:$0xf] %v5269_v19  ;;  %v7542_v43 = vld [vmem:[#allocation7 + $0x198] sm:$0xf] }
 0x5fd   : > { %6214 = vmatmul.bf16.gmra.mxu2 %v7527_v29  ;;  %v6170_v29 = vpop.f32.mrf.mxu2 }
 0x5fe   : > { %6022 = vmatmul.bf16.gmra.mxu3 %v7515_v4  ;;  %v7930_v4 = vld [vmem:[#allocation7 + $0xf4] sm:$0xf] }
 0x5ff   : > { %6273 = vmatmul.bf16.gmra.mxu1 %v7511_v3 }
 0x600   : > { %v4896_v10 = vld [vmem:[#allocation6 + $0x157] ss:$2 sm:$0xff]  ;;  %v4984_v12 = vld [vmem:[#allocation6 + $0x158] ss:$2 sm:$0xff] }
 0x601   : > { %v5072_v13 = vld [vmem:[#allocation6 + $0x159] ss:$2 sm:$0xff]  ;;  %v4918_v36 = vpack.c.bf16 %v4896_v10, %v4896_v10  ;;  %v5006_v2 = vpack.c.bf16 %v4984_v12, %v4984_v12  ;;  %v5160_v16 = vld [vmem:[#allocation6 + $0x15a] ss:$2 sm:$0xff]  ;;  %v9656_v28 = vpop.f32.mrf.mxu3  ;;  %v7459_v10 = vor.u32 %v7930_v4, %v7456_v38  ;;  %v6234_v12 = vpop.f32.mrf.mxu1 }
 0x602   : > { %v5094_v14 = vpack.c.bf16 %v5072_v13, %v5072_v13  ;;  %v5248_v50 = vld [vmem:[#allocation6 + $0x15b] ss:$2 sm:$0xff]  ;;  %v5182_v17 = vpack.c.bf16 %v5160_v16, %v5160_v16  ;;  %v7951_v59 = vld [vmem:[#allocation7 + $0x19c] sm:$0xf] }
 0x603   : > { %v5270_v22 = vpack.c.bf16 %v5248_v50, %v5248_v50  ;;  %4940 = vst [vmem:[#allocation7 + $0x1a4] sm:$0xf] %v4918_v36  ;;  %v7550_v39 = vld [vmem:[#allocation7 + $0x1a0] sm:$0xf]  ;;  %v7476_v16 = vld [vmem:[#allocation7 + $0x12c] sm:$0xf0] }
 0x604   : > { %5028 = vst [vmem:[#allocation7 + $0x1a8] sm:$0xf] %v5006_v2  ;;  %v7935_v50 = vld [vmem:[#allocation7 + $0x11c] sm:$0xf] }
 0x605   : > { %5116 = vst [vmem:[#allocation7 + $0x1ac] sm:$0xf] %v5094_v14  ;;  %v6172_v36 = vpop.f32.mrf.mxu2 }
 0x606   : > { %5204 = vst [vmem:[#allocation7 + $0x1b0] sm:$0xf] %v5182_v17  ;;  %v7479_v17 = vor.u32 %v7935_v50, %v7476_v16 }
 0x607   : > { %5292 = vst [vmem:[#allocation7 + $0x1b4] sm:$0xf] %v5270_v22  ;;  %v6106_v22 = vpop.f32.mrf.mxu0 }
 0x609   : > { %v9658_v24 = vpop.f32.mrf.mxu3  ;;  %v6236_v2 = vpop.f32.mrf.mxu1 }
 0x60a   : > { %v7952_v23 = vld [vmem:[#allocation7 + $0x1a0] sm:$0xf0] }
 0x60b   : > { %v7535_v35 = vor.u32 %v7952_v23, %v7534_v27  ;;  %v7496_v27 = vld [vmem:[#allocation7 + $0x154] sm:$0xf0]  ;;  %v7536_v50 = vld [vmem:[#allocation7 + $0x1a4] sm:$0xf0] }
 0x60c   : > { %v7953_v32 = vld [vmem:[#allocation7 + $0x1a8] sm:$0xf0] }
 0x60d   : > { %v7543_v42 = vor.u32 %v7953_v32, %v7542_v43  ;;  %v7544_v33 = vld [vmem:[#allocation7 + $0x1ac] sm:$0xf0]  ;;  %v6175_v52 = vpop.f32.mrf.mxu2 }
 0x60e   : > { %v7547_v26 = vor.u32 %v7951_v59, %v7544_v33  ;;  %6027 = vmatmul.bf16.gmra.mxu3 %v7535_v35  ;;  %v7954_v34 = vld [vmem:[#allocation7 + $0x1b0] sm:$0xf0]  ;;  %v7940_v59 = vld [vmem:[#allocation7 + $0x144] sm:$0xf]  ;;  %v9696_v33 = vld [vmem:[#allocation18] ss:$0 sm:$0xff] }
 0x60f   : > { %6278 = vmatmul.bf16.gmra.mxu1 %v7531_v31  ;;  %6155 = vmatmul.bf16.gmra.mxu0 %v7543_v42  ;;  %v7551_v40 = vor.u32 %v7954_v34, %v7550_v39  ;;  %v6108_v43 = vpop.f32.mrf.mxu0  ;;  %v7499_v35 = vor.u32 %v7940_v59, %v7496_v27  ;;  %v5979_v34 = vadd.f32 %v9696_v33, %v9652_v48  ;;  %v7950_v27 = vld [vmem:[#allocation7 + $0x194] sm:$0xf] }
 0x610   : > { %6219 = vmatmul.bf16.gmra.mxu2 %v7547_v26  ;;  %v5981_v11 = vadd.f32 %v9696_v33, %v9654_v1  ;;  %v5984_v62 = vadd.f32 %v9696_v33, %v9656_v28 }
 0x611   : > { %v9660_v20 = vpop.f32.mrf.mxu3  ;;  %v6239_v23 = vpop.f32.mrf.mxu1 }
 0x615   : > { %v6177_v31 = vpop.f32.mrf.mxu2 }
 0x617   : > { %v6111_v26 = vpop.f32.mrf.mxu0 }
 0x619   : > { %v9662_v25 = vpop.f32.mrf.mxu3  ;;  %v6241_v42 = vpop.f32.mrf.mxu1 }
 0x61d   : > { %v6180_v63 = vpop.f32.mrf.mxu2 }
 0x61e   : > { %6041 = vmatmul.bf16.vlgmr.msrb.gmra.mxu3 %v7339_v41 }
 0x61f   : > { %6283 = vmatmul.bf16.gmra.mxu1 %v7551_v40  ;;  %v6113_v46 = vpop.f32.mrf.mxu0 }
 0x621   : > { %v9664_v9 = vpop.f32.mrf.mxu3  ;;  %v6244_v40 = vpop.f32.mrf.mxu1 }
 0x625   : > { %v6182_v15 = vpop.f32.mrf.mxu2 }
 0x629   : > { %v9666_v44 = vpop.f32.mrf.mxu3 }
 0x62d   : > { %v6185_v16 = vpop.f32.mrf.mxu2 }
 0x62e   : > { %6046 = vmatmul.bf16.gmra.mxu3 %v7359_v7 }
 0x631   : > { %v9668_v53 = vpop.f32.mrf.mxu3 }
 0x639   : > { %v9670_v57 = vpop.f32.mrf.mxu3 }
 0x63e   : > { %6051 = vmatmul.bf16.gmra.mxu3 %v7379_v8 }
 0x641   : > { %v9672_v55 = vpop.f32.mrf.mxu3 }
 0x649   : > { %v9674_v58 = vpop.f32.mrf.mxu3 }
 0x64e   : > { %6056 = vmatmul.bf16.gmra.mxu3 %v7399_v54  ;;  %v7519_v54 = vor.u32 %v7945_v60, %v7516_v45 }
 0x651   : > { %v9676_v21 = vpop.f32.mrf.mxu3 }
 0x659   : > { %v9678_v5 = vpop.f32.mrf.mxu3 }
 0x65e   : > { %6061 = vmatmul.bf16.gmra.mxu3 %v7419_v51  ;;  %v6246_v51 = vpop.f32.mrf.mxu1 }
 0x661   : > { %v9680_v19 = vpop.f32.mrf.mxu3 }
 0x666   : > { %v6249_v28 = vpop.f32.mrf.mxu1 }
 0x669   : > { %v9682_v6 = vpop.f32.mrf.mxu3 }
 0x66e   : > { %6066 = vmatmul.bf16.gmra.mxu3 %v7439_v0  ;;  %v6116_v0 = vpop.f32.mrf.mxu0 }
 0x671   : > { %v9684_v56 = vpop.f32.mrf.mxu3 }
 0x679   : > { %v9686_v3 = vpop.f32.mrf.mxu3 }
 0x67e   : > { %6071 = vmatmul.bf16.gmra.mxu3 %v7459_v10 }
 0x681   : > { %v9688_v13 = vpop.f32.mrf.mxu3 }
 0x689   : > { %v9690_v14 = vpop.f32.mrf.mxu3 }
 0x68e   : > { %6076 = vmatmul.bf16.gmra.mxu3 %v7479_v17 }
 0x691   : > { %v9692_v49 = vpop.f32.mrf.mxu3 }
 0x699   : > { %v9694_v32 = vpop.f32.mrf.mxu3 }
 0x69e   : > { %6081 = vmatmul.bf16.gmra.mxu3 %v7499_v35  ;;  %v7539_v35 = vor.u32 %v7950_v27, %v7536_v50 }
 0x6a1   : > { %v6042_v37 = vpop.f32.mrf.mxu3 }
 0x6a2   : > { %v6043_v39 = vadd.f32 %v6042_v37, %v5979_v34 }
 0x6a4   : > { %v6107_v41 = vadd.f32 %v6106_v22, %v6043_v39 }
 0x6a6   : > { %v6171_v47 = vadd.f32 %v6170_v29, %v6107_v41 }
 0x6a8   : > { %v6235_v30 = vadd.f32 %v6234_v12, %v6171_v47 }
 0x6a9   : > { %v6044_v7 = vpop.f32.mrf.mxu3 }
 0x6aa   : > { %v6045_v8 = vadd.f32 %v6044_v7, %v5981_v11  ;;  %v6289_v38 = vmax.f32 %v6235_v30, 0.0 }
 0x6ac   : > { %v6109_v61 = vadd.f32 %v6108_v43, %v6045_v8  ;;  %v6118_v43 = vpop.f32.mrf.mxu0 }
 0x6ae   : > { %v6173_v48 = vadd.f32 %v6172_v36, %v6109_v61  ;;  %6086 = vmatmul.bf16.gmra.mxu3 %v7519_v54  ;;  %v5986_v36 = vadd.f32 %v9696_v33, %v9658_v24  ;;  %v6187_v24 = vpop.f32.mrf.mxu2 }
 0x6b0   : > { %v6237_v18 = vadd.f32 %v6236_v2, %v6173_v48 }
 0x6b1   : > { %v6047_v1 = vpop.f32.mrf.mxu3 }
 0x6b2   : > { %v6290_v4 = vmax.f32 %v6237_v18, 0.0  ;;  %v6048_v10 = vadd.f32 %v6047_v1, %v5984_v62  ;;  %v5994_v18 = vadd.f32 %v9696_v33, %v9664_v9 }
 0x6b4   : > { %v7998_v29 = vpack.c.bf16 %v6290_v4, %v6289_v38  ;;  %v6112_v12 = vadd.f32 %v6111_v26, %v6048_v10  ;;  %v5989_v26 = vadd.f32 %v9696_v33, %v9660_v20  ;;  %v6121_v47 = vpop.f32.mrf.mxu0 }
 0x6b6   : > { %7999 = vst [vmem:[%s9708_s17] sm:$0xff] %v7998_v29   ;;  %v6176_v17 = vadd.f32 %v6175_v52, %v6112_v12  ;;  %v6251_v52 = vpop.f32.mrf.mxu1  ;;  %v6190_v54 = vpop.f32.mrf.mxu2 }
 0x6b8   : > { %v6240_v34 = vadd.f32 %v6239_v23, %v6176_v17 }
 0x6b9   : > { %v6049_v2 = vpop.f32.mrf.mxu3 }
 0x6ba   : > { %v6050_v22 = vadd.f32 %v6049_v2, %v5986_v36  ;;  %v6291_v11 = vmax.f32 %v6240_v34, 0.0  ;;  %v5996_v2 = vadd.f32 %v9696_v33, %v9666_v44 }
 0x6bc   : > { %v6114_v59 = vadd.f32 %v6113_v46, %v6050_v22  ;;  %v5991_v46 = vadd.f32 %v9696_v33, %v9662_v25 }
 0x6be   : > { %v6178_v37 = vadd.f32 %v6177_v31, %v6114_v59  ;;  %6091 = vmatmul.bf16.gmra.mxu3 %v7539_v35  ;;  %v6254_v30 = vpop.f32.mrf.mxu1  ;;  %v6192_v12 = vpop.f32.mrf.mxu2 }
 0x6c0   : > { %v6242_v39 = vadd.f32 %v6241_v42, %v6178_v37  ;;  %v6123_v42 = vpop.f32.mrf.mxu0 }
 0x6c1   : > { %v6052_v41 = vpop.f32.mrf.mxu3 }
 0x6c2   : > { %v6292_v7 = vmax.f32 %v6242_v39, 0.0  ;;  %v6053_v45 = vadd.f32 %v6052_v41, %v5989_v26 }
 0x6c4   : > { %v8003_v8 = vpack.c.bf16 %v6292_v7, %v6291_v11  ;;  %v6117_v60 = vadd.f32 %v6116_v0, %v6053_v45 }
 0x6c6   : > { %8050 = vst [vmem:[%s9708_s17 + $0x8] sm:$0xff] %v8003_v8   ;;  %v6181_v31 = vadd.f32 %v6180_v63, %v6117_v60  ;;  %v6256_v36 = vpop.f32.mrf.mxu1  ;;  %v6195_v27 = vpop.f32.mrf.mxu2  ;;  %v6004_v60 = vadd.f32 %v9696_v33, %v9672_v55 }
 0x6c8   : > { %v6245_v48 = vadd.f32 %v6244_v40, %v6181_v31  ;;  %v6126_v25 = vpop.f32.mrf.mxu0 }
 0x6c9   : > { %v6054_v23 = vpop.f32.mrf.mxu3 }
 0x6ca   : > { %v6055_v61 = vadd.f32 %v6054_v23, %v5991_v46  ;;  %v6293_v4 = vmax.f32 %v6245_v48, 0.0 }
 0x6cc   : > { %v6119_v20 = vadd.f32 %v6118_v43, %v6055_v61  ;;  %v5999_v43 = vadd.f32 %v9696_v33, %v9668_v53 }
 0x6ce   : > { %v6183_v62 = vadd.f32 %v6182_v15, %v6119_v20  ;;  %v6259_v35 = vpop.f32.mrf.mxu1 }
 0x6d0   : > { %v6247_v1 = vadd.f32 %v6246_v51, %v6183_v62  ;;  %v6128_v22 = vpop.f32.mrf.mxu0 }
 0x6d1   : > { %v6057_v38 = vpop.f32.mrf.mxu3 }
 0x6d2   : > { %v6294_v0 = vmax.f32 %v6247_v1, 0.0  ;;  %v6058_v10 = vadd.f32 %v6057_v38, %v5994_v18  ;;  %v6006_v18 = vadd.f32 %v9696_v33, %v9674_v58 }
 0x6d4   : > { %v8008_v29 = vpack.c.bf16 %v6294_v0, %v6293_v4  ;;  %v6122_v63 = vadd.f32 %v6121_v47, %v6058_v10 }
 0x6d6   : > { %8051 = vst [vmem:[%s9708_s17 + $0x10] sm:$0xff] %v8008_v29   ;;  %v6186_v40 = vadd.f32 %v6185_v16, %v6122_v63  ;;  %v6001_v16 = vadd.f32 %v9696_v33, %v9670_v57  ;;  %v6261_v53 = vpop.f32.mrf.mxu1 }
 0x6d8   : > { %v6250_v9 = vadd.f32 %v6249_v28, %v6186_v40  ;;  %v6131_v11 = vpop.f32.mrf.mxu0 }
 0x6d9   : > { %v6059_v50 = vpop.f32.mrf.mxu3 }
 0x6da   : > { %v6060_v15 = vadd.f32 %v6059_v50, %v5996_v2  ;;  %v6295_v37 = vmax.f32 %v6250_v9, 0.0  ;;  %v6011_v9 = vadd.f32 %v9696_v33, %v9678_v5 }
 0x6dc   : > { %v6124_v17 = vadd.f32 %v6123_v42, %v6060_v15 }
 0x6de   : > { %v6188_v51 = vadd.f32 %v6187_v24, %v6124_v17  ;;  %v6197_v24 = vpop.f32.mrf.mxu2  ;;  %v6264_v62 = vpop.f32.mrf.mxu1 }
 0x6e0   : > { %v6252_v59 = vadd.f32 %v6251_v52, %v6188_v51  ;;  %v6133_v23 = vpop.f32.mrf.mxu0 }
 0x6e1   : > { %v6062_v34 = vpop.f32.mrf.mxu3 }
 0x6e2   : > { %v6296_v26 = vmax.f32 %v6252_v59, 0.0  ;;  %v6063_v39 = vadd.f32 %v6062_v34, %v5999_v43 }
 0x6e4   : > { %v8013_v41 = vpack.c.bf16 %v6296_v26, %v6295_v37  ;;  %v6127_v44 = vadd.f32 %v6126_v25, %v6063_v39  ;;  %v6014_v26 = vadd.f32 %v9696_v33, %v9680_v19 }
 0x6e6   : > { %8052 = vst [vmem:[%s9708_s17 + $0x18] sm:$0xff] %v8013_v41   ;;  %v6191_v7 = vadd.f32 %v6190_v54, %v6127_v44  ;;  %v6200_v48 = vpop.f32.mrf.mxu2  ;;  %v6266_v25 = vpop.f32.mrf.mxu1 }
 0x6e8   : > { %v6255_v52 = vadd.f32 %v6254_v30, %v6191_v7  ;;  %v6136_v1 = vpop.f32.mrf.mxu0 }
 0x6e9   : > { %v6064_v28 = vpop.f32.mrf.mxu3 }
 0x6ea   : > { %v6065_v45 = vadd.f32 %v6064_v28, %v6001_v16  ;;  %v6297_v61 = vmax.f32 %v6255_v52, 0.0 }
 0x6ec   : > { %v6129_v47 = vadd.f32 %v6128_v22, %v6065_v45 }
 0x6ee   : > { %v6193_v8 = vadd.f32 %v6192_v12, %v6129_v47  ;;  %v6202_v0 = vpop.f32.mrf.mxu2  ;;  %v6009_v12 = vadd.f32 %v9696_v33, %v9676_v21  ;;  %v6269_v22 = vpop.f32.mrf.mxu1 }
 0x6f0   : > { %v6257_v46 = vadd.f32 %v6256_v36, %v6193_v8  ;;  %v6138_v15 = vpop.f32.mrf.mxu0 }
 0x6f1   : > { %v6067_v31 = vpop.f32.mrf.mxu3 }
 0x6f2   : > { %v6298_v20 = vmax.f32 %v6257_v46, 0.0  ;;  %v6068_v42 = vadd.f32 %v6067_v31, %v6004_v60 }
 0x6f4   : > { %v8018_v57 = vpack.c.bf16 %v6298_v20, %v6297_v61  ;;  %v6132_v54 = vadd.f32 %v6131_v11, %v6068_v42  ;;  %v6019_v20 = vadd.f32 %v9696_v33, %v9684_v56 }
 0x6f6   : > { %8053 = vst [vmem:[%s9708_s17 + $0x20] sm:$0xff] %v8018_v57   ;;  %v6196_v38 = vadd.f32 %v6195_v27, %v6132_v54  ;;  %v6205_v51 = vpop.f32.mrf.mxu2  ;;  %v6271_v5 = vpop.f32.mrf.mxu1 }
 0x6f8   : > { %v6260_v10 = vadd.f32 %v6259_v35, %v6196_v38  ;;  %v6141_v35 = vpop.f32.mrf.mxu0 }
 0x6f9   : > { %v6069_v30 = vpop.f32.mrf.mxu3 }
 0x6fa   : > { %v6070_v4 = vadd.f32 %v6069_v30, %v6006_v18  ;;  %v6299_v2 = vmax.f32 %v6260_v10, 0.0 }
 0x6fc   : > { %v6134_v55 = vadd.f32 %v6133_v23, %v6070_v4  ;;  %v6021_v4 = vadd.f32 %v9696_v33, %v9686_v3 }
 0x6fe   : > { %v6198_v29 = vadd.f32 %v6197_v24, %v6134_v55  ;;  %v6207_v44 = vpop.f32.mrf.mxu2  ;;  %v6274_v23 = vpop.f32.mrf.mxu1 }
 0x700   : > { %v6262_v63 = vadd.f32 %v6261_v53, %v6198_v29  ;;  %v6143_v7 = vpop.f32.mrf.mxu0  ;;  %v6016_v53 = vadd.f32 %v9696_v33, %v9682_v6 }
 0x701   : > { %v6072_v36 = vpop.f32.mrf.mxu3 }
 0x702   : > { %v6300_v50 = vmax.f32 %v6262_v63, 0.0  ;;  %v6073_v40 = vadd.f32 %v6072_v36, %v6009_v12  ;;  %v6024_v36 = vadd.f32 %v9696_v33, %v9688_v13 }
 0x704   : > { %v8023_v58 = vpack.c.bf16 %v6300_v50, %v6299_v2  ;;  %v6137_v17 = vadd.f32 %v6136_v1, %v6073_v40 }
 0x706   : > { %8054 = vst [vmem:[%s9708_s17 + $0x28] sm:$0xff] %v8023_v58   ;;  %v6201_v27 = vadd.f32 %v6200_v48, %v6137_v17  ;;  %v6210_v60 = vpop.f32.mrf.mxu2  ;;  %v6276_v38 = vpop.f32.mrf.mxu1 }
 0x708   : > { %v6265_v34 = vadd.f32 %v6264_v62, %v6201_v27  ;;  %v6146_v46 = vpop.f32.mrf.mxu0 }
 0x709   : > { %v6074_v43 = vpop.f32.mrf.mxu3 }
 0x70a   : > { %v6075_v59 = vadd.f32 %v6074_v43, %v6011_v9  ;;  %v6301_v11 = vmax.f32 %v6265_v34, 0.0 }
 0x70c   : > { %v6139_v21 = vadd.f32 %v6138_v15, %v6075_v59 }
 0x70e   : > { %v6203_v37 = vadd.f32 %v6202_v0, %v6139_v21  ;;  %v6212_v6 = vpop.f32.mrf.mxu2  ;;  %v6279_v50 = vpop.f32.mrf.mxu1 }
 0x710   : > { %v6267_v39 = vadd.f32 %v6266_v25, %v6203_v37  ;;  %v6148_v30 = vpop.f32.mrf.mxu0 }
 0x711   : > { %v6077_v41 = vpop.f32.mrf.mxu3 }
 0x712   : > { %v6302_v16 = vmax.f32 %v6267_v39, 0.0  ;;  %v6078_v28 = vadd.f32 %v6077_v41, %v6014_v26  ;;  %v6029_v26 = vadd.f32 %v9696_v33, %v9692_v49 }
 0x714   : > { %v8028_v24 = vpack.c.bf16 %v6302_v16, %v6301_v11  ;;  %v6142_v45 = vadd.f32 %v6141_v35, %v6078_v28 }
 0x716   : > { %8055 = vst [vmem:[%s9708_s17 + $0x30] sm:$0xff] %v8028_v24   ;;  %v6206_v52 = vadd.f32 %v6205_v51, %v6142_v45  ;;  %v6215_v63 = vpop.f32.mrf.mxu2  ;;  %v6026_v51 = vadd.f32 %v9696_v33, %v9690_v14  ;;  %v6281_v21 = vpop.f32.mrf.mxu1  ;;  %v6031_v45 = vadd.f32 %v9696_v33, %v9694_v32 }
 0x718   : > { %v6270_v31 = vadd.f32 %v6269_v22, %v6206_v52  ;;  %v6151_v12 = vpop.f32.mrf.mxu0 }
 0x719   : > { %v6079_v47 = vpop.f32.mrf.mxu3 }
 0x71a   : > { %v6080_v8 = vadd.f32 %v6079_v47, %v6016_v53  ;;  %v6303_v57 = vmax.f32 %v6270_v31, 0.0 }
 0x71c   : > { %v6144_v19 = vadd.f32 %v6143_v7, %v6080_v8 }
 0x71e   : > { %v6208_v61 = vadd.f32 %v6207_v44, %v6144_v19  ;;  %v6217_v35 = vpop.f32.mrf.mxu2  ;;  %v6284_v24 = vpop.f32.mrf.mxu1 }
 0x720   : > { %v6272_v42 = vadd.f32 %v6271_v5, %v6208_v61  ;;  %v6153_v22 = vpop.f32.mrf.mxu0 }
 0x721   : > { %v6082_v48 = vpop.f32.mrf.mxu3 }
 0x722   : > { %v6304_v62 = vmax.f32 %v6272_v42, 0.0  ;;  %v6083_v54 = vadd.f32 %v6082_v48, %v6019_v20 }
 0x724   : > { %v8033_v18 = vpack.c.bf16 %v6304_v62, %v6303_v57  ;;  %v6147_v1 = vadd.f32 %v6146_v46, %v6083_v54 }
 0x726   : > { %8056 = vst [vmem:[%s9708_s17 + $0x38] sm:$0xff] %v8033_v18   ;;  %v6211_v0 = vadd.f32 %v6210_v60, %v6147_v1  ;;  %v6220_v14 = vpop.f32.mrf.mxu2 }
 0x728   : > { %v6275_v56 = vadd.f32 %v6274_v23, %v6211_v0  ;;  %v6156_v41 = vpop.f32.mrf.mxu0  ;;  %v6286_v23 = vpop.f32.mrf.mxu1 }
 0x729   : > { %v6084_v55 = vpop.f32.mrf.mxu3 }
 0x72a   : > { %v6085_v10 = vadd.f32 %v6084_v55, %v6021_v4  ;;  %v6305_v15 = vmax.f32 %v6275_v56, 0.0 }
 0x72c   : > { %v6149_v29 = vadd.f32 %v6148_v30, %v6085_v10 }
 0x72e   : > { %v6213_v25 = vadd.f32 %v6212_v6, %v6149_v29  ;;  %v6222_v60 = vpop.f32.mrf.mxu2 }
 0x730   : > { %v6277_v2 = vadd.f32 %v6276_v38, %v6213_v25  ;;  %v6158_v8 = vpop.f32.mrf.mxu0 }
 0x731   : > { %v6087_v40 = vpop.f32.mrf.mxu3 }
 0x732   : > { %v6306_v58 = vmax.f32 %v6277_v2, 0.0  ;;  %v6088_v17 = vadd.f32 %v6087_v40, %v6024_v36 }
 0x734   : > { %v8038_v9 = vpack.c.bf16 %v6306_v58, %v6305_v15  ;;  %v6152_v3 = vadd.f32 %v6151_v12, %v6088_v17 }
 0x736   : > { %8057 = vst [vmem:[%s9708_s17 + $0x40] sm:$0xff] %v8038_v9   ;;  %v6216_v27 = vadd.f32 %v6215_v63, %v6152_v3 }
 0x738   : > { %v6280_v34 = vadd.f32 %v6279_v50, %v6216_v27 }
 0x739   : > { %v6089_v43 = vpop.f32.mrf.mxu3 }
 0x73a   : > { %v6090_v59 = vadd.f32 %v6089_v43, %v6026_v51  ;;  %v6307_v11 = vmax.f32 %v6280_v34, 0.0 }
 0x73c   : > { %v6154_v13 = vadd.f32 %v6153_v22, %v6090_v59 }
 0x73e   : > { %v6218_v37 = vadd.f32 %v6217_v35, %v6154_v13 }
 0x740   : > { %v6282_v39 = vadd.f32 %v6281_v21, %v6218_v37 }
 0x741   : > { %v6092_v44 = vpop.f32.mrf.mxu3 }
 0x742   : > { %v6308_v16 = vmax.f32 %v6282_v39, 0.0  ;;  %v6093_v28 = vadd.f32 %v6092_v44, %v6029_v26 }
 0x744   : > { %v8043_v5 = vpack.c.bf16 %v6308_v16, %v6307_v11  ;;  %v6157_v7 = vadd.f32 %v6156_v41, %v6093_v28 }
 0x746   : > { %8058 = vst [vmem:[%s9708_s17 + $0x48] sm:$0xff] %v8043_v5   ;;  %v6221_v47 = vadd.f32 %v6220_v14, %v6157_v7 }
 0x748   : > { %v6285_v19 = vadd.f32 %v6284_v24, %v6221_v47 }
 0x749   : > { %v6094_v53 = vpop.f32.mrf.mxu3 }
 0x74a   : > { %v6095_v52 = vadd.f32 %v6094_v53, %v6031_v45  ;;  %v6309_v61 = vmax.f32 %v6285_v19, 0.0 }
 0x74c   : > { %v6159_v49 = vadd.f32 %v6158_v8, %v6095_v52 }
 0x74e   : > { %v6223_v46 = vadd.f32 %v6222_v60, %v6159_v49 }
 0x750   : > { %v6287_v31 = vadd.f32 %v6286_v23, %v6223_v46 }
 0x752   : > { %v6310_v20 = vmax.f32 %v6287_v31, 0.0 }
 0x754   : > { %v8048_v42 = vpack.c.bf16 %v6310_v20, %v6309_v61 }
 0x756   : > { %8059 = vst [vmem:[%s9708_s17 + $0x50] sm:$0xff] %v8048_v42  }
 0x757 PF: > { %s23_s30 = sadd.s32 1, %s8404_s30  }
 0x758   : > { %p20_p7 = scmp.ge.s32.totalorder %s23_s30, 4  }
 0x75a   :  { %22 = sbr.rel (!%p20_p7) target bundleno = 4 (0x4), region = 357 }
 0x75f   :  { %6376 = vsyncpa [#allocation9], 1 }
 0x760   :  { %6378 = vsyncpa [#allocation9 + $0x1], 1 }
 0x761   :  { %6379 = vsyncpa [#allocation11], 1 }
 0x762   :  { %6380 = vsyncpa [#allocation14], 1 }
 0x763   :  { %6381 = vsyncpa [#allocation17], 1 }

</bundles_post_ra>
